<compile_context>
chip_gen: v7x
topology: tpu7x:2x2x1
jax: 0.10.0
libtpu: 0.0.40
codegen_flags: <defaults>
</compile_context>

<pallas_src>
import numpy as np
import jax
import jax.numpy as jnp
from jax import lax
from jax.experimental import pallas as pl
from jax.experimental.pallas import tpu as pltpu


# ----------------------------- fused kernel -----------------------------

def _make_kernel(L, C, SP, B, NC, MG, PW):
    SPB = B * SP
    # centered 3x3 tap offsets on the flattened padded grid (row stride = PW),
    # tap index t = dy*3 + dx matches the packed wc layout.
    deltas = [(dy - 1) * PW + (dx - 1) for dy in range(3) for dx in range(3)]

    def kernel(x_ref, mask_ref, wc_ref, bc_ref, wfc_ref, bfc_ref, o_ref, scr_ref):
        # Zero only the halo margins (the centre is fully rewritten every layer).
        # Unconditional so it is safe when the parallel grid is split across cores.
        scr_ref[:, :MG] = jnp.zeros((C, MG), jnp.float32)
        scr_ref[:, MG + SPB:] = jnp.zeros((C, MG), jnp.float32)

        act = x_ref[0]                                  # (C, B*SP), ring/tail already 0
        scr_ref[:, MG:MG + SPB] = act
        mask = mask_ref[...]                            # (1, B*SP) interior mask

        for l in range(L):
            # 9 accumulating (C,C) x (C,B*SP) matmuls — no 72-vreg operand, no spill.
            z = None
            for t, d in enumerate(deltas):
                tap = scr_ref[:, MG + d: MG + d + SPB]                   # (C, B*SP)
                part = jnp.dot(wc_ref[l, t], tap,
                               preferred_element_type=jnp.float32)       # (C, B*SP)
                z = part if z is None else z + part
            act = jnp.maximum(z + bc_ref[l], 0.0) * mask                 # bias+ReLU+re-pad
            if l + 1 < L:
                scr_ref[:, MG:MG + SPB] = act

        # FC: scores[b, n] = sum_{c,p} act[c, b*SP + p] * wfc[c, n, p] + bfc[n]
        # One (B,SP)x(SP->NC) dot per channel (no redundant rows).
        scores = jnp.zeros((B, NC), jnp.float32)
        for c in range(C):
            rows = jnp.concatenate(
                [act[c:c + 1, b * SP:(b + 1) * SP] for b in range(B)], axis=0)  # (B, SP)
            scores = scores + lax.dot_general(
                rows, wfc_ref[c], (((1,), (1,)), ((), ())),
                preferred_element_type=jnp.float32)                      # (B, NC)
        o_ref[0] = (scores + bfc_ref[...]).astype(o_ref.dtype)

    return kernel


def medium_vgg_forward(x_nchw, p, images_per_step=2):
    """Pallas implementation of MediumVGG.forward (mode='classify')."""
    N, cin, H, W = x_nchw.shape
    L = p["wc"].shape[0]
    C = p["wc"].shape[2]
    NC = p["bfc"].shape[1]
    SP = p["wfc"].shape[2]
    PH, PW = H + 2, W + 2
    MG = 32                                    # halo margin (>= PW + 1)
    assert MG >= PW + 1, "halo margin too small for this spatial size"
    assert SP >= PH * PW and SP % 128 == 0
    assert cin <= C

    B = max(1, int(images_per_step))
    steps = -(-N // B)                         # cdiv
    N_pad = steps * B

    # one-time prep: channel-pad to C, 1px zero halo, flatten, lane-pad to SP,
    # then pack B images per grid step side-by-side along the lane axis.
    xp = jnp.pad(x_nchw.astype(jnp.float32),
                 ((0, N_pad - N), (0, C - cin), (1, 1), (1, 1)))
    xp = xp.reshape(N_pad, C, PH * PW)
    xp = jnp.pad(xp, ((0, 0), (0, 0), (0, SP - PH * PW)))
    xp = xp.reshape(steps, B, C, SP).transpose(0, 2, 1, 3).reshape(steps, C, B * SP)
    mask = jnp.tile(p["mask"], (1, B))         # (1, B*SP)

    kernel = _make_kernel(L, C, SP, B, NC, MG, PW)
    flops = N_pad * (L * 9 * 2 * C * C * SP + 2 * C * SP * NC)
    bytes_acc = 4 * (xp.size + mask.size + p["wc"].size + p["bc"].size
                     + p["wfc"].size + p["bfc"].size + N_pad * NC)

    out = pl.pallas_call(
        kernel,
        out_shape=jax.ShapeDtypeStruct((steps, B, NC), jnp.float32),
        grid=(steps,),
        in_specs=[
            pl.BlockSpec((1, C, B * SP), lambda s: (s, 0, 0)),      # B images / step
            pl.BlockSpec((1, B * SP), lambda s: (0, 0)),            # interior mask
            pl.BlockSpec((L, 9, C, C), lambda s: (0, 0, 0, 0)),     # conv tap weights
            pl.BlockSpec((L, C, 1), lambda s: (0, 0, 0)),           # conv biases
            pl.BlockSpec((C, NC, SP), lambda s: (0, 0, 0)),         # fc weight, SP last
            pl.BlockSpec((1, NC), lambda s: (0, 0)),                # fc bias
        ],
        out_specs=pl.BlockSpec((1, B, NC), lambda s: (s, 0, 0)),
        scratch_shapes=[pltpu.VMEM((C, MG + B * SP + MG), jnp.float32)],
        compiler_params=pltpu.CompilerParams(
            dimension_semantics=("parallel",)),
        cost_estimate=pl.CostEstimate(
            flops=int(flops), transcendentals=0, bytes_accessed=int(bytes_acc)),
    )(xp, mask, p["wc"], p["bc"], p["wfc"], p["bfc"])

    scores = out.reshape(N_pad, NC)[:N]
    return scores, None, None                  # mode == 'classify' -> content/style None


# ----------------------------- parameters -----------------------------

def init_params(key, num_classes, in_channel, cs, spatial):
    """PyTorch-equivalent init (kaiming_normal_ weights, default uniform
    biases), kept in torch layout (OIHW conv weights, (out,in) fc weight)."""
    convs = []
    cin = in_channel
    for cout in cs:
        key, kw, kb = jax.random.split(key, 3)
        fan_in = cin * 9
        w = jax.random.normal(kw, (cout, cin, 3, 3), jnp.float32) * jnp.sqrt(2.0 / fan_in)
        bound = 1.0 / np.sqrt(fan_in)
        b = jax.random.uniform(kb, (cout,), jnp.float32, -bound, bound)
        convs.append((w, b))
        cin = cout
    F = cs[-1] * spatial * spatial
    key, kw, kb = jax.random.split(key, 3)
    fc_w = jax.random.normal(kw, (num_classes, F), jnp.float32) * jnp.sqrt(2.0 / F)
    bound = 1.0 / np.sqrt(F)
    fc_b = jax.random.uniform(kb, (num_classes,), jnp.float32, -bound, bound)
    return {"convs": convs, "fc_w": fc_w, "fc_b": fc_b}


def prepare_params(params, H, W, num_classes):
    """Pack torch-layout params into the fused-kernel layout."""
    couts = [w.shape[0] for w, _ in params["convs"]]
    C = couts[0]
    assert all(co == C for co in couts), "packing assumes c1 == ... == c5"
    PH, PW = H + 2, W + 2
    SP = ((PH * PW + 127) // 128) * 128          # lane-pad flattened spatial

    wcs, bcs = [], []
    for w, b in params["convs"]:
        cout, cin = w.shape[0], w.shape[1]
        w = jnp.pad(w, ((0, C - cout), (0, C - cin), (0, 0), (0, 0)))
        # (C, C, 3, 3) -> (3, 3, C, C) -> (9, C, C); tap t = dy*3 + dx
        wcs.append(jnp.transpose(w, (2, 3, 0, 1)).reshape(9, C, C))
        bcs.append(jnp.pad(b, (0, C - cout)).reshape(C, 1))
    wc = jnp.stack(wcs)                           # (L, 9, C, C)
    bc = jnp.stack(bcs)                           # (L, C, 1)

    # fc weight with spatial LAST (lane-dense) on the padded grid, preserving
    # PyTorch's NCHW flatten order:
    #   wfc[c, n, (y+1)*PW + (x+1)] = fc_w[n, c*H*W + y*W + x]
    wfc = params["fc_w"].reshape(num_classes, C, H, W)
    wfc = jnp.transpose(wfc, (1, 0, 2, 3))                       # (C, NC, H, W)
    wfc = jnp.pad(wfc, ((0, 0), (0, 0), (1, 1), (1, 1)))         # zero ring
    wfc = wfc.reshape(C, num_classes, PH * PW)
    wfc = jnp.pad(wfc, ((0, 0), (0, 0), (0, SP - PH * PW)))      # (C, NC, SP)
    bfc = params["fc_b"].reshape(1, num_classes)

    m = np.zeros((PH, PW), np.float32)
    m[1:H + 1, 1:W + 1] = 1.0
    mask = jnp.asarray(np.pad(m.reshape(-1), (0, SP - PH * PW)).reshape(1, SP))
    return {"wc": wc, "bc": bc, "wfc": wfc, "bfc": bfc, "mask": mask}


# ----------------------------- pure-JAX reference -----------------------------

def ref_forward(x, params):
    r = x
    for w, b in params["convs"]:
        r = lax.conv_general_dilated(
            r, w, window_strides=(1, 1), padding=((1, 1), (1, 1)),
            dimension_numbers=("NCHW", "OIHW", "NCHW"))
        r = jnp.maximum(r + b[None, :, None, None], 0.0)
    flat = r.reshape(r.shape[0], -1)
    return flat @ params["fc_w"].T + params["fc_b"]


# ----------------------------- main -----------------------------

if __name__ == "__main__":
    # MediumVGG hardcodes fc in_features = c5 * 28 * 28 (no pooling in forward),
    # so the input spatial size must be 28x28.
    N, IN_C, H = 4, 3, 28
    CS = (8, 8, 8, 8, 8)
    NUM_CLASSES = 10

    key = jax.random.PRNGKey(0)
    key, kx = jax.random.split(key)
    x = jax.random.normal(kx, (N, IN_C, H, H), jnp.float32)   # NCHW, like PyTorch

    params = init_params(key, NUM_CLASSES, IN_C, CS, H)
    packed = prepare_params(params, H, H, NUM_CLASSES)

    scores, content, style = jax.jit(medium_vgg_forward)(x, packed)
    scores = jax.block_until_ready(scores)

    ref = jax.block_until_ready(ref_forward(x, params))
    np.testing.assert_allclose(np.asarray(scores), np.asarray(ref),
                               rtol=1e-4, atol=1e-4)
    assert content is None and style is None   # mode == 'classify'
    # TODO(synk): gram()/style/content path (mode='transfer') and the unused
    # max_pool are not exercised by forward() in 'classify' mode, so they are
    # not implemented as kernels.
    print("KERNEL_OK")
</pallas_src>

<mosaic_0001>
module attributes {stable_mosaic.version = 11 : i64} {
  func.func @kernel(%arg0: i32, %arg1: memref<1x8x2048xf32, #tpu.memory_space<vmem>>, %arg2: memref<1x2048xf32, #tpu.memory_space<vmem>>, %arg3: memref<5x9x8x8xf32, #tpu.memory_space<vmem>>, %arg4: memref<5x8x1xf32, #tpu.memory_space<vmem>>, %arg5: memref<8x10x1024xf32, #tpu.memory_space<vmem>>, %arg6: memref<1x10xf32, #tpu.memory_space<vmem>>, %arg7: memref<1x2x10xf32, #tpu.memory_space<vmem>>, %arg8: memref<8x2112xf32, #tpu.memory_space<vmem>>) attributes {dimension_semantics = [#tpu.dimension_semantics<parallel>], iteration_bounds = array<i64: 2>, scalar_prefetch = 0 : i64, scratch_operands = 1 : i64, tpu.core_type = #tpu.core_type<tc>, window_params = [{transform_indices = @transform_0, window_bounds = array<i64: 1, 8, 2048>}, {pipeline_mode = #tpu.pipeline_mode<synchronous>, transform_indices = @transform_1, window_bounds = array<i64: 1, 2048>}, {pipeline_mode = #tpu.pipeline_mode<synchronous>, transform_indices = @transform_2, window_bounds = array<i64: 5, 9, 8, 8>}, {pipeline_mode = #tpu.pipeline_mode<synchronous>, transform_indices = @transform_3, window_bounds = array<i64: 5, 8, 1>}, {pipeline_mode = #tpu.pipeline_mode<synchronous>, transform_indices = @transform_4, window_bounds = array<i64: 8, 10, 1024>}, {pipeline_mode = #tpu.pipeline_mode<synchronous>, transform_indices = @transform_5, window_bounds = array<i64: 1, 10>}, {transform_indices = @transform_6, window_bounds = array<i64: 1, 2, 10>}]} {
    %cst = arith.constant 0.000000e+00 : f32
    %0 = vector.broadcast %cst : f32 to vector<8x32xf32>
    %c0 = arith.constant 0 : index
    %c0_0 = arith.constant 0 : index
    %1 = vector.load %arg8[%c0, %c0_0] : memref<8x2112xf32, #tpu.memory_space<vmem>>, vector<8x32xf32>
    tpu.vector_store %arg8[%c0, %c0_0], %0 {strides = array<i32>} : memref<8x2112xf32, #tpu.memory_space<vmem>>, vector<8x32xf32>,
    %cst_1 = arith.constant 0.000000e+00 : f32
    %2 = vector.broadcast %cst_1 : f32 to vector<8x32xf32>
    %c0_2 = arith.constant 0 : index
    %c2080 = arith.constant 2080 : index
    %3 = vector.load %arg8[%c0_2, %c2080] : memref<8x2112xf32, #tpu.memory_space<vmem>>, vector<8x32xf32>
    tpu.vector_store %arg8[%c0_2, %c2080], %2 {strides = array<i32>} : memref<8x2112xf32, #tpu.memory_space<vmem>>, vector<8x32xf32>,
    %c0_3 = arith.constant 0 : index
    %c0_4 = arith.constant 0 : index
    %c0_5 = arith.constant 0 : index
    %4 = vector.load %arg1[%c0_3, %c0_4, %c0_5] : memref<1x8x2048xf32, #tpu.memory_space<vmem>>, vector<1x8x2048xf32>
    %5 = vector.shape_cast %4 : vector<1x8x2048xf32> to vector<8x2048xf32>
    %c0_6 = arith.constant 0 : index
    %c32 = arith.constant 32 : index
    %6 = vector.load %arg8[%c0_6, %c32] : memref<8x2112xf32, #tpu.memory_space<vmem>>, vector<8x2048xf32>
    tpu.vector_store %arg8[%c0_6, %c32], %5 {strides = array<i32>} : memref<8x2112xf32, #tpu.memory_space<vmem>>, vector<8x2048xf32>,
    %c0_7 = arith.constant 0 : index
    %c0_8 = arith.constant 0 : index
    %7 = vector.load %arg2[%c0_7, %c0_8] : memref<1x2048xf32, #tpu.memory_space<vmem>>, vector<1x2048xf32>
    %c0_9 = arith.constant 0 : index
    %c1 = arith.constant 1 : index
    %8 = vector.load %arg8[%c0_9, %c1] : memref<8x2112xf32, #tpu.memory_space<vmem>>, vector<8x2048xf32>
    %c0_10 = arith.constant 0 : index
    %c0_11 = arith.constant 0 : index
    %c0_12 = arith.constant 0 : index
    %c0_13 = arith.constant 0 : index
    %9 = vector.load %arg3[%c0_10, %c0_11, %c0_12, %c0_13] : memref<5x9x8x8xf32, #tpu.memory_space<vmem>>, vector<1x1x8x8xf32>
    %10 = vector.shape_cast %9 : vector<1x1x8x8xf32> to vector<8x8xf32>
    %cst_14 = arith.constant dense<0.000000e+00> : vector<8x2048xf32>
    %11 = tpu.matmul %10, %8, %cst_14 {dimension_numbers = #tpu.dot_dimension_numbers<[1], [0], [0], [1], [0, 0, 1, 1], [], []>} : vector<8x8xf32>, vector<8x2048xf32>, vector<8x2048xf32> -> vector<8x2048xf32>
    %c0_15 = arith.constant 0 : index
    %c2 = arith.constant 2 : index
    %12 = vector.load %arg8[%c0_15, %c2] : memref<8x2112xf32, #tpu.memory_space<vmem>>, vector<8x2048xf32>
    %c0_16 = arith.constant 0 : index
    %c1_17 = arith.constant 1 : index
    %c0_18 = arith.constant 0 : index
    %c0_19 = arith.constant 0 : index
    %13 = vector.load %arg3[%c0_16, %c1_17, %c0_18, %c0_19] : memref<5x9x8x8xf32, #tpu.memory_space<vmem>>, vector<1x1x8x8xf32>
    %14 = vector.shape_cast %13 : vector<1x1x8x8xf32> to vector<8x8xf32>
    %cst_20 = arith.constant dense<0.000000e+00> : vector<8x2048xf32>
    %15 = tpu.matmul %14, %12, %cst_20 {dimension_numbers = #tpu.dot_dimension_numbers<[1], [0], [0], [1], [0, 0, 1, 1], [], []>} : vector<8x8xf32>, vector<8x2048xf32>, vector<8x2048xf32> -> vector<8x2048xf32>
    %16 = arith.addf %11, %15 : vector<8x2048xf32>
    %c0_21 = arith.constant 0 : index
    %c3 = arith.constant 3 : index
    %17 = vector.load %arg8[%c0_21, %c3] : memref<8x2112xf32, #tpu.memory_space<vmem>>, vector<8x2048xf32>
    %c0_22 = arith.constant 0 : index
    %c2_23 = arith.constant 2 : index
    %c0_24 = arith.constant 0 : index
    %c0_25 = arith.constant 0 : index
    %18 = vector.load %arg3[%c0_22, %c2_23, %c0_24, %c0_25] : memref<5x9x8x8xf32, #tpu.memory_space<vmem>>, vector<1x1x8x8xf32>
    %19 = vector.shape_cast %18 : vector<1x1x8x8xf32> to vector<8x8xf32>
    %cst_26 = arith.constant dense<0.000000e+00> : vector<8x2048xf32>
    %20 = tpu.matmul %19, %17, %cst_26 {dimension_numbers = #tpu.dot_dimension_numbers<[1], [0], [0], [1], [0, 0, 1, 1], [], []>} : vector<8x8xf32>, vector<8x2048xf32>, vector<8x2048xf32> -> vector<8x2048xf32>
    %21 = arith.addf %16, %20 : vector<8x2048xf32>
    %c0_27 = arith.constant 0 : index
    %c31 = arith.constant 31 : index
    %22 = vector.load %arg8[%c0_27, %c31] : memref<8x2112xf32, #tpu.memory_space<vmem>>, vector<8x2048xf32>
    %c0_28 = arith.constant 0 : index
    %c3_29 = arith.constant 3 : index
    %c0_30 = arith.constant 0 : index
    %c0_31 = arith.constant 0 : index
    %23 = vector.load %arg3[%c0_28, %c3_29, %c0_30, %c0_31] : memref<5x9x8x8xf32, #tpu.memory_space<vmem>>, vector<1x1x8x8xf32>
    %24 = vector.shape_cast %23 : vector<1x1x8x8xf32> to vector<8x8xf32>
    %cst_32 = arith.constant dense<0.000000e+00> : vector<8x2048xf32>
    %25 = tpu.matmul %24, %22, %cst_32 {dimension_numbers = #tpu.dot_dimension_numbers<[1], [0], [0], [1], [0, 0, 1, 1], [], []>} : vector<8x8xf32>, vector<8x2048xf32>, vector<8x2048xf32> -> vector<8x2048xf32>
    %26 = arith.addf %21, %25 : vector<8x2048xf32>
    %c0_33 = arith.constant 0 : index
    %c32_34 = arith.constant 32 : index
    %27 = vector.load %arg8[%c0_33, %c32_34] : memref<8x2112xf32, #tpu.memory_space<vmem>>, vector<8x2048xf32>
    %c0_35 = arith.constant 0 : index
    %c4 = arith.constant 4 : index
    %c0_36 = arith.constant 0 : index
    %c0_37 = arith.constant 0 : index
    %28 = vector.load %arg3[%c0_35, %c4, %c0_36, %c0_37] : memref<5x9x8x8xf32, #tpu.memory_space<vmem>>, vector<1x1x8x8xf32>
    %29 = vector.shape_cast %28 : vector<1x1x8x8xf32> to vector<8x8xf32>
    %cst_38 = arith.constant dense<0.000000e+00> : vector<8x2048xf32>
    %30 = tpu.matmul %29, %27, %cst_38 {dimension_numbers = #tpu.dot_dimension_numbers<[1], [0], [0], [1], [0, 0, 1, 1], [], []>} : vector<8x8xf32>, vector<8x2048xf32>, vector<8x2048xf32> -> vector<8x2048xf32>
    %31 = arith.addf %26, %30 : vector<8x2048xf32>
    %c0_39 = arith.constant 0 : index
    %c33 = arith.constant 33 : index
    %32 = vector.load %arg8[%c0_39, %c33] : memref<8x2112xf32, #tpu.memory_space<vmem>>, vector<8x2048xf32>
    %c0_40 = arith.constant 0 : index
    %c5 = arith.constant 5 : index
    %c0_41 = arith.constant 0 : index
    %c0_42 = arith.constant 0 : index
    %33 = vector.load %arg3[%c0_40, %c5, %c0_41, %c0_42] : memref<5x9x8x8xf32, #tpu.memory_space<vmem>>, vector<1x1x8x8xf32>
    %34 = vector.shape_cast %33 : vector<1x1x8x8xf32> to vector<8x8xf32>
    %cst_43 = arith.constant dense<0.000000e+00> : vector<8x2048xf32>
    %35 = tpu.matmul %34, %32, %cst_43 {dimension_numbers = #tpu.dot_dimension_numbers<[1], [0], [0], [1], [0, 0, 1, 1], [], []>} : vector<8x8xf32>, vector<8x2048xf32>, vector<8x2048xf32> -> vector<8x2048xf32>
    %36 = arith.addf %31, %35 : vector<8x2048xf32>
    %c0_44 = arith.constant 0 : index
    %c61 = arith.constant 61 : index
    %37 = vector.load %arg8[%c0_44, %c61] : memref<8x2112xf32, #tpu.memory_space<vmem>>, vector<8x2048xf32>
    %c0_45 = arith.constant 0 : index
    %c6 = arith.constant 6 : index
    %c0_46 = arith.constant 0 : index
    %c0_47 = arith.constant 0 : index
    %38 = vector.load %arg3[%c0_45, %c6, %c0_46, %c0_47] : memref<5x9x8x8xf32, #tpu.memory_space<vmem>>, vector<1x1x8x8xf32>
    %39 = vector.shape_cast %38 : vector<1x1x8x8xf32> to vector<8x8xf32>
    %cst_48 = arith.constant dense<0.000000e+00> : vector<8x2048xf32>
    %40 = tpu.matmul %39, %37, %cst_48 {dimension_numbers = #tpu.dot_dimension_numbers<[1], [0], [0], [1], [0, 0, 1, 1], [], []>} : vector<8x8xf32>, vector<8x2048xf32>, vector<8x2048xf32> -> vector<8x2048xf32>
    %41 = arith.addf %36, %40 : vector<8x2048xf32>
    %c0_49 = arith.constant 0 : index
    %c62 = arith.constant 62 : index
    %42 = vector.load %arg8[%c0_49, %c62] : memref<8x2112xf32, #tpu.memory_space<vmem>>, vector<8x2048xf32>
    %c0_50 = arith.constant 0 : index
    %c7 = arith.constant 7 : index
    %c0_51 = arith.constant 0 : index
    %c0_52 = arith.constant 0 : index
    %43 = vector.load %arg3[%c0_50, %c7, %c0_51, %c0_52] : memref<5x9x8x8xf32, #tpu.memory_space<vmem>>, vector<1x1x8x8xf32>
    %44 = vector.shape_cast %43 : vector<1x1x8x8xf32> to vector<8x8xf32>
    %cst_53 = arith.constant dense<0.000000e+00> : vector<8x2048xf32>
    %45 = tpu.matmul %44, %42, %cst_53 {dimension_numbers = #tpu.dot_dimension_numbers<[1], [0], [0], [1], [0, 0, 1, 1], [], []>} : vector<8x8xf32>, vector<8x2048xf32>, vector<8x2048xf32> -> vector<8x2048xf32>
    %46 = arith.addf %41, %45 : vector<8x2048xf32>
    %c0_54 = arith.constant 0 : index
    %c63 = arith.constant 63 : index
    %47 = vector.load %arg8[%c0_54, %c63] : memref<8x2112xf32, #tpu.memory_space<vmem>>, vector<8x2048xf32>
    %c0_55 = arith.constant 0 : index
    %c8 = arith.constant 8 : index
    %c0_56 = arith.constant 0 : index
    %c0_57 = arith.constant 0 : index
    %48 = vector.load %arg3[%c0_55, %c8, %c0_56, %c0_57] : memref<5x9x8x8xf32, #tpu.memory_space<vmem>>, vector<1x1x8x8xf32>
    %49 = vector.shape_cast %48 : vector<1x1x8x8xf32> to vector<8x8xf32>
    %cst_58 = arith.constant dense<0.000000e+00> : vector<8x2048xf32>
    %50 = tpu.matmul %49, %47, %cst_58 {dimension_numbers = #tpu.dot_dimension_numbers<[1], [0], [0], [1], [0, 0, 1, 1], [], []>} : vector<8x8xf32>, vector<8x2048xf32>, vector<8x2048xf32> -> vector<8x2048xf32>
    %51 = arith.addf %46, %50 : vector<8x2048xf32>
    %c0_59 = arith.constant 0 : index
    %c0_60 = arith.constant 0 : index
    %c0_61 = arith.constant 0 : index
    %52 = vector.load %arg4[%c0_59, %c0_60, %c0_61] : memref<5x8x1xf32, #tpu.memory_space<vmem>>, vector<1x8x1xf32>
    %53 = vector.shape_cast %52 : vector<1x8x1xf32> to vector<8x1xf32>
    %54 = vector.broadcast %53 : vector<8x1xf32> to vector<8x2048xf32>
    %55 = arith.addf %51, %54 : vector<8x2048xf32>
    %cst_62 = arith.constant 0.000000e+00 : f32
    %56 = vector.broadcast %cst_62 : f32 to vector<8x2048xf32>
    %57 = arith.maximumf %55, %56 : vector<8x2048xf32>
    %58 = vector.broadcast %7 : vector<1x2048xf32> to vector<8x2048xf32>
    %59 = arith.mulf %57, %58 : vector<8x2048xf32>
    %c0_63 = arith.constant 0 : index
    %c32_64 = arith.constant 32 : index
    %60 = vector.load %arg8[%c0_63, %c32_64] : memref<8x2112xf32, #tpu.memory_space<vmem>>, vector<8x2048xf32>
    tpu.vector_store %arg8[%c0_63, %c32_64], %59 {strides = array<i32>} : memref<8x2112xf32, #tpu.memory_space<vmem>>, vector<8x2048xf32>,
    %c0_65 = arith.constant 0 : index
    %c1_66 = arith.constant 1 : index
    %61 = vector.load %arg8[%c0_65, %c1_66] : memref<8x2112xf32, #tpu.memory_space<vmem>>, vector<8x2048xf32>
    %c1_67 = arith.constant 1 : index
    %c0_68 = arith.constant 0 : index
    %c0_69 = arith.constant 0 : index
    %c0_70 = arith.constant 0 : index
    %62 = vector.load %arg3[%c1_67, %c0_68, %c0_69, %c0_70] : memref<5x9x8x8xf32, #tpu.memory_space<vmem>>, vector<1x1x8x8xf32>
    %63 = vector.shape_cast %62 : vector<1x1x8x8xf32> to vector<8x8xf32>
    %cst_71 = arith.constant dense<0.000000e+00> : vector<8x2048xf32>
    %64 = tpu.matmul %63, %61, %cst_71 {dimension_numbers = #tpu.dot_dimension_numbers<[1], [0], [0], [1], [0, 0, 1, 1], [], []>} : vector<8x8xf32>, vector<8x2048xf32>, vector<8x2048xf32> -> vector<8x2048xf32>
    %c0_72 = arith.constant 0 : index
    %c2_73 = arith.constant 2 : index
    %65 = vector.load %arg8[%c0_72, %c2_73] : memref<8x2112xf32, #tpu.memory_space<vmem>>, vector<8x2048xf32>
    %c1_74 = arith.constant 1 : index
    %c1_75 = arith.constant 1 : index
    %c0_76 = arith.constant 0 : index
    %c0_77 = arith.constant 0 : index
    %66 = vector.load %arg3[%c1_74, %c1_75, %c0_76, %c0_77] : memref<5x9x8x8xf32, #tpu.memory_space<vmem>>, vector<1x1x8x8xf32>
    %67 = vector.shape_cast %66 : vector<1x1x8x8xf32> to vector<8x8xf32>
    %cst_78 = arith.constant dense<0.000000e+00> : vector<8x2048xf32>
    %68 = tpu.matmul %67, %65, %cst_78 {dimension_numbers = #tpu.dot_dimension_numbers<[1], [0], [0], [1], [0, 0, 1, 1], [], []>} : vector<8x8xf32>, vector<8x2048xf32>, vector<8x2048xf32> -> vector<8x2048xf32>
    %69 = arith.addf %64, %68 : vector<8x2048xf32>
    %c0_79 = arith.constant 0 : index
    %c3_80 = arith.constant 3 : index
    %70 = vector.load %arg8[%c0_79, %c3_80] : memref<8x2112xf32, #tpu.memory_space<vmem>>, vector<8x2048xf32>
    %c1_81 = arith.constant 1 : index
    %c2_82 = arith.constant 2 : index
    %c0_83 = arith.constant 0 : index
    %c0_84 = arith.constant 0 : index
    %71 = vector.load %arg3[%c1_81, %c2_82, %c0_83, %c0_84] : memref<5x9x8x8xf32, #tpu.memory_space<vmem>>, vector<1x1x8x8xf32>
    %72 = vector.shape_cast %71 : vector<1x1x8x8xf32> to vector<8x8xf32>
    %cst_85 = arith.constant dense<0.000000e+00> : vector<8x2048xf32>
    %73 = tpu.matmul %72, %70, %cst_85 {dimension_numbers = #tpu.dot_dimension_numbers<[1], [0], [0], [1], [0, 0, 1, 1], [], []>} : vector<8x8xf32>, vector<8x2048xf32>, vector<8x2048xf32> -> vector<8x2048xf32>
    %74 = arith.addf %69, %73 : vector<8x2048xf32>
    %c0_86 = arith.constant 0 : index
    %c31_87 = arith.constant 31 : index
    %75 = vector.load %arg8[%c0_86, %c31_87] : memref<8x2112xf32, #tpu.memory_space<vmem>>, vector<8x2048xf32>
    %c1_88 = arith.constant 1 : index
    %c3_89 = arith.constant 3 : index
    %c0_90 = arith.constant 0 : index
    %c0_91 = arith.constant 0 : index
    %76 = vector.load %arg3[%c1_88, %c3_89, %c0_90, %c0_91] : memref<5x9x8x8xf32, #tpu.memory_space<vmem>>, vector<1x1x8x8xf32>
    %77 = vector.shape_cast %76 : vector<1x1x8x8xf32> to vector<8x8xf32>
    %cst_92 = arith.constant dense<0.000000e+00> : vector<8x2048xf32>
    %78 = tpu.matmul %77, %75, %cst_92 {dimension_numbers = #tpu.dot_dimension_numbers<[1], [0], [0], [1], [0, 0, 1, 1], [], []>} : vector<8x8xf32>, vector<8x2048xf32>, vector<8x2048xf32> -> vector<8x2048xf32>
    %79 = arith.addf %74, %78 : vector<8x2048xf32>
    %c0_93 = arith.constant 0 : index
    %c32_94 = arith.constant 32 : index
    %80 = vector.load %arg8[%c0_93, %c32_94] : memref<8x2112xf32, #tpu.memory_space<vmem>>, vector<8x2048xf32>
    %c1_95 = arith.constant 1 : index
    %c4_96 = arith.constant 4 : index
    %c0_97 = arith.constant 0 : index
    %c0_98 = arith.constant 0 : index
    %81 = vector.load %arg3[%c1_95, %c4_96, %c0_97, %c0_98] : memref<5x9x8x8xf32, #tpu.memory_space<vmem>>, vector<1x1x8x8xf32>
    %82 = vector.shape_cast %81 : vector<1x1x8x8xf32> to vector<8x8xf32>
    %cst_99 = arith.constant dense<0.000000e+00> : vector<8x2048xf32>
    %83 = tpu.matmul %82, %80, %cst_99 {dimension_numbers = #tpu.dot_dimension_numbers<[1], [0], [0], [1], [0, 0, 1, 1], [], []>} : vector<8x8xf32>, vector<8x2048xf32>, vector<8x2048xf32> -> vector<8x2048xf32>
    %84 = arith.addf %79, %83 : vector<8x2048xf32>
    %c0_100 = arith.constant 0 : index
    %c33_101 = arith.constant 33 : index
    %85 = vector.load %arg8[%c0_100, %c33_101] : memref<8x2112xf32, #tpu.memory_space<vmem>>, vector<8x2048xf32>
    %c1_102 = arith.constant 1 : index
    %c5_103 = arith.constant 5 : index
    %c0_104 = arith.constant 0 : index
    %c0_105 = arith.constant 0 : index
    %86 = vector.load %arg3[%c1_102, %c5_103, %c0_104, %c0_105] : memref<5x9x8x8xf32, #tpu.memory_space<vmem>>, vector<1x1x8x8xf32>
    %87 = vector.shape_cast %86 : vector<1x1x8x8xf32> to vector<8x8xf32>
    %cst_106 = arith.constant dense<0.000000e+00> : vector<8x2048xf32>
    %88 = tpu.matmul %87, %85, %cst_106 {dimension_numbers = #tpu.dot_dimension_numbers<[1], [0], [0], [1], [0, 0, 1, 1], [], []>} : vector<8x8xf32>, vector<8x2048xf32>, vector<8x2048xf32> -> vector<8x2048xf32>
    %89 = arith.addf %84, %88 : vector<8x2048xf32>
    %c0_107 = arith.constant 0 : index
    %c61_108 = arith.constant 61 : index
    %90 = vector.load %arg8[%c0_107, %c61_108] : memref<8x2112xf32, #tpu.memory_space<vmem>>, vector<8x2048xf32>
    %c1_109 = arith.constant 1 : index
    %c6_110 = arith.constant 6 : index
    %c0_111 = arith.constant 0 : index
    %c0_112 = arith.constant 0 : index
    %91 = vector.load %arg3[%c1_109, %c6_110, %c0_111, %c0_112] : memref<5x9x8x8xf32, #tpu.memory_space<vmem>>, vector<1x1x8x8xf32>
    %92 = vector.shape_cast %91 : vector<1x1x8x8xf32> to vector<8x8xf32>
    %cst_113 = arith.constant dense<0.000000e+00> : vector<8x2048xf32>
    %93 = tpu.matmul %92, %90, %cst_113 {dimension_numbers = #tpu.dot_dimension_numbers<[1], [0], [0], [1], [0, 0, 1, 1], [], []>} : vector<8x8xf32>, vector<8x2048xf32>, vector<8x2048xf32> -> vector<8x2048xf32>
    %94 = arith.addf %89, %93 : vector<8x2048xf32>
    %c0_114 = arith.constant 0 : index
    %c62_115 = arith.constant 62 : index
    %95 = vector.load %arg8[%c0_114, %c62_115] : memref<8x2112xf32, #tpu.memory_space<vmem>>, vector<8x2048xf32>
    %c1_116 = arith.constant 1 : index
    %c7_117 = arith.constant 7 : index
    %c0_118 = arith.constant 0 : index
    %c0_119 = arith.constant 0 : index
    %96 = vector.load %arg3[%c1_116, %c7_117, %c0_118, %c0_119] : memref<5x9x8x8xf32, #tpu.memory_space<vmem>>, vector<1x1x8x8xf32>
    %97 = vector.shape_cast %96 : vector<1x1x8x8xf32> to vector<8x8xf32>
    %cst_120 = arith.constant dense<0.000000e+00> : vector<8x2048xf32>
    %98 = tpu.matmul %97, %95, %cst_120 {dimension_numbers = #tpu.dot_dimension_numbers<[1], [0], [0], [1], [0, 0, 1, 1], [], []>} : vector<8x8xf32>, vector<8x2048xf32>, vector<8x2048xf32> -> vector<8x2048xf32>
    %99 = arith.addf %94, %98 : vector<8x2048xf32>
    %c0_121 = arith.constant 0 : index
    %c63_122 = arith.constant 63 : index
    %100 = vector.load %arg8[%c0_121, %c63_122] : memref<8x2112xf32, #tpu.memory_space<vmem>>, vector<8x2048xf32>
    %c1_123 = arith.constant 1 : index
    %c8_124 = arith.constant 8 : index
    %c0_125 = arith.constant 0 : index
    %c0_126 = arith.constant 0 : index
    %101 = vector.load %arg3[%c1_123, %c8_124, %c0_125, %c0_126] : memref<5x9x8x8xf32, #tpu.memory_space<vmem>>, vector<1x1x8x8xf32>
    %102 = vector.shape_cast %101 : vector<1x1x8x8xf32> to vector<8x8xf32>
    %cst_127 = arith.constant dense<0.000000e+00> : vector<8x2048xf32>
    %103 = tpu.matmul %102, %100, %cst_127 {dimension_numbers = #tpu.dot_dimension_numbers<[1], [0], [0], [1], [0, 0, 1, 1], [], []>} : vector<8x8xf32>, vector<8x2048xf32>, vector<8x2048xf32> -> vector<8x2048xf32>
    %104 = arith.addf %99, %103 : vector<8x2048xf32>
    %c1_128 = arith.constant 1 : index
    %c0_129 = arith.constant 0 : index
    %c0_130 = arith.constant 0 : index
    %105 = vector.load %arg4[%c1_128, %c0_129, %c0_130] : memref<5x8x1xf32, #tpu.memory_space<vmem>>, vector<1x8x1xf32>
    %106 = vector.shape_cast %105 : vector<1x8x1xf32> to vector<8x1xf32>
    %107 = vector.broadcast %106 : vector<8x1xf32> to vector<8x2048xf32>
    %108 = arith.addf %104, %107 : vector<8x2048xf32>
    %cst_131 = arith.constant 0.000000e+00 : f32
    %109 = vector.broadcast %cst_131 : f32 to vector<8x2048xf32>
    %110 = arith.maximumf %108, %109 : vector<8x2048xf32>
    %111 = vector.broadcast %7 : vector<1x2048xf32> to vector<8x2048xf32>
    %112 = arith.mulf %110, %111 : vector<8x2048xf32>
    %c0_132 = arith.constant 0 : index
    %c32_133 = arith.constant 32 : index
    %113 = vector.load %arg8[%c0_132, %c32_133] : memref<8x2112xf32, #tpu.memory_space<vmem>>, vector<8x2048xf32>
    tpu.vector_store %arg8[%c0_132, %c32_133], %112 {strides = array<i32>} : memref<8x2112xf32, #tpu.memory_space<vmem>>, vector<8x2048xf32>,
    %c0_134 = arith.constant 0 : index
    %c1_135 = arith.constant 1 : index
    %114 = vector.load %arg8[%c0_134, %c1_135] : memref<8x2112xf32, #tpu.memory_space<vmem>>, vector<8x2048xf32>
    %c2_136 = arith.constant 2 : index
    %c0_137 = arith.constant 0 : index
    %c0_138 = arith.constant 0 : index
    %c0_139 = arith.constant 0 : index
    %115 = vector.load %arg3[%c2_136, %c0_137, %c0_138, %c0_139] : memref<5x9x8x8xf32, #tpu.memory_space<vmem>>, vector<1x1x8x8xf32>
    %116 = vector.shape_cast %115 : vector<1x1x8x8xf32> to vector<8x8xf32>
    %cst_140 = arith.constant dense<0.000000e+00> : vector<8x2048xf32>
    %117 = tpu.matmul %116, %114, %cst_140 {dimension_numbers = #tpu.dot_dimension_numbers<[1], [0], [0], [1], [0, 0, 1, 1], [], []>} : vector<8x8xf32>, vector<8x2048xf32>, vector<8x2048xf32> -> vector<8x2048xf32>
    %c0_141 = arith.constant 0 : index
    %c2_142 = arith.constant 2 : index
    %118 = vector.load %arg8[%c0_141, %c2_142] : memref<8x2112xf32, #tpu.memory_space<vmem>>, vector<8x2048xf32>
    %c2_143 = arith.constant 2 : index
    %c1_144 = arith.constant 1 : index
    %c0_145 = arith.constant 0 : index
    %c0_146 = arith.constant 0 : index
    %119 = vector.load %arg3[%c2_143, %c1_144, %c0_145, %c0_146] : memref<5x9x8x8xf32, #tpu.memory_space<vmem>>, vector<1x1x8x8xf32>
    %120 = vector.shape_cast %119 : vector<1x1x8x8xf32> to vector<8x8xf32>
    %cst_147 = arith.constant dense<0.000000e+00> : vector<8x2048xf32>
    %121 = tpu.matmul %120, %118, %cst_147 {dimension_numbers = #tpu.dot_dimension_numbers<[1], [0], [0], [1], [0, 0, 1, 1], [], []>} : vector<8x8xf32>, vector<8x2048xf32>, vector<8x2048xf32> -> vector<8x2048xf32>
    %122 = arith.addf %117, %121 : vector<8x2048xf32>
    %c0_148 = arith.constant 0 : index
    %c3_149 = arith.constant 3 : index
    %123 = vector.load %arg8[%c0_148, %c3_149] : memref<8x2112xf32, #tpu.memory_space<vmem>>, vector<8x2048xf32>
    %c2_150 = arith.constant 2 : index
    %c2_151 = arith.constant 2 : index
    %c0_152 = arith.constant 0 : index
    %c0_153 = arith.constant 0 : index
    %124 = vector.load %arg3[%c2_150, %c2_151, %c0_152, %c0_153] : memref<5x9x8x8xf32, #tpu.memory_space<vmem>>, vector<1x1x8x8xf32>
    %125 = vector.shape_cast %124 : vector<1x1x8x8xf32> to vector<8x8xf32>
    %cst_154 = arith.constant dense<0.000000e+00> : vector<8x2048xf32>
    %126 = tpu.matmul %125, %123, %cst_154 {dimension_numbers = #tpu.dot_dimension_numbers<[1], [0], [0], [1], [0, 0, 1, 1], [], []>} : vector<8x8xf32>, vector<8x2048xf32>, vector<8x2048xf32> -> vector<8x2048xf32>
    %127 = arith.addf %122, %126 : vector<8x2048xf32>
    %c0_155 = arith.constant 0 : index
    %c31_156 = arith.constant 31 : index
    %128 = vector.load %arg8[%c0_155, %c31_156] : memref<8x2112xf32, #tpu.memory_space<vmem>>, vector<8x2048xf32>
    %c2_157 = arith.constant 2 : index
    %c3_158 = arith.constant 3 : index
    %c0_159 = arith.constant 0 : index
    %c0_160 = arith.constant 0 : index
    %129 = vector.load %arg3[%c2_157, %c3_158, %c0_159, %c0_160] : memref<5x9x8x8xf32, #tpu.memory_space<vmem>>, vector<1x1x8x8xf32>
    %130 = vector.shape_cast %129 : vector<1x1x8x8xf32> to vector<8x8xf32>
    %cst_161 = arith.constant dense<0.000000e+00> : vector<8x2048xf32>
    %131 = tpu.matmul %130, %128, %cst_161 {dimension_numbers = #tpu.dot_dimension_numbers<[1], [0], [0], [1], [0, 0, 1, 1], [], []>} : vector<8x8xf32>, vector<8x2048xf32>, vector<8x2048xf32> -> vector<8x2048xf32>
    %132 = arith.addf %127, %131 : vector<8x2048xf32>
    %c0_162 = arith.constant 0 : index
    %c32_163 = arith.constant 32 : index
    %133 = vector.load %arg8[%c0_162, %c32_163] : memref<8x2112xf32, #tpu.memory_space<vmem>>, vector<8x2048xf32>
    %c2_164 = arith.constant 2 : index
    %c4_165 = arith.constant 4 : index
    %c0_166 = arith.constant 0 : index
    %c0_167 = arith.constant 0 : index
    %134 = vector.load %arg3[%c2_164, %c4_165, %c0_166, %c0_167] : memref<5x9x8x8xf32, #tpu.memory_space<vmem>>, vector<1x1x8x8xf32>
    %135 = vector.shape_cast %134 : vector<1x1x8x8xf32> to vector<8x8xf32>
    %cst_168 = arith.constant dense<0.000000e+00> : vector<8x2048xf32>
    %136 = tpu.matmul %135, %133, %cst_168 {dimension_numbers = #tpu.dot_dimension_numbers<[1], [0], [0], [1], [0, 0, 1, 1], [], []>} : vector<8x8xf32>, vector<8x2048xf32>, vector<8x2048xf32> -> vector<8x2048xf32>
    %137 = arith.addf %132, %136 : vector<8x2048xf32>
    %c0_169 = arith.constant 0 : index
    %c33_170 = arith.constant 33 : index
    %138 = vector.load %arg8[%c0_169, %c33_170] : memref<8x2112xf32, #tpu.memory_space<vmem>>, vector<8x2048xf32>
    %c2_171 = arith.constant 2 : index
    %c5_172 = arith.constant 5 : index
    %c0_173 = arith.constant 0 : index
    %c0_174 = arith.constant 0 : index
    %139 = vector.load %arg3[%c2_171, %c5_172, %c0_173, %c0_174] : memref<5x9x8x8xf32, #tpu.memory_space<vmem>>, vector<1x1x8x8xf32>
    %140 = vector.shape_cast %139 : vector<1x1x8x8xf32> to vector<8x8xf32>
    %cst_175 = arith.constant dense<0.000000e+00> : vector<8x2048xf32>
    %141 = tpu.matmul %140, %138, %cst_175 {dimension_numbers = #tpu.dot_dimension_numbers<[1], [0], [0], [1], [0, 0, 1, 1], [], []>} : vector<8x8xf32>, vector<8x2048xf32>, vector<8x2048xf32> -> vector<8x2048xf32>
    %142 = arith.addf %137, %141 : vector<8x2048xf32>
    %c0_176 = arith.constant 0 : index
    %c61_177 = arith.constant 61 : index
    %143 = vector.load %arg8[%c0_176, %c61_177] : memref<8x2112xf32, #tpu.memory_space<vmem>>, vector<8x2048xf32>
    %c2_178 = arith.constant 2 : index
    %c6_179 = arith.constant 6 : index
    %c0_180 = arith.constant 0 : index
    %c0_181 = arith.constant 0 : index
    %144 = vector.load %arg3[%c2_178, %c6_179, %c0_180, %c0_181] : memref<5x9x8x8xf32, #tpu.memory_space<vmem>>, vector<1x1x8x8xf32>
    %145 = vector.shape_cast %144 : vector<1x1x8x8xf32> to vector<8x8xf32>
    %cst_182 = arith.constant dense<0.000000e+00> : vector<8x2048xf32>
    %146 = tpu.matmul %145, %143, %cst_182 {dimension_numbers = #tpu.dot_dimension_numbers<[1], [0], [0], [1], [0, 0, 1, 1], [], []>} : vector<8x8xf32>, vector<8x2048xf32>, vector<8x2048xf32> -> vector<8x2048xf32>
    %147 = arith.addf %142, %146 : vector<8x2048xf32>
    %c0_183 = arith.constant 0 : index
    %c62_184 = arith.constant 62 : index
    %148 = vector.load %arg8[%c0_183, %c62_184] : memref<8x2112xf32, #tpu.memory_space<vmem>>, vector<8x2048xf32>
    %c2_185 = arith.constant 2 : index
    %c7_186 = arith.constant 7 : index
    %c0_187 = arith.constant 0 : index
    %c0_188 = arith.constant 0 : index
    %149 = vector.load %arg3[%c2_185, %c7_186, %c0_187, %c0_188] : memref<5x9x8x8xf32, #tpu.memory_space<vmem>>, vector<1x1x8x8xf32>
    %150 = vector.shape_cast %149 : vector<1x1x8x8xf32> to vector<8x8xf32>
    %cst_189 = arith.constant dense<0.000000e+00> : vector<8x2048xf32>
    %151 = tpu.matmul %150, %148, %cst_189 {dimension_numbers = #tpu.dot_dimension_numbers<[1], [0], [0], [1], [0, 0, 1, 1], [], []>} : vector<8x8xf32>, vector<8x2048xf32>, vector<8x2048xf32> -> vector<8x2048xf32>
    %152 = arith.addf %147, %151 : vector<8x2048xf32>
    %c0_190 = arith.constant 0 : index
    %c63_191 = arith.constant 63 : index
    %153 = vector.load %arg8[%c0_190, %c63_191] : memref<8x2112xf32, #tpu.memory_space<vmem>>, vector<8x2048xf32>
    %c2_192 = arith.constant 2 : index
    %c8_193 = arith.constant 8 : index
    %c0_194 = arith.constant 0 : index
    %c0_195 = arith.constant 0 : index
    %154 = vector.load %arg3[%c2_192, %c8_193, %c0_194, %c0_195] : memref<5x9x8x8xf32, #tpu.memory_space<vmem>>, vector<1x1x8x8xf32>
    %155 = vector.shape_cast %154 : vector<1x1x8x8xf32> to vector<8x8xf32>
    %cst_196 = arith.constant dense<0.000000e+00> : vector<8x2048xf32>
    %156 = tpu.matmul %155, %153, %cst_196 {dimension_numbers = #tpu.dot_dimension_numbers<[1], [0], [0], [1], [0, 0, 1, 1], [], []>} : vector<8x8xf32>, vector<8x2048xf32>, vector<8x2048xf32> -> vector<8x2048xf32>
    %157 = arith.addf %152, %156 : vector<8x2048xf32>
    %c2_197 = arith.constant 2 : index
    %c0_198 = arith.constant 0 : index
    %c0_199 = arith.constant 0 : index
    %158 = vector.load %arg4[%c2_197, %c0_198, %c0_199] : memref<5x8x1xf32, #tpu.memory_space<vmem>>, vector<1x8x1xf32>
    %159 = vector.shape_cast %158 : vector<1x8x1xf32> to vector<8x1xf32>
    %160 = vector.broadcast %159 : vector<8x1xf32> to vector<8x2048xf32>
    %161 = arith.addf %157, %160 : vector<8x2048xf32>
    %cst_200 = arith.constant 0.000000e+00 : f32
    %162 = vector.broadcast %cst_200 : f32 to vector<8x2048xf32>
    %163 = arith.maximumf %161, %162 : vector<8x2048xf32>
    %164 = vector.broadcast %7 : vector<1x2048xf32> to vector<8x2048xf32>
    %165 = arith.mulf %163, %164 : vector<8x2048xf32>
    %c0_201 = arith.constant 0 : index
    %c32_202 = arith.constant 32 : index
    %166 = vector.load %arg8[%c0_201, %c32_202] : memref<8x2112xf32, #tpu.memory_space<vmem>>, vector<8x2048xf32>
    tpu.vector_store %arg8[%c0_201, %c32_202], %165 {strides = array<i32>} : memref<8x2112xf32, #tpu.memory_space<vmem>>, vector<8x2048xf32>,
    %c0_203 = arith.constant 0 : index
    %c1_204 = arith.constant 1 : index
    %167 = vector.load %arg8[%c0_203, %c1_204] : memref<8x2112xf32, #tpu.memory_space<vmem>>, vector<8x2048xf32>
    %c3_205 = arith.constant 3 : index
    %c0_206 = arith.constant 0 : index
    %c0_207 = arith.constant 0 : index
    %c0_208 = arith.constant 0 : index
    %168 = vector.load %arg3[%c3_205, %c0_206, %c0_207, %c0_208] : memref<5x9x8x8xf32, #tpu.memory_space<vmem>>, vector<1x1x8x8xf32>
    %169 = vector.shape_cast %168 : vector<1x1x8x8xf32> to vector<8x8xf32>
    %cst_209 = arith.constant dense<0.000000e+00> : vector<8x2048xf32>
    %170 = tpu.matmul %169, %167, %cst_209 {dimension_numbers = #tpu.dot_dimension_numbers<[1], [0], [0], [1], [0, 0, 1, 1], [], []>} : vector<8x8xf32>, vector<8x2048xf32>, vector<8x2048xf32> -> vector<8x2048xf32>
    %c0_210 = arith.constant 0 : index
    %c2_211 = arith.constant 2 : index
    %171 = vector.load %arg8[%c0_210, %c2_211] : memref<8x2112xf32, #tpu.memory_space<vmem>>, vector<8x2048xf32>
    %c3_212 = arith.constant 3 : index
    %c1_213 = arith.constant 1 : index
    %c0_214 = arith.constant 0 : index
    %c0_215 = arith.constant 0 : index
    %172 = vector.load %arg3[%c3_212, %c1_213, %c0_214, %c0_215] : memref<5x9x8x8xf32, #tpu.memory_space<vmem>>, vector<1x1x8x8xf32>
    %173 = vector.shape_cast %172 : vector<1x1x8x8xf32> to vector<8x8xf32>
    %cst_216 = arith.constant dense<0.000000e+00> : vector<8x2048xf32>
    %174 = tpu.matmul %173, %171, %cst_216 {dimension_numbers = #tpu.dot_dimension_numbers<[1], [0], [0], [1], [0, 0, 1, 1], [], []>} : vector<8x8xf32>, vector<8x2048xf32>, vector<8x2048xf32> -> vector<8x2048xf32>
    %175 = arith.addf %170, %174 : vector<8x2048xf32>
    %c0_217 = arith.constant 0 : index
    %c3_218 = arith.constant 3 : index
    %176 = vector.load %arg8[%c0_217, %c3_218] : memref<8x2112xf32, #tpu.memory_space<vmem>>, vector<8x2048xf32>
    %c3_219 = arith.constant 3 : index
    %c2_220 = arith.constant 2 : index
    %c0_221 = arith.constant 0 : index
    %c0_222 = arith.constant 0 : index
    %177 = vector.load %arg3[%c3_219, %c2_220, %c0_221, %c0_222] : memref<5x9x8x8xf32, #tpu.memory_space<vmem>>, vector<1x1x8x8xf32>
    %178 = vector.shape_cast %177 : vector<1x1x8x8xf32> to vector<8x8xf32>
    %cst_223 = arith.constant dense<0.000000e+00> : vector<8x2048xf32>
    %179 = tpu.matmul %178, %176, %cst_223 {dimension_numbers = #tpu.dot_dimension_numbers<[1], [0], [0], [1], [0, 0, 1, 1], [], []>} : vector<8x8xf32>, vector<8x2048xf32>, vector<8x2048xf32> -> vector<8x2048xf32>
    %180 = arith.addf %175, %179 : vector<8x2048xf32>
    %c0_224 = arith.constant 0 : index
    %c31_225 = arith.constant 31 : index
    %181 = vector.load %arg8[%c0_224, %c31_225] : memref<8x2112xf32, #tpu.memory_space<vmem>>, vector<8x2048xf32>
    %c3_226 = arith.constant 3 : index
    %c3_227 = arith.constant 3 : index
    %c0_228 = arith.constant 0 : index
    %c0_229 = arith.constant 0 : index
    %182 = vector.load %arg3[%c3_226, %c3_227, %c0_228, %c0_229] : memref<5x9x8x8xf32, #tpu.memory_space<vmem>>, vector<1x1x8x8xf32>
    %183 = vector.shape_cast %182 : vector<1x1x8x8xf32> to vector<8x8xf32>
    %cst_230 = arith.constant dense<0.000000e+00> : vector<8x2048xf32>
    %184 = tpu.matmul %183, %181, %cst_230 {dimension_numbers = #tpu.dot_dimension_numbers<[1], [0], [0], [1], [0, 0, 1, 1], [], []>} : vector<8x8xf32>, vector<8x2048xf32>, vector<8x2048xf32> -> vector<8x2048xf32>
    %185 = arith.addf %180, %184 : vector<8x2048xf32>
    %c0_231 = arith.constant 0 : index
    %c32_232 = arith.constant 32 : index
    %186 = vector.load %arg8[%c0_231, %c32_232] : memref<8x2112xf32, #tpu.memory_space<vmem>>, vector<8x2048xf32>
    %c3_233 = arith.constant 3 : index
    %c4_234 = arith.constant 4 : index
    %c0_235 = arith.constant 0 : index
    %c0_236 = arith.constant 0 : index
    %187 = vector.load %arg3[%c3_233, %c4_234, %c0_235, %c0_236] : memref<5x9x8x8xf32, #tpu.memory_space<vmem>>, vector<1x1x8x8xf32>
    %188 = vector.shape_cast %187 : vector<1x1x8x8xf32> to vector<8x8xf32>
    %cst_237 = arith.constant dense<0.000000e+00> : vector<8x2048xf32>
    %189 = tpu.matmul %188, %186, %cst_237 {dimension_numbers = #tpu.dot_dimension_numbers<[1], [0], [0], [1], [0, 0, 1, 1], [], []>} : vector<8x8xf32>, vector<8x2048xf32>, vector<8x2048xf32> -> vector<8x2048xf32>
    %190 = arith.addf %185, %189 : vector<8x2048xf32>
    %c0_238 = arith.constant 0 : index
    %c33_239 = arith.constant 33 : index
    %191 = vector.load %arg8[%c0_238, %c33_239] : memref<8x2112xf32, #tpu.memory_space<vmem>>, vector<8x2048xf32>
    %c3_240 = arith.constant 3 : index
    %c5_241 = arith.constant 5 : index
    %c0_242 = arith.constant 0 : index
    %c0_243 = arith.constant 0 : index
    %192 = vector.load %arg3[%c3_240, %c5_241, %c0_242, %c0_243] : memref<5x9x8x8xf32, #tpu.memory_space<vmem>>, vector<1x1x8x8xf32>
    %193 = vector.shape_cast %192 : vector<1x1x8x8xf32> to vector<8x8xf32>
    %cst_244 = arith.constant dense<0.000000e+00> : vector<8x2048xf32>
    %194 = tpu.matmul %193, %191, %cst_244 {dimension_numbers = #tpu.dot_dimension_numbers<[1], [0], [0], [1], [0, 0, 1, 1], [], []>} : vector<8x8xf32>, vector<8x2048xf32>, vector<8x2048xf32> -> vector<8x2048xf32>
    %195 = arith.addf %190, %194 : vector<8x2048xf32>
    %c0_245 = arith.constant 0 : index
    %c61_246 = arith.constant 61 : index
    %196 = vector.load %arg8[%c0_245, %c61_246] : memref<8x2112xf32, #tpu.memory_space<vmem>>, vector<8x2048xf32>
    %c3_247 = arith.constant 3 : index
    %c6_248 = arith.constant 6 : index
    %c0_249 = arith.constant 0 : index
    %c0_250 = arith.constant 0 : index
    %197 = vector.load %arg3[%c3_247, %c6_248, %c0_249, %c0_250] : memref<5x9x8x8xf32, #tpu.memory_space<vmem>>, vector<1x1x8x8xf32>
    %198 = vector.shape_cast %197 : vector<1x1x8x8xf32> to vector<8x8xf32>
    %cst_251 = arith.constant dense<0.000000e+00> : vector<8x2048xf32>
    %199 = tpu.matmul %198, %196, %cst_251 {dimension_numbers = #tpu.dot_dimension_numbers<[1], [0], [0], [1], [0, 0, 1, 1], [], []>} : vector<8x8xf32>, vector<8x2048xf32>, vector<8x2048xf32> -> vector<8x2048xf32>
    %200 = arith.addf %195, %199 : vector<8x2048xf32>
    %c0_252 = arith.constant 0 : index
    %c62_253 = arith.constant 62 : index
    %201 = vector.load %arg8[%c0_252, %c62_253] : memref<8x2112xf32, #tpu.memory_space<vmem>>, vector<8x2048xf32>
    %c3_254 = arith.constant 3 : index
    %c7_255 = arith.constant 7 : index
    %c0_256 = arith.constant 0 : index
    %c0_257 = arith.constant 0 : index
    %202 = vector.load %arg3[%c3_254, %c7_255, %c0_256, %c0_257] : memref<5x9x8x8xf32, #tpu.memory_space<vmem>>, vector<1x1x8x8xf32>
    %203 = vector.shape_cast %202 : vector<1x1x8x8xf32> to vector<8x8xf32>
    %cst_258 = arith.constant dense<0.000000e+00> : vector<8x2048xf32>
    %204 = tpu.matmul %203, %201, %cst_258 {dimension_numbers = #tpu.dot_dimension_numbers<[1], [0], [0], [1], [0, 0, 1, 1], [], []>} : vector<8x8xf32>, vector<8x2048xf32>, vector<8x2048xf32> -> vector<8x2048xf32>
    %205 = arith.addf %200, %204 : vector<8x2048xf32>
    %c0_259 = arith.constant 0 : index
    %c63_260 = arith.constant 63 : index
    %206 = vector.load %arg8[%c0_259, %c63_260] : memref<8x2112xf32, #tpu.memory_space<vmem>>, vector<8x2048xf32>
    %c3_261 = arith.constant 3 : index
    %c8_262 = arith.constant 8 : index
    %c0_263 = arith.constant 0 : index
    %c0_264 = arith.constant 0 : index
    %207 = vector.load %arg3[%c3_261, %c8_262, %c0_263, %c0_264] : memref<5x9x8x8xf32, #tpu.memory_space<vmem>>, vector<1x1x8x8xf32>
    %208 = vector.shape_cast %207 : vector<1x1x8x8xf32> to vector<8x8xf32>
    %cst_265 = arith.constant dense<0.000000e+00> : vector<8x2048xf32>
    %209 = tpu.matmul %208, %206, %cst_265 {dimension_numbers = #tpu.dot_dimension_numbers<[1], [0], [0], [1], [0, 0, 1, 1], [], []>} : vector<8x8xf32>, vector<8x2048xf32>, vector<8x2048xf32> -> vector<8x2048xf32>
    %210 = arith.addf %205, %209 : vector<8x2048xf32>
    %c3_266 = arith.constant 3 : index
    %c0_267 = arith.constant 0 : index
    %c0_268 = arith.constant 0 : index
    %211 = vector.load %arg4[%c3_266, %c0_267, %c0_268] : memref<5x8x1xf32, #tpu.memory_space<vmem>>, vector<1x8x1xf32>
    %212 = vector.shape_cast %211 : vector<1x8x1xf32> to vector<8x1xf32>
    %213 = vector.broadcast %212 : vector<8x1xf32> to vector<8x2048xf32>
    %214 = arith.addf %210, %213 : vector<8x2048xf32>
    %cst_269 = arith.constant 0.000000e+00 : f32
    %215 = vector.broadcast %cst_269 : f32 to vector<8x2048xf32>
    %216 = arith.maximumf %214, %215 : vector<8x2048xf32>
    %217 = vector.broadcast %7 : vector<1x2048xf32> to vector<8x2048xf32>
    %218 = arith.mulf %216, %217 : vector<8x2048xf32>
    %c0_270 = arith.constant 0 : index
    %c32_271 = arith.constant 32 : index
    %219 = vector.load %arg8[%c0_270, %c32_271] : memref<8x2112xf32, #tpu.memory_space<vmem>>, vector<8x2048xf32>
    tpu.vector_store %arg8[%c0_270, %c32_271], %218 {strides = array<i32>} : memref<8x2112xf32, #tpu.memory_space<vmem>>, vector<8x2048xf32>,
    %c0_272 = arith.constant 0 : index
    %c1_273 = arith.constant 1 : index
    %220 = vector.load %arg8[%c0_272, %c1_273] : memref<8x2112xf32, #tpu.memory_space<vmem>>, vector<8x2048xf32>
    %c4_274 = arith.constant 4 : index
    %c0_275 = arith.constant 0 : index
    %c0_276 = arith.constant 0 : index
    %c0_277 = arith.constant 0 : index
    %221 = vector.load %arg3[%c4_274, %c0_275, %c0_276, %c0_277] : memref<5x9x8x8xf32, #tpu.memory_space<vmem>>, vector<1x1x8x8xf32>
    %222 = vector.shape_cast %221 : vector<1x1x8x8xf32> to vector<8x8xf32>
    %cst_278 = arith.constant dense<0.000000e+00> : vector<8x2048xf32>
    %223 = tpu.matmul %222, %220, %cst_278 {dimension_numbers = #tpu.dot_dimension_numbers<[1], [0], [0], [1], [0, 0, 1, 1], [], []>} : vector<8x8xf32>, vector<8x2048xf32>, vector<8x2048xf32> -> vector<8x2048xf32>
    %c0_279 = arith.constant 0 : index
    %c2_280 = arith.constant 2 : index
    %224 = vector.load %arg8[%c0_279, %c2_280] : memref<8x2112xf32, #tpu.memory_space<vmem>>, vector<8x2048xf32>
    %c4_281 = arith.constant 4 : index
    %c1_282 = arith.constant 1 : index
    %c0_283 = arith.constant 0 : index
    %c0_284 = arith.constant 0 : index
    %225 = vector.load %arg3[%c4_281, %c1_282, %c0_283, %c0_284] : memref<5x9x8x8xf32, #tpu.memory_space<vmem>>, vector<1x1x8x8xf32>
    %226 = vector.shape_cast %225 : vector<1x1x8x8xf32> to vector<8x8xf32>
    %cst_285 = arith.constant dense<0.000000e+00> : vector<8x2048xf32>
    %227 = tpu.matmul %226, %224, %cst_285 {dimension_numbers = #tpu.dot_dimension_numbers<[1], [0], [0], [1], [0, 0, 1, 1], [], []>} : vector<8x8xf32>, vector<8x2048xf32>, vector<8x2048xf32> -> vector<8x2048xf32>
    %228 = arith.addf %223, %227 : vector<8x2048xf32>
    %c0_286 = arith.constant 0 : index
    %c3_287 = arith.constant 3 : index
    %229 = vector.load %arg8[%c0_286, %c3_287] : memref<8x2112xf32, #tpu.memory_space<vmem>>, vector<8x2048xf32>
    %c4_288 = arith.constant 4 : index
    %c2_289 = arith.constant 2 : index
    %c0_290 = arith.constant 0 : index
    %c0_291 = arith.constant 0 : index
    %230 = vector.load %arg3[%c4_288, %c2_289, %c0_290, %c0_291] : memref<5x9x8x8xf32, #tpu.memory_space<vmem>>, vector<1x1x8x8xf32>
    %231 = vector.shape_cast %230 : vector<1x1x8x8xf32> to vector<8x8xf32>
    %cst_292 = arith.constant dense<0.000000e+00> : vector<8x2048xf32>
    %232 = tpu.matmul %231, %229, %cst_292 {dimension_numbers = #tpu.dot_dimension_numbers<[1], [0], [0], [1], [0, 0, 1, 1], [], []>} : vector<8x8xf32>, vector<8x2048xf32>, vector<8x2048xf32> -> vector<8x2048xf32>
    %233 = arith.addf %228, %232 : vector<8x2048xf32>
    %c0_293 = arith.constant 0 : index
    %c31_294 = arith.constant 31 : index
    %234 = vector.load %arg8[%c0_293, %c31_294] : memref<8x2112xf32, #tpu.memory_space<vmem>>, vector<8x2048xf32>
    %c4_295 = arith.constant 4 : index
    %c3_296 = arith.constant 3 : index
    %c0_297 = arith.constant 0 : index
    %c0_298 = arith.constant 0 : index
    %235 = vector.load %arg3[%c4_295, %c3_296, %c0_297, %c0_298] : memref<5x9x8x8xf32, #tpu.memory_space<vmem>>, vector<1x1x8x8xf32>
    %236 = vector.shape_cast %235 : vector<1x1x8x8xf32> to vector<8x8xf32>
    %cst_299 = arith.constant dense<0.000000e+00> : vector<8x2048xf32>
    %237 = tpu.matmul %236, %234, %cst_299 {dimension_numbers = #tpu.dot_dimension_numbers<[1], [0], [0], [1], [0, 0, 1, 1], [], []>} : vector<8x8xf32>, vector<8x2048xf32>, vector<8x2048xf32> -> vector<8x2048xf32>
    %238 = arith.addf %233, %237 : vector<8x2048xf32>
    %c0_300 = arith.constant 0 : index
    %c32_301 = arith.constant 32 : index
    %239 = vector.load %arg8[%c0_300, %c32_301] : memref<8x2112xf32, #tpu.memory_space<vmem>>, vector<8x2048xf32>
    %c4_302 = arith.constant 4 : index
    %c4_303 = arith.constant 4 : index
    %c0_304 = arith.constant 0 : index
    %c0_305 = arith.constant 0 : index
    %240 = vector.load %arg3[%c4_302, %c4_303, %c0_304, %c0_305] : memref<5x9x8x8xf32, #tpu.memory_space<vmem>>, vector<1x1x8x8xf32>
    %241 = vector.shape_cast %240 : vector<1x1x8x8xf32> to vector<8x8xf32>
    %cst_306 = arith.constant dense<0.000000e+00> : vector<8x2048xf32>
    %242 = tpu.matmul %241, %239, %cst_306 {dimension_numbers = #tpu.dot_dimension_numbers<[1], [0], [0], [1], [0, 0, 1, 1], [], []>} : vector<8x8xf32>, vector<8x2048xf32>, vector<8x2048xf32> -> vector<8x2048xf32>
    %243 = arith.addf %238, %242 : vector<8x2048xf32>
    %c0_307 = arith.constant 0 : index
    %c33_308 = arith.constant 33 : index
    %244 = vector.load %arg8[%c0_307, %c33_308] : memref<8x2112xf32, #tpu.memory_space<vmem>>, vector<8x2048xf32>
    %c4_309 = arith.constant 4 : index
    %c5_310 = arith.constant 5 : index
    %c0_311 = arith.constant 0 : index
    %c0_312 = arith.constant 0 : index
    %245 = vector.load %arg3[%c4_309, %c5_310, %c0_311, %c0_312] : memref<5x9x8x8xf32, #tpu.memory_space<vmem>>, vector<1x1x8x8xf32>
    %246 = vector.shape_cast %245 : vector<1x1x8x8xf32> to vector<8x8xf32>
    %cst_313 = arith.constant dense<0.000000e+00> : vector<8x2048xf32>
    %247 = tpu.matmul %246, %244, %cst_313 {dimension_numbers = #tpu.dot_dimension_numbers<[1], [0], [0], [1], [0, 0, 1, 1], [], []>} : vector<8x8xf32>, vector<8x2048xf32>, vector<8x2048xf32> -> vector<8x2048xf32>
    %248 = arith.addf %243, %247 : vector<8x2048xf32>
    %c0_314 = arith.constant 0 : index
    %c61_315 = arith.constant 61 : index
    %249 = vector.load %arg8[%c0_314, %c61_315] : memref<8x2112xf32, #tpu.memory_space<vmem>>, vector<8x2048xf32>
    %c4_316 = arith.constant 4 : index
    %c6_317 = arith.constant 6 : index
    %c0_318 = arith.constant 0 : index
    %c0_319 = arith.constant 0 : index
    %250 = vector.load %arg3[%c4_316, %c6_317, %c0_318, %c0_319] : memref<5x9x8x8xf32, #tpu.memory_space<vmem>>, vector<1x1x8x8xf32>
    %251 = vector.shape_cast %250 : vector<1x1x8x8xf32> to vector<8x8xf32>
    %cst_320 = arith.constant dense<0.000000e+00> : vector<8x2048xf32>
    %252 = tpu.matmul %251, %249, %cst_320 {dimension_numbers = #tpu.dot_dimension_numbers<[1], [0], [0], [1], [0, 0, 1, 1], [], []>} : vector<8x8xf32>, vector<8x2048xf32>, vector<8x2048xf32> -> vector<8x2048xf32>
    %253 = arith.addf %248, %252 : vector<8x2048xf32>
    %c0_321 = arith.constant 0 : index
    %c62_322 = arith.constant 62 : index
    %254 = vector.load %arg8[%c0_321, %c62_322] : memref<8x2112xf32, #tpu.memory_space<vmem>>, vector<8x2048xf32>
    %c4_323 = arith.constant 4 : index
    %c7_324 = arith.constant 7 : index
    %c0_325 = arith.constant 0 : index
    %c0_326 = arith.constant 0 : index
    %255 = vector.load %arg3[%c4_323, %c7_324, %c0_325, %c0_326] : memref<5x9x8x8xf32, #tpu.memory_space<vmem>>, vector<1x1x8x8xf32>
    %256 = vector.shape_cast %255 : vector<1x1x8x8xf32> to vector<8x8xf32>
    %cst_327 = arith.constant dense<0.000000e+00> : vector<8x2048xf32>
    %257 = tpu.matmul %256, %254, %cst_327 {dimension_numbers = #tpu.dot_dimension_numbers<[1], [0], [0], [1], [0, 0, 1, 1], [], []>} : vector<8x8xf32>, vector<8x2048xf32>, vector<8x2048xf32> -> vector<8x2048xf32>
    %258 = arith.addf %253, %257 : vector<8x2048xf32>
    %c0_328 = arith.constant 0 : index
    %c63_329 = arith.constant 63 : index
    %259 = vector.load %arg8[%c0_328, %c63_329] : memref<8x2112xf32, #tpu.memory_space<vmem>>, vector<8x2048xf32>
    %c4_330 = arith.constant 4 : index
    %c8_331 = arith.constant 8 : index
    %c0_332 = arith.constant 0 : index
    %c0_333 = arith.constant 0 : index
    %260 = vector.load %arg3[%c4_330, %c8_331, %c0_332, %c0_333] : memref<5x9x8x8xf32, #tpu.memory_space<vmem>>, vector<1x1x8x8xf32>
    %261 = vector.shape_cast %260 : vector<1x1x8x8xf32> to vector<8x8xf32>
    %cst_334 = arith.constant dense<0.000000e+00> : vector<8x2048xf32>
    %262 = tpu.matmul %261, %259, %cst_334 {dimension_numbers = #tpu.dot_dimension_numbers<[1], [0], [0], [1], [0, 0, 1, 1], [], []>} : vector<8x8xf32>, vector<8x2048xf32>, vector<8x2048xf32> -> vector<8x2048xf32>
    %263 = arith.addf %258, %262 : vector<8x2048xf32>
    %c4_335 = arith.constant 4 : index
    %c0_336 = arith.constant 0 : index
    %c0_337 = arith.constant 0 : index
    %264 = vector.load %arg4[%c4_335, %c0_336, %c0_337] : memref<5x8x1xf32, #tpu.memory_space<vmem>>, vector<1x8x1xf32>
    %265 = vector.shape_cast %264 : vector<1x8x1xf32> to vector<8x1xf32>
    %266 = vector.broadcast %265 : vector<8x1xf32> to vector<8x2048xf32>
    %267 = arith.addf %263, %266 : vector<8x2048xf32>
    %cst_338 = arith.constant 0.000000e+00 : f32
    %268 = vector.broadcast %cst_338 : f32 to vector<8x2048xf32>
    %269 = arith.maximumf %267, %268 : vector<8x2048xf32>
    %270 = vector.broadcast %7 : vector<1x2048xf32> to vector<8x2048xf32>
    %271 = arith.mulf %269, %270 : vector<8x2048xf32>
    %cst_339 = arith.constant 0.000000e+00 : f32
    %272 = vector.broadcast %cst_339 : f32 to vector<2x10xf32>
    %273 = vector.extract_strided_slice %271 {offsets = [0, 0], sizes = [1, 1024], strides = [1, 1]} : vector<8x2048xf32> to vector<1x1024xf32>
    %274 = vector.extract_strided_slice %271 {offsets = [0, 1024], sizes = [1, 1024], strides = [1, 1]} : vector<8x2048xf32> to vector<1x1024xf32>
    %275 = tpu.concatenate %273, %274 in 0 : vector<1x1024xf32>, vector<1x1024xf32> -> vector<2x1024xf32>
    %c0_340 = arith.constant 0 : index
    %c0_341 = arith.constant 0 : index
    %c0_342 = arith.constant 0 : index
    %276 = vector.load %arg5[%c0_340, %c0_341, %c0_342] : memref<8x10x1024xf32, #tpu.memory_space<vmem>>, vector<1x10x1024xf32>
    %277 = vector.shape_cast %276 : vector<1x10x1024xf32> to vector<10x1024xf32>
    %cst_343 = arith.constant dense<0.000000e+00> : vector<2x10xf32>
    %278 = tpu.matmul %275, %277, %cst_343 {dimension_numbers = #tpu.dot_dimension_numbers<[1], [1], [0], [0], [0, 0, 1, 0], [], []>} : vector<2x1024xf32>, vector<10x1024xf32>, vector<2x10xf32> -> vector<2x10xf32>
    %279 = arith.addf %272, %278 : vector<2x10xf32>
    %280 = vector.extract_strided_slice %271 {offsets = [1, 0], sizes = [1, 1024], strides = [1, 1]} : vector<8x2048xf32> to vector<1x1024xf32>
    %281 = vector.extract_strided_slice %271 {offsets = [1, 1024], sizes = [1, 1024], strides = [1, 1]} : vector<8x2048xf32> to vector<1x1024xf32>
    %282 = tpu.concatenate %280, %281 in 0 : vector<1x1024xf32>, vector<1x1024xf32> -> vector<2x1024xf32>
    %c1_344 = arith.constant 1 : index
    %c0_345 = arith.constant 0 : index
    %c0_346 = arith.constant 0 : index
    %283 = vector.load %arg5[%c1_344, %c0_345, %c0_346] : memref<8x10x1024xf32, #tpu.memory_space<vmem>>, vector<1x10x1024xf32>
    %284 = vector.shape_cast %283 : vector<1x10x1024xf32> to vector<10x1024xf32>
    %cst_347 = arith.constant dense<0.000000e+00> : vector<2x10xf32>
    %285 = tpu.matmul %282, %284, %cst_347 {dimension_numbers = #tpu.dot_dimension_numbers<[1], [1], [0], [0], [0, 0, 1, 0], [], []>} : vector<2x1024xf32>, vector<10x1024xf32>, vector<2x10xf32> -> vector<2x10xf32>
    %286 = arith.addf %279, %285 : vector<2x10xf32>
    %287 = vector.extract_strided_slice %271 {offsets = [2, 0], sizes = [1, 1024], strides = [1, 1]} : vector<8x2048xf32> to vector<1x1024xf32>
    %288 = vector.extract_strided_slice %271 {offsets = [2, 1024], sizes = [1, 1024], strides = [1, 1]} : vector<8x2048xf32> to vector<1x1024xf32>
    %289 = tpu.concatenate %287, %288 in 0 : vector<1x1024xf32>, vector<1x1024xf32> -> vector<2x1024xf32>
    %c2_348 = arith.constant 2 : index
    %c0_349 = arith.constant 0 : index
    %c0_350 = arith.constant 0 : index
    %290 = vector.load %arg5[%c2_348, %c0_349, %c0_350] : memref<8x10x1024xf32, #tpu.memory_space<vmem>>, vector<1x10x1024xf32>
    %291 = vector.shape_cast %290 : vector<1x10x1024xf32> to vector<10x1024xf32>
    %cst_351 = arith.constant dense<0.000000e+00> : vector<2x10xf32>
    %292 = tpu.matmul %289, %291, %cst_351 {dimension_numbers = #tpu.dot_dimension_numbers<[1], [1], [0], [0], [0, 0, 1, 0], [], []>} : vector<2x1024xf32>, vector<10x1024xf32>, vector<2x10xf32> -> vector<2x10xf32>
    %293 = arith.addf %286, %292 : vector<2x10xf32>
    %294 = vector.extract_strided_slice %271 {offsets = [3, 0], sizes = [1, 1024], strides = [1, 1]} : vector<8x2048xf32> to vector<1x1024xf32>
    %295 = vector.extract_strided_slice %271 {offsets = [3, 1024], sizes = [1, 1024], strides = [1, 1]} : vector<8x2048xf32> to vector<1x1024xf32>
    %296 = tpu.concatenate %294, %295 in 0 : vector<1x1024xf32>, vector<1x1024xf32> -> vector<2x1024xf32>
    %c3_352 = arith.constant 3 : index
    %c0_353 = arith.constant 0 : index
    %c0_354 = arith.constant 0 : index
    %297 = vector.load %arg5[%c3_352, %c0_353, %c0_354] : memref<8x10x1024xf32, #tpu.memory_space<vmem>>, vector<1x10x1024xf32>
    %298 = vector.shape_cast %297 : vector<1x10x1024xf32> to vector<10x1024xf32>
    %cst_355 = arith.constant dense<0.000000e+00> : vector<2x10xf32>
    %299 = tpu.matmul %296, %298, %cst_355 {dimension_numbers = #tpu.dot_dimension_numbers<[1], [1], [0], [0], [0, 0, 1, 0], [], []>} : vector<2x1024xf32>, vector<10x1024xf32>, vector<2x10xf32> -> vector<2x10xf32>
    %300 = arith.addf %293, %299 : vector<2x10xf32>
    %301 = vector.extract_strided_slice %271 {offsets = [4, 0], sizes = [1, 1024], strides = [1, 1]} : vector<8x2048xf32> to vector<1x1024xf32>
    %302 = vector.extract_strided_slice %271 {offsets = [4, 1024], sizes = [1, 1024], strides = [1, 1]} : vector<8x2048xf32> to vector<1x1024xf32>
    %303 = tpu.concatenate %301, %302 in 0 : vector<1x1024xf32>, vector<1x1024xf32> -> vector<2x1024xf32>
    %c4_356 = arith.constant 4 : index
    %c0_357 = arith.constant 0 : index
    %c0_358 = arith.constant 0 : index
    %304 = vector.load %arg5[%c4_356, %c0_357, %c0_358] : memref<8x10x1024xf32, #tpu.memory_space<vmem>>, vector<1x10x1024xf32>
    %305 = vector.shape_cast %304 : vector<1x10x1024xf32> to vector<10x1024xf32>
    %cst_359 = arith.constant dense<0.000000e+00> : vector<2x10xf32>
    %306 = tpu.matmul %303, %305, %cst_359 {dimension_numbers = #tpu.dot_dimension_numbers<[1], [1], [0], [0], [0, 0, 1, 0], [], []>} : vector<2x1024xf32>, vector<10x1024xf32>, vector<2x10xf32> -> vector<2x10xf32>
    %307 = arith.addf %300, %306 : vector<2x10xf32>
    %308 = vector.extract_strided_slice %271 {offsets = [5, 0], sizes = [1, 1024], strides = [1, 1]} : vector<8x2048xf32> to vector<1x1024xf32>
    %309 = vector.extract_strided_slice %271 {offsets = [5, 1024], sizes = [1, 1024], strides = [1, 1]} : vector<8x2048xf32> to vector<1x1024xf32>
    %310 = tpu.concatenate %308, %309 in 0 : vector<1x1024xf32>, vector<1x1024xf32> -> vector<2x1024xf32>
    %c5_360 = arith.constant 5 : index
    %c0_361 = arith.constant 0 : index
    %c0_362 = arith.constant 0 : index
    %311 = vector.load %arg5[%c5_360, %c0_361, %c0_362] : memref<8x10x1024xf32, #tpu.memory_space<vmem>>, vector<1x10x1024xf32>
    %312 = vector.shape_cast %311 : vector<1x10x1024xf32> to vector<10x1024xf32>
    %cst_363 = arith.constant dense<0.000000e+00> : vector<2x10xf32>
    %313 = tpu.matmul %310, %312, %cst_363 {dimension_numbers = #tpu.dot_dimension_numbers<[1], [1], [0], [0], [0, 0, 1, 0], [], []>} : vector<2x1024xf32>, vector<10x1024xf32>, vector<2x10xf32> -> vector<2x10xf32>
    %314 = arith.addf %307, %313 : vector<2x10xf32>
    %315 = vector.extract_strided_slice %271 {offsets = [6, 0], sizes = [1, 1024], strides = [1, 1]} : vector<8x2048xf32> to vector<1x1024xf32>
    %316 = vector.extract_strided_slice %271 {offsets = [6, 1024], sizes = [1, 1024], strides = [1, 1]} : vector<8x2048xf32> to vector<1x1024xf32>
    %317 = tpu.concatenate %315, %316 in 0 : vector<1x1024xf32>, vector<1x1024xf32> -> vector<2x1024xf32>
    %c6_364 = arith.constant 6 : index
    %c0_365 = arith.constant 0 : index
    %c0_366 = arith.constant 0 : index
    %318 = vector.load %arg5[%c6_364, %c0_365, %c0_366] : memref<8x10x1024xf32, #tpu.memory_space<vmem>>, vector<1x10x1024xf32>
    %319 = vector.shape_cast %318 : vector<1x10x1024xf32> to vector<10x1024xf32>
    %cst_367 = arith.constant dense<0.000000e+00> : vector<2x10xf32>
    %320 = tpu.matmul %317, %319, %cst_367 {dimension_numbers = #tpu.dot_dimension_numbers<[1], [1], [0], [0], [0, 0, 1, 0], [], []>} : vector<2x1024xf32>, vector<10x1024xf32>, vector<2x10xf32> -> vector<2x10xf32>
    %321 = arith.addf %314, %320 : vector<2x10xf32>
    %322 = vector.extract_strided_slice %271 {offsets = [7, 0], sizes = [1, 1024], strides = [1, 1]} : vector<8x2048xf32> to vector<1x1024xf32>
    %323 = vector.extract_strided_slice %271 {offsets = [7, 1024], sizes = [1, 1024], strides = [1, 1]} : vector<8x2048xf32> to vector<1x1024xf32>
    %324 = tpu.concatenate %322, %323 in 0 : vector<1x1024xf32>, vector<1x1024xf32> -> vector<2x1024xf32>
    %c7_368 = arith.constant 7 : index
    %c0_369 = arith.constant 0 : index
    %c0_370 = arith.constant 0 : index
    %325 = vector.load %arg5[%c7_368, %c0_369, %c0_370] : memref<8x10x1024xf32, #tpu.memory_space<vmem>>, vector<1x10x1024xf32>
    %326 = vector.shape_cast %325 : vector<1x10x1024xf32> to vector<10x1024xf32>
    %cst_371 = arith.constant dense<0.000000e+00> : vector<2x10xf32>
    %327 = tpu.matmul %324, %326, %cst_371 {dimension_numbers = #tpu.dot_dimension_numbers<[1], [1], [0], [0], [0, 0, 1, 0], [], []>} : vector<2x1024xf32>, vector<10x1024xf32>, vector<2x10xf32> -> vector<2x10xf32>
    %328 = arith.addf %321, %327 : vector<2x10xf32>
    %c0_372 = arith.constant 0 : index
    %c0_373 = arith.constant 0 : index
    %329 = vector.load %arg6[%c0_372, %c0_373] : memref<1x10xf32, #tpu.memory_space<vmem>>, vector<1x10xf32>
    %330 = vector.broadcast %329 : vector<1x10xf32> to vector<2x10xf32>
    %331 = arith.addf %328, %330 : vector<2x10xf32>
    %c0_374 = arith.constant 0 : index
    %c0_375 = arith.constant 0 : index
    %c0_376 = arith.constant 0 : index
    %332 = vector.load %arg7[%c0_374, %c0_375, %c0_376] : memref<1x2x10xf32, #tpu.memory_space<vmem>>, vector<1x2x10xf32>
    %333 = vector.shape_cast %332 : vector<1x2x10xf32> to vector<2x10xf32>
    %334 = vector.shape_cast %331 : vector<2x10xf32> to vector<1x2x10xf32>
    tpu.vector_store %arg7[%c0_374, %c0_375, %c0_376], %334 {strides = array<i32>} : memref<1x2x10xf32, #tpu.memory_space<vmem>>, vector<1x2x10xf32>,
    return
  }
  func.func @transform_0(%arg0: i32) -> (i32, i32, i32) {
    %c0_i32 = arith.constant 0 : i32
    %c0_i32_0 = arith.constant 0 : i32
    %c0_i32_1 = arith.constant 0 : i32
    return %arg0, %c0_i32, %c0_i32_0 : i32, i32, i32
  }
  func.func @transform_1(%arg0: i32) -> (i32, i32) {
    %c0_i32 = arith.constant 0 : i32
    %c0_i32_0 = arith.constant 0 : i32
    %c0_i32_1 = arith.constant 0 : i32
    return %c0_i32, %c0_i32_0 : i32, i32
  }
  func.func @transform_2(%arg0: i32) -> (i32, i32, i32, i32) {
    %c0_i32 = arith.constant 0 : i32
    %c0_i32_0 = arith.constant 0 : i32
    %c0_i32_1 = arith.constant 0 : i32
    %c0_i32_2 = arith.constant 0 : i32
    %c0_i32_3 = arith.constant 0 : i32
    return %c0_i32, %c0_i32_0, %c0_i32_1, %c0_i32_2 : i32, i32, i32, i32
  }
  func.func @transform_3(%arg0: i32) -> (i32, i32, i32) {
    %c0_i32 = arith.constant 0 : i32
    %c0_i32_0 = arith.constant 0 : i32
    %c0_i32_1 = arith.constant 0 : i32
    %c0_i32_2 = arith.constant 0 : i32
    return %c0_i32, %c0_i32_0, %c0_i32_1 : i32, i32, i32
  }
  func.func @transform_4(%arg0: i32) -> (i32, i32, i32) {
    %c0_i32 = arith.constant 0 : i32
    %c0_i32_0 = arith.constant 0 : i32
    %c0_i32_1 = arith.constant 0 : i32
    %c0_i32_2 = arith.constant 0 : i32
    return %c0_i32, %c0_i32_0, %c0_i32_1 : i32, i32, i32
  }
  func.func @transform_5(%arg0: i32) -> (i32, i32) {
    %c0_i32 = arith.constant 0 : i32
    %c0_i32_0 = arith.constant 0 : i32
    %c0_i32_1 = arith.constant 0 : i32
    return %c0_i32, %c0_i32_0 : i32, i32
  }
  func.func @transform_6(%arg0: i32) -> (i32, i32, i32) {
    %c0_i32 = arith.constant 0 : i32
    %c0_i32_0 = arith.constant 0 : i32
    %c0_i32_1 = arith.constant 0 : i32
    return %arg0, %c0_i32, %c0_i32_0 : i32, i32, i32
  }
}

</mosaic_0001>

<bundles_post_ra>
// kernel: medium_vgg_forward.1
= control target key start
LH: loop header
LB: loop body
LE: loop exit
PB: predicated region body
PF: predicated region fallthrough
CT: control target
= control target key end

     0   :  { %11 = vsyncpa [#allocation4], 0  ;;  %s41774_s0 = inlined_call_operand.vmem [shape: f32[2,8,2048], index: 0, kind: input, shape index: {}]   ;;  %s41775_s1 = inlined_call_operand.vmem [shape: f32[1,2048], index: 1, kind: input, shape index: {}]   ;;  %s41776_s2 = inlined_call_operand.vmem [shape: f32[5,9,8,8], index: 2, kind: input, shape index: {}]   ;;  %s41777_s3 = inlined_call_operand.vmem [shape: f32[5,8,1], index: 3, kind: input, shape index: {}]   ;;  %s41778_s4 = inlined_call_operand.vmem [shape: f32[8,10,1024], index: 4, kind: input, shape index: {}]   ;;  %s41779_s5 = inlined_call_operand.vmem [shape: f32[1,10], index: 5, kind: input, shape index: {}]   ;;  %s41780_s6 = inlined_call_operand.hbm [shape: f32[2,2,10], index: 6, kind: output, shape index: {}]  }
   0x1   :  { %13 = vsyncpa [#allocation4 + $0x1], 0  ;;  %s34844_s21 = smov 0   ;;  %s34846_s22 = smov 0  }
   0x2   :  { %s34848_s23 = smov 0   ;;  %s34850_s24 = smov 0  }
   0x3 LB: > { %s34865_s25 = sadd.s32 4294967295, %s34794_s24   ;;  %s33377_s26 = sadd.s32 4294967294, %s34794_s24   ;;  %s34794_s24 = sphi %s34850_s24, %s42295_s24   ;;  %s34790_s23 = sphi %s34848_s23, %s42294_s23   ;;  %s34786_s22 = sphi %s34846_s22, %s42293_s22   ;;  %s34782_s21 = sphi %s34844_s21, %s42292_s21  }
   0x4   : > { %s34869_s27 = sadd.s32 1, %s34794_s24   ;;  %s157_s28 = sadd.s32 1, %s34790_s23 }
   0x5   : > { %s154_s29 = ssub.s32 %s34794_s24, %s34869_s27  ;;  %p167_p0 = scmp.ne.s32.totalorder %s34790_s23, %s34786_s22 }
   0x6   : > { %p155_p1 = scmp.eq.s32.totalorder %s154_s29, 0  ;;  %p168_p2 = scmp.eq.s32.totalorder %s34865_s25, 1 }
   0x7   : > { %p173_p3 = scmp.ne.s32.totalorder %s34786_s22, %s34782_s21  ;;  %p174_p4 = scmp.eq.s32.totalorder %s33377_s26, 1 }
   0x8   : > { %s34880_s30 = scalar_select %p155_p1, %s34790_s23, %s157_s28  }
   0x9   : > { %p34882_p5 = por %p168_p2, %p167_p0  ;;  %p34886_p6 = por %p174_p4, %p173_p3 }
   0xa   : > { %p33380_p7 = scmp.ge.s32.totalorder %s34794_s24, 1  ;;  %p215_p8 = scmp.lt.s32.totalorder %s34794_s24, 3 }
   0xc   : > { %p216_p9 = pnand %p33380_p7, %p215_p8 }
   0xe   : > { %219 = sbr.rel (%p216_p9) target bundleno = 4132 (0x1024), region = 44 }
  0x15   : > { %p245_p10 = scmp.lt.s32.totalorder %s34865_s25, 1  ;;  %vm250_vm0 = vcmask 261120   ;;  %v41781_v0 = vmov 0.0   ;;  %s34797_s14 = smov 32   ;;  %vm252_vm1 = vcmask 523520   ;;  %vm350_vm2 = vcmask 1047808  }
  0x16   : > { %251 = vst.msk [vmem:[#allocation2] sm:$0xff] %vm250_vm0, %v41781_v0  ;;  %542 = vmatprep.mubr.f32.mxu0 %v41781_v0  ;;  %613 = vmatprep.mubr.f32.mxu1 %v41781_v0  ;;  %s34798_s15 = smov 127   ;;  %s34799_s16 = smov 126   ;;  %vm441_vm3 = vcmask 1031168   ;;  %v35132_v60 = vld [vmem:[%s41776_s2 + $0x8] sm:$0xff]  ;;  %vm474_vm4 = vcmask 64512  }
  0x17   : > { %s246_s9 = scalar_select %p245_p10, %s34865_s25, 1  ;;  %253 = vst.msk [vmem:[#allocation2 + $0x80] sm:$0xff] %vm252_vm1, %v41781_v0  ;;  %vm1080_vm5 = vcmask 1039360   ;;  %vm1720_vm6 = vcmask 1022976   ;;  %vm2376_vm7 = vcmask 793600   ;;  %vm3032_vm8 = vcmask 785408  }
  0x18   : > { %s34800_s17 = smov 125   ;;  %s34801_s18 = smov 97   ;;  %vm3688_vm9 = vcmask 777216   ;;  %vm4344_vm10 = vcmask 547840   ;;  %vm5000_vm11 = vcmask 539648   ;;  %vm5656_vm12 = vcmask 531456  }
  0x19   : > { %s33909_s10 = sshll.u32 %s246_s9, 7  ;;  %s34802_s26 = smov 96   ;;  %vm30632_vm13 = vcmask 1040384   ;;  %vm33302_vm14 = vcmask 74752  }
  0x1a   : > { %s34901_s13 = scalar_lea.vmem %s41774_s0, %s33909_s10  ;;  %s34803_s9 = smov 95  }
  0x1b   : > { %v256_v1 = vld [vmem:[%s34901_s13 + $0x10] sm:$0xff]  ;;  %v254_v2 = vld [vmem:[%s34901_s13] sm:$0xff]  ;;  %v257_v3 = vld [vmem:[%s34901_s13 + $0x18] sm:$0xff]  ;;  %s34804_s12 = smov 67   ;;  %s34805_s20 = smov 66  }
  0x1c   : > { %290 = vrot.lane.b32.xlu1 %v256_v1, %s34797_s14  ;;  %286 = vrot.lane.b32.xlu0 %v254_v2, %s34797_s14  ;;  %v255_v4 = vld [vmem:[%s34901_s13 + $0x8] sm:$0xff]  ;;  %v258_v6 = vld [vmem:[%s34901_s13 + $0x20] sm:$0xff]  ;;  %s34806_s10 = smov 65  }
  0x1d   : > { %v259_v5 = vld [vmem:[%s34901_s13 + $0x28] sm:$0xff]  ;;  %v261_v7 = vld [vmem:[%s34901_s13 + $0x38] sm:$0xff]  ;;  %v260_v8 = vld [vmem:[%s34901_s13 + $0x30] sm:$0xff] }
  0x1e   : > { %v263_v9 = vld [vmem:[%s34901_s13 + $0x48] sm:$0xff]  ;;  %v262_v10 = vld [vmem:[%s34901_s13 + $0x40] sm:$0xff]  ;;  %v265_v11 = vld [vmem:[%s34901_s13 + $0x58] sm:$0xff] }
  0x1f   : > { %v264_v12 = vld [vmem:[%s34901_s13 + $0x50] sm:$0xff]  ;;  %v267_v13 = vld [vmem:[%s34901_s13 + $0x68] sm:$0xff]  ;;  %v266_v14 = vld [vmem:[%s34901_s13 + $0x60] sm:$0xff] }
  0x20   : > { %292 = vrot.lane.b32.xlu1 %v257_v3, %s34797_s14  ;;  %288 = vrot.lane.b32.xlu0 %v255_v4, %s34797_s14  ;;  %v269_v15 = vld [vmem:[%s34901_s13 + $0x78] sm:$0xff]  ;;  %v268_v16 = vld [vmem:[%s34901_s13 + $0x70] sm:$0xff] }
  0x24   : > { %296 = vrot.lane.b32.xlu1 %v259_v5, %s34797_s14  ;;  %294 = vrot.lane.b32.xlu0 %v258_v6, %s34797_s14 }
  0x28   : > { %300 = vrot.lane.b32.xlu1 %v261_v7, %s34797_s14  ;;  %298 = vrot.lane.b32.xlu0 %v260_v8, %s34797_s14 }
  0x2c   : > { %304 = vrot.lane.b32.xlu1 %v263_v9, %s34797_s14  ;;  %302 = vrot.lane.b32.xlu0 %v262_v10, %s34797_s14 }
  0x30   : > { %308 = vrot.lane.b32.xlu1 %v265_v11, %s34797_s14  ;;  %306 = vrot.lane.b32.xlu0 %v264_v12, %s34797_s14 }
  0x34   : > { %312 = vrot.lane.b32.xlu1 %v267_v13, %s34797_s14  ;;  %310 = vrot.lane.b32.xlu0 %v266_v14, %s34797_s14 }
  0x38   : > { %316 = vrot.lane.b32.xlu1 %v269_v15, %s34797_s14  ;;  %314 = vrot.lane.b32.xlu0 %v268_v16, %s34797_s14 }
  0x8e   : > { %v291_v17 = vpop.permute.xlu1 %290  ;;  %v287_v18 = vpop.permute.xlu0 %286 }
  0x8f   : > { %351 = vst.msk [vmem:[#allocation2] sm:$0xff] %vm350_vm2, %v287_v18 }
  0x92   : > { %v293_v19 = vpop.permute.xlu1 %292  ;;  %v289_v27 = vpop.permute.xlu0 %288 }
  0x93   : > { %v34951_v30 = vsel %vm250_vm0, %v289_v27, %v291_v17  ;;  %v34958_v32 = vsel %vm250_vm0, %v291_v17, %v293_v19  ;;  %v34961_v33 = vsel %vm250_vm0, %v287_v18, %v289_v27 }
  0x96   : > { %v297_v20 = vpop.permute.xlu1 %296  ;;  %v34937_v21 = vld [vmem:[#allocation2] sm:$0xff]  ;;  %v295_v28 = vpop.permute.xlu0 %294 }
  0x97   : > { %1046 = vrot.lane.b32.xlu1 %v34937_v21, %s34798_s15  ;;  %407 = vrot.lane.b32.xlu0 %v34937_v21, %s34799_s16  ;;  %v34968_v35 = vsel %vm250_vm0, %v293_v19, %v295_v28  ;;  %v34971_v36 = vsel %vm250_vm0, %v295_v28, %v297_v20 }
  0x9a   : > { %v301_v22 = vpop.permute.xlu1 %300  ;;  %v299_v31 = vpop.permute.xlu0 %298 }
  0x9b   : > { %v34978_v37 = vsel %vm250_vm0, %v297_v20, %v299_v31  ;;  %v34981_v38 = vsel %vm250_vm0, %v299_v31, %v301_v22  ;;  %v35203_v31 = vld [vmem:[%s41776_s2] sm:$0xff] }
  0x9e   : > { %v305_v23 = vpop.permute.xlu1 %304  ;;  %v303_v34 = vpop.permute.xlu0 %302 }
  0x9f   : > { %v34988_v40 = vsel %vm250_vm0, %v301_v22, %v303_v34  ;;  %v34991_v41 = vsel %vm250_vm0, %v303_v34, %v305_v23 }
  0xa2   : > { %v309_v24 = vpop.permute.xlu1 %308  ;;  %v307_v39 = vpop.permute.xlu0 %306 }
  0xa3   : > { %v34998_v43 = vsel %vm250_vm0, %v305_v23, %v307_v39  ;;  %v35001_v44 = vsel %vm250_vm0, %v307_v39, %v309_v24 }
  0xa6   : > { %v313_v25 = vpop.permute.xlu1 %312  ;;  %v311_v42 = vpop.permute.xlu0 %310 }
  0xa7   : > { %v35008_v45 = vsel %vm250_vm0, %v309_v24, %v311_v42  ;;  %v35011_v46 = vsel %vm250_vm0, %v311_v42, %v313_v25 }
  0xaa   : > { %v317_v26 = vpop.permute.xlu1 %316  ;;  %v315_v47 = vpop.permute.xlu0 %314 }
  0xab   : > { %367 = vst.msk [vmem:[#allocation2 + $0x80] sm:$0xff] %vm250_vm0, %v317_v26  ;;  %v35018_v48 = vsel %vm250_vm0, %v313_v25, %v315_v47  ;;  %v35021_v49 = vsel %vm250_vm0, %v315_v47, %v317_v26 }
  0xb2   : > { %v34944_v29 = vld [vmem:[#allocation2 + $0x80] sm:$0xff] }
  0xb3   : > { %1078 = vrot.lane.b32.xlu1 %v34944_v29, %s34798_s15  ;;  %439 = vrot.lane.b32.xlu0 %v34944_v29, %s34799_s16 }
  0xb7   : > { %1686 = vrot.lane.b32.xlu0 %v34937_v21, %s34800_s17  ;;  %411 = vrot.lane.b32.xlu1 %v34951_v30, %s34799_s16 }
  0xbb   : > { %413 = vrot.lane.b32.xlu1 %v34958_v32, %s34799_s16  ;;  %409 = vrot.lane.b32.xlu0 %v34961_v33, %s34799_s16 }
  0xbf   : > { %417 = vrot.lane.b32.xlu1 %v34971_v36, %s34799_s16  ;;  %415 = vrot.lane.b32.xlu0 %v34968_v35, %s34799_s16 }
  0xc3   : > { %421 = vrot.lane.b32.xlu1 %v34981_v38, %s34799_s16  ;;  %419 = vrot.lane.b32.xlu0 %v34978_v37, %s34799_s16 }
  0xc7   : > { %425 = vrot.lane.b32.xlu1 %v34991_v41, %s34799_s16  ;;  %423 = vrot.lane.b32.xlu0 %v34988_v40, %s34799_s16 }
  0xcb   : > { %429 = vrot.lane.b32.xlu1 %v35001_v44, %s34799_s16  ;;  %427 = vrot.lane.b32.xlu0 %v34998_v43, %s34799_s16 }
  0xcf   : > { %433 = vrot.lane.b32.xlu1 %v35011_v46, %s34799_s16  ;;  %431 = vrot.lane.b32.xlu0 %v35008_v45, %s34799_s16 }
  0xd3   : > { %437 = vrot.lane.b32.xlu1 %v35021_v49, %s34799_s16  ;;  %435 = vrot.lane.b32.xlu0 %v35018_v48, %s34799_s16 }
  0xd7   : > { %1048 = vrot.lane.b32.xlu1 %v34961_v33, %s34798_s15  ;;  %1050 = vrot.lane.b32.xlu0 %v34951_v30, %s34798_s15 }
  0xdb   : > { %1054 = vrot.lane.b32.xlu1 %v34968_v35, %s34798_s15  ;;  %1052 = vrot.lane.b32.xlu0 %v34958_v32, %s34798_s15 }
  0xdf   : > { %1058 = vrot.lane.b32.xlu1 %v34978_v37, %s34798_s15  ;;  %1056 = vrot.lane.b32.xlu0 %v34971_v36, %s34798_s15 }
  0xe3   : > { %1062 = vrot.lane.b32.xlu1 %v34988_v40, %s34798_s15  ;;  %1060 = vrot.lane.b32.xlu0 %v34981_v38, %s34798_s15 }
  0xe7   : > { %1066 = vrot.lane.b32.xlu1 %v34998_v43, %s34798_s15  ;;  %1064 = vrot.lane.b32.xlu0 %v34991_v41, %s34798_s15 }
  0xeb   : > { %1070 = vrot.lane.b32.xlu1 %v35008_v45, %s34798_s15  ;;  %1068 = vrot.lane.b32.xlu0 %v35001_v44, %s34798_s15 }
  0xef   : > { %1074 = vrot.lane.b32.xlu1 %v35018_v48, %s34798_s15  ;;  %1072 = vrot.lane.b32.xlu0 %v35011_v46, %s34798_s15 }
  0xf3   : > { %1690 = vrot.lane.b32.xlu1 %v34951_v30, %s34800_s17  ;;  %1076 = vrot.lane.b32.xlu0 %v35021_v49, %s34798_s15 }
  0xf7   : > { %1692 = vrot.lane.b32.xlu1 %v34958_v32, %s34800_s17  ;;  %1688 = vrot.lane.b32.xlu0 %v34961_v33, %s34800_s17 }
  0xfb   : > { %1696 = vrot.lane.b32.xlu1 %v34971_v36, %s34800_s17  ;;  %1694 = vrot.lane.b32.xlu0 %v34968_v35, %s34800_s17 }
  0xff   : > { %1700 = vrot.lane.b32.xlu1 %v34981_v38, %s34800_s17  ;;  %1698 = vrot.lane.b32.xlu0 %v34978_v37, %s34800_s17 }
 0x103   : > { %1704 = vrot.lane.b32.xlu1 %v34991_v41, %s34800_s17  ;;  %1702 = vrot.lane.b32.xlu0 %v34988_v40, %s34800_s17 }
 0x107   : > { %1708 = vrot.lane.b32.xlu1 %v35001_v44, %s34800_s17  ;;  %1706 = vrot.lane.b32.xlu0 %v34998_v43, %s34800_s17 }
 0x109   : > { %v35103_v50 = vpop.permute.xlu1 %1046  ;;  %v408_v51 = vpop.permute.xlu0 %407 }
 0x10b   : > { %1712 = vrot.lane.b32.xlu1 %v35011_v46, %s34800_s17  ;;  %1710 = vrot.lane.b32.xlu0 %v35008_v45, %s34800_s17 }
 0x10f   : > { %1716 = vrot.lane.b32.xlu1 %v35021_v49, %s34800_s17  ;;  %1714 = vrot.lane.b32.xlu0 %v35018_v48, %s34800_s17 }
 0x113   : > { %2344 = vrot.lane.b32.xlu1 %v34961_v33, %s34801_s18  ;;  %1718 = vrot.lane.b32.xlu0 %v34944_v29, %s34800_s17 }
 0x117   : > { %2342 = vrot.lane.b32.xlu1 %v34937_v21, %s34801_s18  ;;  %2346 = vrot.lane.b32.xlu0 %v34951_v30, %s34801_s18 }
 0x11b   : > { %2350 = vrot.lane.b32.xlu1 %v34968_v35, %s34801_s18  ;;  %2348 = vrot.lane.b32.xlu0 %v34958_v32, %s34801_s18 }
 0x11f   : > { %2354 = vrot.lane.b32.xlu1 %v34978_v37, %s34801_s18  ;;  %2352 = vrot.lane.b32.xlu0 %v34971_v36, %s34801_s18 }
 0x123   : > { %2358 = vrot.lane.b32.xlu1 %v34988_v40, %s34801_s18  ;;  %2356 = vrot.lane.b32.xlu0 %v34981_v38, %s34801_s18 }
 0x125   : > { %v35109_v52 = vpop.permute.xlu1 %1078  ;;  %v35111_v53 = vpop.permute.xlu0 %439 }
 0x127   : > { %2362 = vrot.lane.b32.xlu1 %v34998_v43, %s34801_s18  ;;  %2360 = vrot.lane.b32.xlu0 %v34991_v41, %s34801_s18 }
 0x129   : > { %v412_v54 = vpop.permute.xlu1 %411  ;;  %v35117_v55 = vpop.permute.xlu0 %1686 }
 0x12b   : > { %2366 = vrot.lane.b32.xlu1 %v35008_v45, %s34801_s18  ;;  %2364 = vrot.lane.b32.xlu0 %v35001_v44, %s34801_s18 }
 0x12d   : > { %v414_v56 = vpop.permute.xlu1 %413  ;;  %v410_v57 = vpop.permute.xlu0 %409 }
 0x12e   : > { %v443_v58 = vsel %vm441_vm3, %v410_v57, %v412_v54  ;;  %v442_v59 = vsel %vm441_vm3, %v408_v51, %v410_v57  ;;  %v444_v1 = vsel %vm441_vm3, %v412_v54, %v414_v56 }
 0x12f   : > { %2370 = vrot.lane.b32.xlu1 %v35018_v48, %s34801_s18  ;;  %2368 = vrot.lane.b32.xlu0 %v35011_v46, %s34801_s18 }
 0x130   : > { %478 = vmatprep.subr.mxu0 %v443_v58 }
 0x131   : > { %479 = vmatpush1.msra.mxu0 %v442_v59  ;;  %v418_v61 = vpop.permute.xlu1 %417  ;;  %v416_v62 = vpop.permute.xlu0 %415 }
 0x132   : > { %v445_v63 = vsel %vm441_vm3, %v414_v56, %v416_v62  ;;  %33385 = vmatmul.mubr.msk.f32.vlgmr.msra.gmra.mrb[0].mxu0 %vm474_vm4, %v35132_v60  ;;  %v446_v5 = vsel %vm441_vm3, %v416_v62, %v418_v61 }
 0x133   : > { %2374 = vrot.lane.b32.xlu1 %v34944_v29, %s34801_s18  ;;  %2372 = vrot.lane.b32.xlu0 %v35021_v49, %s34801_s18 }
 0x134   : > { %549 = vmatprep.subr.mxu1 %v445_v63  ;;  %684 = vmatprep.mubr.f32.mxu0 %v41781_v0 }
 0x135   : > { %550 = vmatpush1.msra.mxu1 %v444_v1  ;;  %v422_v2 = vpop.permute.xlu1 %421  ;;  %v420_v3 = vpop.permute.xlu0 %419 }
 0x136   : > { %v447_v4 = vsel %vm441_vm3, %v418_v61, %v420_v3  ;;  %33386 = vmatmul.mubr.msk.f32.vlgmr.msra.gmra.mrb[0].mxu1 %vm474_vm4, %v35132_v60  ;;  %v448_v9 = vsel %vm441_vm3, %v420_v3, %v422_v2 }
 0x137   : > { %3002 = vrot.lane.b32.xlu1 %v34951_v30, %s34802_s26  ;;  %3000 = vrot.lane.b32.xlu0 %v34961_v33, %s34802_s26 }
 0x138   : > { %620 = vmatprep.subr.mxu0 %v447_v4  ;;  %755 = vmatprep.mubr.f32.mxu1 %v41781_v0 }
 0x139   : > { %621 = vmatpush1.msra.mxu0 %v446_v5  ;;  %v426_v6 = vpop.permute.xlu1 %425  ;;  %v424_v7 = vpop.permute.xlu0 %423 }
 0x13a   : > { %v449_v8 = vsel %vm441_vm3, %v422_v2, %v424_v7  ;;  %33387 = vmatmul.mubr.msk.f32.vlgmr.msra.gmra.mrb[2].mxu0 %vm474_vm4, %v35132_v60  ;;  %v450_v13 = vsel %vm441_vm3, %v424_v7, %v426_v6 }
 0x13b   : > { %3004 = vrot.lane.b32.xlu1 %v34958_v32, %s34802_s26  ;;  %2998 = vrot.lane.b32.xlu0 %v34937_v21, %s34802_s26 }
 0x13c   : > { %691 = vmatprep.subr.mxu1 %v449_v8  ;;  %826 = vmatprep.mubr.f32.mxu0 %v41781_v0 }
 0x13d   : > { %692 = vmatpush1.msra.mxu1 %v448_v9  ;;  %v430_v10 = vpop.permute.xlu1 %429  ;;  %v428_v11 = vpop.permute.xlu0 %427 }
 0x13e   : > { %v451_v12 = vsel %vm441_vm3, %v426_v6, %v428_v11  ;;  %33388 = vmatmul.mubr.msk.f32.vlgmr.msra.gmra.mrb[2].mxu1 %vm474_vm4, %v35132_v60  ;;  %v452_v17 = vsel %vm441_vm3, %v428_v11, %v430_v10 }
 0x13f   : > { %3008 = vrot.lane.b32.xlu1 %v34971_v36, %s34802_s26  ;;  %3006 = vrot.lane.b32.xlu0 %v34968_v35, %s34802_s26 }
 0x140   : > { %762 = vmatprep.subr.mxu0 %v451_v12  ;;  %897 = vmatprep.mubr.f32.mxu1 %v41781_v0 }
 0x141   : > { %763 = vmatpush1.msra.mxu0 %v450_v13  ;;  %v434_v14 = vpop.permute.xlu1 %433  ;;  %v432_v15 = vpop.permute.xlu0 %431 }
 0x142   : > { %v453_v16 = vsel %vm441_vm3, %v430_v10, %v432_v15  ;;  %33389 = vmatmul.mubr.msk.f32.vlgmr.msra.gmra.mrb[4].mxu0 %vm474_vm4, %v35132_v60  ;;  %v454_v24 = vsel %vm441_vm3, %v432_v15, %v434_v14 }
 0x143   : > { %3012 = vrot.lane.b32.xlu1 %v34981_v38, %s34802_s26  ;;  %3010 = vrot.lane.b32.xlu0 %v34978_v37, %s34802_s26 }
 0x144   : > { %833 = vmatprep.subr.mxu1 %v453_v16  ;;  %968 = vmatprep.mubr.f32.mxu0 %v41781_v0  ;;  %v35285_v16 = vld [vmem:[%s41776_s2 + $0x10] sm:$0xff] }
 0x145   : > { %834 = vmatpush1.msra.mxu1 %v452_v17  ;;  %v438_v18 = vpop.permute.xlu1 %437  ;;  %v436_v19 = vpop.permute.xlu0 %435 }
 0x146   : > { %v455_v20 = vsel %vm441_vm3, %v434_v14, %v436_v19  ;;  %v457_v22 = vsel %vm441_vm3, %v438_v18, %v35111_v53  ;;  %33390 = vmatmul.mubr.msk.f32.vlgmr.msra.gmra.mrb[4].mxu1 %vm474_vm4, %v35132_v60  ;;  %v456_v23 = vsel %vm441_vm3, %v436_v19, %v438_v18 }
 0x147   : > { %3016 = vrot.lane.b32.xlu1 %v34991_v41, %s34802_s26  ;;  %3014 = vrot.lane.b32.xlu0 %v34988_v40, %s34802_s26 }
 0x148   : > { %904 = vmatprep.subr.mxu0 %v455_v20  ;;  %975 = vmatprep.subr.mxu1 %v457_v22 }
 0x149   : > { %905 = vmatpush1.msra.mxu0 %v454_v24  ;;  %976 = vmatpush1.msra.mxu1 %v456_v23  ;;  %v1049_v25 = vpop.permute.xlu1 %1048  ;;  %v1051_v26 = vpop.permute.xlu0 %1050 }
 0x14a   : > { %v1082_v27 = vsel %vm1080_vm5, %v1049_v25, %v1051_v26  ;;  %33391 = vmatmul.mubr.msk.f32.vlgmr.msra.gmra.mrb[6].mxu0 %vm474_vm4, %v35132_v60  ;;  %v1081_v28 = vsel %vm1080_vm5, %v35103_v50, %v1049_v25  ;;  %1039 = vmatprep.mubr.f32.mxu1 %v41781_v0 }
 0x14b   : > { %3020 = vrot.lane.b32.xlu1 %v35001_v44, %s34802_s26  ;;  %3018 = vrot.lane.b32.xlu0 %v34998_v43, %s34802_s26 }
 0x14c   : > { %1116 = vmatprep.subr.mxu0 %v1082_v27  ;;  %33392 = vmatmul.mubr.msk.f32.vlgmr.msra.gmra.mrb[6].mxu1 %vm474_vm4, %v35132_v60 }
 0x14d   : > { %1117 = vmatpush1.msra.mxu0 %v1081_v28  ;;  %v1055_v34 = vpop.permute.xlu1 %1054  ;;  %v1053_v39 = vpop.permute.xlu0 %1052  ;;  %1180 = vmatprep.mubr.f32.mxu0 %v41781_v0 }
 0x14e   : > { %v1084_v42 = vsel %vm1080_vm5, %v1053_v39, %v1055_v34  ;;  %v1083_v47 = vsel %vm1080_vm5, %v1051_v26, %v1053_v39  ;;  %33393 = vmatmul.mubr.msk.f32.vlgmr.msra.gmra.mrb[0].mxu0 %vm474_vm4, %v35203_v31  ;;  %1251 = vmatprep.mubr.f32.mxu1 %v41781_v0 }
 0x14f   : > { %3024 = vrot.lane.b32.xlu1 %v35011_v46, %s34802_s26  ;;  %3022 = vrot.lane.b32.xlu0 %v35008_v45, %s34802_s26 }
 0x150   : > { %1187 = vmatprep.subr.mxu1 %v1084_v42  ;;  %1322 = vmatprep.mubr.f32.mxu0 %v41781_v0 }
 0x151   : > { %1188 = vmatpush1.msra.mxu1 %v1083_v47  ;;  %v1059_v50 = vpop.permute.xlu1 %1058  ;;  %v1057_v51 = vpop.permute.xlu0 %1056 }
 0x152   : > { %v1086_v53 = vsel %vm1080_vm5, %v1057_v51, %v1059_v50  ;;  %v1085_v54 = vsel %vm1080_vm5, %v1055_v34, %v1057_v51  ;;  %33394 = vmatmul.mubr.msk.f32.vlgmr.msra.gmra.mrb[0].mxu1 %vm474_vm4, %v35203_v31 }
 0x153   : > { %3028 = vrot.lane.b32.xlu1 %v35021_v49, %s34802_s26  ;;  %3026 = vrot.lane.b32.xlu0 %v35018_v48, %s34802_s26 }
 0x154   : > { %1258 = vmatprep.subr.mxu0 %v1086_v53  ;;  %1393 = vmatprep.mubr.f32.mxu1 %v41781_v0 }
 0x155   : > { %1259 = vmatpush1.msra.mxu0 %v1085_v54  ;;  %v1063_v56 = vpop.permute.xlu1 %1062  ;;  %v1061_v57 = vpop.permute.xlu0 %1060 }
 0x156   : > { %v1088_v58 = vsel %vm1080_vm5, %v1061_v57, %v1063_v56  ;;  %v1087_v59 = vsel %vm1080_vm5, %v1059_v50, %v1061_v57  ;;  %33395 = vmatmul.mubr.msk.f32.vlgmr.msra.gmra.mrb[2].mxu0 %vm474_vm4, %v35203_v31 }
 0x157   : > { %3656 = vrot.lane.b32.xlu1 %v34961_v33, %s34803_s9  ;;  %3030 = vrot.lane.b32.xlu0 %v34944_v29, %s34802_s26 }
 0x158   : > { %1329 = vmatprep.subr.mxu1 %v1088_v58  ;;  %1464 = vmatprep.mubr.f32.mxu0 %v41781_v0 }
 0x159   : > { %1330 = vmatpush1.msra.mxu1 %v1087_v59  ;;  %v1067_v60 = vpop.permute.xlu1 %1066  ;;  %v1065_v61 = vpop.permute.xlu0 %1064 }
 0x15a   : > { %v1090_v62 = vsel %vm1080_vm5, %v1065_v61, %v1067_v60  ;;  %v1089_v63 = vsel %vm1080_vm5, %v1063_v56, %v1065_v61  ;;  %33396 = vmatmul.mubr.msk.f32.vlgmr.msra.gmra.mrb[2].mxu1 %vm474_vm4, %v35203_v31 }
 0x15b   : > { %3654 = vrot.lane.b32.xlu1 %v34937_v21, %s34803_s9  ;;  %3658 = vrot.lane.b32.xlu0 %v34951_v30, %s34803_s9 }
 0x15c   : > { %1400 = vmatprep.subr.mxu0 %v1090_v62  ;;  %1535 = vmatprep.mubr.f32.mxu1 %v41781_v0 }
 0x15d   : > { %1401 = vmatpush1.msra.mxu0 %v1089_v63  ;;  %v1071_v1 = vpop.permute.xlu1 %1070  ;;  %v1069_v2 = vpop.permute.xlu0 %1068 }
 0x15e   : > { %v1092_v3 = vsel %vm1080_vm5, %v1069_v2, %v1071_v1  ;;  %v1091_v4 = vsel %vm1080_vm5, %v1067_v60, %v1069_v2  ;;  %33397 = vmatmul.mubr.msk.f32.vlgmr.msra.gmra.mrb[4].mxu0 %vm474_vm4, %v35203_v31 }
 0x15f   : > { %3662 = vrot.lane.b32.xlu1 %v34968_v35, %s34803_s9  ;;  %3660 = vrot.lane.b32.xlu0 %v34958_v32, %s34803_s9 }
 0x160   : > { %1471 = vmatprep.subr.mxu1 %v1092_v3  ;;  %1606 = vmatprep.mubr.f32.mxu0 %v41781_v0 }
 0x161   : > { %1472 = vmatpush1.msra.mxu1 %v1091_v4  ;;  %v1075_v5 = vpop.permute.xlu1 %1074  ;;  %v1073_v6 = vpop.permute.xlu0 %1072  ;;  %v35362_v4 = vld [vmem:[%s41776_s2 + $0x18] sm:$0xff] }
 0x162   : > { %v1094_v7 = vsel %vm1080_vm5, %v1073_v6, %v1075_v5  ;;  %v1093_v8 = vsel %vm1080_vm5, %v1071_v1, %v1073_v6  ;;  %33398 = vmatmul.mubr.msk.f32.vlgmr.msra.gmra.mrb[4].mxu1 %vm474_vm4, %v35203_v31 }
 0x163   : > { %3666 = vrot.lane.b32.xlu1 %v34978_v37, %s34803_s9  ;;  %3664 = vrot.lane.b32.xlu0 %v34971_v36, %s34803_s9 }
 0x164   : > { %1542 = vmatprep.subr.mxu0 %v1094_v7  ;;  %1677 = vmatprep.mubr.f32.mxu1 %v41781_v0 }
 0x165   : > { %1543 = vmatpush1.msra.mxu0 %v1093_v8  ;;  %v1691_v9 = vpop.permute.xlu1 %1690  ;;  %v1077_v10 = vpop.permute.xlu0 %1076 }
 0x166   : > { %v1096_v11 = vsel %vm1080_vm5, %v1077_v10, %v35109_v52  ;;  %v1095_v12 = vsel %vm1080_vm5, %v1075_v5, %v1077_v10  ;;  %33399 = vmatmul.mubr.msk.f32.vlgmr.msra.gmra.mrb[6].mxu0 %vm474_vm4, %v35203_v31 }
 0x167   : > { %3670 = vrot.lane.b32.xlu1 %v34988_v40, %s34803_s9  ;;  %3668 = vrot.lane.b32.xlu0 %v34981_v38, %s34803_s9 }
 0x168   : > { %1613 = vmatprep.subr.mxu1 %v1096_v11  ;;  %1820 = vmatprep.mubr.f32.mxu0 %v41781_v0 }
 0x169   : > { %1614 = vmatpush1.msra.mxu1 %v1095_v12  ;;  %v1693_v13 = vpop.permute.xlu1 %1692  ;;  %v1689_v14 = vpop.permute.xlu0 %1688 }
 0x16a   : > { %v1722_v52 = vsel %vm1720_vm6, %v1689_v14, %v1691_v9  ;;  %v1721_v15 = vsel %vm1720_vm6, %v35117_v55, %v1689_v14  ;;  %33400 = vmatmul.mubr.msk.f32.vlgmr.msra.gmra.mrb[6].mxu1 %vm474_vm4, %v35203_v31  ;;  %v1723_v19 = vsel %vm1720_vm6, %v1691_v9, %v1693_v13 }
 0x16b   : > { %3674 = vrot.lane.b32.xlu1 %v34998_v43, %s34803_s9  ;;  %3672 = vrot.lane.b32.xlu0 %v34991_v41, %s34803_s9 }
 0x16c   : > { %1756 = vmatprep.subr.mxu0 %v1722_v52  ;;  %1891 = vmatprep.mubr.f32.mxu1 %v41781_v0 }
 0x16d   : > { %1757 = vmatpush1.msra.mxu0 %v1721_v15  ;;  %v1697_v17 = vpop.permute.xlu1 %1696  ;;  %v1695_v55 = vpop.permute.xlu0 %1694 }
 0x16e   : > { %v1724_v18 = vsel %vm1720_vm6, %v1693_v13, %v1695_v55  ;;  %33402 = vmatmul.mubr.msk.f32.vlgmr.msra.gmra.mrb[0].mxu0 %vm474_vm4, %v35285_v16  ;;  %v1725_v24 = vsel %vm1720_vm6, %v1695_v55, %v1697_v17 }
 0x16f   : > { %3678 = vrot.lane.b32.xlu1 %v35008_v45, %s34803_s9  ;;  %3676 = vrot.lane.b32.xlu0 %v35001_v44, %s34803_s9 }
 0x170   : > { %1827 = vmatprep.subr.mxu1 %v1724_v18  ;;  %1962 = vmatprep.mubr.f32.mxu0 %v41781_v0 }
 0x171   : > { %1828 = vmatpush1.msra.mxu1 %v1723_v19  ;;  %v1701_v20 = vpop.permute.xlu1 %1700  ;;  %v1699_v22 = vpop.permute.xlu0 %1698 }
 0x172   : > { %v1726_v23 = vsel %vm1720_vm6, %v1697_v17, %v1699_v22  ;;  %33403 = vmatmul.mubr.msk.f32.vlgmr.msra.gmra.mrb[0].mxu1 %vm474_vm4, %v35285_v16  ;;  %v1727_v28 = vsel %vm1720_vm6, %v1699_v22, %v1701_v20 }
 0x173   : > { %3682 = vrot.lane.b32.xlu1 %v35018_v48, %s34803_s9  ;;  %3680 = vrot.lane.b32.xlu0 %v35011_v46, %s34803_s9 }
 0x174   : > { %1898 = vmatprep.subr.mxu0 %v1726_v23  ;;  %2033 = vmatprep.mubr.f32.mxu1 %v41781_v0 }
 0x175   : > { %1899 = vmatpush1.msra.mxu0 %v1725_v24  ;;  %v1705_v25 = vpop.permute.xlu1 %1704  ;;  %v1703_v26 = vpop.permute.xlu0 %1702 }
 0x176   : > { %v1728_v27 = vsel %vm1720_vm6, %v1701_v20, %v1703_v26  ;;  %33404 = vmatmul.mubr.msk.f32.vlgmr.msra.gmra.mrb[2].mxu0 %vm474_vm4, %v35285_v16  ;;  %v1729_v42 = vsel %vm1720_vm6, %v1703_v26, %v1705_v25 }
 0x177   : > { %3686 = vrot.lane.b32.xlu1 %v34944_v29, %s34803_s9  ;;  %3684 = vrot.lane.b32.xlu0 %v35021_v49, %s34803_s9 }
 0x178   : > { %1969 = vmatprep.subr.mxu1 %v1728_v27  ;;  %2104 = vmatprep.mubr.f32.mxu0 %v41781_v0 }
 0x179   : > { %1970 = vmatpush1.msra.mxu1 %v1727_v28  ;;  %v1709_v31 = vpop.permute.xlu1 %1708  ;;  %v1707_v34 = vpop.permute.xlu0 %1706 }
 0x17a   : > { %v1730_v39 = vsel %vm1720_vm6, %v1705_v25, %v1707_v34  ;;  %33405 = vmatmul.mubr.msk.f32.vlgmr.msra.gmra.mrb[2].mxu1 %vm474_vm4, %v35285_v16  ;;  %v1731_v53 = vsel %vm1720_vm6, %v1707_v34, %v1709_v31 }
 0x17b   : > { %4314 = vrot.lane.b32.xlu1 %v34951_v30, %s34804_s12  ;;  %4312 = vrot.lane.b32.xlu0 %v34961_v33, %s34804_s12 }
 0x17c   : > { %2040 = vmatprep.subr.mxu0 %v1730_v39  ;;  %2175 = vmatprep.mubr.f32.mxu1 %v41781_v0 }
 0x17d   : > { %2041 = vmatpush1.msra.mxu0 %v1729_v42  ;;  %v1713_v47 = vpop.permute.xlu1 %1712  ;;  %v1711_v50 = vpop.permute.xlu0 %1710 }
 0x17e   : > { %v1732_v51 = vsel %vm1720_vm6, %v1709_v31, %v1711_v50  ;;  %33406 = vmatmul.mubr.msk.f32.vlgmr.msra.gmra.mrb[4].mxu0 %vm474_vm4, %v35285_v16  ;;  %v1733_v58 = vsel %vm1720_vm6, %v1711_v50, %v1713_v47 }
 0x17f   : > { %4316 = vrot.lane.b32.xlu1 %v34958_v32, %s34804_s12  ;;  %4310 = vrot.lane.b32.xlu0 %v34937_v21, %s34804_s12 }
 0x180   : > { %2111 = vmatprep.subr.mxu1 %v1732_v51  ;;  %2246 = vmatprep.mubr.f32.mxu0 %v41781_v0 }
 0x181   : > { %2112 = vmatpush1.msra.mxu1 %v1731_v53  ;;  %v1717_v54 = vpop.permute.xlu1 %1716  ;;  %v1715_v56 = vpop.permute.xlu0 %1714 }
 0x182   : > { %v1734_v57 = vsel %vm1720_vm6, %v1713_v47, %v1715_v56  ;;  %33407 = vmatmul.mubr.msk.f32.vlgmr.msra.gmra.mrb[4].mxu1 %vm474_vm4, %v35285_v16  ;;  %v1735_v62 = vsel %vm1720_vm6, %v1715_v56, %v1717_v54  ;;  %v35440_v56 = vld [vmem:[%s41776_s2 + $0x20] sm:$0xff] }
 0x183   : > { %4320 = vrot.lane.b32.xlu1 %v34971_v36, %s34804_s12  ;;  %4318 = vrot.lane.b32.xlu0 %v34968_v35, %s34804_s12 }
 0x184   : > { %2182 = vmatprep.subr.mxu0 %v1734_v57  ;;  %2317 = vmatprep.mubr.f32.mxu1 %v41781_v0 }
 0x185   : > { %2183 = vmatpush1.msra.mxu0 %v1733_v58  ;;  %v2345_v59 = vpop.permute.xlu1 %2344  ;;  %v1719_v60 = vpop.permute.xlu0 %1718 }
 0x186   : > { %v1736_v61 = vsel %vm1720_vm6, %v1717_v54, %v1719_v60  ;;  %33408 = vmatmul.mubr.msk.f32.vlgmr.msra.gmra.mrb[6].mxu0 %vm474_vm4, %v35285_v16 }
 0x187   : > { %4324 = vrot.lane.b32.xlu1 %v34981_v38, %s34804_s12  ;;  %4322 = vrot.lane.b32.xlu0 %v34978_v37, %s34804_s12 }
 0x188   : > { %2253 = vmatprep.subr.mxu1 %v1736_v61  ;;  %2476 = vmatprep.mubr.f32.mxu0 %v41781_v0 }
 0x189   : > { %2254 = vmatpush1.msra.mxu1 %v1735_v62  ;;  %v2343_v63 = vpop.permute.xlu1 %2342  ;;  %v2347_v1 = vpop.permute.xlu0 %2346 }
 0x18a   : > { %v2377_v2 = vsel %vm2376_vm7, %v2343_v63, %v2345_v59  ;;  %v2378_v3 = vsel %vm2376_vm7, %v2345_v59, %v2347_v1  ;;  %33409 = vmatmul.mubr.msk.f32.vlgmr.msra.gmra.mrb[6].mxu1 %vm474_vm4, %v35285_v16 }
 0x18b   : > { %4328 = vrot.lane.b32.xlu1 %v34991_v41, %s34804_s12  ;;  %4326 = vrot.lane.b32.xlu0 %v34988_v40, %s34804_s12 }
 0x18c   : > { %2412 = vmatprep.subr.mxu0 %v2378_v3  ;;  %2547 = vmatprep.mubr.f32.mxu1 %v41781_v0 }
 0x18d   : > { %2413 = vmatpush1.msra.mxu0 %v2377_v2  ;;  %v2351_v5 = vpop.permute.xlu1 %2350  ;;  %v2349_v6 = vpop.permute.xlu0 %2348 }
 0x18e   : > { %v2380_v7 = vsel %vm2376_vm7, %v2349_v6, %v2351_v5  ;;  %v2379_v8 = vsel %vm2376_vm7, %v2347_v1, %v2349_v6  ;;  %33411 = vmatmul.mubr.msk.f32.vlgmr.msra.gmra.mrb[0].mxu0 %vm474_vm4, %v35362_v4 }
 0x18f   : > { %4332 = vrot.lane.b32.xlu1 %v35001_v44, %s34804_s12  ;;  %4330 = vrot.lane.b32.xlu0 %v34998_v43, %s34804_s12 }
 0x190   : > { %2483 = vmatprep.subr.mxu1 %v2380_v7  ;;  %2618 = vmatprep.mubr.f32.mxu0 %v41781_v0 }
 0x191   : > { %2484 = vmatpush1.msra.mxu1 %v2379_v8  ;;  %v2355_v9 = vpop.permute.xlu1 %2354  ;;  %v2353_v10 = vpop.permute.xlu0 %2352 }
 0x192   : > { %v2382_v11 = vsel %vm2376_vm7, %v2353_v10, %v2355_v9  ;;  %v2381_v12 = vsel %vm2376_vm7, %v2351_v5, %v2353_v10  ;;  %33412 = vmatmul.mubr.msk.f32.vlgmr.msra.gmra.mrb[0].mxu1 %vm474_vm4, %v35362_v4 }
 0x193   : > { %4336 = vrot.lane.b32.xlu1 %v35011_v46, %s34804_s12  ;;  %4334 = vrot.lane.b32.xlu0 %v35008_v45, %s34804_s12 }
 0x194   : > { %2554 = vmatprep.subr.mxu0 %v2382_v11  ;;  %2689 = vmatprep.mubr.f32.mxu1 %v41781_v0 }
 0x195   : > { %2555 = vmatpush1.msra.mxu0 %v2381_v12  ;;  %v2359_v13 = vpop.permute.xlu1 %2358  ;;  %v2357_v14 = vpop.permute.xlu0 %2356 }
 0x196   : > { %v2384_v52 = vsel %vm2376_vm7, %v2357_v14, %v2359_v13  ;;  %v2383_v15 = vsel %vm2376_vm7, %v2355_v9, %v2357_v14  ;;  %33413 = vmatmul.mubr.msk.f32.vlgmr.msra.gmra.mrb[2].mxu0 %vm474_vm4, %v35362_v4 }
 0x197   : > { %4340 = vrot.lane.b32.xlu1 %v35021_v49, %s34804_s12  ;;  %4338 = vrot.lane.b32.xlu0 %v35018_v48, %s34804_s12 }
 0x198   : > { %2625 = vmatprep.subr.mxu1 %v2384_v52  ;;  %2760 = vmatprep.mubr.f32.mxu0 %v41781_v0 }
 0x199   : > { %2626 = vmatpush1.msra.mxu1 %v2383_v15  ;;  %v2363_v16 = vpop.permute.xlu1 %2362  ;;  %v2361_v17 = vpop.permute.xlu0 %2360 }
 0x19a   : > { %v2386_v55 = vsel %vm2376_vm7, %v2361_v17, %v2363_v16  ;;  %v2385_v18 = vsel %vm2376_vm7, %v2359_v13, %v2361_v17  ;;  %33414 = vmatmul.mubr.msk.f32.vlgmr.msra.gmra.mrb[2].mxu1 %vm474_vm4, %v35362_v4 }
 0x19b   : > { %4968 = vrot.lane.b32.xlu1 %v34961_v33, %s34805_s20  ;;  %4342 = vrot.lane.b32.xlu0 %v34944_v29, %s34804_s12 }
 0x19c   : > { %2696 = vmatprep.subr.mxu0 %v2386_v55  ;;  %2831 = vmatprep.mubr.f32.mxu1 %v41781_v0 }
 0x19d   : > { %2697 = vmatpush1.msra.mxu0 %v2385_v18  ;;  %v2367_v19 = vpop.permute.xlu1 %2366  ;;  %v2365_v20 = vpop.permute.xlu0 %2364 }
 0x19e   : > { %v2388_v22 = vsel %vm2376_vm7, %v2365_v20, %v2367_v19  ;;  %v2387_v23 = vsel %vm2376_vm7, %v2363_v16, %v2365_v20  ;;  %33415 = vmatmul.mubr.msk.f32.vlgmr.msra.gmra.mrb[4].mxu0 %vm474_vm4, %v35362_v4 }
 0x19f   : > { %4966 = vrot.lane.b32.xlu1 %v34937_v21, %s34805_s20  ;;  %4970 = vrot.lane.b32.xlu0 %v34951_v30, %s34805_s20 }
 0x1a0   : > { %2767 = vmatprep.subr.mxu1 %v2388_v22  ;;  %2902 = vmatprep.mubr.f32.mxu0 %v41781_v0 }
 0x1a1   : > { %2768 = vmatpush1.msra.mxu1 %v2387_v23  ;;  %v2371_v24 = vpop.permute.xlu1 %2370  ;;  %v2369_v25 = vpop.permute.xlu0 %2368  ;;  %v34807_v23 = vmov 0  }
 0x1a2   : > { %v2390_v26 = vsel %vm2376_vm7, %v2369_v25, %v2371_v24  ;;  %v2389_v27 = vsel %vm2376_vm7, %v2367_v19, %v2369_v25  ;;  %33416 = vmatmul.mubr.msk.f32.vlgmr.msra.gmra.mrb[4].mxu1 %vm474_vm4, %v35362_v4  ;;  %34729 = vset.pattern.permute.xlu1 %v34807_v23 }
 0x1a3   : > { %4974 = vrot.lane.b32.xlu1 %v34968_v35, %s34805_s20  ;;  %4972 = vrot.lane.b32.xlu0 %v34958_v32, %s34805_s20 }
 0x1a4   : > { %2838 = vmatprep.subr.mxu0 %v2390_v26  ;;  %2973 = vmatprep.mubr.f32.mxu1 %v41781_v0 }
 0x1a5   : > { %2839 = vmatpush1.msra.mxu0 %v2389_v27  ;;  %v2375_v28 = vpop.permute.xlu1 %2374  ;;  %v2373_v31 = vpop.permute.xlu0 %2372  ;;  %34730 = vset.pattern.permute.xlu0 %v34807_v23 }
 0x1a6   : > { %v2392_v34 = vsel %vm2376_vm7, %v2373_v31, %v2375_v28  ;;  %v2391_v39 = vsel %vm2376_vm7, %v2371_v24, %v2373_v31  ;;  %33417 = vmatmul.mubr.msk.f32.vlgmr.msra.gmra.mrb[6].mxu0 %vm474_vm4, %v35362_v4  ;;  %v34731_v28 = vld [vmem:[#allocation2 + $0x80] sm:$0xff] }
 0x1a7   : > { %4978 = vrot.lane.b32.xlu1 %v34978_v37, %s34805_s20  ;;  %4976 = vrot.lane.b32.xlu0 %v34971_v36, %s34805_s20 }
 0x1a8   : > { %2909 = vmatprep.subr.mxu1 %v2392_v34  ;;  %3132 = vmatprep.mubr.f32.mxu0 %v41781_v0 }
 0x1a9   : > { %2910 = vmatpush1.msra.mxu1 %v2391_v39  ;;  %v3003_v42 = vpop.permute.xlu1 %3002  ;;  %v3001_v47 = vpop.permute.xlu0 %3000 }
 0x1aa   : > { %v3034_v50 = vsel %vm3032_vm8, %v3001_v47, %v3003_v42  ;;  %33418 = vmatmul.mubr.msk.f32.vlgmr.msra.gmra.mrb[6].mxu1 %vm474_vm4, %v35362_v4 }
 0x1ab   : > { %4982 = vrot.lane.b32.xlu1 %v34988_v40, %s34805_s20  ;;  %4980 = vrot.lane.b32.xlu0 %v34981_v38, %s34805_s20 }
 0x1ac   : > { %3068 = vmatprep.subr.mxu0 %v3034_v50  ;;  %3203 = vmatprep.mubr.f32.mxu1 %v41781_v0 }
 0x1ad   : > { %v3005_v51 = vpop.permute.xlu1 %3004  ;;  %v2999_v53 = vpop.permute.xlu0 %2998 }
 0x1ae   : > { %v3033_v54 = vsel %vm3032_vm8, %v2999_v53, %v3001_v47  ;;  %v3035_v60 = vsel %vm3032_vm8, %v3003_v42, %v3005_v51 }
 0x1af   : > { %4986 = vrot.lane.b32.xlu1 %v34998_v43, %s34805_s20  ;;  %4984 = vrot.lane.b32.xlu0 %v34991_v41, %s34805_s20 }
 0x1b0   : > { %3069 = vmatpush1.msra.mxu0 %v3033_v54 }
 0x1b1   : > { %v3009_v57 = vpop.permute.xlu1 %3008  ;;  %v3007_v58 = vpop.permute.xlu0 %3006  ;;  %33420 = vmatmul.mubr.msk.f32.vlgmr.msra.gmra.mrb[0].mxu0 %vm474_vm4, %v35440_v56 }
 0x1b2   : > { %v3036_v59 = vsel %vm3032_vm8, %v3005_v51, %v3007_v58  ;;  %3274 = vmatprep.mubr.f32.mxu0 %v41781_v0  ;;  %v3037_v1 = vsel %vm3032_vm8, %v3007_v58, %v3009_v57 }
 0x1b3   : > { %4990 = vrot.lane.b32.xlu1 %v35008_v45, %s34805_s20  ;;  %4988 = vrot.lane.b32.xlu0 %v35001_v44, %s34805_s20 }
 0x1b4   : > { %3139 = vmatprep.subr.mxu1 %v3036_v59 }
 0x1b5   : > { %3140 = vmatpush1.msra.mxu1 %v3035_v60  ;;  %v3013_v61 = vpop.permute.xlu1 %3012  ;;  %v3011_v62 = vpop.permute.xlu0 %3010 }
 0x1b6   : > { %v3038_v63 = vsel %vm3032_vm8, %v3009_v57, %v3011_v62  ;;  %33421 = vmatmul.mubr.msk.f32.vlgmr.msra.gmra.mrb[0].mxu1 %vm474_vm4, %v35440_v56  ;;  %v3039_v5 = vsel %vm3032_vm8, %v3011_v62, %v3013_v61 }
 0x1b7   : > { %4994 = vrot.lane.b32.xlu1 %v35018_v48, %s34805_s20  ;;  %4992 = vrot.lane.b32.xlu0 %v35011_v46, %s34805_s20 }
 0x1b8   : > { %3210 = vmatprep.subr.mxu0 %v3038_v63  ;;  %3345 = vmatprep.mubr.f32.mxu1 %v41781_v0  ;;  %v33437_v63 = vld [vmem:[%s41776_s2 + $0x30] sm:$0xff] }
 0x1b9   : > { %3211 = vmatpush1.msra.mxu0 %v3037_v1  ;;  %v3017_v2 = vpop.permute.xlu1 %3016  ;;  %v3015_v3 = vpop.permute.xlu0 %3014 }
 0x1ba   : > { %v3040_v4 = vsel %vm3032_vm8, %v3013_v61, %v3015_v3  ;;  %33422 = vmatmul.mubr.msk.f32.vlgmr.msra.gmra.mrb[2].mxu0 %vm474_vm4, %v35440_v56 }
 0x1bb   : > { %4998 = vrot.lane.b32.xlu1 %v34944_v29, %s34805_s20  ;;  %4996 = vrot.lane.b32.xlu0 %v35021_v49, %s34805_s20  ;;  %v3041_v29 = vsel %vm3032_vm8, %v3015_v3, %v3017_v2 }
 0x1bc   : > { %3281 = vmatprep.subr.mxu1 %v3040_v4  ;;  %3416 = vmatprep.mubr.f32.mxu0 %v41781_v0 }
 0x1bd   : > { %3282 = vmatpush1.msra.mxu1 %v3039_v5  ;;  %v3021_v6 = vpop.permute.xlu1 %3020  ;;  %v3019_v7 = vpop.permute.xlu0 %3018 }
 0x1be   : > { %v3042_v8 = vsel %vm3032_vm8, %v3017_v2, %v3019_v7  ;;  %33423 = vmatmul.mubr.msk.f32.vlgmr.msra.gmra.mrb[2].mxu1 %vm474_vm4, %v35440_v56 }
 0x1bf   : > { %5626 = vrot.lane.b32.xlu1 %v34951_v30, %s34806_s10  ;;  %5624 = vrot.lane.b32.xlu0 %v34961_v33, %s34806_s10  ;;  %v3043_v30 = vsel %vm3032_vm8, %v3019_v7, %v3021_v6 }
 0x1c0   : > { %3352 = vmatprep.subr.mxu0 %v3042_v8  ;;  %3487 = vmatprep.mubr.f32.mxu1 %v41781_v0 }
 0x1c1   : > { %3353 = vmatpush1.msra.mxu0 %v3041_v29  ;;  %v3025_v9 = vpop.permute.xlu1 %3024  ;;  %v3023_v10 = vpop.permute.xlu0 %3022 }
 0x1c2   : > { %v3044_v11 = vsel %vm3032_vm8, %v3021_v6, %v3023_v10  ;;  %33424 = vmatmul.mubr.msk.f32.vlgmr.msra.gmra.mrb[4].mxu0 %vm474_vm4, %v35440_v56 }
 0x1c3   : > { %5628 = vrot.lane.b32.xlu1 %v34958_v32, %s34806_s10  ;;  %5622 = vrot.lane.b32.xlu0 %v34937_v21, %s34806_s10  ;;  %v3045_v21 = vsel %vm3032_vm8, %v3023_v10, %v3025_v9 }
 0x1c4   : > { %3423 = vmatprep.subr.mxu1 %v3044_v11  ;;  %3558 = vmatprep.mubr.f32.mxu0 %v41781_v0 }
 0x1c5   : > { %3424 = vmatpush1.msra.mxu1 %v3043_v30  ;;  %v3029_v33 = vpop.permute.xlu1 %3028  ;;  %v3027_v12 = vpop.permute.xlu0 %3026 }
 0x1c6   : > { %v3046_v13 = vsel %vm3032_vm8, %v3025_v9, %v3027_v12  ;;  %33425 = vmatmul.mubr.msk.f32.vlgmr.msra.gmra.mrb[4].mxu1 %vm474_vm4, %v35440_v56 }
 0x1c7   : > { %5632 = vrot.lane.b32.xlu1 %v34971_v36, %s34806_s10  ;;  %5630 = vrot.lane.b32.xlu0 %v34968_v35, %s34806_s10  ;;  %v3047_v35 = vsel %vm3032_vm8, %v3027_v12, %v3029_v33 }
 0x1c8   : > { %3494 = vmatprep.subr.mxu0 %v3046_v13  ;;  %3629 = vmatprep.mubr.f32.mxu1 %v41781_v0 }
 0x1c9   : > { %3495 = vmatpush1.msra.mxu0 %v3045_v21  ;;  %v3657_v32 = vpop.permute.xlu1 %3656  ;;  %v3031_v14 = vpop.permute.xlu0 %3030 }
 0x1ca   : > { %v3048_v52 = vsel %vm3032_vm8, %v3029_v33, %v3031_v14  ;;  %33426 = vmatmul.mubr.msk.f32.vlgmr.msra.gmra.mrb[6].mxu0 %vm474_vm4, %v35440_v56 }
 0x1cb   : > { %5636 = vrot.lane.b32.xlu1 %v34981_v38, %s34806_s10  ;;  %5634 = vrot.lane.b32.xlu0 %v34978_v37, %s34806_s10  ;;  %v35520_v37 = vld [vmem:[%s41776_s2 + $0x28] sm:$0xff] }
 0x1cc   : > { %3565 = vmatprep.subr.mxu1 %v3048_v52  ;;  %3788 = vmatprep.mubr.f32.mxu0 %v41781_v0 }
 0x1cd   : > { %3566 = vmatpush1.msra.mxu1 %v3047_v35  ;;  %v3655_v36 = vpop.permute.xlu1 %3654  ;;  %v3659_v15 = vpop.permute.xlu0 %3658 }
 0x1ce   : > { %v3689_v16 = vsel %vm3688_vm9, %v3655_v36, %v3657_v32  ;;  %v3690_v17 = vsel %vm3688_vm9, %v3657_v32, %v3659_v15  ;;  %33427 = vmatmul.mubr.msk.f32.vlgmr.msra.gmra.mrb[6].mxu1 %vm474_vm4, %v35440_v56 }
 0x1cf   : > { %5640 = vrot.lane.b32.xlu1 %v34991_v41, %s34806_s10  ;;  %5638 = vrot.lane.b32.xlu0 %v34988_v40, %s34806_s10 }
 0x1d0   : > { %3724 = vmatprep.subr.mxu0 %v3690_v17  ;;  %3859 = vmatprep.mubr.f32.mxu1 %v41781_v0 }
 0x1d1   : > { %3725 = vmatpush1.msra.mxu0 %v3689_v16  ;;  %v3663_v38 = vpop.permute.xlu1 %3662  ;;  %v3661_v55 = vpop.permute.xlu0 %3660 }
 0x1d2   : > { %v3692_v18 = vsel %vm3688_vm9, %v3661_v55, %v3663_v38  ;;  %v3691_v19 = vsel %vm3688_vm9, %v3659_v15, %v3661_v55  ;;  %33429 = vmatmul.mubr.msk.f32.vlgmr.msra.gmra.mrb[0].mxu0 %vm474_vm4, %v35520_v37 }
 0x1d3   : > { %5644 = vrot.lane.b32.xlu1 %v35001_v44, %s34806_s10  ;;  %5642 = vrot.lane.b32.xlu0 %v34998_v43, %s34806_s10 }
 0x1d4   : > { %3795 = vmatprep.subr.mxu1 %v3692_v18  ;;  %3930 = vmatprep.mubr.f32.mxu0 %v41781_v0 }
 0x1d5   : > { %3796 = vmatpush1.msra.mxu1 %v3691_v19  ;;  %v3667_v40 = vpop.permute.xlu1 %3666  ;;  %v3665_v41 = vpop.permute.xlu0 %3664 }
 0x1d6   : > { %v3694_v20 = vsel %vm3688_vm9, %v3665_v41, %v3667_v40  ;;  %v3693_v22 = vsel %vm3688_vm9, %v3663_v38, %v3665_v41  ;;  %33430 = vmatmul.mubr.msk.f32.vlgmr.msra.gmra.mrb[0].mxu1 %vm474_vm4, %v35520_v37 }
 0x1d7   : > { %5648 = vrot.lane.b32.xlu1 %v35011_v46, %s34806_s10  ;;  %5646 = vrot.lane.b32.xlu0 %v35008_v45, %s34806_s10 }
 0x1d8   : > { %3866 = vmatprep.subr.mxu0 %v3694_v20  ;;  %4001 = vmatprep.mubr.f32.mxu1 %v41781_v0 }
 0x1d9   : > { %3867 = vmatpush1.msra.mxu0 %v3693_v22  ;;  %v3671_v43 = vpop.permute.xlu1 %3670  ;;  %v3669_v44 = vpop.permute.xlu0 %3668  ;;  %v35616_v22 = vld [vmem:[%s41776_s2 + $0x38] sm:$0xff] }
 0x1da   : > { %v3696_v24 = vsel %vm3688_vm9, %v3669_v44, %v3671_v43  ;;  %v3695_v25 = vsel %vm3688_vm9, %v3667_v40, %v3669_v44  ;;  %33431 = vmatmul.mubr.msk.f32.vlgmr.msra.gmra.mrb[2].mxu0 %vm474_vm4, %v35520_v37 }
 0x1db   : > { %5652 = vrot.lane.b32.xlu1 %v35021_v49, %s34806_s10  ;;  %5650 = vrot.lane.b32.xlu0 %v35018_v48, %s34806_s10  ;;  %v6276_v49 = vld [vmem:[%s41777_s3] sm:$0xff] }
 0x1dc   : > { %3937 = vmatprep.subr.mxu1 %v3696_v24  ;;  %4072 = vmatprep.mubr.f32.mxu0 %v41781_v0 }
 0x1dd   : > { %3938 = vmatpush1.msra.mxu1 %v3695_v25  ;;  %v3675_v45 = vpop.permute.xlu1 %3674  ;;  %v3673_v46 = vpop.permute.xlu0 %3672 }
 0x1de   : > { %v3698_v26 = vsel %vm3688_vm9, %v3673_v46, %v3675_v45  ;;  %v3697_v27 = vsel %vm3688_vm9, %v3671_v43, %v3673_v46  ;;  %33432 = vmatmul.mubr.msk.f32.vlgmr.msra.gmra.mrb[2].mxu1 %vm474_vm4, %v35520_v37 }
 0x1df   : > { %5654 = vrot.lane.b32.xlu0 %v34731_v28, %s34806_s10  ;;  %4008 = vmatprep.subr.mxu0 %v3698_v26 }
 0x1e0   : > { %4009 = vmatpush1.msra.mxu0 %v3697_v27  ;;  %4143 = vmatprep.mubr.f32.mxu1 %v41781_v0 }
 0x1e1   : > { %v3679_v48 = vpop.permute.xlu1 %3678  ;;  %v3677_v31 = vpop.permute.xlu0 %3676  ;;  %33433 = vmatmul.mubr.msk.f32.vlgmr.msra.gmra.mrb[4].mxu0 %vm474_vm4, %v35520_v37  ;;  %6279 = vperm.xlu1 %34729, %v6276_v49  }
 0x1e2   : > { %v3700_v34 = vsel %vm3688_vm9, %v3677_v31, %v3679_v48  ;;  %v3699_v39 = vsel %vm3688_vm9, %v3675_v45, %v3677_v31  ;;  %4214 = vmatprep.mubr.f32.mxu0 %v41781_v0 }
 0x1e3   : > { %4079 = vmatprep.subr.mxu1 %v3700_v34 }
 0x1e4   : > { %4080 = vmatpush1.msra.mxu1 %v3699_v39 }
 0x1e5   : > { %v3683_v42 = vpop.permute.xlu1 %3682  ;;  %v3681_v47 = vpop.permute.xlu0 %3680  ;;  %33434 = vmatmul.mubr.msk.f32.vlgmr.msra.gmra.mrb[4].mxu1 %vm474_vm4, %v35520_v37 }
 0x1e6   : > { %v3702_v50 = vsel %vm3688_vm9, %v3681_v47, %v3683_v42  ;;  %v3701_v51 = vsel %vm3688_vm9, %v3679_v48, %v3681_v47  ;;  %4285 = vmatprep.mubr.f32.mxu1 %v41781_v0 }
 0x1e7   : > { %4150 = vmatprep.subr.mxu0 %v3702_v50 }
 0x1e8   : > { %4151 = vmatpush1.msra.mxu0 %v3701_v51 }
 0x1e9   : > { %v3687_v53 = vpop.permute.xlu1 %3686  ;;  %v3685_v54 = vpop.permute.xlu0 %3684  ;;  %33435 = vmatmul.mubr.msk.f32.vlgmr.msra.gmra.mrb[6].mxu0 %vm474_vm4, %v35520_v37 }
 0x1ea   : > { %v3704_v56 = vsel %vm3688_vm9, %v3685_v54, %v3687_v53  ;;  %v3703_v57 = vsel %vm3688_vm9, %v3683_v42, %v3685_v54  ;;  %4444 = vmatprep.mubr.f32.mxu0 %v41781_v0 }
 0x1eb   : > { %4221 = vmatprep.subr.mxu1 %v3704_v56 }
 0x1ec   : > { %4222 = vmatpush1.msra.mxu1 %v3703_v57 }
 0x1ed   : > { %v4315_v58 = vpop.permute.xlu1 %4314  ;;  %v4313_v59 = vpop.permute.xlu0 %4312  ;;  %33436 = vmatmul.mubr.msk.f32.vlgmr.msra.gmra.mrb[6].mxu1 %vm474_vm4, %v35520_v37 }
 0x1ee   : > { %v4346_v60 = vsel %vm4344_vm10, %v4313_v59, %v4315_v58  ;;  %4515 = vmatprep.mubr.f32.mxu1 %v41781_v0 }
 0x1ef   : > { %4380 = vmatprep.subr.mxu0 %v4346_v60 }
 0x1f1   : > { %v4317_v61 = vpop.permute.xlu1 %4316  ;;  %v4311_v62 = vpop.permute.xlu0 %4310 }
 0x1f2   : > { %v4345_v1 = vsel %vm4344_vm10, %v4311_v62, %v4313_v59  ;;  %v4347_v5 = vsel %vm4344_vm10, %v4315_v58, %v4317_v61 }
 0x1f3   : > { %4381 = vmatpush1.msra.mxu0 %v4345_v1 }
 0x1f4   : > { %33438 = vmatmul.mubr.msk.f32.vlgmr.msra.gmra.mrb[0].mxu0 %vm474_vm4, %v33437_v63 }
 0x1f5   : > { %v4321_v2 = vpop.permute.xlu1 %4320  ;;  %v4319_v3 = vpop.permute.xlu0 %4318  ;;  %4586 = vmatprep.mubr.f32.mxu0 %v41781_v0 }
 0x1f6   : > { %v4348_v4 = vsel %vm4344_vm10, %v4317_v61, %v4319_v3  ;;  %v4349_v29 = vsel %vm4344_vm10, %v4319_v3, %v4321_v2 }
 0x1f7   : > { %4451 = vmatprep.subr.mxu1 %v4348_v4 }
 0x1f8   : > { %4452 = vmatpush1.msra.mxu1 %v4347_v5  ;;  %v33455_v5 = vld [vmem:[%s41776_s2 + $0x40] sm:$0xff] }
 0x1f9   : > { %v4325_v6 = vpop.permute.xlu1 %4324  ;;  %v4323_v7 = vpop.permute.xlu0 %4322  ;;  %33439 = vmatmul.mubr.msk.f32.vlgmr.msra.gmra.mrb[0].mxu1 %vm474_vm4, %v33437_v63 }
 0x1fa   : > { %v4350_v8 = vsel %vm4344_vm10, %v4321_v2, %v4323_v7  ;;  %4657 = vmatprep.mubr.f32.mxu1 %v41781_v0  ;;  %v4351_v30 = vsel %vm4344_vm10, %v4323_v7, %v4325_v6 }
 0x1fb   : > { %4522 = vmatprep.subr.mxu0 %v4350_v8 }
 0x1fc   : > { %4523 = vmatpush1.msra.mxu0 %v4349_v29 }
 0x1fd   : > { %v4329_v9 = vpop.permute.xlu1 %4328  ;;  %v4327_v10 = vpop.permute.xlu0 %4326  ;;  %33440 = vmatmul.mubr.msk.f32.vlgmr.msra.gmra.mrb[2].mxu0 %vm474_vm4, %v33437_v63 }
 0x1fe   : > { %v4352_v11 = vsel %vm4344_vm10, %v4325_v6, %v4327_v10  ;;  %4728 = vmatprep.mubr.f32.mxu0 %v41781_v0  ;;  %v4353_v21 = vsel %vm4344_vm10, %v4327_v10, %v4329_v9 }
 0x1ff   : > { %4593 = vmatprep.subr.mxu1 %v4352_v11 }
 0x200   : > { %4594 = vmatpush1.msra.mxu1 %v4351_v30 }
 0x201   : > { %v4333_v33 = vpop.permute.xlu1 %4332  ;;  %v4331_v12 = vpop.permute.xlu0 %4330  ;;  %33441 = vmatmul.mubr.msk.f32.vlgmr.msra.gmra.mrb[2].mxu1 %vm474_vm4, %v33437_v63 }
 0x202   : > { %v4354_v13 = vsel %vm4344_vm10, %v4329_v9, %v4331_v12  ;;  %4799 = vmatprep.mubr.f32.mxu1 %v41781_v0  ;;  %v4355_v35 = vsel %vm4344_vm10, %v4331_v12, %v4333_v33 }
 0x203   : > { %4664 = vmatprep.subr.mxu0 %v4354_v13 }
 0x204   : > { %4665 = vmatpush1.msra.mxu0 %v4353_v21 }
 0x205   : > { %v4337_v32 = vpop.permute.xlu1 %4336  ;;  %v4335_v14 = vpop.permute.xlu0 %4334  ;;  %33442 = vmatmul.mubr.msk.f32.vlgmr.msra.gmra.mrb[4].mxu0 %vm474_vm4, %v33437_v63 }
 0x206   : > { %v4356_v52 = vsel %vm4344_vm10, %v4333_v33, %v4335_v14  ;;  %4870 = vmatprep.mubr.f32.mxu0 %v41781_v0  ;;  %v4357_v17 = vsel %vm4344_vm10, %v4335_v14, %v4337_v32 }
 0x207   : > { %4735 = vmatprep.subr.mxu1 %v4356_v52 }
 0x208   : > { %4736 = vmatpush1.msra.mxu1 %v4355_v35 }
 0x209   : > { %v4341_v36 = vpop.permute.xlu1 %4340  ;;  %v4339_v15 = vpop.permute.xlu0 %4338  ;;  %33443 = vmatmul.mubr.msk.f32.vlgmr.msra.gmra.mrb[4].mxu1 %vm474_vm4, %v33437_v63 }
 0x20a   : > { %v4358_v16 = vsel %vm4344_vm10, %v4337_v32, %v4339_v15  ;;  %4941 = vmatprep.mubr.f32.mxu1 %v41781_v0  ;;  %v4359_v18 = vsel %vm4344_vm10, %v4339_v15, %v4341_v36 }
 0x20b   : > { %4806 = vmatprep.subr.mxu0 %v4358_v16 }
 0x20c   : > { %4807 = vmatpush1.msra.mxu0 %v4357_v17 }
 0x20d   : > { %v4969_v37 = vpop.permute.xlu1 %4968  ;;  %v4343_v38 = vpop.permute.xlu0 %4342  ;;  %33444 = vmatmul.mubr.msk.f32.vlgmr.msra.gmra.mrb[6].mxu0 %vm474_vm4, %v33437_v63 }
 0x20e   : > { %v4360_v55 = vsel %vm4344_vm10, %v4341_v36, %v4343_v38  ;;  %5100 = vmatprep.mubr.f32.mxu0 %v41781_v0 }
 0x20f   : > { %4877 = vmatprep.subr.mxu1 %v4360_v55 }
 0x210   : > { %4878 = vmatpush1.msra.mxu1 %v4359_v18 }
 0x211   : > { %v4967_v19 = vpop.permute.xlu1 %4966  ;;  %v4971_v40 = vpop.permute.xlu0 %4970  ;;  %33445 = vmatmul.mubr.msk.f32.vlgmr.msra.gmra.mrb[6].mxu1 %vm474_vm4, %v33437_v63 }
 0x212   : > { %v5001_v41 = vsel %vm5000_vm11, %v4967_v19, %v4969_v37  ;;  %v5002_v20 = vsel %vm5000_vm11, %v4969_v37, %v4971_v40  ;;  %5171 = vmatprep.mubr.f32.mxu1 %v41781_v0 }
 0x213   : > { %5036 = vmatprep.subr.mxu0 %v5002_v20 }
 0x214   : > { %5037 = vmatpush1.msra.mxu0 %v5001_v41 }
 0x215   : > { %v4975_v23 = vpop.permute.xlu1 %4974  ;;  %v4973_v43 = vpop.permute.xlu0 %4972  ;;  %33447 = vmatmul.mubr.msk.f32.vlgmr.msra.gmra.mrb[0].mxu0 %vm474_vm4, %v35616_v22 }
 0x216   : > { %v5004_v44 = vsel %vm5000_vm11, %v4973_v43, %v4975_v23  ;;  %v5003_v24 = vsel %vm5000_vm11, %v4971_v40, %v4973_v43  ;;  %5242 = vmatprep.mubr.f32.mxu0 %v41781_v0 }
 0x217   : > { %5107 = vmatprep.subr.mxu1 %v5004_v44 }
 0x218   : > { %5108 = vmatpush1.msra.mxu1 %v5003_v24  ;;  %v368_v24 = vld [vmem:[%s41775_s1] sm:$0xff] }
 0x219   : > { %v4979_v25 = vpop.permute.xlu1 %4978  ;;  %v4977_v45 = vpop.permute.xlu0 %4976  ;;  %33448 = vmatmul.mubr.msk.f32.vlgmr.msra.gmra.mrb[0].mxu1 %vm474_vm4, %v35616_v22 }
 0x21a   : > { %v5006_v46 = vsel %vm5000_vm11, %v4977_v45, %v4979_v25  ;;  %v5005_v26 = vsel %vm5000_vm11, %v4975_v23, %v4977_v45  ;;  %5313 = vmatprep.mubr.f32.mxu1 %v41781_v0 }
 0x21b   : > { %5178 = vmatprep.subr.mxu0 %v5006_v46 }
 0x21c   : > { %5179 = vmatpush1.msra.mxu0 %v5005_v26 }
 0x21d   : > { %v4983_v27 = vpop.permute.xlu1 %4982  ;;  %v4981_v49 = vpop.permute.xlu0 %4980  ;;  %33449 = vmatmul.mubr.msk.f32.vlgmr.msra.gmra.mrb[2].mxu0 %vm474_vm4, %v35616_v22 }
 0x21e   : > { %v5008_v28 = vsel %vm5000_vm11, %v4981_v49, %v4983_v27  ;;  %v5007_v48 = vsel %vm5000_vm11, %v4979_v25, %v4981_v49  ;;  %5384 = vmatprep.mubr.f32.mxu0 %v41781_v0 }
 0x21f   : > { %5249 = vmatprep.subr.mxu1 %v5008_v28 }
 0x220   : > { %5250 = vmatpush1.msra.mxu1 %v5007_v48 }
 0x221   : > { %v4987_v31 = vpop.permute.xlu1 %4986  ;;  %v4985_v34 = vpop.permute.xlu0 %4984  ;;  %33450 = vmatmul.mubr.msk.f32.vlgmr.msra.gmra.mrb[2].mxu1 %vm474_vm4, %v35616_v22 }
 0x222   : > { %v5010_v39 = vsel %vm5000_vm11, %v4985_v34, %v4987_v31  ;;  %v5009_v42 = vsel %vm5000_vm11, %v4983_v27, %v4985_v34  ;;  %5455 = vmatprep.mubr.f32.mxu1 %v41781_v0 }
 0x223   : > { %5320 = vmatprep.subr.mxu0 %v5010_v39 }
 0x224   : > { %5321 = vmatpush1.msra.mxu0 %v5009_v42 }
 0x225   : > { %v4991_v47 = vpop.permute.xlu1 %4990  ;;  %v4989_v50 = vpop.permute.xlu0 %4988  ;;  %33451 = vmatmul.mubr.msk.f32.vlgmr.msra.gmra.mrb[4].mxu0 %vm474_vm4, %v35616_v22 }
 0x226   : > { %v5012_v51 = vsel %vm5000_vm11, %v4989_v50, %v4991_v47  ;;  %v5011_v53 = vsel %vm5000_vm11, %v4987_v31, %v4989_v50  ;;  %5526 = vmatprep.mubr.f32.mxu0 %v41781_v0 }
 0x227   : > { %5391 = vmatprep.subr.mxu1 %v5012_v51 }
 0x228   : > { %5392 = vmatpush1.msra.mxu1 %v5011_v53 }
 0x229   : > { %v4995_v54 = vpop.permute.xlu1 %4994  ;;  %v4993_v56 = vpop.permute.xlu0 %4992  ;;  %33452 = vmatmul.mubr.msk.f32.vlgmr.msra.gmra.mrb[4].mxu1 %vm474_vm4, %v35616_v22 }
 0x22a   : > { %v5014_v57 = vsel %vm5000_vm11, %v4993_v56, %v4995_v54  ;;  %v5013_v58 = vsel %vm5000_vm11, %v4991_v47, %v4993_v56  ;;  %5597 = vmatprep.mubr.f32.mxu1 %v41781_v0 }
 0x22b   : > { %5462 = vmatprep.subr.mxu0 %v5014_v57 }
 0x22c   : > { %5463 = vmatpush1.msra.mxu0 %v5013_v58 }
 0x22d   : > { %v4999_v59 = vpop.permute.xlu1 %4998  ;;  %v4997_v60 = vpop.permute.xlu0 %4996  ;;  %33453 = vmatmul.mubr.msk.f32.vlgmr.msra.gmra.mrb[6].mxu0 %vm474_vm4, %v35616_v22 }
 0x22e   : > { %v5016_v61 = vsel %vm5000_vm11, %v4997_v60, %v4999_v59  ;;  %v5015_v62 = vsel %vm5000_vm11, %v4995_v54, %v4997_v60  ;;  %5756 = vmatprep.mubr.f32.mxu0 %v41781_v0 }
 0x22f   : > { %5533 = vmatprep.subr.mxu1 %v5016_v61 }
 0x230   : > { %5534 = vmatpush1.msra.mxu1 %v5015_v62 }
 0x231   : > { %v5627_v63 = vpop.permute.xlu1 %5626  ;;  %v5625_v1 = vpop.permute.xlu0 %5624  ;;  %33454 = vmatmul.mubr.msk.f32.vlgmr.msra.gmra.mrb[6].mxu1 %vm474_vm4, %v35616_v22  ;;  %v6316_v22 = vlaneseq }
 0x232   : > { %v5658_v2 = vsel %vm5656_vm12, %v5625_v1, %v5627_v63  ;;  %5827 = vmatprep.mubr.f32.mxu1 %v41781_v0 }
 0x233   : > { %5692 = vmatprep.subr.mxu0 %v5658_v2  ;;  %v35692_v23 = vshrl.u32 %v6316_v22, 7 }
 0x235   : > { %v5629_v3 = vpop.permute.xlu1 %5628  ;;  %v5623_v4 = vpop.permute.xlu0 %5622  ;;  %v6318_v43 = vsub.s32 0, %v35692_v23  ;;  %v6322_v25 = vsub.s32 1, %v35692_v23  ;;  %v6326_v48 = vsub.s32 2, %v35692_v23  ;;  %v6330_v34 = vsub.s32 3, %v35692_v23 }
 0x236   : > { %v5657_v6 = vsel %vm5656_vm12, %v5623_v4, %v5625_v1  ;;  %v5659_v9 = vsel %vm5656_vm12, %v5627_v63, %v5629_v3  ;;  %v6334_v56 = vsub.s32 4, %v35692_v23  ;;  %v6338_v59 = vsub.s32 5, %v35692_v23 }
 0x237   : > { %5693 = vmatpush1.msra.mxu0 %v5657_v6  ;;  %v35702_v26 = vrot.slane %v368_v24, %v6318_v43  ;;  %v35705_v28 = vrot.slane %v368_v24, %v6322_v25  ;;  %v35712_v53 = vrot.slane %v368_v24, %v6326_v48  ;;  %v35716_v58 = vrot.slane %v368_v24, %v6330_v34 }
 0x238   : > { %33456 = vmatmul.mubr.msk.f32.vlgmr.msra.gmra.mrb[0].mxu0 %vm474_vm4, %v33455_v5  ;;  %v35723_v2 = vrot.slane %v368_v24, %v6334_v56  ;;  %v6342_v4 = vsub.s32 6, %v35692_v23 }
 0x239   : > { %v5633_v7 = vpop.permute.xlu1 %5632  ;;  %v5631_v8 = vpop.permute.xlu0 %5630  ;;  %5898 = vmatprep.mubr.f32.mxu0 %v41781_v0  ;;  %41920 = vst [vmem:[#allocation6_spill] sm:$0xff] %v35702_v26  ;;  %41921 = vst [vmem:[#allocation7_spill] sm:$0xff] %v35705_v28 }
 0x23a   : > { %v5660_v29 = vsel %vm5656_vm12, %v5629_v3, %v5631_v8  ;;  %v5661_v33 = vsel %vm5656_vm12, %v5631_v8, %v5633_v7  ;;  %41922 = vst [vmem:[#allocation8_spill] sm:$0xff] %v35712_v53  ;;  %41923 = vst [vmem:[#allocation9_spill] sm:$0xff] %v35716_v58  ;;  %v6346_v8 = vsub.s32 7, %v35692_v23 }
 0x23b   : > { %5763 = vmatprep.subr.mxu1 %v5660_v29  ;;  %41924 = vst [vmem:[#allocation10_spill] sm:$0xff] %v35723_v2 }
 0x23c   : > { %5764 = vmatpush1.msra.mxu1 %v5659_v9 }
 0x23d   : > { %v5637_v10 = vpop.permute.xlu1 %5636  ;;  %33457 = vmatmul.mubr.msk.f32.vlgmr.msra.gmra.mrb[0].mxu1 %vm474_vm4, %v33455_v5  ;;  %v5635_v11 = vpop.permute.xlu0 %5634 }
 0x23e   : > { %v5662_v30 = vsel %vm5656_vm12, %v5633_v7, %v5635_v11  ;;  %5969 = vmatprep.mubr.f32.mxu1 %v41781_v0  ;;  %v5663_v32 = vsel %vm5656_vm12, %v5635_v11, %v5637_v10  ;;  %v35728_v7 = vrot.slane %v368_v24, %v6338_v59 }
 0x23f   : > { %5834 = vmatprep.subr.mxu0 %v5662_v30 }
 0x240   : > { %5835 = vmatpush1.msra.mxu0 %v5661_v33  ;;  %41925 = vst [vmem:[#allocation11_spill] sm:$0xff] %v35728_v7  ;;  %v35735_v33 = vrot.slane %v368_v24, %v6342_v4 }
 0x241   : > { %v5641_v12 = vpop.permute.xlu1 %5640  ;;  %33458 = vmatmul.mubr.msk.f32.vlgmr.msra.gmra.mrb[2].mxu0 %vm474_vm4, %v33455_v5  ;;  %v5639_v13 = vpop.permute.xlu0 %5638 }
 0x242   : > { %v5664_v21 = vsel %vm5656_vm12, %v5637_v10, %v5639_v13  ;;  %6040 = vmatprep.mubr.f32.mxu0 %v41781_v0  ;;  %v5665_v36 = vsel %vm5656_vm12, %v5639_v13, %v5641_v12  ;;  %41926 = vst [vmem:[#allocation12_spill] sm:$0xff] %v35735_v33 }
 0x243   : > { %5905 = vmatprep.subr.mxu1 %v5664_v21 }
 0x244   : > { %5906 = vmatpush1.msra.mxu1 %v5663_v32  ;;  %v35739_v32 = vrot.slane %v368_v24, %v6346_v8 }
 0x245   : > { %v5645_v14 = vpop.permute.xlu1 %5644  ;;  %33459 = vmatmul.mubr.msk.f32.vlgmr.msra.gmra.mrb[2].mxu1 %vm474_vm4, %v33455_v5  ;;  %v5643_v52 = vpop.permute.xlu0 %5642 }
 0x246   : > { %v5666_v35 = vsel %vm5656_vm12, %v5641_v12, %v5643_v52  ;;  %6111 = vmatprep.mubr.f32.mxu1 %v41781_v0  ;;  %v5667_v37 = vsel %vm5656_vm12, %v5643_v52, %v5645_v14  ;;  %41927 = vst [vmem:[#allocation13_spill] sm:$0xff] %v35739_v32 }
 0x247   : > { %5976 = vmatprep.subr.mxu0 %v5666_v35 }
 0x248   : > { %5977 = vmatpush1.msra.mxu0 %v5665_v36 }
 0x249   : > { %33460 = vmatmul.mubr.msk.f32.vlgmr.msra.gmra.mrb[4].mxu0 %vm474_vm4, %v33455_v5  ;;  %v5647_v15 = vpop.permute.xlu0 %5646  ;;  %v5649_v16 = vpop.permute.xlu1 %5648 }
 0x24a   : > { %v5668_v17 = vsel %vm5656_vm12, %v5645_v14, %v5647_v15  ;;  %6182 = vmatprep.mubr.f32.mxu0 %v41781_v0  ;;  %v5669_v18 = vsel %vm5656_vm12, %v5647_v15, %v5649_v16  ;;  %v369_v14 = vld [vmem:[%s41775_s1 + $0x8] sm:$0xff] }
 0x24b   : > { %6047 = vmatprep.subr.mxu1 %v5668_v17  ;;  %v35748_v17 = vrot.slane %v369_v14, %v6318_v43  ;;  %v35758_v23 = vrot.slane %v369_v14, %v6326_v48  ;;  %v35768_v48 = vrot.slane %v369_v14, %v6334_v56  ;;  %v35778_v56 = vrot.slane %v369_v14, %v6342_v4 }
 0x24c   : > { %6048 = vmatpush1.msra.mxu1 %v5667_v37 }
 0x24d   : > { %33461 = vmatmul.mubr.msk.f32.vlgmr.msra.gmra.mrb[4].mxu1 %vm474_vm4, %v33455_v5  ;;  %v5651_v38 = vpop.permute.xlu0 %5650  ;;  %v5653_v19 = vpop.permute.xlu1 %5652  ;;  %41928 = vst [vmem:[#allocation14_spill] sm:$0xff] %v35748_v17  ;;  %41930 = vst [vmem:[#allocation16_spill] sm:$0xff] %v35758_v23 }
 0x24e   : > { %v5670_v55 = vsel %vm5656_vm12, %v5649_v16, %v5651_v38  ;;  %6253 = vmatprep.mubr.f32.mxu1 %v41781_v0  ;;  %v5671_v20 = vsel %vm5656_vm12, %v5651_v38, %v5653_v19  ;;  %41932 = vst [vmem:[#allocation18_spill] sm:$0xff] %v35768_v48  ;;  %41934 = vst [vmem:[#allocation20_spill] sm:$0xff] %v35778_v56 }
 0x24f   : > { %6118 = vmatprep.subr.mxu0 %v5670_v55 }
 0x250   : > { %6119 = vmatpush1.msra.mxu0 %v5669_v18  ;;  %v35752_v18 = vrot.slane %v369_v14, %v6322_v25  ;;  %v35762_v25 = vrot.slane %v369_v14, %v6330_v34  ;;  %v35772_v34 = vrot.slane %v369_v14, %v6338_v59  ;;  %v35782_v59 = vrot.slane %v369_v14, %v6346_v8 }
 0x251   : > { %33462 = vmatmul.mubr.msk.f32.vlgmr.msra.gmra.mrb[6].mxu0 %vm474_vm4, %v33455_v5  ;;  %v5655_v40 = vpop.permute.xlu0 %5654 }
 0x252   : > { %v5672_v41 = vsel %vm5656_vm12, %v5653_v19, %v5655_v40  ;;  %6680 = vmatprep.mubr.f32.mxu0 %v41781_v0  ;;  %41929 = vst [vmem:[#allocation15_spill] sm:$0xff] %v35752_v18  ;;  %41931 = vst [vmem:[#allocation17_spill] sm:$0xff] %v35762_v25 }
 0x253   : > { %6189 = vmatprep.subr.mxu1 %v5672_v41  ;;  %41933 = vst [vmem:[#allocation19_spill] sm:$0xff] %v35772_v34  ;;  %41935 = vst [vmem:[#allocation21_spill] sm:$0xff] %v35782_v59 }
 0x254   : > { %6190 = vmatpush1.msra.mxu1 %v5671_v20 }
 0x255   : > { %33463 = vmatmul.mubr.msk.f32.vlgmr.msra.gmra.mrb[6].mxu1 %vm474_vm4, %v33455_v5 }
 0x256   : > { %6751 = vmatprep.mubr.f32.mxu1 %v41781_v0 }
 0x260   : > { %v35695_v44 = vpop.permute.xlu1 %6279 }
 0x30b   : > { %v5758_v45 = vpop.f32.mrb[0].mxu0 }
 0x30c   : > { %v6282_v46 = vadd.f32 %v35695_v44, %v5758_v45  ;;  %v5760_v27 = vpop.f32.mrb[1].mxu0 }
 0x30d   : > { %v6283_v49 = vadd.f32 %v35695_v44, %v5760_v27 }
 0x30e   : > { %v6298_v31 = vmax.f32 %v6282_v46, 0.0 }
 0x30f   : > { %v6299_v39 = vmax.f32 %v6283_v49, 0.0 }
 0x310   : > { %v6396_v42 = vmul.f32 %v35702_v26, %v6298_v31  ;;  %v5829_v47 = vpop.f32.mrb[0].mxu1 }
 0x311   : > { %v6397_v50 = vmul.f32 %v35705_v28, %v6299_v39  ;;  %v6284_v51 = vadd.f32 %v35695_v44, %v5829_v47  ;;  %v5831_v54 = vpop.f32.mrb[1].mxu1 }
 0x312   : > { %v6285_v57 = vadd.f32 %v35695_v44, %v5831_v54  ;;  %6428 = vrot.lane.b32.xlu0 %v6396_v42, %s34797_s14 }
 0x313   : > { %v6300_v60 = vmax.f32 %v6284_v51, 0.0  ;;  %6430 = vrot.lane.b32.xlu1 %v6397_v50, %s34797_s14 }
 0x314   : > { %v6301_v61 = vmax.f32 %v6285_v57, 0.0  ;;  %v5900_v62 = vpop.f32.mrb[2].mxu0 }
 0x315   : > { %v6398_v63 = vmul.f32 %v35712_v53, %v6300_v60  ;;  %v6286_v1 = vadd.f32 %v35695_v44, %v5900_v62  ;;  %v5902_v3 = vpop.f32.mrb[3].mxu0 }
 0x316   : > { %v6399_v5 = vmul.f32 %v35716_v58, %v6301_v61  ;;  %v6287_v6 = vadd.f32 %v35695_v44, %v5902_v3 }
 0x317   : > { %v6302_v29 = vmax.f32 %v6286_v1, 0.0  ;;  %6432 = vrot.lane.b32.xlu0 %v6398_v63, %s34797_s14 }
 0x318   : > { %v6303_v9 = vmax.f32 %v6287_v6, 0.0  ;;  %6434 = vrot.lane.b32.xlu1 %v6399_v5, %s34797_s14  ;;  %v5971_v10 = vpop.f32.mrb[2].mxu1 }
 0x319   : > { %v6400_v11 = vmul.f32 %v35723_v2, %v6302_v29  ;;  %v6288_v30 = vadd.f32 %v35695_v44, %v5971_v10  ;;  %v5973_v12 = vpop.f32.mrb[3].mxu1 }
 0x31a   : > { %v6401_v13 = vmul.f32 %v35728_v7, %v6303_v9  ;;  %v6289_v21 = vadd.f32 %v35695_v44, %v5973_v12 }
 0x31b   : > { %v6304_v52 = vmax.f32 %v6288_v30, 0.0  ;;  %6436 = vrot.lane.b32.xlu0 %v6400_v11, %s34797_s14 }
 0x31c   : > { %v6305_v35 = vmax.f32 %v6289_v21, 0.0  ;;  %6438 = vrot.lane.b32.xlu1 %v6401_v13, %s34797_s14  ;;  %v6042_v36 = vpop.f32.mrb[4].mxu0 }
 0x31d   : > { %v6402_v15 = vmul.f32 %v35735_v33, %v6304_v52  ;;  %v6290_v16 = vadd.f32 %v35695_v44, %v6042_v36  ;;  %v6044_v37 = vpop.f32.mrb[5].mxu0 }
 0x31e   : > { %v6403_v38 = vmul.f32 %v35739_v32, %v6305_v35  ;;  %v6291_v55 = vadd.f32 %v35695_v44, %v6044_v37 }
 0x31f   : > { %v6306_v19 = vmax.f32 %v6290_v16, 0.0  ;;  %6440 = vrot.lane.b32.xlu0 %v6402_v15, %s34797_s14 }
 0x320   : > { %v6307_v40 = vmax.f32 %v6291_v55, 0.0  ;;  %6442 = vrot.lane.b32.xlu1 %v6403_v38, %s34797_s14  ;;  %v6113_v41 = vpop.f32.mrb[4].mxu1 }
 0x321   : > { %v6404_v20 = vmul.f32 %v35748_v17, %v6306_v19  ;;  %v6292_v22 = vadd.f32 %v35695_v44, %v6113_v41  ;;  %v6115_v43 = vpop.f32.mrb[5].mxu1 }
 0x322   : > { %v6405_v24 = vmul.f32 %v35752_v18, %v6307_v40  ;;  %v6293_v45 = vadd.f32 %v35695_v44, %v6115_v43 }
 0x323   : > { %v6308_v46 = vmax.f32 %v6292_v22, 0.0  ;;  %6444 = vrot.lane.b32.xlu0 %v6404_v20, %s34797_s14 }
 0x324   : > { %v6309_v27 = vmax.f32 %v6293_v45, 0.0  ;;  %6446 = vrot.lane.b32.xlu1 %v6405_v24, %s34797_s14  ;;  %v6184_v49 = vpop.f32.mrb[6].mxu0 }
 0x325   : > { %v6406_v31 = vmul.f32 %v35758_v23, %v6308_v46  ;;  %v6294_v39 = vadd.f32 %v35695_v44, %v6184_v49  ;;  %v6186_v42 = vpop.f32.mrb[7].mxu0 }
 0x326   : > { %v6407_v47 = vmul.f32 %v35762_v25, %v6309_v27  ;;  %v6295_v50 = vadd.f32 %v35695_v44, %v6186_v42 }
 0x327   : > { %v6310_v51 = vmax.f32 %v6294_v39, 0.0  ;;  %6448 = vrot.lane.b32.xlu0 %v6406_v31, %s34797_s14 }
 0x328   : > { %v6311_v54 = vmax.f32 %v6295_v50, 0.0  ;;  %6450 = vrot.lane.b32.xlu1 %v6407_v47, %s34797_s14  ;;  %v6255_v57 = vpop.f32.mrb[6].mxu1 }
 0x329   : > { %v6408_v60 = vmul.f32 %v35768_v48, %v6310_v51  ;;  %v6296_v61 = vadd.f32 %v35695_v44, %v6255_v57  ;;  %v6257_v62 = vpop.f32.mrb[7].mxu1 }
 0x32a   : > { %v6409_v63 = vmul.f32 %v35772_v34, %v6311_v54  ;;  %v6297_v1 = vadd.f32 %v35695_v44, %v6257_v62 }
 0x32b   : > { %v6312_v3 = vmax.f32 %v6296_v61, 0.0  ;;  %6452 = vrot.lane.b32.xlu0 %v6408_v60, %s34797_s14  ;;  %v35990_v60 = vld [vmem:[%s41776_s2 + $0x50] sm:$0xff] }
 0x32c   : > { %v6313_v5 = vmax.f32 %v6297_v1, 0.0  ;;  %6454 = vrot.lane.b32.xlu1 %v6409_v63, %s34797_s14 }
 0x32d   : > { %v6410_v6 = vmul.f32 %v35778_v56, %v6312_v3 }
 0x32e   : > { %v6411_v29 = vmul.f32 %v35782_v59, %v6313_v5 }
 0x32f   : > { %6456 = vrot.lane.b32.xlu0 %v6410_v6, %s34797_s14 }
 0x330   : > { %6458 = vrot.lane.b32.xlu1 %v6411_v29, %s34797_s14 }
 0x384   : > { %v6429_v4 = vpop.permute.xlu0 %6428 }
 0x385   : > { %6492 = vst.msk [vmem:[#allocation2] sm:$0xff] %vm350_vm2, %v6429_v4  ;;  %v6431_v44 = vpop.permute.xlu1 %6430 }
 0x386   : > { %v35808_v13 = vsel %vm250_vm0, %v6429_v4, %v6431_v44 }
 0x389   : > { %v6433_v30 = vpop.permute.xlu0 %6432 }
 0x38a   : > { %v6435_v8 = vpop.permute.xlu1 %6434  ;;  %v35811_v21 = vsel %vm250_vm0, %v6431_v44, %v6433_v30 }
 0x38b   : > { %v35820_v52 = vsel %vm250_vm0, %v6433_v30, %v6435_v8 }
 0x38c   : > { %v35791_v9 = vld [vmem:[#allocation2] sm:$0xff] }
 0x38d   : > { %7184 = vrot.lane.b32.xlu1 %v35791_v9, %s34798_s15  ;;  %6547 = vrot.lane.b32.xlu0 %v35791_v9, %s34799_s16  ;;  %v6437_v15 = vpop.permute.xlu0 %6436 }
 0x38e   : > { %v6439_v10 = vpop.permute.xlu1 %6438  ;;  %v35861_v16 = vsel %vm250_vm0, %v6435_v8, %v6437_v15 }
 0x38f   : > { %v35876_v37 = vsel %vm250_vm0, %v6437_v15, %v6439_v10 }
 0x391   : > { %8478 = vrot.lane.b32.xlu1 %v35791_v9, %s34801_s18  ;;  %7823 = vrot.lane.b32.xlu0 %v35791_v9, %s34800_s17  ;;  %v6441_v38 = vpop.permute.xlu0 %6440 }
 0x392   : > { %v6443_v11 = vpop.permute.xlu1 %6442  ;;  %v35883_v55 = vsel %vm250_vm0, %v6439_v10, %v6441_v38 }
 0x393   : > { %v35886_v19 = vsel %vm250_vm0, %v6441_v38, %v6443_v11 }
 0x395   : > { %9788 = vrot.lane.b32.xlu1 %v35791_v9, %s34803_s9  ;;  %9133 = vrot.lane.b32.xlu0 %v35791_v9, %s34802_s26  ;;  %v6445_v40 = vpop.permute.xlu0 %6444 }
 0x396   : > { %v35805_v12 = vpop.permute.xlu1 %6446  ;;  %v35921_v41 = vsel %vm250_vm0, %v6443_v11, %v6445_v40 }
 0x397   : > { %v35939_v43 = vsel %vm250_vm0, %v6445_v40, %v35805_v12 }
 0x399   : > { %6549 = vrot.lane.b32.xlu0 %v35808_v13, %s34799_s16  ;;  %6551 = vrot.lane.b32.xlu1 %v35811_v21, %s34799_s16  ;;  %v6449_v20 = vpop.permute.xlu0 %6448 }
 0x39a   : > { %v35817_v14 = vpop.permute.xlu1 %6450  ;;  %v35949_v45 = vsel %vm250_vm0, %v35805_v12, %v6449_v20 }
 0x39b   : > { %v35953_v46 = vsel %vm250_vm0, %v6449_v20, %v35817_v14 }
 0x39d   : > { %7188 = vrot.lane.b32.xlu0 %v35811_v21, %s34798_s15  ;;  %6553 = vrot.lane.b32.xlu1 %v35820_v52, %s34799_s16  ;;  %v35931_v22 = vpop.permute.xlu0 %6452 }
 0x39e   : > { %v35826_v35 = vpop.permute.xlu1 %6454  ;;  %v36024_v4 = vsel %vm250_vm0, %v35817_v14, %v35931_v22 }
 0x3a1   : > { %7190 = vrot.lane.b32.xlu0 %v35820_v52, %s34798_s15  ;;  %7186 = vrot.lane.b32.xlu1 %v35808_v13, %s34798_s15  ;;  %v35945_v24 = vpop.permute.xlu0 %6456 }
 0x3a2   : > { %v35832_v36 = vpop.permute.xlu1 %6458 }
 0x3a3   : > { %6508 = vst.msk [vmem:[#allocation2 + $0x80] sm:$0xff] %vm250_vm0, %v35832_v36  ;;  %v36097_v34 = vsel %vm250_vm0, %v35945_v24, %v35832_v36 }
 0x3a5   : > { %7825 = vrot.lane.b32.xlu0 %v35808_v13, %s34800_s17  ;;  %7827 = vrot.lane.b32.xlu1 %v35811_v21, %s34800_s17 }
 0x3a9   : > { %8482 = vrot.lane.b32.xlu0 %v35811_v21, %s34801_s18  ;;  %7829 = vrot.lane.b32.xlu1 %v35820_v52, %s34800_s17 }
 0x3aa   : > { %v36034_v10 = vld [vmem:[#allocation2 + $0x80] sm:$0xff] }
 0x3ad   : > { %8484 = vrot.lane.b32.xlu0 %v35820_v52, %s34801_s18  ;;  %8480 = vrot.lane.b32.xlu1 %v35808_v13, %s34801_s18 }
 0x3b1   : > { %9135 = vrot.lane.b32.xlu0 %v35808_v13, %s34802_s26  ;;  %9137 = vrot.lane.b32.xlu1 %v35811_v21, %s34802_s26 }
 0x3b5   : > { %9792 = vrot.lane.b32.xlu0 %v35811_v21, %s34803_s9  ;;  %9139 = vrot.lane.b32.xlu1 %v35820_v52, %s34802_s26 }
 0x3b9   : > { %9794 = vrot.lane.b32.xlu0 %v35820_v52, %s34803_s9  ;;  %9790 = vrot.lane.b32.xlu1 %v35808_v13, %s34803_s9 }
 0x3bd   : > { %10445 = vrot.lane.b32.xlu0 %v35808_v13, %s34804_s12  ;;  %7192 = vrot.lane.b32.xlu1 %v35861_v16, %s34798_s15 }
 0x3c1   : > { %8486 = vrot.lane.b32.xlu1 %v35861_v16, %s34801_s18  ;;  %6555 = vrot.lane.b32.xlu0 %v35861_v16, %s34799_s16 }
 0x3c5   : > { %9796 = vrot.lane.b32.xlu1 %v35861_v16, %s34803_s9  ;;  %7831 = vrot.lane.b32.xlu0 %v35861_v16, %s34800_s17 }
 0x3c9   : > { %6557 = vrot.lane.b32.xlu1 %v35876_v37, %s34799_s16  ;;  %9141 = vrot.lane.b32.xlu0 %v35861_v16, %s34802_s26 }
 0x3cd   : > { %6561 = vrot.lane.b32.xlu1 %v35886_v19, %s34799_s16  ;;  %6559 = vrot.lane.b32.xlu0 %v35883_v55, %s34799_s16 }
 0x3d1   : > { %7196 = vrot.lane.b32.xlu1 %v35883_v55, %s34798_s15  ;;  %7194 = vrot.lane.b32.xlu0 %v35876_v37, %s34798_s15 }
 0x3d5   : > { %7833 = vrot.lane.b32.xlu1 %v35876_v37, %s34800_s17  ;;  %7198 = vrot.lane.b32.xlu0 %v35886_v19, %s34798_s15 }
 0x3d9   : > { %7837 = vrot.lane.b32.xlu1 %v35886_v19, %s34800_s17  ;;  %7835 = vrot.lane.b32.xlu0 %v35883_v55, %s34800_s17 }
 0x3dd   : > { %8490 = vrot.lane.b32.xlu1 %v35883_v55, %s34801_s18  ;;  %8488 = vrot.lane.b32.xlu0 %v35876_v37, %s34801_s18 }
 0x3e1   : > { %9143 = vrot.lane.b32.xlu1 %v35876_v37, %s34802_s26  ;;  %8492 = vrot.lane.b32.xlu0 %v35886_v19, %s34801_s18 }
 0x3e5   : > { %9147 = vrot.lane.b32.xlu1 %v35886_v19, %s34802_s26  ;;  %9145 = vrot.lane.b32.xlu0 %v35883_v55, %s34802_s26 }
 0x3e9   : > { %9800 = vrot.lane.b32.xlu1 %v35883_v55, %s34803_s9  ;;  %9798 = vrot.lane.b32.xlu0 %v35876_v37, %s34803_s9 }
 0x3ed   : > { %9802 = vrot.lane.b32.xlu0 %v35886_v19, %s34803_s9  ;;  %7200 = vrot.lane.b32.xlu1 %v35921_v41, %s34798_s15 }
 0x3f1   : > { %8494 = vrot.lane.b32.xlu1 %v35921_v41, %s34801_s18  ;;  %6563 = vrot.lane.b32.xlu0 %v35921_v41, %s34799_s16 }
 0x3f5   : > { %9804 = vrot.lane.b32.xlu1 %v35921_v41, %s34803_s9  ;;  %7839 = vrot.lane.b32.xlu0 %v35921_v41, %s34800_s17 }
 0x3f9   : > { %6565 = vrot.lane.b32.xlu1 %v35939_v43, %s34799_s16  ;;  %9149 = vrot.lane.b32.xlu0 %v35921_v41, %s34802_s26 }
 0x3fd   : > { %6569 = vrot.lane.b32.xlu1 %v35953_v46, %s34799_s16  ;;  %6567 = vrot.lane.b32.xlu0 %v35949_v45, %s34799_s16 }
 0x3ff   : > { %v35959_v27 = vpop.permute.xlu1 %7184  ;;  %v6548_v49 = vpop.permute.xlu0 %6547 }
 0x401   : > { %7204 = vrot.lane.b32.xlu1 %v35949_v45, %s34798_s15  ;;  %7202 = vrot.lane.b32.xlu0 %v35939_v43, %s34798_s15 }
 0x403   : > { %v35965_v31 = vpop.permute.xlu1 %8478  ;;  %v35967_v39 = vpop.permute.xlu0 %7823 }
 0x405   : > { %7841 = vrot.lane.b32.xlu1 %v35939_v43, %s34800_s17  ;;  %7206 = vrot.lane.b32.xlu0 %v35953_v46, %s34798_s15 }
 0x407   : > { %v35973_v42 = vpop.permute.xlu1 %9788  ;;  %v35975_v47 = vpop.permute.xlu0 %9133 }
 0x408   : > { %41936 = vst [vmem:[#allocation22_spill] sm:$0xff] %v35973_v42  ;;  %41937 = vst [vmem:[#allocation23_spill] sm:$0xff] %v35975_v47 }
 0x409   : > { %7845 = vrot.lane.b32.xlu1 %v35953_v46, %s34800_s17  ;;  %7843 = vrot.lane.b32.xlu0 %v35949_v45, %s34800_s17 }
 0x40b   : > { %v6552_v50 = vpop.permute.xlu1 %6551  ;;  %v6550_v51 = vpop.permute.xlu0 %6549 }
 0x40c   : > { %v6582_v54 = vsel %vm441_vm3, %v6550_v51, %v6552_v50  ;;  %v6581_v57 = vsel %vm441_vm3, %v6548_v49, %v6550_v51 }
 0x40d   : > { %8498 = vrot.lane.b32.xlu1 %v35949_v45, %s34801_s18  ;;  %8496 = vrot.lane.b32.xlu0 %v35939_v43, %s34801_s18 }
 0x40e   : > { %6616 = vmatprep.subr.mxu0 %v6582_v54  ;;  %v36077_v54 = vsel %vm250_vm0, %v35931_v22, %v35826_v35  ;;  %v36092_v22 = vsel %vm250_vm0, %v35826_v35, %v35945_v24 }
 0x40f   : > { %6617 = vmatpush1.msra.mxu0 %v6581_v57  ;;  %v6554_v61 = vpop.permute.xlu1 %6553  ;;  %v35992_v62 = vpop.permute.xlu0 %7188 }
 0x410   : > { %33466 = vmatmul.mubr.msk.f32.vlgmr.msra.gmra.mrb[8].mxu0 %vm474_vm4, %v35990_v60 }
 0x411   : > { %9151 = vrot.lane.b32.xlu1 %v35939_v43, %s34802_s26  ;;  %8500 = vrot.lane.b32.xlu0 %v35953_v46, %s34801_s18 }
 0x412   : > { %6822 = vmatprep.mubr.f32.mxu0 %v41781_v0  ;;  %v6583_v0 = vsel %vm441_vm3, %v6552_v50, %v6554_v61 }
 0x413   : > { %v36001_v63 = vpop.permute.xlu1 %7186  ;;  %v36003_v1 = vpop.permute.xlu0 %7190 }
 0x415   : > { %9155 = vrot.lane.b32.xlu1 %v35953_v46, %s34802_s26  ;;  %9153 = vrot.lane.b32.xlu0 %v35949_v45, %s34802_s26 }
 0x417   : > { %v36009_v3 = vpop.permute.xlu1 %7827  ;;  %v36011_v5 = vpop.permute.xlu0 %7825 }
 0x419   : > { %9808 = vrot.lane.b32.xlu1 %v35949_v45, %s34803_s9  ;;  %9806 = vrot.lane.b32.xlu0 %v35939_v43, %s34803_s9 }
 0x41b   : > { %v36017_v6 = vpop.permute.xlu1 %7829  ;;  %v36019_v29 = vpop.permute.xlu0 %8482 }
 0x41d   : > { %9810 = vrot.lane.b32.xlu0 %v35953_v46, %s34803_s9  ;;  %7208 = vrot.lane.b32.xlu1 %v36024_v4, %s34798_s15 }
 0x41f   : > { %v36030_v44 = vpop.permute.xlu1 %8480  ;;  %v36032_v8 = vpop.permute.xlu0 %8484 }
 0x421   : > { %7216 = vrot.lane.b32.xlu1 %v36034_v10, %s34798_s15  ;;  %6571 = vrot.lane.b32.xlu0 %v36024_v4, %s34799_s16 }
 0x423   : > { %v36040_v11 = vpop.permute.xlu1 %9137  ;;  %v36042_v30 = vpop.permute.xlu0 %9135 }
 0x424   : > { %41938 = vst [vmem:[#allocation24_spill] sm:$0xff] %v36042_v30 }
 0x425   : > { %8502 = vrot.lane.b32.xlu1 %v36024_v4, %s34801_s18  ;;  %6579 = vrot.lane.b32.xlu0 %v36034_v10, %s34799_s16 }
 0x427   : > { %v36048_v12 = vpop.permute.xlu1 %9139  ;;  %v36050_v14 = vpop.permute.xlu0 %9792 }
 0x428   : > { %41939 = vst [vmem:[#allocation25_spill] sm:$0xff] %v36048_v12  ;;  %41940 = vst [vmem:[#allocation26_spill] sm:$0xff] %v36050_v14 }
 0x429   : > { %8510 = vrot.lane.b32.xlu1 %v36034_v10, %s34801_s18  ;;  %7847 = vrot.lane.b32.xlu0 %v36024_v4, %s34800_s17 }
 0x42b   : > { %v36056_v15 = vpop.permute.xlu1 %9790  ;;  %v36058_v38 = vpop.permute.xlu0 %9794 }
 0x42c   : > { %41941 = vst [vmem:[#allocation27_spill] sm:$0xff] %v36056_v15  ;;  %41942 = vst [vmem:[#allocation28_spill] sm:$0xff] %v36058_v38 }
 0x42d   : > { %9812 = vrot.lane.b32.xlu1 %v36024_v4, %s34803_s9  ;;  %7855 = vrot.lane.b32.xlu0 %v36034_v10, %s34800_s17 }
 0x42f   : > { %v36064_v40 = vpop.permute.xlu1 %7192  ;;  %v36066_v20 = vpop.permute.xlu0 %10445 }
 0x430   : > { %41943 = vst [vmem:[#allocation29_spill] sm:$0xff] %v36066_v20 }
 0x431   : > { %9820 = vrot.lane.b32.xlu1 %v36034_v10, %s34803_s9  ;;  %9157 = vrot.lane.b32.xlu0 %v36024_v4, %s34802_s26 }
 0x433   : > { %v36072_v49 = vpop.permute.xlu1 %8486  ;;  %v6556_v51 = vpop.permute.xlu0 %6555 }
 0x434   : > { %v6584_v57 = vsel %vm441_vm3, %v6554_v61, %v6556_v51 }
 0x435   : > { %6573 = vrot.lane.b32.xlu1 %v36077_v54, %s34799_s16  ;;  %9165 = vrot.lane.b32.xlu0 %v36034_v10, %s34802_s26 }
 0x436   : > { %6687 = vmatprep.subr.mxu1 %v6584_v57 }
 0x437   : > { %6688 = vmatpush1.msra.mxu1 %v6583_v0  ;;  %v36085_v59 = vpop.permute.xlu1 %9796  ;;  %v36087_v56 = vpop.permute.xlu0 %7831  ;;  %v41945_v0 = vmov 0.0  }
 0x438   : > { %41944 = vst [vmem:[#allocation30_spill] sm:$0xff] %v36085_v59  ;;  %33467 = vmatmul.mubr.msk.f32.vlgmr.msra.gmra.mrb[8].mxu1 %vm474_vm4, %v35990_v60 }
 0x439   : > { %6577 = vrot.lane.b32.xlu1 %v36097_v34, %s34799_s16  ;;  %6575 = vrot.lane.b32.xlu0 %v36092_v22, %s34799_s16 }
 0x43a   : > { %6893 = vmatprep.mubr.f32.mxu1 %v41945_v0 }
 0x43b   : > { %v6558_v50 = vpop.permute.xlu1 %6557  ;;  %v36106_v61 = vpop.permute.xlu0 %9141 }
 0x43c   : > { %41946 = vst [vmem:[#allocation31_spill] sm:$0xff] %v36106_v61  ;;  %v6585_v57 = vsel %vm441_vm3, %v6556_v51, %v6558_v50 }
 0x43d   : > { %10447 = vrot.lane.b32.xlu1 %v35811_v21, %s34804_s12  ;;  %10443 = vrot.lane.b32.xlu0 %v35791_v9, %s34804_s12 }
 0x43f   : > { %v6562_v35 = vpop.permute.xlu1 %6561  ;;  %v6560_v36 = vpop.permute.xlu0 %6559 }
 0x440   : > { %v6586_v24 = vsel %vm441_vm3, %v6558_v50, %v6560_v36 }
 0x441   : > { %10449 = vrot.lane.b32.xlu1 %v35820_v52, %s34804_s12  ;;  %10451 = vrot.lane.b32.xlu0 %v35861_v16, %s34804_s12 }
 0x442   : > { %6758 = vmatprep.subr.mxu0 %v6586_v24 }
 0x443   : > { %6759 = vmatpush1.msra.mxu0 %v6585_v57  ;;  %v36118_v48 = vpop.permute.xlu1 %7196  ;;  %v36120_v25 = vpop.permute.xlu0 %7194 }
 0x444   : > { %33468 = vmatmul.mubr.msk.f32.vlgmr.msra.gmra.mrb[10].mxu0 %vm474_vm4, %v35990_v60 }
 0x445   : > { %7212 = vrot.lane.b32.xlu1 %v36092_v22, %s34798_s15  ;;  %7210 = vrot.lane.b32.xlu0 %v36077_v54, %s34798_s15 }
 0x446   : > { %6964 = vmatprep.mubr.f32.mxu0 %v41945_v0 }
 0x447   : > { %v36129_v23 = vpop.permute.xlu1 %7833  ;;  %v36131_v24 = vpop.permute.xlu0 %7198 }
 0x449   : > { %10453 = vrot.lane.b32.xlu1 %v35876_v37, %s34804_s12  ;;  %10455 = vrot.lane.b32.xlu0 %v35883_v55, %s34804_s12 }
 0x44b   : > { %v36137_v51 = vpop.permute.xlu1 %7837  ;;  %v36139_v50 = vpop.permute.xlu0 %7835 }
 0x44d   : > { %10457 = vrot.lane.b32.xlu1 %v35886_v19, %s34804_s12  ;;  %7214 = vrot.lane.b32.xlu0 %v36097_v34, %s34798_s15 }
 0x44f   : > { %v36145_v57 = vpop.permute.xlu1 %8490  ;;  %v36147_v18 = vpop.permute.xlu0 %8488 }
 0x451   : > { %10461 = vrot.lane.b32.xlu1 %v35939_v43, %s34804_s12  ;;  %10459 = vrot.lane.b32.xlu0 %v35921_v41, %s34804_s12 }
 0x453   : > { %v36153_v17 = vpop.permute.xlu1 %9143  ;;  %v36155_v32 = vpop.permute.xlu0 %8492 }
 0x454   : > { %41947 = vst [vmem:[#allocation32_spill] sm:$0xff] %v36153_v17 }
 0x455   : > { %7849 = vrot.lane.b32.xlu1 %v36077_v54, %s34800_s17  ;;  %10463 = vrot.lane.b32.xlu0 %v35949_v45, %s34804_s12 }
 0x457   : > { %v36161_v33 = vpop.permute.xlu1 %9147  ;;  %v36163_v7 = vpop.permute.xlu0 %9145 }
 0x458   : > { %41948 = vst [vmem:[#allocation33_spill] sm:$0xff] %v36161_v33  ;;  %41949 = vst [vmem:[#allocation34_spill] sm:$0xff] %v36163_v7 }
 0x459   : > { %7853 = vrot.lane.b32.xlu1 %v36097_v34, %s34800_s17  ;;  %7851 = vrot.lane.b32.xlu0 %v36092_v22, %s34800_s17 }
 0x45b   : > { %v36169_v2 = vpop.permute.xlu1 %9800  ;;  %v36171_v58 = vpop.permute.xlu0 %9798 }
 0x45c   : > { %41950 = vst [vmem:[#allocation35_spill] sm:$0xff] %v36169_v2  ;;  %41951 = vst [vmem:[#allocation36_spill] sm:$0xff] %v36171_v58 }
 0x45d   : > { %10465 = vrot.lane.b32.xlu1 %v35953_v46, %s34804_s12  ;;  %10467 = vrot.lane.b32.xlu0 %v36024_v4, %s34804_s12 }
 0x45f   : > { %v36177_v53 = vpop.permute.xlu1 %7200  ;;  %v36179_v28 = vpop.permute.xlu0 %9802 }
 0x460   : > { %41952 = vst [vmem:[#allocation37_spill] sm:$0xff] %v36179_v28  ;;  %v6587_v28 = vsel %vm441_vm3, %v6560_v36, %v6562_v35 }
 0x461   : > { %11100 = vrot.lane.b32.xlu1 %v35808_v13, %s34805_s20  ;;  %10475 = vrot.lane.b32.xlu0 %v36034_v10, %s34804_s12 }
 0x463   : > { %v36185_v26 = vpop.permute.xlu1 %8494  ;;  %v6564_v20 = vpop.permute.xlu0 %6563 }
 0x464   : > { %v6588_v58 = vsel %vm441_vm3, %v6562_v35, %v6564_v20 }
 0x465   : > { %8506 = vrot.lane.b32.xlu1 %v36092_v22, %s34801_s18  ;;  %11102 = vrot.lane.b32.xlu0 %v35811_v21, %s34805_s20 }
 0x466   : > { %6829 = vmatprep.subr.mxu1 %v6588_v58 }
 0x467   : > { %6830 = vmatpush1.msra.mxu1 %v6587_v28  ;;  %v36193_v2 = vpop.permute.xlu1 %9804  ;;  %v36195_v38 = vpop.permute.xlu0 %7839 }
 0x468   : > { %41953 = vst [vmem:[#allocation38_spill] sm:$0xff] %v36193_v2  ;;  %33469 = vmatmul.mubr.msk.f32.vlgmr.msra.gmra.mrb[10].mxu1 %vm474_vm4, %v35990_v60 }
 0x469   : > { %11098 = vrot.lane.b32.xlu1 %v35791_v9, %s34805_s20  ;;  %8504 = vrot.lane.b32.xlu0 %v36077_v54, %s34801_s18 }
 0x46a   : > { %7035 = vmatprep.mubr.f32.mxu1 %v41945_v0 }
 0x46b   : > { %v6566_v59 = vpop.permute.xlu1 %6565  ;;  %v36204_v58 = vpop.permute.xlu0 %9149 }
 0x46c   : > { %41954 = vst [vmem:[#allocation39_spill] sm:$0xff] %v36204_v58  ;;  %v6589_v2 = vsel %vm441_vm3, %v6564_v20, %v6566_v59 }
 0x46d   : > { %11106 = vrot.lane.b32.xlu1 %v35861_v16, %s34805_s20  ;;  %8508 = vrot.lane.b32.xlu0 %v36097_v34, %s34801_s18 }
 0x46f   : > { %v6570_v28 = vpop.permute.xlu1 %6569  ;;  %v6568_v35 = vpop.permute.xlu0 %6567 }
 0x470   : > { %v6590_v36 = vsel %vm441_vm3, %v6566_v59, %v6568_v35 }
 0x471   : > { %11110 = vrot.lane.b32.xlu1 %v35883_v55, %s34805_s20  ;;  %11104 = vrot.lane.b32.xlu0 %v35820_v52, %s34805_s20 }
 0x472   : > { %6900 = vmatprep.subr.mxu0 %v6590_v36 }
 0x473   : > { %6901 = vmatpush1.msra.mxu0 %v6589_v2  ;;  %v36216_v42 = vpop.permute.xlu1 %7204  ;;  %v36218_v15 = vpop.permute.xlu0 %7202 }
 0x474   : > { %33470 = vmatmul.mubr.msk.f32.vlgmr.msra.gmra.mrb[12].mxu0 %vm474_vm4, %v35990_v60 }
 0x475   : > { %9159 = vrot.lane.b32.xlu1 %v36077_v54, %s34802_s26  ;;  %11108 = vrot.lane.b32.xlu0 %v35876_v37, %s34805_s20 }
 0x476   : > { %7106 = vmatprep.mubr.f32.mxu0 %v41945_v0 }
 0x477   : > { %v36227_v14 = vpop.permute.xlu1 %7841  ;;  %v36229_v36 = vpop.permute.xlu0 %7206 }
 0x479   : > { %9163 = vrot.lane.b32.xlu1 %v36097_v34, %s34802_s26  ;;  %9161 = vrot.lane.b32.xlu0 %v36092_v22, %s34802_s26 }
 0x47b   : > { %v36235_v2 = vpop.permute.xlu1 %7845  ;;  %v36237_v59 = vpop.permute.xlu0 %7843 }
 0x47d   : > { %11114 = vrot.lane.b32.xlu1 %v35921_v41, %s34805_s20  ;;  %11112 = vrot.lane.b32.xlu0 %v35886_v19, %s34805_s20 }
 0x47f   : > { %v36243_v20 = vpop.permute.xlu1 %8498  ;;  %v36245_v33 = vpop.permute.xlu0 %8496 }
 0x481   : > { %11118 = vrot.lane.b32.xlu1 %v35949_v45, %s34805_s20  ;;  %11116 = vrot.lane.b32.xlu0 %v35939_v43, %s34805_s20 }
 0x483   : > { %v36251_v58 = vpop.permute.xlu1 %9151  ;;  %v36253_v12 = vpop.permute.xlu0 %8500 }
 0x484   : > { %41955 = vst [vmem:[#allocation40_spill] sm:$0xff] %v36251_v58 }
 0x485   : > { %9816 = vrot.lane.b32.xlu1 %v36092_v22, %s34803_s9  ;;  %11120 = vrot.lane.b32.xlu0 %v35953_v46, %s34805_s20 }
 0x487   : > { %v36259_v61 = vpop.permute.xlu1 %9155  ;;  %v36261_v17 = vpop.permute.xlu0 %9153 }
 0x488   : > { %41956 = vst [vmem:[#allocation41_spill] sm:$0xff] %v36259_v61  ;;  %41957 = vst [vmem:[#allocation42_spill] sm:$0xff] %v36261_v17 }
 0x489   : > { %11122 = vrot.lane.b32.xlu1 %v36024_v4, %s34805_s20  ;;  %9814 = vrot.lane.b32.xlu0 %v36077_v54, %s34803_s9 }
 0x48b   : > { %v36267_v7 = vpop.permute.xlu1 %9808  ;;  %v36269_v58 = vpop.permute.xlu0 %9806 }
 0x48c   : > { %41958 = vst [vmem:[#allocation43_spill] sm:$0xff] %v36267_v7  ;;  %41959 = vst [vmem:[#allocation44_spill] sm:$0xff] %v36269_v58 }
 0x48d   : > { %11130 = vrot.lane.b32.xlu1 %v36034_v10, %s34805_s20  ;;  %9818 = vrot.lane.b32.xlu0 %v36097_v34, %s34803_s9 }
 0x48f   : > { %v36275_v47 = vpop.permute.xlu1 %7208  ;;  %v36277_v61 = vpop.permute.xlu0 %9810 }
 0x490   : > { %41960 = vst [vmem:[#allocation45_spill] sm:$0xff] %v36277_v61  ;;  %v6591_v61 = vsel %vm441_vm3, %v6568_v35, %v6570_v28 }
 0x491   : > { %11757 = vrot.lane.b32.xlu1 %v35811_v21, %s34806_s10  ;;  %11755 = vrot.lane.b32.xlu0 %v35808_v13, %s34806_s10 }
 0x493   : > { %v36283_v17 = vpop.permute.xlu1 %7216  ;;  %v6572_v7 = vpop.permute.xlu0 %6571 }
 0x494   : > { %v6592_v58 = vsel %vm441_vm3, %v6570_v28, %v6572_v7 }
 0x495   : > { %10469 = vrot.lane.b32.xlu1 %v36077_v54, %s34804_s12  ;;  %11753 = vrot.lane.b32.xlu0 %v35791_v9, %s34806_s10 }
 0x496   : > { %6971 = vmatprep.subr.mxu1 %v6592_v58 }
 0x497   : > { %6972 = vmatpush1.msra.mxu1 %v6591_v61  ;;  %v36291_v30 = vpop.permute.xlu1 %8502  ;;  %v6580_v21 = vpop.permute.xlu0 %6579 }
 0x498   : > { %33471 = vmatmul.mubr.msk.f32.vlgmr.msra.gmra.mrb[12].mxu1 %vm474_vm4, %v35990_v60 }
 0x499   : > { %10473 = vrot.lane.b32.xlu1 %v36097_v34, %s34804_s12  ;;  %10471 = vrot.lane.b32.xlu0 %v36092_v22, %s34804_s12 }
 0x49a   : > { %7177 = vmatprep.mubr.f32.mxu1 %v41945_v0 }
 0x49b   : > { %v36300_v13 = vpop.permute.xlu1 %8510  ;;  %v36302_v9 = vpop.permute.xlu0 %7847 }
 0x49d   : > { %11759 = vrot.lane.b32.xlu1 %v35820_v52, %s34806_s10  ;;  %11761 = vrot.lane.b32.xlu0 %v35861_v16, %s34806_s10 }
 0x49f   : > { %v36308_v61 = vpop.permute.xlu1 %9812  ;;  %v36310_v58 = vpop.permute.xlu0 %7855 }
 0x4a0   : > { %41961 = vst [vmem:[#allocation46_spill] sm:$0xff] %v36308_v61 }
 0x4a1   : > { %11763 = vrot.lane.b32.xlu1 %v35876_v37, %s34806_s10  ;;  %11765 = vrot.lane.b32.xlu0 %v35883_v55, %s34806_s10 }
 0x4a3   : > { %v36316_v28 = vpop.permute.xlu1 %9820  ;;  %v36318_v35 = vpop.permute.xlu0 %9157 }
 0x4a4   : > { %41962 = vst [vmem:[#allocation47_spill] sm:$0xff] %v36316_v28  ;;  %41963 = vst [vmem:[#allocation48_spill] sm:$0xff] %v36318_v35 }
 0x4a5   : > { %11126 = vrot.lane.b32.xlu1 %v36092_v22, %s34805_s20  ;;  %11124 = vrot.lane.b32.xlu0 %v36077_v54, %s34805_s20 }
 0x4a7   : > { %v6574_v52 = vpop.permute.xlu1 %6573  ;;  %v36324_v16 = vpop.permute.xlu0 %9165 }
 0x4a8   : > { %41964 = vst [vmem:[#allocation49_spill] sm:$0xff] %v36324_v16 }
 0x4a9   : > { %11767 = vrot.lane.b32.xlu1 %v35886_v19, %s34806_s10  ;;  %11769 = vrot.lane.b32.xlu0 %v35921_v41, %s34806_s10  ;;  %v6593_v19 = vsel %vm441_vm3, %v6572_v7, %v6574_v52  ;;  %v7221_v7 = vsel %vm1080_vm5, %v36003_v1, %v36064_v40 }
 0x4ab   : > { %v6578_v37 = vpop.permute.xlu1 %6577  ;;  %v6576_v55 = vpop.permute.xlu0 %6575 }
 0x4ac   : > { %v6594_v28 = vsel %vm441_vm3, %v6574_v52, %v6576_v55  ;;  %v6596_v61 = vsel %vm441_vm3, %v6578_v37, %v6580_v21  ;;  %v6595_v35 = vsel %vm441_vm3, %v6576_v55, %v6578_v37  ;;  %v7218_v21 = vsel %vm1080_vm5, %v35959_v27, %v36001_v63 }
 0x4ad   : > { %11771 = vrot.lane.b32.xlu1 %v35939_v43, %s34806_s10  ;;  %11128 = vrot.lane.b32.xlu0 %v36097_v34, %s34805_s20  ;;  %v7219_v43 = vsel %vm1080_vm5, %v36001_v63, %v35992_v62  ;;  %v7225_v27 = vsel %vm1080_vm5, %v36131_v24, %v36177_v53 }
 0x4ae   : > { %7042 = vmatprep.subr.mxu0 %v6594_v28  ;;  %7113 = vmatprep.subr.mxu1 %v6596_v61  ;;  %v7220_v61 = vsel %vm1080_vm5, %v35992_v62, %v36003_v1  ;;  %v33464_v62 = vld [vmem:[%s41776_s2 + $0x48] sm:$0xff]  ;;  %v7227_v28 = vsel %vm1080_vm5, %v36218_v15, %v36216_v42 }
 0x4af   : > { %7043 = vmatpush1.msra.mxu0 %v6593_v19  ;;  %7114 = vmatpush1.msra.mxu1 %v6595_v35  ;;  %v36338_v41 = vpop.permute.xlu1 %10447  ;;  %v36340_v16 = vpop.permute.xlu0 %10443  ;;  %v7229_v35 = vsel %vm1080_vm5, %v36229_v36, %v36275_v47 }
 0x4b0   : > { %33472 = vmatmul.mubr.msk.f32.vlgmr.msra.gmra.mrb[14].mxu0 %vm474_vm4, %v35990_v60  ;;  %33473 = vmatmul.mubr.msk.f32.vlgmr.msra.gmra.mrb[14].mxu1 %vm474_vm4, %v35990_v60  ;;  %v7223_v60 = vsel %vm1080_vm5, %v36120_v25, %v36118_v48 }
 0x4b1   : > { %7253 = vmatprep.subr.mxu0 %v7219_v43  ;;  %7324 = vmatprep.subr.mxu1 %v7221_v7  ;;  %v7859_v43 = vsel %vm1720_vm6, %v36009_v3, %v36017_v6 }
 0x4b2   : > { %7254 = vmatpush1.msra.mxu0 %v7218_v21  ;;  %7325 = vmatpush1.msra.mxu1 %v7220_v61  ;;  %v7866_v61 = vsel %vm1720_vm6, %v36227_v14, %v36237_v59 }
 0x4b3   : > { %11775 = vrot.lane.b32.xlu1 %v35953_v46, %s34806_s10  ;;  %11773 = vrot.lane.b32.xlu0 %v35949_v45, %s34806_s10  ;;  %v36368_v63 = vpop.permute.xlu1 %10449  ;;  %v36373_v1 = vpop.permute.xlu0 %10451  ;;  %v7222_v45 = vsel %vm1080_vm5, %v36064_v40, %v36120_v25  ;;  %v7224_v46 = vsel %vm1080_vm5, %v36118_v48, %v36131_v24  ;;  %v7226_v25 = vsel %vm1080_vm5, %v36177_v53, %v36218_v15  ;;  %v33545_v53 = vld [vmem:[%s41777_s3 + $0x8] sm:$0xff] }
 0x4b4   : > { %7395 = vmatprep.subr.mxu0 %v7223_v60  ;;  %7466 = vmatprep.subr.mxu1 %v7225_v27  ;;  %v7228_v48 = vsel %vm1080_vm5, %v36216_v42, %v36229_v36  ;;  %v7864_v60 = vsel %vm1720_vm6, %v36137_v51, %v36195_v38  ;;  %v7868_v27 = vsel %vm1720_vm6, %v36235_v2, %v36302_v9 }
 0x4b5   : > { %7317 = vmatprep.mubr.f32.mxu0 %v41945_v0  ;;  %7388 = vmatprep.mubr.f32.mxu1 %v41945_v0 }
 0x4b6   : > { %33474 = vmatmul.mubr.msk.f32.vlgmr.msra.gmra.mrb[8].mxu0 %vm474_vm4, %v33464_v62  ;;  %33475 = vmatmul.mubr.msk.f32.vlgmr.msra.gmra.mrb[8].mxu1 %vm474_vm4, %v33464_v62 }
 0x4b7   : > { %7396 = vmatpush1.msra.mxu0 %v7222_v45  ;;  %7467 = vmatpush1.msra.mxu1 %v7224_v46  ;;  %v7213_v52 = vpop.permute.xlu1 %7212  ;;  %v7211_v37 = vpop.permute.xlu0 %7210  ;;  %v8513_v45 = vsel %vm2376_vm7, %v36030_v44, %v36019_v29 }
 0x4b8   : > { %7537 = vmatprep.subr.mxu0 %v7227_v28  ;;  %7608 = vmatprep.subr.mxu1 %v7229_v35  ;;  %v7231_v40 = vsel %vm1080_vm5, %v7211_v37, %v7213_v52  ;;  %v7230_v42 = vsel %vm1080_vm5, %v36275_v47, %v7211_v37  ;;  %v7857_v47 = vsel %vm1720_vm6, %v35967_v39, %v36011_v5 }
 0x4b9   : > { %11779 = vrot.lane.b32.xlu1 %v36077_v54, %s34806_s10  ;;  %11777 = vrot.lane.b32.xlu0 %v36024_v4, %s34806_s10  ;;  %v7860_v39 = vsel %vm1720_vm6, %v36017_v6, %v36087_v56  ;;  %v8515_v28 = vsel %vm2376_vm7, %v36032_v8, %v36072_v49  ;;  %v8517_v35 = vsel %vm2376_vm7, %v36147_v18, %v36145_v57 }
 0x4ba   : > { %7459 = vmatprep.mubr.f32.mxu0 %v41945_v0  ;;  %7530 = vmatprep.mubr.f32.mxu1 %v41945_v0 }
 0x4bb   : > { %33476 = vmatmul.mubr.msk.f32.vlgmr.msra.gmra.mrb[10].mxu0 %vm474_vm4, %v33464_v62  ;;  %33477 = vmatmul.mubr.msk.f32.vlgmr.msra.gmra.mrb[10].mxu1 %vm474_vm4, %v33464_v62  ;;  %v36406_v54 = vpop.permute.xlu1 %10453  ;;  %v36408_v4 = vpop.permute.xlu0 %10455 }
 0x4bc   : > { %7538 = vmatpush1.msra.mxu0 %v7226_v25  ;;  %7609 = vmatpush1.msra.mxu1 %v7228_v48  ;;  %v8519_v48 = vsel %vm2376_vm7, %v36155_v32, %v36185_v26 }
 0x4bd   : > { %11783 = vrot.lane.b32.xlu1 %v36097_v34, %s34806_s10  ;;  %11781 = vrot.lane.b32.xlu0 %v36092_v22, %s34806_s10  ;;  %v7858_v22 = vsel %vm1720_vm6, %v36011_v5, %v36009_v3  ;;  %v7861_v5 = vsel %vm1720_vm6, %v36087_v56, %v36129_v23  ;;  %v7865_v56 = vsel %vm1720_vm6, %v36195_v38, %v36227_v14 }
 0x4be   : > { %7679 = vmatprep.subr.mxu0 %v7231_v40  ;;  %7601 = vmatprep.mubr.f32.mxu0 %v41945_v0  ;;  %v7867_v14 = vsel %vm1720_vm6, %v36237_v59, %v36235_v2  ;;  %v8512_v59 = vsel %vm2376_vm7, %v35965_v31, %v36030_v44  ;;  %v8514_v31 = vsel %vm2376_vm7, %v36019_v29, %v36032_v8 }
 0x4bf   : > { %33478 = vmatmul.mubr.msk.f32.vlgmr.msra.gmra.mrb[12].mxu0 %vm474_vm4, %v33464_v62  ;;  %7672 = vmatprep.mubr.f32.mxu1 %v41945_v0  ;;  %v36422_v15 = vpop.permute.xlu1 %10457  ;;  %v7215_v34 = vpop.permute.xlu0 %7214  ;;  %v8516_v44 = vsel %vm2376_vm7, %v36072_v49, %v36147_v18  ;;  %v8521_v40 = vsel %vm2376_vm7, %v36245_v33, %v36243_v20  ;;  %v8518_v18 = vsel %vm2376_vm7, %v36145_v57, %v36155_v32 }
 0x4c0   : > { %7680 = vmatpush1.msra.mxu0 %v7230_v42  ;;  %7743 = vmatprep.mubr.f32.mxu0 %v41945_v0  ;;  %v7233_v24 = vsel %vm1080_vm5, %v7215_v34, %v36283_v17  ;;  %v7232_v36 = vsel %vm1080_vm5, %v7213_v52, %v7215_v34  ;;  %v7862_v17 = vsel %vm1720_vm6, %v36129_v23, %v36139_v50  ;;  %v33491_v52 = vld [vmem:[%s41776_s2 + $0x60] sm:$0xff] }
 0x4c1   : > { %7892 = vmatprep.subr.mxu0 %v7858_v22  ;;  %12410 = vperm.xlu1 %34729, %v33545_v53   ;;  %v7863_v23 = vsel %vm1720_vm6, %v36139_v50, %v36137_v51  ;;  %v8520_v29 = vsel %vm2376_vm7, %v36185_v26, %v36245_v33  ;;  %v8523_v53 = vsel %vm2376_vm7, %v36253_v12, %v36291_v30 }
 0x4c2   : > { %11785 = vrot.lane.b32.xlu0 %v36034_v10, %s34806_s10  ;;  %33479 = vmatmul.mubr.msk.f32.vlgmr.msra.gmra.mrb[12].mxu1 %vm474_vm4, %v33464_v62  ;;  %v36448_v10 = vld [vmem:[%s41776_s2 + $0x58] sm:$0xff]  ;;  %v8522_v33 = vsel %vm2376_vm7, %v36243_v20, %v36253_v12 }
 0x4c3   : > { %33480 = vmatmul.mubr.msk.f32.vlgmr.msra.gmra.mrb[14].mxu0 %vm474_vm4, %v33464_v62  ;;  %7750 = vmatprep.subr.mxu1 %v7233_v24  ;;  %v36438_v55 = vpop.permute.xlu1 %10461  ;;  %v36440_v19 = vpop.permute.xlu0 %10459  ;;  %v41966_v12 = vld [vmem:[#allocation23_spill] sm:$0xff] }
 0x4c4   : > { %7893 = vmatpush1.msra.mxu0 %v7857_v47  ;;  %7751 = vmatpush1.msra.mxu1 %v7232_v36  ;;  %v41967_v47 = vld [vmem:[#allocation34_spill] sm:$0xff] }
 0x4c5   : > { %8034 = vmatprep.subr.mxu0 %v7862_v17  ;;  %7814 = vmatprep.mubr.f32.mxu1 %v41945_v0  ;;  %v41968_v17 = vld [vmem:[#allocation32_spill] sm:$0xff] }
 0x4c6   : > { %7956 = vmatprep.mubr.f32.mxu0 %v41945_v0  ;;  %33481 = vmatmul.mubr.msk.f32.vlgmr.msra.gmra.mrb[14].mxu1 %vm474_vm4, %v33464_v62 }
 0x4c7   : > { %33483 = vmatmul.mubr.msk.f32.vlgmr.msra.gmra.mrb[8].mxu0 %vm474_vm4, %v36448_v10  ;;  %7963 = vmatprep.subr.mxu1 %v7860_v39  ;;  %v7850_v7 = vpop.permute.xlu1 %7849  ;;  %v36464_v21 = vpop.permute.xlu0 %10463  ;;  %v36600_v39 = vld [vmem:[%s41776_s2 + $0x68] sm:$0xff] }
 0x4c8   : > { %8035 = vmatpush1.msra.mxu0 %v7861_v5  ;;  %7964 = vmatpush1.msra.mxu1 %v7859_v43  ;;  %v41969_v5 = vld [vmem:[#allocation31_spill] sm:$0xff]  ;;  %v41970_v43 = vld [vmem:[#allocation25_spill] sm:$0xff] }
 0x4c9   : > { %8176 = vmatprep.subr.mxu0 %v7866_v61  ;;  %8105 = vmatprep.subr.mxu1 %v7864_v60  ;;  %v9171_v61 = vsel %vm3032_vm8, %v41969_v5, %v41968_v17  ;;  %v9169_v60 = vsel %vm3032_vm8, %v36040_v11, %v41970_v43 }
 0x4ca   : > { %8027 = vmatprep.mubr.f32.mxu1 %v41945_v0  ;;  %8098 = vmatprep.mubr.f32.mxu0 %v41945_v0 }
 0x4cb   : > { %33484 = vmatmul.mubr.msk.f32.vlgmr.msra.gmra.mrb[8].mxu1 %vm474_vm4, %v36448_v10  ;;  %33485 = vmatmul.mubr.msk.f32.vlgmr.msra.gmra.mrb[10].mxu0 %vm474_vm4, %v36448_v10  ;;  %v7854_v3 = vpop.permute.xlu1 %7853  ;;  %v7852_v6 = vpop.permute.xlu0 %7851 }
 0x4cc   : > { %8106 = vmatpush1.msra.mxu1 %v7863_v23  ;;  %8177 = vmatpush1.msra.mxu0 %v7865_v56  ;;  %v7870_v62 = vsel %vm1720_vm6, %v7850_v7, %v7852_v6  ;;  %v7872_v51 = vsel %vm1720_vm6, %v7854_v3, %v36310_v58  ;;  %v7869_v58 = vsel %vm1720_vm6, %v36302_v9, %v7850_v7 }
 0x4cd   : > { %8247 = vmatprep.subr.mxu1 %v7868_v27  ;;  %8169 = vmatprep.mubr.f32.mxu1 %v41945_v0  ;;  %v7871_v2 = vsel %vm1720_vm6, %v7852_v6, %v7854_v3  ;;  %v9170_v7 = vsel %vm3032_vm8, %v41970_v43, %v41969_v5  ;;  %v41971_v3 = vld [vmem:[#allocation42_spill] sm:$0xff]  ;;  %v41972_v6 = vld [vmem:[#allocation40_spill] sm:$0xff] }
 0x4ce   : > { %8240 = vmatprep.mubr.f32.mxu0 %v41945_v0  ;;  %8318 = vmatprep.subr.mxu0 %v7870_v62  ;;  %v9176_v27 = vsel %vm3032_vm8, %v41972_v6, %v41971_v3  ;;  %v41973_v62 = vld [vmem:[#allocation39_spill] sm:$0xff] }
 0x4cf   : > { %33486 = vmatmul.mubr.msk.f32.vlgmr.msra.gmra.mrb[10].mxu1 %vm474_vm4, %v36448_v10  ;;  %33487 = vmatmul.mubr.msk.f32.vlgmr.msra.gmra.mrb[12].mxu0 %vm474_vm4, %v36448_v10  ;;  %v36499_v38 = vpop.permute.xlu1 %10465  ;;  %v36501_v50 = vpop.permute.xlu0 %10467 }
 0x4d0   : > { %8248 = vmatpush1.msra.mxu1 %v7867_v14  ;;  %8311 = vmatprep.mubr.f32.mxu1 %v41945_v0 }
 0x4d1   : > { %8389 = vmatprep.subr.mxu1 %v7872_v51  ;;  %8319 = vmatpush1.msra.mxu0 %v7869_v58  ;;  %v41974_v51 = vld [vmem:[#allocation33_spill] sm:$0xff]  ;;  %v9175_v58 = vsel %vm3032_vm8, %v41973_v62, %v41972_v6 }
 0x4d2   : > { %8382 = vmatprep.mubr.f32.mxu0 %v41945_v0  ;;  %8547 = vmatprep.subr.mxu0 %v8513_v45  ;;  %v9174_v14 = vsel %vm3032_vm8, %v41974_v51, %v41973_v62 }
 0x4d3   : > { %33488 = vmatmul.mubr.msk.f32.vlgmr.msra.gmra.mrb[12].mxu1 %vm474_vm4, %v36448_v10  ;;  %33489 = vmatmul.mubr.msk.f32.vlgmr.msra.gmra.mrb[14].mxu0 %vm474_vm4, %v36448_v10  ;;  %v36518_v9 = vpop.permute.xlu1 %11100  ;;  %v36520_v46 = vpop.permute.xlu0 %10475 }
 0x4d4   : > { %8390 = vmatpush1.msra.mxu1 %v7871_v2  ;;  %8548 = vmatpush1.msra.mxu0 %v8512_v59  ;;  %v41975_v59 = vld [vmem:[#allocation48_spill] sm:$0xff] }
 0x4d5   : > { %8618 = vmatprep.subr.mxu1 %v8515_v28  ;;  %8689 = vmatprep.subr.mxu0 %v8517_v35  ;;  %v41976_v28 = vld [vmem:[#allocation41_spill] sm:$0xff] }
 0x4d6   : > { %8453 = vmatprep.mubr.f32.mxu1 %v41945_v0  ;;  %8611 = vmatprep.mubr.f32.mxu0 %v41945_v0  ;;  %v9178_v35 = vsel %vm3032_vm8, %v41976_v28, %v41975_v59 }
 0x4d7   : > { %33490 = vmatmul.mubr.msk.f32.vlgmr.msra.gmra.mrb[14].mxu1 %vm474_vm4, %v36448_v10  ;;  %33492 = vmatmul.mubr.msk.f32.vlgmr.msra.gmra.mrb[8].mxu0 %vm474_vm4, %v33491_v52  ;;  %v8507_v37 = vpop.permute.xlu1 %8506  ;;  %v36542_v25 = vpop.permute.xlu0 %11102  ;;  %v9172_v10 = vsel %vm3032_vm8, %v41968_v17, %v41967_v47  ;;  %v33509_v17 = vld [vmem:[%s41776_s2 + $0x70] sm:$0xff] }
 0x4d8   : > { %8619 = vmatpush1.msra.mxu1 %v8514_v31  ;;  %8690 = vmatpush1.msra.mxu0 %v8516_v44  ;;  %v41977_v31 = vld [vmem:[#allocation49_spill] sm:$0xff] }
 0x4d9   : > { %8760 = vmatprep.subr.mxu1 %v8519_v48  ;;  %8831 = vmatprep.subr.mxu0 %v8521_v40 }
 0x4da   : > { %8682 = vmatprep.mubr.f32.mxu1 %v41945_v0  ;;  %8753 = vmatprep.mubr.f32.mxu0 %v41945_v0 }
 0x4db   : > { %33493 = vmatmul.mubr.msk.f32.vlgmr.msra.gmra.mrb[8].mxu1 %vm474_vm4, %v33491_v52  ;;  %33494 = vmatmul.mubr.msk.f32.vlgmr.msra.gmra.mrb[10].mxu0 %vm474_vm4, %v33491_v52  ;;  %v36560_v8 = vpop.permute.xlu1 %11098  ;;  %v8505_v49 = vpop.permute.xlu0 %8504 }
 0x4dc   : > { %8761 = vmatpush1.msra.mxu1 %v8518_v18  ;;  %8832 = vmatpush1.msra.mxu0 %v8520_v29  ;;  %v8525_v42 = vsel %vm2376_vm7, %v8505_v49, %v8507_v37  ;;  %v8524_v26 = vsel %vm2376_vm7, %v36291_v30, %v8505_v49  ;;  %v41965_v30 = vld [vmem:[#allocation24_spill] sm:$0xff]  ;;  %v41978_v29 = vld [vmem:[#allocation26_spill] sm:$0xff]  ;;  %v41979_v49 = vld [vmem:[#allocation27_spill] sm:$0xff] }
 0x4dd   : > { %8902 = vmatprep.subr.mxu1 %v8523_v53  ;;  %8824 = vmatprep.mubr.f32.mxu1 %v41945_v0  ;;  %v9168_v22 = vsel %vm3032_vm8, %v41965_v30, %v36040_v11  ;;  %v9167_v20 = vsel %vm3032_vm8, %v41966_v12, %v41965_v30  ;;  %v9173_v11 = vsel %vm3032_vm8, %v41967_v47, %v41974_v51  ;;  %v41981_v30 = vld [vmem:[#allocation30_spill] sm:$0xff]  ;;  %v41983_v12 = vld [vmem:[#allocation35_spill] sm:$0xff] }
 0x4de   : > { %8895 = vmatprep.mubr.f32.mxu0 %v41945_v0  ;;  %8973 = vmatprep.subr.mxu0 %v8525_v42  ;;  %v9823_v53 = vsel %vm3688_vm9, %v41979_v49, %v41978_v29 }
 0x4df   : > { %33495 = vmatmul.mubr.msk.f32.vlgmr.msra.gmra.mrb[10].mxu1 %vm474_vm4, %v33491_v52  ;;  %33496 = vmatmul.mubr.msk.f32.vlgmr.msra.gmra.mrb[12].mxu0 %vm474_vm4, %v33491_v52  ;;  %v36575_v32 = vpop.permute.xlu1 %11106  ;;  %v8509_v57 = vpop.permute.xlu0 %8508 }
 0x4e0   : > { %8903 = vmatpush1.msra.mxu1 %v8522_v33  ;;  %8966 = vmatprep.mubr.f32.mxu1 %v41945_v0  ;;  %v8527_v34 = vsel %vm2376_vm7, %v8509_v57, %v36300_v13  ;;  %v8526_v24 = vsel %vm2376_vm7, %v8507_v37, %v8509_v57  ;;  %v9177_v37 = vsel %vm3032_vm8, %v41971_v3, %v41976_v28  ;;  %v41988_v3 = vld [vmem:[#allocation44_spill] sm:$0xff] }
 0x4e1   : > { %8974 = vmatpush1.msra.mxu0 %v8524_v26  ;;  %9037 = vmatprep.mubr.f32.mxu0 %v41945_v0  ;;  %v41980_v26 = vld [vmem:[#allocation22_spill] sm:$0xff] }
 0x4e2   : > { %9202 = vmatprep.subr.mxu0 %v9168_v22  ;;  %9044 = vmatprep.subr.mxu1 %v8527_v34  ;;  %v9822_v33 = vsel %vm3688_vm9, %v41980_v26, %v41979_v49  ;;  %v41982_v22 = vld [vmem:[#allocation28_spill] sm:$0xff]  ;;  %v10482_v26 = vsel %vm4344_vm10, %v36406_v54, %v36408_v4 }
 0x4e3   : > { %33497 = vmatmul.mubr.msk.f32.vlgmr.msra.gmra.mrb[12].mxu1 %vm474_vm4, %v33491_v52  ;;  %33498 = vmatmul.mubr.msk.f32.vlgmr.msra.gmra.mrb[14].mxu0 %vm474_vm4, %v33491_v52  ;;  %v36590_v13 = vpop.permute.xlu1 %11110  ;;  %v36592_v36 = vpop.permute.xlu0 %11104 }
 0x4e4   : > { %9203 = vmatpush1.msra.mxu0 %v9167_v20  ;;  %9045 = vmatpush1.msra.mxu1 %v8526_v24  ;;  %v9825_v24 = vsel %vm3688_vm9, %v41982_v22, %v41981_v30  ;;  %v41984_v20 = vld [vmem:[#allocation36_spill] sm:$0xff] }
 0x4e5   : > { %9344 = vmatprep.subr.mxu0 %v9172_v10  ;;  %9108 = vmatprep.mubr.f32.mxu1 %v41945_v0  ;;  %v9827_v47 = vsel %vm3688_vm9, %v41984_v20, %v41983_v12  ;;  %v9824_v10 = vsel %vm3688_vm9, %v41978_v29, %v41982_v22  ;;  %v9826_v5 = vsel %vm3688_vm9, %v41981_v30, %v41984_v20 }
 0x4e6   : > { %9266 = vmatprep.mubr.f32.mxu0 %v41945_v0  ;;  %9273 = vmatprep.subr.mxu1 %v9170_v7  ;;  %v10481_v30 = vsel %vm4344_vm10, %v36373_v1, %v36406_v54  ;;  %v10479_v22 = vsel %vm4344_vm10, %v36338_v41, %v36368_v63  ;;  %v10486_v20 = vsel %vm4344_vm10, %v36438_v55, %v36464_v21 }
 0x4e7   : > { %33499 = vmatmul.mubr.msk.f32.vlgmr.msra.gmra.mrb[14].mxu1 %vm474_vm4, %v33491_v52  ;;  %33501 = vmatmul.mubr.msk.f32.vlgmr.msra.gmra.mrb[8].mxu0 %vm474_vm4, %v36600_v39  ;;  %v9160_v23 = vpop.permute.xlu1 %9159  ;;  %v36616_v56 = vpop.permute.xlu0 %11108 }
 0x4e8   : > { %9345 = vmatpush1.msra.mxu0 %v9171_v61  ;;  %9274 = vmatpush1.msra.mxu1 %v9169_v60  ;;  %v9179_v18 = vsel %vm3032_vm8, %v41975_v59, %v9160_v23  ;;  %v41985_v61 = vld [vmem:[#allocation38_spill] sm:$0xff]  ;;  %v41986_v60 = vld [vmem:[#allocation37_spill] sm:$0xff] }
 0x4e9   : > { %9486 = vmatprep.subr.mxu0 %v9176_v27  ;;  %9415 = vmatprep.subr.mxu1 %v9174_v14  ;;  %v9828_v27 = vsel %vm3688_vm9, %v41983_v12, %v41986_v60  ;;  %v9830_v62 = vsel %vm3688_vm9, %v41985_v61, %v41988_v3 }
 0x4ea   : > { %9337 = vmatprep.mubr.f32.mxu1 %v41945_v0  ;;  %9408 = vmatprep.mubr.f32.mxu0 %v41945_v0 }
 0x4eb   : > { %33502 = vmatmul.mubr.msk.f32.vlgmr.msra.gmra.mrb[8].mxu1 %vm474_vm4, %v36600_v39  ;;  %33503 = vmatmul.mubr.msk.f32.vlgmr.msra.gmra.mrb[10].mxu0 %vm474_vm4, %v36600_v39  ;;  %v9164_v45 = vpop.permute.xlu1 %9163  ;;  %v9162_v2 = vpop.permute.xlu0 %9161 }
 0x4ec   : > { %9416 = vmatpush1.msra.mxu1 %v9173_v11  ;;  %9487 = vmatpush1.msra.mxu0 %v9175_v58  ;;  %v9180_v52 = vsel %vm3032_vm8, %v9160_v23, %v9162_v2  ;;  %v9182_v44 = vsel %vm3032_vm8, %v9164_v45, %v41977_v31  ;;  %v9181_v42 = vsel %vm3032_vm8, %v9162_v2, %v9164_v45  ;;  %v41989_v11 = vld [vmem:[#allocation46_spill] sm:$0xff]  ;;  %v41990_v58 = vld [vmem:[#allocation45_spill] sm:$0xff]  ;;  %v41991_v31 = vld [vmem:[#allocation47_spill] sm:$0xff] }
 0x4ed   : > { %9557 = vmatprep.subr.mxu1 %v9178_v35  ;;  %9479 = vmatprep.mubr.f32.mxu1 %v41945_v0  ;;  %v9829_v23 = vsel %vm3688_vm9, %v41986_v60, %v41985_v61  ;;  %v9833_v45 = vsel %vm3688_vm9, %v41990_v58, %v41989_v11  ;;  %v11135_v61 = vsel %vm5000_vm11, %v36592_v36, %v36575_v32 }
 0x4ee   : > { %9550 = vmatprep.mubr.f32.mxu0 %v41945_v0  ;;  %9628 = vmatprep.subr.mxu0 %v9180_v52  ;;  %v11134_v60 = vsel %vm5000_vm11, %v36542_v25, %v36592_v36 }
 0x4ef   : > { %33504 = vmatmul.mubr.msk.f32.vlgmr.msra.gmra.mrb[10].mxu1 %vm474_vm4, %v36600_v39  ;;  %33505 = vmatmul.mubr.msk.f32.vlgmr.msra.gmra.mrb[12].mxu0 %vm474_vm4, %v36600_v39  ;;  %v36651_v48 = vpop.permute.xlu1 %11114  ;;  %v36653_v40 = vpop.permute.xlu0 %11112 }
 0x4f0   : > { %9558 = vmatpush1.msra.mxu1 %v9177_v37  ;;  %9621 = vmatprep.mubr.f32.mxu1 %v41945_v0  ;;  %v41992_v37 = vld [vmem:[#allocation29_spill] sm:$0xff] }
 0x4f1   : > { %9699 = vmatprep.subr.mxu1 %v9182_v44  ;;  %9629 = vmatpush1.msra.mxu0 %v9179_v18  ;;  %v10478_v18 = vsel %vm4344_vm10, %v41992_v37, %v36338_v41  ;;  %v10477_v49 = vsel %vm4344_vm10, %v36340_v16, %v41992_v37  ;;  %v10480_v16 = vsel %vm4344_vm10, %v36368_v63, %v36373_v1 }
 0x4f2   : > { %9692 = vmatprep.mubr.f32.mxu0 %v41945_v0  ;;  %9857 = vmatprep.subr.mxu0 %v9823_v53  ;;  %v10483_v41 = vsel %vm4344_vm10, %v36408_v4, %v36422_v15  ;;  %v10485_v63 = vsel %vm4344_vm10, %v36440_v19, %v36438_v55 }
 0x4f3   : > { %33506 = vmatmul.mubr.msk.f32.vlgmr.msra.gmra.mrb[12].mxu1 %vm474_vm4, %v36600_v39  ;;  %33507 = vmatmul.mubr.msk.f32.vlgmr.msra.gmra.mrb[14].mxu0 %vm474_vm4, %v36600_v39  ;;  %v36670_v57 = vpop.permute.xlu1 %11118  ;;  %v36672_v34 = vpop.permute.xlu0 %11116 }
 0x4f4   : > { %9700 = vmatpush1.msra.mxu1 %v9181_v42  ;;  %9858 = vmatpush1.msra.mxu0 %v9822_v33  ;;  %v36752_v33 = vld [vmem:[%s41776_s2 + $0x78] sm:$0xff]  ;;  %v11140_v36 = vsel %vm5000_vm11, %v36651_v48, %v36672_v34 }
 0x4f5   : > { %9928 = vmatprep.subr.mxu1 %v9825_v24  ;;  %9999 = vmatprep.subr.mxu0 %v9827_v47  ;;  %v10484_v47 = vsel %vm4344_vm10, %v36422_v15, %v36440_v19  ;;  %v10487_v15 = vsel %vm4344_vm10, %v36464_v21, %v36499_v38  ;;  %v11132_v21 = vsel %vm5000_vm11, %v36560_v8, %v36518_v9  ;;  %v36835_v8 = vld [vmem:[%s41776_s2 + $0x80] sm:$0xff] }
 0x4f6   : > { %9763 = vmatprep.mubr.f32.mxu1 %v41945_v0  ;;  %9921 = vmatprep.mubr.f32.mxu0 %v41945_v0 }
 0x4f7   : > { %33508 = vmatmul.mubr.msk.f32.vlgmr.msra.gmra.mrb[14].mxu1 %vm474_vm4, %v36600_v39  ;;  %33510 = vmatmul.mubr.msk.f32.vlgmr.msra.gmra.mrb[8].mxu0 %vm474_vm4, %v33509_v17  ;;  %v9817_v43 = vpop.permute.xlu1 %9816  ;;  %v36694_v7 = vpop.permute.xlu0 %11120  ;;  %v41987_v39 = vld [vmem:[#allocation43_spill] sm:$0xff] }
 0x4f8   : > { %9929 = vmatpush1.msra.mxu1 %v9824_v10  ;;  %10000 = vmatpush1.msra.mxu0 %v9826_v5  ;;  %v9831_v6 = vsel %vm3688_vm9, %v41988_v3, %v41987_v39  ;;  %v9832_v28 = vsel %vm3688_vm9, %v41987_v39, %v41990_v58  ;;  %v11133_v5 = vsel %vm5000_vm11, %v36518_v9, %v36542_v25 }
 0x4f9   : > { %10070 = vmatprep.subr.mxu1 %v9829_v23  ;;  %10141 = vmatprep.subr.mxu0 %v9831_v6  ;;  %v11137_v9 = vsel %vm5000_vm11, %v36616_v56, %v36590_v13  ;;  %v11136_v23 = vsel %vm5000_vm11, %v36575_v32, %v36616_v56  ;;  %v11139_v6 = vsel %vm5000_vm11, %v36653_v40, %v36651_v48 }
 0x4fa   : > { %9992 = vmatprep.mubr.f32.mxu1 %v41945_v0  ;;  %10063 = vmatprep.mubr.f32.mxu0 %v41945_v0  ;;  %v11138_v32 = vsel %vm5000_vm11, %v36590_v13, %v36653_v40  ;;  %v11142_v13 = vsel %vm5000_vm11, %v36670_v57, %v36694_v7 }
 0x4fb   : > { %33511 = vmatmul.mubr.msk.f32.vlgmr.msra.gmra.mrb[8].mxu1 %vm474_vm4, %v33509_v17  ;;  %33512 = vmatmul.mubr.msk.f32.vlgmr.msra.gmra.mrb[10].mxu0 %vm474_vm4, %v33509_v17  ;;  %v36712_v51 = vpop.permute.xlu1 %11122  ;;  %v9815_v14 = vpop.permute.xlu0 %9814 }
 0x4fc   : > { %10071 = vmatpush1.msra.mxu1 %v9828_v27  ;;  %10142 = vmatpush1.msra.mxu0 %v9830_v62  ;;  %v9835_v2 = vsel %vm3688_vm9, %v9815_v14, %v9817_v43  ;;  %v9834_v59 = vsel %vm3688_vm9, %v41989_v11, %v9815_v14  ;;  %v11141_v27 = vsel %vm5000_vm11, %v36672_v34, %v36670_v57 }
 0x4fd   : > { %10212 = vmatprep.subr.mxu1 %v9833_v45  ;;  %10134 = vmatprep.mubr.f32.mxu1 %v41945_v0  ;;  %v11143_v14 = vsel %vm5000_vm11, %v36694_v7, %v36712_v51 }
 0x4fe   : > { %10205 = vmatprep.mubr.f32.mxu0 %v41945_v0  ;;  %10283 = vmatprep.subr.mxu0 %v9835_v2 }
 0x4ff   : > { %33513 = vmatmul.mubr.msk.f32.vlgmr.msra.gmra.mrb[10].mxu1 %vm474_vm4, %v33509_v17  ;;  %33514 = vmatmul.mubr.msk.f32.vlgmr.msra.gmra.mrb[12].mxu0 %vm474_vm4, %v33509_v17  ;;  %v36727_v35 = vpop.permute.xlu1 %11130  ;;  %v9819_v52 = vpop.permute.xlu0 %9818 }
 0x500   : > { %10213 = vmatpush1.msra.mxu1 %v9832_v28  ;;  %10276 = vmatprep.mubr.f32.mxu1 %v41945_v0  ;;  %v9837_v44 = vsel %vm3688_vm9, %v9819_v52, %v41991_v31  ;;  %v9836_v29 = vsel %vm3688_vm9, %v9817_v43, %v9819_v52 }
 0x501   : > { %10284 = vmatpush1.msra.mxu0 %v9834_v59  ;;  %10347 = vmatprep.mubr.f32.mxu0 %v41945_v0 }
 0x502   : > { %10512 = vmatprep.subr.mxu0 %v10478_v18  ;;  %10354 = vmatprep.subr.mxu1 %v9837_v44 }
 0x503   : > { %33515 = vmatmul.mubr.msk.f32.vlgmr.msra.gmra.mrb[12].mxu1 %vm474_vm4, %v33509_v17  ;;  %33516 = vmatmul.mubr.msk.f32.vlgmr.msra.gmra.mrb[14].mxu0 %vm474_vm4, %v33509_v17  ;;  %v36742_v53 = vpop.permute.xlu1 %11757  ;;  %v36744_v42 = vpop.permute.xlu0 %11755 }
 0x504   : > { %10513 = vmatpush1.msra.mxu0 %v10477_v49  ;;  %10355 = vmatpush1.msra.mxu1 %v9836_v29  ;;  %v11788_v34 = vsel %vm5656_vm12, %v36744_v42, %v36742_v53 }
 0x505   : > { %10654 = vmatprep.subr.mxu0 %v10482_v26  ;;  %10418 = vmatprep.mubr.f32.mxu1 %v41945_v0 }
 0x506   : > { %10576 = vmatprep.mubr.f32.mxu0 %v41945_v0  ;;  %10583 = vmatprep.subr.mxu1 %v10480_v16 }
 0x507   : > { %33517 = vmatmul.mubr.msk.f32.vlgmr.msra.gmra.mrb[14].mxu1 %vm474_vm4, %v33509_v17  ;;  %33519 = vmatmul.mubr.msk.f32.vlgmr.msra.gmra.mrb[8].mxu0 %vm474_vm4, %v36752_v33  ;;  %v10470_v24 = vpop.permute.xlu1 %10469  ;;  %v36768_v12 = vpop.permute.xlu0 %11753  ;;  %v10488_v17 = vsel %vm4344_vm10, %v36499_v38, %v36501_v50 }
 0x508   : > { %10655 = vmatpush1.msra.mxu0 %v10481_v30  ;;  %10584 = vmatpush1.msra.mxu1 %v10479_v22  ;;  %v11787_v57 = vsel %vm5656_vm12, %v36768_v12, %v36744_v42 }
 0x509   : > { %10796 = vmatprep.subr.mxu0 %v10486_v20  ;;  %10725 = vmatprep.subr.mxu1 %v10484_v47 }
 0x50a   : > { %10647 = vmatprep.mubr.f32.mxu1 %v41945_v0  ;;  %10718 = vmatprep.mubr.f32.mxu0 %v41945_v0 }
 0x50b   : > { %33520 = vmatmul.mubr.msk.f32.vlgmr.msra.gmra.mrb[8].mxu1 %vm474_vm4, %v36752_v33  ;;  %33521 = vmatmul.mubr.msk.f32.vlgmr.msra.gmra.mrb[10].mxu0 %vm474_vm4, %v36752_v33  ;;  %v10474_v1 = vpop.permute.xlu1 %10473  ;;  %v10472_v54 = vpop.permute.xlu0 %10471 }
 0x50c   : > { %10726 = vmatpush1.msra.mxu1 %v10483_v41  ;;  %10797 = vmatpush1.msra.mxu0 %v10485_v63  ;;  %v10490_v10 = vsel %vm4344_vm10, %v10470_v24, %v10472_v54  ;;  %v10492_v4 = vsel %vm4344_vm10, %v10474_v1, %v36520_v46  ;;  %v10489_v46 = vsel %vm4344_vm10, %v36501_v50, %v10470_v24 }
 0x50d   : > { %10867 = vmatprep.subr.mxu1 %v10488_v17  ;;  %10789 = vmatprep.mubr.f32.mxu1 %v41945_v0  ;;  %v10491_v38 = vsel %vm4344_vm10, %v10472_v54, %v10474_v1 }
 0x50e   : > { %10860 = vmatprep.mubr.f32.mxu0 %v41945_v0  ;;  %10938 = vmatprep.subr.mxu0 %v10490_v10 }
 0x50f   : > { %33522 = vmatmul.mubr.msk.f32.vlgmr.msra.gmra.mrb[10].mxu1 %vm474_vm4, %v36752_v33  ;;  %33523 = vmatmul.mubr.msk.f32.vlgmr.msra.gmra.mrb[12].mxu0 %vm474_vm4, %v36752_v33  ;;  %v36803_v55 = vpop.permute.xlu1 %11759  ;;  %v36805_v19 = vpop.permute.xlu0 %11761 }
 0x510   : > { %10868 = vmatpush1.msra.mxu1 %v10487_v15  ;;  %10931 = vmatprep.mubr.f32.mxu1 %v41945_v0  ;;  %v11790_v2 = vsel %vm5656_vm12, %v36803_v55, %v36805_v19  ;;  %v11789_v31 = vsel %vm5656_vm12, %v36742_v53, %v36803_v55  ;;  %v41993_v15 = vld [vmem:[#allocation6_spill] sm:$0xff] }
 0x511   : > { %11009 = vmatprep.subr.mxu1 %v10492_v4  ;;  %10939 = vmatpush1.msra.mxu0 %v10489_v46 }
 0x512   : > { %11002 = vmatprep.mubr.f32.mxu0 %v41945_v0  ;;  %11167 = vmatprep.subr.mxu0 %v11133_v5 }
 0x513   : > { %33524 = vmatmul.mubr.msk.f32.vlgmr.msra.gmra.mrb[12].mxu1 %vm474_vm4, %v36752_v33  ;;  %33525 = vmatmul.mubr.msk.f32.vlgmr.msra.gmra.mrb[14].mxu0 %vm474_vm4, %v36752_v33  ;;  %v36822_v50 = vpop.permute.xlu1 %11763  ;;  %v36824_v43 = vpop.permute.xlu0 %11765 }
 0x514   : > { %11010 = vmatpush1.msra.mxu1 %v10491_v38  ;;  %11168 = vmatpush1.msra.mxu0 %v11132_v21  ;;  %v11792_v7 = vsel %vm5656_vm12, %v36822_v50, %v36824_v43  ;;  %v11791_v52 = vsel %vm5656_vm12, %v36805_v19, %v36822_v50  ;;  %v41994_v38 = vld [vmem:[#allocation7_spill] sm:$0xff] }
 0x515   : > { %11238 = vmatprep.subr.mxu1 %v11135_v61  ;;  %11309 = vmatprep.subr.mxu0 %v11137_v9 }
 0x516   : > { %11073 = vmatprep.mubr.f32.mxu1 %v41945_v0  ;;  %11231 = vmatprep.mubr.f32.mxu0 %v41945_v0 }
 0x517   : > { %33526 = vmatmul.mubr.msk.f32.vlgmr.msra.gmra.mrb[14].mxu1 %vm474_vm4, %v36752_v33  ;;  %33528 = vmatmul.mubr.msk.f32.vlgmr.msra.gmra.mrb[8].mxu0 %vm474_vm4, %v36835_v8  ;;  %v11127_v39 = vpop.permute.xlu1 %11126  ;;  %v11125_v3 = vpop.permute.xlu0 %11124 }
 0x518   : > { %11239 = vmatpush1.msra.mxu1 %v11134_v60  ;;  %11310 = vmatpush1.msra.mxu0 %v11136_v23  ;;  %v11145_v25 = vsel %vm5000_vm11, %v11125_v3, %v11127_v39  ;;  %v11144_v48 = vsel %vm5000_vm11, %v36712_v51, %v11125_v3  ;;  %v33536_v51 = vld [vmem:[%s41776_s2 + $0x88] sm:$0xff] }
 0x519   : > { %11380 = vmatprep.subr.mxu1 %v11139_v6  ;;  %11451 = vmatprep.subr.mxu0 %v11141_v27 }
 0x51a   : > { %11302 = vmatprep.mubr.f32.mxu1 %v41945_v0  ;;  %11373 = vmatprep.mubr.f32.mxu0 %v41945_v0 }
 0x51b   : > { %33529 = vmatmul.mubr.msk.f32.vlgmr.msra.gmra.mrb[8].mxu1 %vm474_vm4, %v36835_v8  ;;  %33530 = vmatmul.mubr.msk.f32.vlgmr.msra.gmra.mrb[10].mxu0 %vm474_vm4, %v36835_v8  ;;  %v11768_v56 = vpop.permute.xlu1 %11767  ;;  %v11770_v62 = vpop.permute.xlu0 %11769 }
 0x51c   : > { %11381 = vmatpush1.msra.mxu1 %v11138_v32  ;;  %11452 = vmatpush1.msra.mxu0 %v11140_v36  ;;  %v11794_v44 = vsel %vm5656_vm12, %v11768_v56, %v11770_v62  ;;  %v11793_v37 = vsel %vm5656_vm12, %v36824_v43, %v11768_v56  ;;  %v41996_v36 = vld [vmem:[#allocation9_spill] sm:$0xff] }
 0x51d   : > { %11522 = vmatprep.subr.mxu1 %v11143_v14  ;;  %11593 = vmatprep.subr.mxu0 %v11145_v25 }
 0x51e   : > { %11444 = vmatprep.mubr.f32.mxu1 %v41945_v0  ;;  %11515 = vmatprep.mubr.f32.mxu0 %v41945_v0 }
 0x51f   : > { %33531 = vmatmul.mubr.msk.f32.vlgmr.msra.gmra.mrb[10].mxu1 %vm474_vm4, %v36835_v8  ;;  %33532 = vmatmul.mubr.msk.f32.vlgmr.msra.gmra.mrb[12].mxu0 %vm474_vm4, %v36835_v8  ;;  %v11129_v40 = vpop.permute.xlu0 %11128  ;;  %v11772_v58 = vpop.permute.xlu1 %11771 }
 0x520   : > { %11523 = vmatpush1.msra.mxu1 %v11142_v13  ;;  %11594 = vmatpush1.msra.mxu0 %v11144_v48  ;;  %v11147_v11 = vsel %vm5000_vm11, %v11129_v40, %v36727_v35  ;;  %v11146_v45 = vsel %vm5000_vm11, %v11127_v39, %v11129_v40  ;;  %v11795_v18 = vsel %vm5656_vm12, %v11770_v62, %v11772_v58  ;;  %v41995_v39 = vld [vmem:[#allocation8_spill] sm:$0xff]  ;;  %v41997_v40 = vld [vmem:[#allocation10_spill] sm:$0xff] }
 0x521   : > { %11822 = vmatprep.subr.mxu0 %v11788_v34  ;;  %11586 = vmatprep.mubr.f32.mxu1 %v41945_v0 }
 0x522   : > { %11657 = vmatprep.mubr.f32.mxu0 %v41945_v0  ;;  %11664 = vmatprep.subr.mxu1 %v11147_v11 }
 0x523   : > { %33533 = vmatmul.mubr.msk.f32.vlgmr.msra.gmra.mrb[12].mxu1 %vm474_vm4, %v36835_v8  ;;  %33534 = vmatmul.mubr.msk.f32.vlgmr.msra.gmra.mrb[14].mxu0 %vm474_vm4, %v36835_v8 }
 0x524   : > { %11823 = vmatpush1.msra.mxu0 %v11787_v57  ;;  %11665 = vmatpush1.msra.mxu1 %v11146_v45 }
 0x525   : > { %11964 = vmatprep.subr.mxu0 %v11792_v7  ;;  %11728 = vmatprep.mubr.f32.mxu1 %v41945_v0  ;;  %v11774_v59 = vpop.permute.xlu0 %11773  ;;  %v11776_v35 = vpop.permute.xlu1 %11775  ;;  %v41998_v7 = vld [vmem:[#allocation11_spill] sm:$0xff] }
 0x526   : > { %11886 = vmatprep.mubr.f32.mxu0 %v41945_v0  ;;  %11893 = vmatprep.subr.mxu1 %v11790_v2  ;;  %v11796_v28 = vsel %vm5656_vm12, %v11772_v58, %v11774_v59  ;;  %v11797_v42 = vsel %vm5656_vm12, %v11774_v59, %v11776_v35 }
 0x527   : > { %33535 = vmatmul.mubr.msk.f32.vlgmr.msra.gmra.mrb[14].mxu1 %vm474_vm4, %v36835_v8  ;;  %33537 = vmatmul.mubr.msk.f32.vlgmr.msra.gmra.mrb[8].mxu0 %vm474_vm4, %v33536_v51 }
 0x528   : > { %11965 = vmatpush1.msra.mxu0 %v11791_v52  ;;  %11894 = vmatpush1.msra.mxu1 %v11789_v31 }
 0x529   : > { %12035 = vmatprep.subr.mxu1 %v11794_v44  ;;  %12106 = vmatprep.subr.mxu0 %v11796_v28  ;;  %v41999_v28 = vld [vmem:[#allocation12_spill] sm:$0xff] }
 0x52a   : > { %11957 = vmatprep.mubr.f32.mxu1 %v41945_v0  ;;  %12028 = vmatprep.mubr.f32.mxu0 %v41945_v0 }
 0x52b   : > { %33538 = vmatmul.mubr.msk.f32.vlgmr.msra.gmra.mrb[8].mxu1 %vm474_vm4, %v33536_v51  ;;  %33539 = vmatmul.mubr.msk.f32.vlgmr.msra.gmra.mrb[10].mxu0 %vm474_vm4, %v33536_v51  ;;  %v11778_v29 = vpop.permute.xlu0 %11777  ;;  %v11780_v53 = vpop.permute.xlu1 %11779 }
 0x52c   : > { %12036 = vmatpush1.msra.mxu1 %v11793_v37  ;;  %12107 = vmatpush1.msra.mxu0 %v11795_v18  ;;  %v11798_v49 = vsel %vm5656_vm12, %v11776_v35, %v11778_v29  ;;  %v11799_v16 = vsel %vm5656_vm12, %v11778_v29, %v11780_v53  ;;  %v42000_v37 = vld [vmem:[#allocation13_spill] sm:$0xff] }
 0x52d   : > { %12177 = vmatprep.subr.mxu1 %v11798_v49  ;;  %12099 = vmatprep.mubr.f32.mxu1 %v41945_v0 }
 0x52e   : > { %12170 = vmatprep.mubr.f32.mxu0 %v41945_v0 }
 0x52f   : > { %33540 = vmatmul.mubr.msk.f32.vlgmr.msra.gmra.mrb[10].mxu1 %vm474_vm4, %v33536_v51  ;;  %33541 = vmatmul.mubr.msk.f32.vlgmr.msra.gmra.mrb[12].mxu0 %vm474_vm4, %v33536_v51  ;;  %v11782_v26 = vpop.permute.xlu0 %11781  ;;  %v11784_v30 = vpop.permute.xlu1 %11783 }
 0x530   : > { %12178 = vmatpush1.msra.mxu1 %v11797_v42  ;;  %v11800_v33 = vsel %vm5656_vm12, %v11780_v53, %v11782_v26  ;;  %12241 = vmatprep.mubr.f32.mxu1 %v41945_v0  ;;  %v11801_v12 = vsel %vm5656_vm12, %v11782_v26, %v11784_v30  ;;  %v42001_v42 = vld [vmem:[#allocation14_spill] sm:$0xff] }
 0x531   : > { %12248 = vmatprep.subr.mxu0 %v11800_v33  ;;  %12312 = vmatprep.mubr.f32.mxu0 %v41945_v0 }
 0x532   : > { %12249 = vmatpush1.msra.mxu0 %v11799_v16 }
 0x533   : > { %33542 = vmatmul.mubr.msk.f32.vlgmr.msra.gmra.mrb[12].mxu1 %vm474_vm4, %v33536_v51  ;;  %33543 = vmatmul.mubr.msk.f32.vlgmr.msra.gmra.mrb[14].mxu0 %vm474_vm4, %v33536_v51 }
 0x534   : > { %v11786_v22 = vpop.permute.xlu0 %11785  ;;  %12383 = vmatprep.mubr.f32.mxu1 %v41945_v0  ;;  %12729 = vmatprep.mubr.f32.mxu0 %v41945_v0 }
 0x535   : > { %v11802_v24 = vsel %vm5656_vm12, %v11784_v30, %v11786_v22  ;;  %v42002_v30 = vld [vmem:[#allocation15_spill] sm:$0xff] }
 0x536   : > { %12319 = vmatprep.subr.mxu1 %v11802_v24 }
 0x537   : > { %12320 = vmatpush1.msra.mxu1 %v11801_v12 }
 0x538   : > { %33544 = vmatmul.mubr.msk.f32.vlgmr.msra.gmra.mrb[14].mxu1 %vm474_vm4, %v33536_v51 }
 0x539   : > { %12800 = vmatprep.mubr.f32.mxu1 %v41945_v0 }
 0x540   : > { %v36944_v20 = vpop.permute.xlu1 %12410 }
 0x5fa   : > { %v11888_v47 = vpop.f32.mrb[8].mxu0 }
 0x5fb   : > { %v12413_v41 = vadd.f32 %v36944_v20, %v11888_v47  ;;  %v11890_v63 = vpop.f32.mrb[9].mxu0  ;;  %v42003_v47 = vld [vmem:[#allocation16_spill] sm:$0xff] }
 0x5fc   : > { %v12414_v1 = vadd.f32 %v36944_v20, %v11890_v63 }
 0x5fd   : > { %v12429_v54 = vmax.f32 %v12413_v41, 0.0 }
 0x5fe   : > { %v12430_v17 = vmax.f32 %v12414_v1, 0.0  ;;  %v11959_v10 = vpop.f32.mrb[8].mxu1  ;;  %v12030_v4 = vpop.f32.mrb[10].mxu0 }
 0x5ff   : > { %v12445_v55 = vmul.f32 %v12429_v54, %v41993_v15  ;;  %v12415_v19 = vadd.f32 %v36944_v20, %v11959_v10  ;;  %v12417_v46 = vadd.f32 %v36944_v20, %v12030_v4  ;;  %v11961_v5 = vpop.f32.mrb[9].mxu1  ;;  %v12032_v21 = vpop.f32.mrb[11].mxu0  ;;  %v42004_v54 = vld [vmem:[#allocation17_spill] sm:$0xff] }
 0x600   : > { %v12446_v50 = vmul.f32 %v12430_v17, %v41994_v38  ;;  %v12416_v43 = vadd.f32 %v36944_v20, %v11961_v5  ;;  %v12418_v61 = vadd.f32 %v36944_v20, %v12032_v21  ;;  %v42006_v5 = vld [vmem:[#allocation19_spill] sm:$0xff] }
 0x601   : > { %v12431_v9 = vmax.f32 %v12415_v19, 0.0  ;;  %12477 = vrot.lane.b32.xlu0 %v12445_v55, %s34797_s14  ;;  %v12433_v6 = vmax.f32 %v12417_v46, 0.0  ;;  %v42005_v55 = vld [vmem:[#allocation18_spill] sm:$0xff] }
 0x602   : > { %v12432_v8 = vmax.f32 %v12416_v43, 0.0  ;;  %12479 = vrot.lane.b32.xlu1 %v12446_v50, %s34797_s14  ;;  %v12101_v60 = vpop.f32.mrb[10].mxu1  ;;  %v12172_v23 = vpop.f32.mrb[12].mxu0  ;;  %v12434_v62 = vmax.f32 %v12418_v61, 0.0  ;;  %v42007_v43 = vld [vmem:[#allocation20_spill] sm:$0xff] }
 0x603   : > { %v12447_v3 = vmul.f32 %v12431_v9, %v41995_v39  ;;  %v12419_v27 = vadd.f32 %v36944_v20, %v12101_v60  ;;  %v12103_v25 = vpop.f32.mrb[11].mxu1  ;;  %v12174_v32 = vpop.f32.mrb[13].mxu0  ;;  %v12449_v34 = vmul.f32 %v12433_v6, %v41997_v40  ;;  %v12421_v58 = vadd.f32 %v36944_v20, %v12172_v23  ;;  %v42008_v9 = vld [vmem:[#allocation21_spill] sm:$0xff] }
 0x604   : > { %v12448_v56 = vmul.f32 %v12432_v8, %v41996_v36  ;;  %v12420_v14 = vadd.f32 %v36944_v20, %v12103_v25  ;;  %v12450_v51 = vmul.f32 %v12434_v62, %v41998_v7  ;;  %v12422_v59 = vadd.f32 %v36944_v20, %v12174_v32 }
 0x605   : > { %12481 = vrot.lane.b32.xlu0 %v12447_v3, %s34797_s14  ;;  %v12435_v11 = vmax.f32 %v12419_v27, 0.0  ;;  %v12437_v52 = vmax.f32 %v12421_v58, 0.0 }
 0x606   : > { %12483 = vrot.lane.b32.xlu1 %v12448_v56, %s34797_s14  ;;  %v12243_v13 = vpop.f32.mrb[12].mxu1  ;;  %v12314_v48 = vpop.f32.mrb[14].mxu0  ;;  %v12436_v2 = vmax.f32 %v12420_v14, 0.0  ;;  %v12438_v29 = vmax.f32 %v12422_v59, 0.0 }
 0x607   : > { %v12245_v45 = vpop.f32.mrb[13].mxu1  ;;  %v12316_v57 = vpop.f32.mrb[15].mxu0  ;;  %v12451_v35 = vmul.f32 %v12435_v11, %v41999_v28  ;;  %v12423_v31 = vadd.f32 %v36944_v20, %v12243_v13  ;;  %v12453_v26 = vmul.f32 %v12437_v52, %v42001_v42  ;;  %v12425_v16 = vadd.f32 %v36944_v20, %v12314_v48 }
 0x608   : > { %v12452_v18 = vmul.f32 %v12436_v2, %v42000_v37  ;;  %v12424_v49 = vadd.f32 %v36944_v20, %v12245_v45  ;;  %v12454_v22 = vmul.f32 %v12438_v29, %v42002_v30  ;;  %v12426_v12 = vadd.f32 %v36944_v20, %v12316_v57 }
 0x609   : > { %12485 = vrot.lane.b32.xlu0 %v12449_v34, %s34797_s14  ;;  %v12439_v33 = vmax.f32 %v12423_v31, 0.0  ;;  %v12441_v63 = vmax.f32 %v12425_v16, 0.0 }
 0x60a   : > { %12487 = vrot.lane.b32.xlu1 %v12450_v51, %s34797_s14  ;;  %v12440_v24 = vmax.f32 %v12424_v49, 0.0  ;;  %v12442_v10 = vmax.f32 %v12426_v12, 0.0 }
 0x60b   : > { %v12385_v44 = vpop.f32.mrb[14].mxu1  ;;  %v12455_v41 = vmul.f32 %v12439_v33, %v42003_v47  ;;  %v12457_v19 = vmul.f32 %v12441_v63, %v42005_v55 }
 0x60c   : > { %v12387_v53 = vpop.f32.mrb[15].mxu1  ;;  %v12427_v1 = vadd.f32 %v36944_v20, %v12385_v44  ;;  %v12456_v17 = vmul.f32 %v12440_v24, %v42004_v54  ;;  %v12458_v21 = vmul.f32 %v12442_v10, %v42006_v5 }
 0x60d   : > { %12489 = vrot.lane.b32.xlu0 %v12451_v35, %s34797_s14  ;;  %v12428_v4 = vadd.f32 %v36944_v20, %v12387_v53 }
 0x60e   : > { %12491 = vrot.lane.b32.xlu1 %v12452_v18, %s34797_s14  ;;  %v12443_v46 = vmax.f32 %v12427_v1, 0.0 }
 0x60f   : > { %v12444_v50 = vmax.f32 %v12428_v4, 0.0 }
 0x610   : > { %v12459_v61 = vmul.f32 %v12443_v46, %v42007_v43 }
 0x611   : > { %12493 = vrot.lane.b32.xlu0 %v12453_v26, %s34797_s14  ;;  %v12460_v8 = vmul.f32 %v12444_v50, %v42008_v9  ;;  %v37219_v50 = vld [vmem:[%s41776_s2 + $0x98] sm:$0xff] }
 0x612   : > { %12495 = vrot.lane.b32.xlu1 %v12454_v22, %s34797_s14 }
 0x615   : > { %12497 = vrot.lane.b32.xlu0 %v12455_v41, %s34797_s14 }
 0x616   : > { %12499 = vrot.lane.b32.xlu1 %v12456_v17, %s34797_s14 }
 0x619   : > { %12501 = vrot.lane.b32.xlu0 %v12457_v19, %s34797_s14 }
 0x61a   : > { %12503 = vrot.lane.b32.xlu1 %v12458_v21, %s34797_s14 }
 0x61d   : > { %12505 = vrot.lane.b32.xlu0 %v12459_v61, %s34797_s14 }
 0x61e   : > { %12507 = vrot.lane.b32.xlu1 %v12460_v8, %s34797_s14 }
 0x673   : > { %v12478_v20 = vpop.permute.xlu0 %12477 }
 0x674   : > { %12541 = vst.msk [vmem:[#allocation2] sm:$0xff] %vm350_vm2, %v12478_v20  ;;  %v12480_v60 = vpop.permute.xlu1 %12479 }
 0x675   : > { %v37012_v32 = vsel %vm250_vm0, %v12478_v20, %v12480_v60 }
 0x677   : > { %v12482_v14 = vpop.permute.xlu0 %12481 }
 0x678   : > { %v12484_v23 = vpop.permute.xlu1 %12483  ;;  %v37035_v48 = vsel %vm250_vm0, %v12480_v60, %v12482_v14 }
 0x679   : > { %v37050_v11 = vsel %vm250_vm0, %v12482_v14, %v12484_v23 }
 0x67b   : > { %v36995_v3 = vld [vmem:[#allocation2] sm:$0xff]  ;;  %v12486_v34 = vpop.permute.xlu0 %12485 }
 0x67c   : > { %v12488_v6 = vpop.permute.xlu1 %12487  ;;  %13233 = vrot.lane.b32.xlu1 %v36995_v3, %s34798_s15  ;;  %12596 = vrot.lane.b32.xlu0 %v36995_v3, %s34799_s16  ;;  %v37053_v58 = vsel %vm250_vm0, %v12484_v23, %v12486_v34 }
 0x67d   : > { %v37080_v45 = vsel %vm250_vm0, %v12486_v34, %v12488_v6 }
 0x67f   : > { %v12490_v57 = vpop.permute.xlu0 %12489 }
 0x680   : > { %v12492_v27 = vpop.permute.xlu1 %12491  ;;  %14527 = vrot.lane.b32.xlu1 %v36995_v3, %s34801_s18  ;;  %13872 = vrot.lane.b32.xlu0 %v36995_v3, %s34800_s17  ;;  %v37095_v51 = vsel %vm250_vm0, %v12488_v6, %v12490_v57 }
 0x681   : > { %v37110_v59 = vsel %vm250_vm0, %v12490_v57, %v12492_v27 }
 0x683   : > { %v12494_v2 = vpop.permute.xlu0 %12493 }
 0x684   : > { %v37005_v25 = vpop.permute.xlu1 %12495  ;;  %15837 = vrot.lane.b32.xlu1 %v36995_v3, %s34803_s9  ;;  %15182 = vrot.lane.b32.xlu0 %v36995_v3, %s34802_s26  ;;  %v37113_v35 = vsel %vm250_vm0, %v12492_v27, %v12494_v2 }
 0x685   : > { %v37137_v31 = vsel %vm250_vm0, %v12494_v2, %v37005_v25 }
 0x687   : > { %v12498_v52 = vpop.permute.xlu0 %12497 }
 0x688   : > { %v37014_v56 = vpop.permute.xlu1 %12499  ;;  %13235 = vrot.lane.b32.xlu1 %v37012_v32, %s34798_s15  ;;  %12598 = vrot.lane.b32.xlu0 %v37012_v32, %s34799_s16  ;;  %v37157_v53 = vsel %vm250_vm0, %v37005_v25, %v12498_v52 }
 0x689   : > { %v37177_v24 = vsel %vm250_vm0, %v12498_v52, %v37014_v56 }
 0x68b   : > { %v12502_v44 = vpop.permute.xlu0 %12501 }
 0x68c   : > { %v37020_v62 = vpop.permute.xlu1 %12503  ;;  %14529 = vrot.lane.b32.xlu1 %v37012_v32, %s34801_s18  ;;  %13874 = vrot.lane.b32.xlu0 %v37012_v32, %s34800_s17  ;;  %v37187_v63 = vsel %vm250_vm0, %v37014_v56, %v12502_v44 }
 0x68d   : > { %v37228_v60 = vsel %vm250_vm0, %v12502_v44, %v37020_v62 }
 0x68f   : > { %v37147_v18 = vpop.permute.xlu0 %12505 }
 0x690   : > { %v37026_v13 = vpop.permute.xlu1 %12507  ;;  %15839 = vrot.lane.b32.xlu1 %v37012_v32, %s34803_s9  ;;  %15184 = vrot.lane.b32.xlu0 %v37012_v32, %s34802_s26  ;;  %v37258_v2 = vsel %vm250_vm0, %v37020_v62, %v37147_v18 }
 0x691   : > { %12557 = vst.msk [vmem:[#allocation2 + $0x80] sm:$0xff] %vm250_vm0, %v37026_v13 }
 0x694   : > { %13237 = vrot.lane.b32.xlu0 %v37035_v48, %s34798_s15  ;;  %12600 = vrot.lane.b32.xlu1 %v37035_v48, %s34799_s16 }
 0x698   : > { %14531 = vrot.lane.b32.xlu0 %v37035_v48, %s34801_s18  ;;  %13876 = vrot.lane.b32.xlu1 %v37035_v48, %s34800_s17 }
 0x69c   : > { %15841 = vrot.lane.b32.xlu0 %v37035_v48, %s34803_s9  ;;  %15186 = vrot.lane.b32.xlu1 %v37035_v48, %s34802_s26 }
 0x6a0   : > { %12602 = vrot.lane.b32.xlu1 %v37050_v11, %s34799_s16  ;;  %12604 = vrot.lane.b32.xlu0 %v37053_v58, %s34799_s16 }
 0x6a4   : > { %13241 = vrot.lane.b32.xlu1 %v37053_v58, %s34798_s15  ;;  %13239 = vrot.lane.b32.xlu0 %v37050_v11, %s34798_s15 }
 0x6a8   : > { %13878 = vrot.lane.b32.xlu1 %v37050_v11, %s34800_s17  ;;  %13880 = vrot.lane.b32.xlu0 %v37053_v58, %s34800_s17 }
 0x6ac   : > { %14535 = vrot.lane.b32.xlu1 %v37053_v58, %s34801_s18  ;;  %14533 = vrot.lane.b32.xlu0 %v37050_v11, %s34801_s18 }
 0x6b0   : > { %15188 = vrot.lane.b32.xlu1 %v37050_v11, %s34802_s26  ;;  %15190 = vrot.lane.b32.xlu0 %v37053_v58, %s34802_s26 }
 0x6b4   : > { %15845 = vrot.lane.b32.xlu1 %v37053_v58, %s34803_s9  ;;  %15843 = vrot.lane.b32.xlu0 %v37050_v11, %s34803_s9 }
 0x6b8   : > { %12606 = vrot.lane.b32.xlu1 %v37080_v45, %s34799_s16  ;;  %13243 = vrot.lane.b32.xlu0 %v37080_v45, %s34798_s15 }
 0x6bc   : > { %13882 = vrot.lane.b32.xlu1 %v37080_v45, %s34800_s17  ;;  %14537 = vrot.lane.b32.xlu0 %v37080_v45, %s34801_s18 }
 0x6c0   : > { %15192 = vrot.lane.b32.xlu1 %v37080_v45, %s34802_s26  ;;  %15847 = vrot.lane.b32.xlu0 %v37080_v45, %s34803_s9 }
 0x6c4   : > { %13245 = vrot.lane.b32.xlu1 %v37095_v51, %s34798_s15  ;;  %12608 = vrot.lane.b32.xlu0 %v37095_v51, %s34799_s16 }
 0x6c8   : > { %14539 = vrot.lane.b32.xlu1 %v37095_v51, %s34801_s18  ;;  %13884 = vrot.lane.b32.xlu0 %v37095_v51, %s34800_s17 }
 0x6cc   : > { %15849 = vrot.lane.b32.xlu1 %v37095_v51, %s34803_s9  ;;  %15194 = vrot.lane.b32.xlu0 %v37095_v51, %s34802_s26 }
 0x6d0   : > { %12610 = vrot.lane.b32.xlu1 %v37110_v59, %s34799_s16  ;;  %12612 = vrot.lane.b32.xlu0 %v37113_v35, %s34799_s16 }
 0x6d4   : > { %13249 = vrot.lane.b32.xlu1 %v37113_v35, %s34798_s15  ;;  %13247 = vrot.lane.b32.xlu0 %v37110_v59, %s34798_s15 }
 0x6d8   : > { %13886 = vrot.lane.b32.xlu1 %v37110_v59, %s34800_s17  ;;  %13888 = vrot.lane.b32.xlu0 %v37113_v35, %s34800_s17 }
 0x6dc   : > { %14543 = vrot.lane.b32.xlu1 %v37113_v35, %s34801_s18  ;;  %14541 = vrot.lane.b32.xlu0 %v37110_v59, %s34801_s18 }
 0x6e0   : > { %15196 = vrot.lane.b32.xlu1 %v37110_v59, %s34802_s26  ;;  %15198 = vrot.lane.b32.xlu0 %v37113_v35, %s34802_s26 }
 0x6e4   : > { %12614 = vrot.lane.b32.xlu1 %v37137_v31, %s34799_s16  ;;  %15851 = vrot.lane.b32.xlu0 %v37110_v59, %s34803_s9 }
 0x6e8   : > { %13890 = vrot.lane.b32.xlu1 %v37137_v31, %s34800_s17  ;;  %13251 = vrot.lane.b32.xlu0 %v37137_v31, %s34798_s15 }
 0x6ec   : > { %15200 = vrot.lane.b32.xlu1 %v37137_v31, %s34802_s26  ;;  %14545 = vrot.lane.b32.xlu0 %v37137_v31, %s34801_s18 }
 0x6ee   : > { %v37153_v29 = vpop.permute.xlu1 %13233  ;;  %v12597_v49 = vpop.permute.xlu0 %12596 }
 0x6f0   : > { %13253 = vrot.lane.b32.xlu1 %v37157_v53, %s34798_s15  ;;  %12616 = vrot.lane.b32.xlu0 %v37157_v53, %s34799_s16 }
 0x6f2   : > { %v37163_v26 = vpop.permute.xlu1 %14527  ;;  %v37165_v33 = vpop.permute.xlu0 %13872 }
 0x6f4   : > { %14547 = vrot.lane.b32.xlu1 %v37157_v53, %s34801_s18  ;;  %13892 = vrot.lane.b32.xlu0 %v37157_v53, %s34800_s17 }
 0x6f6   : > { %v37171_v16 = vpop.permute.xlu1 %15837  ;;  %v37173_v22 = vpop.permute.xlu0 %15182 }
 0x6f7   : > { %42009 = vst [vmem:[#allocation24_spill] sm:$0xff] %v37171_v16  ;;  %42010 = vst [vmem:[#allocation23_spill] sm:$0xff] %v37173_v22 }
 0x6f8   : > { %12618 = vrot.lane.b32.xlu1 %v37177_v24, %s34799_s16  ;;  %15202 = vrot.lane.b32.xlu0 %v37157_v53, %s34802_s26 }
 0x6fa   : > { %v37183_v12 = vpop.permute.xlu1 %13235  ;;  %v12599_v41 = vpop.permute.xlu0 %12598 }
 0x6fb   : > { %v12630_v61 = vsel %vm441_vm3, %v12597_v49, %v12599_v41  ;;  %v37271_v49 = vld [vmem:[#allocation2 + $0x80] sm:$0xff] }
 0x6fc   : > { %13257 = vrot.lane.b32.xlu1 %v37187_v63, %s34798_s15  ;;  %12620 = vrot.lane.b32.xlu0 %v37187_v63, %s34799_s16 }
 0x6fe   : > { %v37193_v1 = vpop.permute.xlu1 %14529  ;;  %v37195_v17 = vpop.permute.xlu0 %13874 }
 0x700   : > { %13894 = vrot.lane.b32.xlu1 %v37177_v24, %s34800_s17  ;;  %13255 = vrot.lane.b32.xlu0 %v37177_v24, %s34798_s15 }
 0x702   : > { %v37201_v10 = vpop.permute.xlu1 %15839  ;;  %v37203_v4 = vpop.permute.xlu0 %15184 }
 0x703   : > { %42011 = vst [vmem:[#allocation34_spill] sm:$0xff] %v37201_v10  ;;  %42012 = vst [vmem:[#allocation32_spill] sm:$0xff] %v37203_v4 }
 0x704   : > { %14551 = vrot.lane.b32.xlu1 %v37187_v63, %s34801_s18  ;;  %13896 = vrot.lane.b32.xlu0 %v37187_v63, %s34800_s17 }
 0x706   : > { %v12601_v19 = vpop.permute.xlu1 %12600  ;;  %v37209_v46 = vpop.permute.xlu0 %13237 }
 0x707   : > { %v12631_v21 = vsel %vm441_vm3, %v12599_v41, %v12601_v19 }
 0x708   : > { %15204 = vrot.lane.b32.xlu1 %v37177_v24, %s34802_s26  ;;  %14549 = vrot.lane.b32.xlu0 %v37177_v24, %s34801_s18 }
 0x709   : > { %12665 = vmatprep.subr.mxu0 %v12631_v21 }
 0x70a   : > { %12666 = vmatpush1.msra.mxu0 %v12630_v61  ;;  %v37222_v8 = vpop.permute.xlu1 %13876  ;;  %v37224_v20 = vpop.permute.xlu0 %14531 }
 0x70b   : > { %33548 = vmatmul.mubr.msk.f32.vlgmr.msra.gmra.mrb[16].mxu0 %vm474_vm4, %v37219_v50 }
 0x70c   : > { %12622 = vrot.lane.b32.xlu1 %v37228_v60, %s34799_s16  ;;  %15206 = vrot.lane.b32.xlu0 %v37187_v63, %s34802_s26 }
 0x70d   : > { %12871 = vmatprep.mubr.f32.mxu0 %v41945_v0 }
 0x70e   : > { %v37237_v23 = vpop.permute.xlu1 %15186  ;;  %v37239_v6 = vpop.permute.xlu0 %15841 }
 0x70f   : > { %42013 = vst [vmem:[#allocation31_spill] sm:$0xff] %v37237_v23  ;;  %42014 = vst [vmem:[#allocation25_spill] sm:$0xff] %v37239_v6 }
 0x710   : > { %13898 = vrot.lane.b32.xlu1 %v37228_v60, %s34800_s17  ;;  %13259 = vrot.lane.b32.xlu0 %v37228_v60, %s34798_s15 }
 0x712   : > { %v12603_v27 = vpop.permute.xlu1 %12602  ;;  %v12605_v25 = vpop.permute.xlu0 %12604 }
 0x713   : > { %v12633_v56 = vsel %vm441_vm3, %v12603_v27, %v12605_v25  ;;  %v12632_v14 = vsel %vm441_vm3, %v12601_v19, %v12603_v27 }
 0x714   : > { %15208 = vrot.lane.b32.xlu1 %v37228_v60, %s34802_s26  ;;  %14553 = vrot.lane.b32.xlu0 %v37228_v60, %s34801_s18 }
 0x715   : > { %12736 = vmatprep.subr.mxu1 %v12633_v56  ;;  %v37300_v56 = vsel %vm250_vm0, %v37147_v18, %v37026_v13 }
 0x716   : > { %12737 = vmatpush1.msra.mxu1 %v12632_v14  ;;  %v37251_v34 = vpop.permute.xlu1 %13241  ;;  %v37253_v57 = vpop.permute.xlu0 %13239 }
 0x717   : > { %33549 = vmatmul.mubr.msk.f32.vlgmr.msra.gmra.mrb[16].mxu1 %vm474_vm4, %v37219_v50 }
 0x718   : > { %13261 = vrot.lane.b32.xlu1 %v37258_v2, %s34798_s15  ;;  %12624 = vrot.lane.b32.xlu0 %v37258_v2, %s34799_s16 }
 0x719   : > { %12942 = vmatprep.mubr.f32.mxu1 %v41945_v0 }
 0x71a   : > { %v37267_v52 = vpop.permute.xlu1 %13878  ;;  %v37269_v44 = vpop.permute.xlu0 %13880 }
 0x71c   : > { %13265 = vrot.lane.b32.xlu1 %v37271_v49, %s34798_s15  ;;  %12628 = vrot.lane.b32.xlu0 %v37271_v49, %s34799_s16 }
 0x71e   : > { %v37277_v62 = vpop.permute.xlu1 %14535  ;;  %v37279_v41 = vpop.permute.xlu0 %14533 }
 0x71f   : > { %42015 = vst [vmem:[#allocation42_spill] sm:$0xff] %v37279_v41 }
 0x720   : > { %14555 = vrot.lane.b32.xlu1 %v37258_v2, %s34801_s18  ;;  %13900 = vrot.lane.b32.xlu0 %v37258_v2, %s34800_s17 }
 0x722   : > { %v37285_v19 = vpop.permute.xlu1 %15188  ;;  %v37287_v21 = vpop.permute.xlu0 %15190 }
 0x723   : > { %42016 = vst [vmem:[#allocation40_spill] sm:$0xff] %v37285_v19  ;;  %42017 = vst [vmem:[#allocation39_spill] sm:$0xff] %v37287_v21 }
 0x724   : > { %14559 = vrot.lane.b32.xlu1 %v37271_v49, %s34801_s18  ;;  %13904 = vrot.lane.b32.xlu0 %v37271_v49, %s34800_s17 }
 0x726   : > { %v37293_v61 = vpop.permute.xlu1 %15845  ;;  %v37295_v27 = vpop.permute.xlu0 %15843 }
 0x727   : > { %42018 = vst [vmem:[#allocation33_spill] sm:$0xff] %v37293_v61  ;;  %42019 = vst [vmem:[#allocation48_spill] sm:$0xff] %v37295_v27 }
 0x728   : > { %12626 = vrot.lane.b32.xlu1 %v37300_v56, %s34799_s16  ;;  %15210 = vrot.lane.b32.xlu0 %v37258_v2, %s34802_s26 }
 0x72a   : > { %v12607_v14 = vpop.permute.xlu1 %12606  ;;  %v37306_v9 = vpop.permute.xlu0 %13243 }
 0x72b   : > { %v12634_v30 = vsel %vm441_vm3, %v12605_v25, %v12607_v14 }
 0x72c   : > { %15853 = vrot.lane.b32.xlu1 %v37113_v35, %s34803_s9  ;;  %15214 = vrot.lane.b32.xlu0 %v37271_v49, %s34802_s26 }
 0x72e   : > { %v37312_v43 = vpop.permute.xlu1 %13882  ;;  %v37314_v5 = vpop.permute.xlu0 %14537 }
 0x730   : > { %15857 = vrot.lane.b32.xlu1 %v37157_v53, %s34803_s9  ;;  %15855 = vrot.lane.b32.xlu0 %v37137_v31, %s34803_s9 }
 0x732   : > { %v37320_v13 = vpop.permute.xlu1 %15192  ;;  %v37322_v18 = vpop.permute.xlu0 %15847 }
 0x733   : > { %42020 = vst [vmem:[#allocation41_spill] sm:$0xff] %v37320_v13  ;;  %42021 = vst [vmem:[#allocation49_spill] sm:$0xff] %v37322_v18 }
 0x734   : > { %15861 = vrot.lane.b32.xlu1 %v37187_v63, %s34803_s9  ;;  %15859 = vrot.lane.b32.xlu0 %v37177_v24, %s34803_s9 }
 0x736   : > { %v37328_v55 = vpop.permute.xlu1 %13245  ;;  %v12609_v54 = vpop.permute.xlu0 %12608 }
 0x737   : > { %v12635_v47 = vsel %vm441_vm3, %v12607_v14, %v12609_v54 }
 0x738   : > { %15865 = vrot.lane.b32.xlu1 %v37258_v2, %s34803_s9  ;;  %15863 = vrot.lane.b32.xlu0 %v37228_v60, %s34803_s9 }
 0x739   : > { %12807 = vmatprep.subr.mxu0 %v12635_v47 }
 0x73a   : > { %12808 = vmatpush1.msra.mxu0 %v12634_v30  ;;  %v37336_v42 = vpop.permute.xlu1 %14539  ;;  %v37338_v37 = vpop.permute.xlu0 %13884 }
 0x73b   : > { %33550 = vmatmul.mubr.msk.f32.vlgmr.msra.gmra.mrb[18].mxu0 %vm474_vm4, %v37219_v50 }
 0x73c   : > { %15869 = vrot.lane.b32.xlu1 %v37271_v49, %s34803_s9  ;;  %13263 = vrot.lane.b32.xlu0 %v37300_v56, %s34798_s15 }
 0x73d   : > { %13013 = vmatprep.mubr.f32.mxu0 %v41945_v0 }
 0x73e   : > { %v37347_v28 = vpop.permute.xlu1 %15849  ;;  %v37349_v47 = vpop.permute.xlu0 %15194 }
 0x73f   : > { %42022 = vst [vmem:[#allocation26_spill] sm:$0xff] %v37347_v28  ;;  %42023 = vst [vmem:[#allocation27_spill] sm:$0xff] %v37349_v47 }
 0x740   : > { %16496 = vrot.lane.b32.xlu1 %v37035_v48, %s34804_s12  ;;  %16494 = vrot.lane.b32.xlu0 %v37012_v32, %s34804_s12 }
 0x742   : > { %v12611_v30 = vpop.permute.xlu1 %12610  ;;  %v12613_v25 = vpop.permute.xlu0 %12612 }
 0x743   : > { %v12637_v14 = vsel %vm441_vm3, %v12611_v30, %v12613_v25  ;;  %v12636_v7 = vsel %vm441_vm3, %v12609_v54, %v12611_v30 }
 0x744   : > { %16498 = vrot.lane.b32.xlu1 %v37050_v11, %s34804_s12  ;;  %16492 = vrot.lane.b32.xlu0 %v36995_v3, %s34804_s12 }
 0x745   : > { %12878 = vmatprep.subr.mxu1 %v12637_v14 }
 0x746   : > { %12879 = vmatpush1.msra.mxu1 %v12636_v7  ;;  %v37361_v40 = vpop.permute.xlu1 %13249  ;;  %v37363_v36 = vpop.permute.xlu0 %13247 }
 0x747   : > { %33551 = vmatmul.mubr.msk.f32.vlgmr.msra.gmra.mrb[18].mxu1 %vm474_vm4, %v37219_v50 }
 0x748   : > { %13902 = vrot.lane.b32.xlu1 %v37300_v56, %s34800_s17  ;;  %16500 = vrot.lane.b32.xlu0 %v37053_v58, %s34804_s12 }
 0x749   : > { %13084 = vmatprep.mubr.f32.mxu1 %v41945_v0 }
 0x74a   : > { %v37372_v54 = vpop.permute.xlu1 %13886  ;;  %v37374_v30 = vpop.permute.xlu0 %13888 }
 0x74c   : > { %16502 = vrot.lane.b32.xlu1 %v37080_v45, %s34804_s12  ;;  %16504 = vrot.lane.b32.xlu0 %v37095_v51, %s34804_s12 }
 0x74e   : > { %v37380_v7 = vpop.permute.xlu1 %14543  ;;  %v37382_v14 = vpop.permute.xlu0 %14541 }
 0x74f   : > { %42024 = vst [vmem:[#allocation22_spill] sm:$0xff] %v37382_v14 }
 0x750   : > { %16506 = vrot.lane.b32.xlu1 %v37110_v59, %s34804_s12  ;;  %16508 = vrot.lane.b32.xlu0 %v37113_v35, %s34804_s12 }
 0x752   : > { %v37388_v39 = vpop.permute.xlu1 %15196  ;;  %v37390_v38 = vpop.permute.xlu0 %15198 }
 0x753   : > { %42025 = vst [vmem:[#allocation30_spill] sm:$0xff] %v37388_v39  ;;  %42026 = vst [vmem:[#allocation28_spill] sm:$0xff] %v37390_v38 }
 0x754   : > { %16510 = vrot.lane.b32.xlu1 %v37137_v31, %s34804_s12  ;;  %16512 = vrot.lane.b32.xlu0 %v37157_v53, %s34804_s12 }
 0x756   : > { %v12615_v15 = vpop.permute.xlu1 %12614  ;;  %v37396_v27 = vpop.permute.xlu0 %15851 }
 0x757   : > { %42027 = vst [vmem:[#allocation35_spill] sm:$0xff] %v37396_v27  ;;  %v12638_v10 = vsel %vm441_vm3, %v12613_v25, %v12615_v15 }
 0x758   : > { %16514 = vrot.lane.b32.xlu1 %v37177_v24, %s34804_s12  ;;  %16516 = vrot.lane.b32.xlu0 %v37187_v63, %s34804_s12 }
 0x75a   : > { %v37402_v61 = vpop.permute.xlu1 %13890  ;;  %v37404_v39 = vpop.permute.xlu0 %13251 }
 0x75c   : > { %16518 = vrot.lane.b32.xlu1 %v37228_v60, %s34804_s12  ;;  %14557 = vrot.lane.b32.xlu0 %v37300_v56, %s34801_s18 }
 0x75e   : > { %v37410_v19 = vpop.permute.xlu1 %15200  ;;  %v37412_v18 = vpop.permute.xlu0 %14545 }
 0x75f   : > { %42028 = vst [vmem:[#allocation36_spill] sm:$0xff] %v37410_v19 }
 0x760   : > { %17149 = vrot.lane.b32.xlu1 %v37012_v32, %s34805_s20  ;;  %16520 = vrot.lane.b32.xlu0 %v37258_v2, %s34804_s12 }
 0x762   : > { %v37418_v27 = vpop.permute.xlu1 %13253  ;;  %v12617_v28 = vpop.permute.xlu0 %12616 }
 0x763   : > { %v12639_v16 = vsel %vm441_vm3, %v12615_v15, %v12617_v28 }
 0x764   : > { %17147 = vrot.lane.b32.xlu1 %v36995_v3, %s34805_s20  ;;  %16524 = vrot.lane.b32.xlu0 %v37271_v49, %s34804_s12 }
 0x765   : > { %12949 = vmatprep.subr.mxu0 %v12639_v16 }
 0x766   : > { %12950 = vmatpush1.msra.mxu0 %v12638_v10  ;;  %v37426_v6 = vpop.permute.xlu1 %14547  ;;  %v37428_v38 = vpop.permute.xlu0 %13892 }
 0x767   : > { %33552 = vmatmul.mubr.msk.f32.vlgmr.msra.gmra.mrb[20].mxu0 %vm474_vm4, %v37219_v50 }
 0x768   : > { %15212 = vrot.lane.b32.xlu1 %v37300_v56, %s34802_s26  ;;  %17151 = vrot.lane.b32.xlu0 %v37035_v48, %s34805_s20 }
 0x769   : > { %13155 = vmatprep.mubr.f32.mxu0 %v41945_v0 }
 0x76a   : > { %v12619_v19 = vpop.permute.xlu1 %12618  ;;  %v37437_v16 = vpop.permute.xlu0 %15202 }
 0x76b   : > { %42029 = vst [vmem:[#allocation38_spill] sm:$0xff] %v37437_v16  ;;  %v12640_v16 = vsel %vm441_vm3, %v12617_v28, %v12619_v19 }
 0x76c   : > { %17155 = vrot.lane.b32.xlu1 %v37053_v58, %s34805_s20  ;;  %17153 = vrot.lane.b32.xlu0 %v37050_v11, %s34805_s20 }
 0x76e   : > { %v37443_v15 = vpop.permute.xlu1 %13257  ;;  %v12621_v10 = vpop.permute.xlu0 %12620 }
 0x76f   : > { %v12641_v25 = vsel %vm441_vm3, %v12619_v19, %v12621_v10 }
 0x770   : > { %17159 = vrot.lane.b32.xlu1 %v37095_v51, %s34805_s20  ;;  %17157 = vrot.lane.b32.xlu0 %v37080_v45, %s34805_s20 }
 0x771   : > { %13020 = vmatprep.subr.mxu1 %v12641_v25 }
 0x772   : > { %13021 = vmatpush1.msra.mxu1 %v12640_v16  ;;  %v37451_v14 = vpop.permute.xlu1 %13894  ;;  %v37453_v21 = vpop.permute.xlu0 %13255 }
 0x773   : > { %33553 = vmatmul.mubr.msk.f32.vlgmr.msra.gmra.mrb[20].mxu1 %vm474_vm4, %v37219_v50 }
 0x774   : > { %17163 = vrot.lane.b32.xlu1 %v37113_v35, %s34805_s20  ;;  %17161 = vrot.lane.b32.xlu0 %v37110_v59, %s34805_s20 }
 0x775   : > { %13226 = vmatprep.mubr.f32.mxu1 %v41945_v0 }
 0x776   : > { %v37462_v13 = vpop.permute.xlu1 %14551  ;;  %v37464_v25 = vpop.permute.xlu0 %13896 }
 0x777   : > { %42030 = vst [vmem:[#allocation37_spill] sm:$0xff] %v37462_v13 }
 0x778   : > { %17167 = vrot.lane.b32.xlu1 %v37157_v53, %s34805_s20  ;;  %17165 = vrot.lane.b32.xlu0 %v37137_v31, %s34805_s20 }
 0x77a   : > { %v37470_v28 = vpop.permute.xlu1 %15204  ;;  %v37472_v19 = vpop.permute.xlu0 %14549 }
 0x77b   : > { %42031 = vst [vmem:[#allocation43_spill] sm:$0xff] %v37470_v28  ;;  %42032 = vst [vmem:[#allocation44_spill] sm:$0xff] %v37472_v19 }
 0x77c   : > { %17171 = vrot.lane.b32.xlu1 %v37187_v63, %s34805_s20  ;;  %15867 = vrot.lane.b32.xlu0 %v37300_v56, %s34803_s9 }
 0x77e   : > { %v12623_v16 = vpop.permute.xlu1 %12622  ;;  %v37478_v47 = vpop.permute.xlu0 %15206 }
 0x77f   : > { %42033 = vst [vmem:[#allocation46_spill] sm:$0xff] %v37478_v47 }
 0x780   : > { %17175 = vrot.lane.b32.xlu1 %v37258_v2, %s34805_s20  ;;  %17169 = vrot.lane.b32.xlu0 %v37177_v24, %s34805_s20 }
 0x782   : > { %v37484_v41 = vpop.permute.xlu1 %13898  ;;  %v13260_v28 = vpop.permute.xlu0 %13259 }
 0x784   : > { %17179 = vrot.lane.b32.xlu1 %v37271_v49, %s34805_s20  ;;  %17173 = vrot.lane.b32.xlu0 %v37228_v60, %s34805_s20 }
 0x786   : > { %v37490_v19 = vpop.permute.xlu1 %15208  ;;  %v37492_v22 = vpop.permute.xlu0 %14553 }
 0x787   : > { %42034 = vst [vmem:[#allocation45_spill] sm:$0xff] %v37490_v19  ;;  %42035 = vst [vmem:[#allocation47_spill] sm:$0xff] %v37492_v22  ;;  %v12642_v19 = vsel %vm441_vm3, %v12621_v10, %v12623_v16  ;;  %v13276_v10 = vsel %vm1080_vm5, %v37404_v39, %v37418_v27 }
 0x788   : > { %16522 = vrot.lane.b32.xlu1 %v37300_v56, %s34804_s12  ;;  %17804 = vrot.lane.b32.xlu0 %v37012_v32, %s34806_s10  ;;  %v13268_v32 = vsel %vm1080_vm5, %v37183_v12, %v37209_v46 }
 0x78a   : > { %v37498_v47 = vpop.permute.xlu1 %13261  ;;  %v12625_v4 = vpop.permute.xlu0 %12624 }
 0x78b   : > { %v12643_v23 = vsel %vm441_vm3, %v12623_v16, %v12625_v4 }
 0x78c   : > { %17806 = vrot.lane.b32.xlu1 %v37035_v48, %s34806_s10  ;;  %17802 = vrot.lane.b32.xlu0 %v36995_v3, %s34806_s10  ;;  %v13267_v48 = vsel %vm1080_vm5, %v37153_v29, %v37183_v12  ;;  %v13272_v3 = vsel %vm1080_vm5, %v37306_v9, %v37328_v55 }
 0x78d   : > { %13091 = vmatprep.subr.mxu0 %v12643_v23  ;;  %v37524_v23 = vld [vmem:[%s41776_s2 + $0x90] sm:$0xff] }
 0x78e   : > { %13092 = vmatpush1.msra.mxu0 %v12642_v19  ;;  %v37506_v13 = vpop.permute.xlu1 %13265  ;;  %v12629_v22 = vpop.permute.xlu0 %12628 }
 0x78f   : > { %33554 = vmatmul.mubr.msk.f32.vlgmr.msra.gmra.mrb[22].mxu0 %vm474_vm4, %v37219_v50  ;;  %13302 = vmatprep.subr.mxu0 %v13268_v32 }
 0x790   : > { %13303 = vmatpush1.msra.mxu0 %v13267_v48  ;;  %17808 = vrot.lane.b32.xlu1 %v37050_v11, %s34806_s10  ;;  %v13271_v11 = vsel %vm1080_vm5, %v37251_v34, %v37306_v9  ;;  %v13275_v9 = vsel %vm1080_vm5, %v37361_v40, %v37404_v39  ;;  %v13279_v39 = vsel %vm1080_vm5, %v37443_v15, %v13260_v28 }
 0x791   : > { %17810 = vrot.lane.b32.xlu0 %v37053_v58, %s34806_s10  ;;  %13444 = vmatprep.subr.mxu0 %v13272_v3  ;;  %v13270_v48 = vsel %vm1080_vm5, %v37253_v57, %v37251_v34  ;;  %v13911_v34 = vsel %vm1720_vm6, %v37312_v43, %v37338_v37 }
 0x792   : > { %13366 = vmatprep.mubr.f32.mxu0 %v41945_v0  ;;  %v37529_v29 = vpop.permute.xlu1 %14555  ;;  %v37531_v12 = vpop.permute.xlu0 %13900 }
 0x793   : > { %33556 = vmatmul.mubr.msk.f32.vlgmr.msra.gmra.mrb[16].mxu0 %vm474_vm4, %v37524_v23 }
 0x794   : > { %13445 = vmatpush1.msra.mxu0 %v13271_v11  ;;  %17812 = vrot.lane.b32.xlu1 %v37080_v45, %s34806_s10  ;;  %v13280_v45 = vsel %vm1080_vm5, %v13260_v28, %v37498_v47 }
 0x795   : > { %13586 = vmatprep.subr.mxu0 %v13276_v10  ;;  %17814 = vrot.lane.b32.xlu0 %v37095_v51, %s34806_s10  ;;  %v14561_v10 = vsel %vm2376_vm7, %v37163_v26, %v37193_v1  ;;  %v13909_v26 = vsel %vm1720_vm6, %v37267_v52, %v37269_v44 }
 0x796   : > { %13508 = vmatprep.mubr.f32.mxu0 %v41945_v0  ;;  %v37546_v58 = vpop.permute.xlu1 %14559  ;;  %v37548_v19 = vpop.permute.xlu0 %13904 }
 0x797   : > { %33558 = vmatmul.mubr.msk.f32.vlgmr.msra.gmra.mrb[18].mxu0 %vm474_vm4, %v37524_v23 }
 0x798   : > { %13587 = vmatpush1.msra.mxu0 %v13275_v9  ;;  %17816 = vrot.lane.b32.xlu1 %v37110_v59, %s34806_s10  ;;  %v13907_v59 = vsel %vm1720_vm6, %v37195_v17, %v37222_v8 }
 0x799   : > { %13728 = vmatprep.subr.mxu0 %v13280_v45  ;;  %17818 = vrot.lane.b32.xlu0 %v37113_v35, %s34806_s10  ;;  %v13908_v45 = vsel %vm1720_vm6, %v37222_v8, %v37267_v52  ;;  %v14569_v8 = vsel %vm2376_vm7, %v37380_v7, %v37412_v18 }
 0x79a   : > { %13650 = vmatprep.mubr.f32.mxu0 %v41945_v0  ;;  %v12627_v51 = vpop.permute.xlu1 %12626  ;;  %v37562_v16 = vpop.permute.xlu0 %15210 }
 0x79b   : > { %33560 = vmatmul.mubr.msk.f32.vlgmr.msra.gmra.mrb[20].mxu0 %vm474_vm4, %v37524_v23  ;;  %v12645_v32 = vsel %vm441_vm3, %v12627_v51, %v12629_v22  ;;  %v12644_v35 = vsel %vm441_vm3, %v12625_v4, %v12627_v51  ;;  %v13269_v4 = vsel %vm1080_vm5, %v37209_v46, %v37253_v57  ;;  %v13915_v46 = vsel %vm1720_vm6, %v37402_v61, %v37428_v38 }
 0x79c   : > { %13729 = vmatpush1.msra.mxu0 %v13279_v39  ;;  %17820 = vrot.lane.b32.xlu1 %v37137_v31, %s34806_s10  ;;  %v13906_v31 = vsel %vm1720_vm6, %v37165_v33, %v37195_v17  ;;  %v37608_v33 = vld [vmem:[%s41776_s2 + $0xa0] sm:$0xff] }
 0x79d   : > { %13941 = vmatprep.subr.mxu0 %v13907_v59  ;;  %17177 = vrot.lane.b32.xlu0 %v37300_v56, %s34805_s20  ;;  %v42036_v59 = vld [vmem:[#allocation47_spill] sm:$0xff] }
 0x79e   : > { %13162 = vmatprep.subr.mxu1 %v12645_v32  ;;  %13792 = vmatprep.mubr.f32.mxu0 %v41945_v0  ;;  %v37578_v28 = vpop.permute.xlu1 %15853  ;;  %v37580_v22 = vpop.permute.xlu0 %15214  ;;  %v13917_v32 = vsel %vm1720_vm6, %v37451_v14, %v37464_v25 }
 0x79f   : > { %13163 = vmatpush1.msra.mxu1 %v12644_v35  ;;  %33562 = vmatmul.mubr.msk.f32.vlgmr.msra.gmra.mrb[22].mxu0 %vm474_vm4, %v37524_v23 }
 0x7a0   : > { %33555 = vmatmul.mubr.msk.f32.vlgmr.msra.gmra.mrb[22].mxu1 %vm474_vm4, %v37219_v50  ;;  %13373 = vmatprep.subr.mxu1 %v13270_v48  ;;  %v13274_v50 = vsel %vm1080_vm5, %v37363_v36, %v37361_v40  ;;  %v13273_v40 = vsel %vm1080_vm5, %v37328_v55, %v37363_v36  ;;  %v13277_v55 = vsel %vm1080_vm5, %v37418_v27, %v37453_v21 }
 0x7a1   : > { %13942 = vmatpush1.msra.mxu0 %v13906_v31  ;;  %13374 = vmatpush1.msra.mxu1 %v13269_v4  ;;  %v42039_v4 = vld [vmem:[#allocation32_spill] sm:$0xff] }
 0x7a2   : > { %14083 = vmatprep.subr.mxu0 %v13911_v34  ;;  %17824 = vrot.lane.b32.xlu1 %v37177_v24, %s34806_s10  ;;  %v37603_v3 = vpop.permute.xlu1 %15857  ;;  %v37610_v17 = vpop.permute.xlu0 %15855  ;;  %v13910_v24 = vsel %vm1720_vm6, %v37269_v44, %v37312_v43  ;;  %v13914_v43 = vsel %vm1720_vm6, %v37374_v30, %v37402_v61  ;;  %v13918_v61 = vsel %vm1720_vm6, %v37464_v25, %v37484_v41  ;;  %v42037_v25 = vld [vmem:[#allocation37_spill] sm:$0xff] }
 0x7a3   : > { %17822 = vrot.lane.b32.xlu0 %v37157_v53, %s34806_s10  ;;  %13515 = vmatprep.subr.mxu1 %v13274_v50  ;;  %v13278_v53 = vsel %vm1080_vm5, %v37453_v21, %v37443_v15  ;;  %v13919_v15 = vsel %vm1720_vm6, %v37484_v41, %v37531_v12  ;;  %v33627_v21 = vld [vmem:[%s41777_s3 + $0x10] sm:$0xff]  ;;  %v14570_v44 = vsel %vm2376_vm7, %v37412_v18, %v37426_v6 }
 0x7a4   : > { %13437 = vmatprep.mubr.f32.mxu1 %v41945_v0  ;;  %14005 = vmatprep.mubr.f32.mxu0 %v41945_v0  ;;  %v14573_v35 = vsel %vm2376_vm7, %v42037_v25, %v42036_v59 }
 0x7a5   : > { %33557 = vmatmul.mubr.msk.f32.vlgmr.msra.gmra.mrb[16].mxu1 %vm474_vm4, %v37524_v23  ;;  %33565 = vmatmul.mubr.msk.f32.vlgmr.msra.gmra.mrb[16].mxu0 %vm474_vm4, %v37608_v33 }
 0x7a6   : > { %13516 = vmatpush1.msra.mxu1 %v13273_v40  ;;  %14084 = vmatpush1.msra.mxu0 %v13910_v24  ;;  %v37632_v57 = vpop.permute.xlu1 %15861  ;;  %v37634_v36 = vpop.permute.xlu0 %15859 }
 0x7a7   : > { %13657 = vmatprep.subr.mxu1 %v13278_v53  ;;  %14225 = vmatprep.subr.mxu0 %v13915_v46  ;;  %v42041_v53 = vld [vmem:[#allocation42_spill] sm:$0xff] }
 0x7a8   : > { %17828 = vrot.lane.b32.xlu1 %v37228_v60, %s34806_s10  ;;  %17826 = vrot.lane.b32.xlu0 %v37187_v63, %s34806_s10  ;;  %v14564_v46 = vsel %vm2376_vm7, %v42041_v53, %v37277_v62 }
 0x7a9   : > { %13579 = vmatprep.mubr.f32.mxu1 %v41945_v0  ;;  %14147 = vmatprep.mubr.f32.mxu0 %v41945_v0 }
 0x7aa   : > { %33559 = vmatmul.mubr.msk.f32.vlgmr.msra.gmra.mrb[18].mxu1 %vm474_vm4, %v37524_v23  ;;  %33567 = vmatmul.mubr.msk.f32.vlgmr.msra.gmra.mrb[18].mxu0 %vm474_vm4, %v37608_v33  ;;  %v37652_v60 = vpop.permute.xlu1 %15865  ;;  %v37654_v63 = vpop.permute.xlu0 %15863 }
 0x7ab   : > { %13658 = vmatpush1.msra.mxu1 %v13277_v55  ;;  %14226 = vmatpush1.msra.mxu0 %v13914_v43  ;;  %v42042_v55 = vld [vmem:[#allocation27_spill] sm:$0xff]  ;;  %v42043_v43 = vld [vmem:[#allocation41_spill] sm:$0xff] }
 0x7ac   : > { %14367 = vmatprep.subr.mxu0 %v13919_v15  ;;  %17832 = vrot.lane.b32.xlu1 %v37300_v56, %s34806_s10  ;;  %v37794_v15 = vld [vmem:[%s41776_s2 + $0xb0] sm:$0xff] }
 0x7ad   : > { %17830 = vrot.lane.b32.xlu0 %v37258_v2, %s34806_s10  ;;  %14289 = vmatprep.mubr.f32.mxu0 %v41945_v0  ;;  %v14562_v2 = vsel %vm2376_vm7, %v37193_v1, %v37224_v20  ;;  %v14565_v1 = vsel %vm2376_vm7, %v37277_v62, %v37314_v5  ;;  %v14563_v62 = vsel %vm2376_vm7, %v37224_v20, %v42041_v53  ;;  %v37880_v53 = vld [vmem:[%s41776_s2 + $0xb8] sm:$0xff] }
 0x7ae   : > { %33569 = vmatmul.mubr.msk.f32.vlgmr.msra.gmra.mrb[20].mxu0 %vm474_vm4, %v37608_v33  ;;  %13721 = vmatprep.mubr.f32.mxu1 %v41945_v0  ;;  %v37673_v27 = vpop.permute.xlu1 %15869  ;;  %v13264_v56 = vpop.permute.xlu0 %13263 }
 0x7af   : > { %14368 = vmatpush1.msra.mxu0 %v13918_v61  ;;  %14431 = vmatprep.mubr.f32.mxu0 %v41945_v0  ;;  %v13282_v11 = vsel %vm1080_vm5, %v13264_v56, %v37506_v13  ;;  %v13281_v41 = vsel %vm1080_vm5, %v37498_v47, %v13264_v56  ;;  %v37702_v47 = vld [vmem:[%s41776_s2 + $0xa8] sm:$0xff] }
 0x7b0   : > { %14596 = vmatprep.subr.mxu0 %v14562_v2  ;;  %18459 = vperm.xlu1 %34729, %v33627_v21   ;;  %v42044_v21 = vld [vmem:[#allocation39_spill] sm:$0xff] }
 0x7b1   : > { %17834 = vrot.lane.b32.xlu0 %v37271_v49, %s34806_s10  ;;  %33561 = vmatmul.mubr.msk.f32.vlgmr.msra.gmra.mrb[20].mxu1 %vm474_vm4, %v37524_v23  ;;  %v14566_v49 = vsel %vm2376_vm7, %v37314_v5, %v37336_v42  ;;  %v13912_v5 = vsel %vm1720_vm6, %v37338_v37, %v37372_v54  ;;  %v14574_v37 = vsel %vm2376_vm7, %v42036_v59, %v37529_v29 }
 0x7b2   : > { %33571 = vmatmul.mubr.msk.f32.vlgmr.msra.gmra.mrb[22].mxu0 %vm474_vm4, %v37608_v33  ;;  %13799 = vmatprep.subr.mxu1 %v13282_v11  ;;  %v37692_v13 = vpop.permute.xlu1 %16496  ;;  %v37694_v9 = vpop.permute.xlu0 %16494  ;;  %v15220_v61 = vsel %vm3032_vm8, %v42044_v21, %v42043_v43  ;;  %v42045_v11 = vld [vmem:[#allocation22_spill] sm:$0xff] }
 0x7b3   : > { %14597 = vmatpush1.msra.mxu0 %v14561_v10  ;;  %13800 = vmatpush1.msra.mxu1 %v13281_v41  ;;  %v42046_v41 = vld [vmem:[#allocation38_spill] sm:$0xff]  ;;  %v42047_v10 = vld [vmem:[#allocation36_spill] sm:$0xff] }
 0x7b4   : > { %14738 = vmatprep.subr.mxu0 %v14566_v49  ;;  %13863 = vmatprep.mubr.f32.mxu1 %v41945_v0  ;;  %v15225_v20 = vsel %vm3032_vm8, %v42047_v10, %v42046_v41  ;;  %v14567_v49 = vsel %vm2376_vm7, %v37336_v42, %v42045_v11 }
 0x7b5   : > { %14660 = vmatprep.mubr.f32.mxu0 %v41945_v0  ;;  %33563 = vmatmul.mubr.msk.f32.vlgmr.msra.gmra.mrb[22].mxu1 %vm474_vm4, %v37524_v23  ;;  %v13913_v23 = vsel %vm1720_vm6, %v37372_v54, %v37374_v30  ;;  %v13916_v54 = vsel %vm1720_vm6, %v37428_v38, %v37451_v14  ;;  %v42040_v14 = vld [vmem:[#allocation23_spill] sm:$0xff] }
 0x7b6   : > { %14012 = vmatprep.subr.mxu1 %v13909_v26  ;;  %33574 = vmatmul.mubr.msk.f32.vlgmr.msra.gmra.mrb[16].mxu0 %vm474_vm4, %v37702_v47  ;;  %v37719_v51 = vpop.permute.xlu1 %16498  ;;  %v37721_v39 = vpop.permute.xlu0 %16492  ;;  %v15216_v50 = vsel %vm3032_vm8, %v42040_v14, %v42039_v4  ;;  %v42055_v14 = vld [vmem:[#allocation26_spill] sm:$0xff] }
 0x7b7   : > { %14739 = vmatpush1.msra.mxu0 %v14565_v1  ;;  %14013 = vmatpush1.msra.mxu1 %v13908_v45 }
 0x7b8   : > { %14880 = vmatprep.subr.mxu0 %v14570_v44  ;;  %14154 = vmatprep.subr.mxu1 %v13913_v23  ;;  %v42049_v44 = vld [vmem:[#allocation44_spill] sm:$0xff] }
 0x7b9   : > { %14076 = vmatprep.mubr.f32.mxu1 %v41945_v0  ;;  %14802 = vmatprep.mubr.f32.mxu0 %v41945_v0  ;;  %v14572_v23 = vsel %vm2376_vm7, %v42049_v44, %v42037_v25 }
 0x7ba   : > { %33566 = vmatmul.mubr.msk.f32.vlgmr.msra.gmra.mrb[16].mxu1 %vm474_vm4, %v37608_v33  ;;  %33576 = vmatmul.mubr.msk.f32.vlgmr.msra.gmra.mrb[18].mxu0 %vm474_vm4, %v37702_v47  ;;  %v13903_v52 = vpop.permute.xlu1 %13902  ;;  %v37741_v30 = vpop.permute.xlu0 %16500 }
 0x7bb   : > { %14155 = vmatpush1.msra.mxu1 %v13912_v5  ;;  %14881 = vmatpush1.msra.mxu0 %v14569_v8  ;;  %v13921_v18 = vsel %vm1720_vm6, %v13903_v52, %v37548_v19  ;;  %v42038_v19 = vld [vmem:[#allocation31_spill] sm:$0xff]  ;;  %v13920_v38 = vsel %vm1720_vm6, %v37531_v12, %v13903_v52  ;;  %v15221_v12 = vsel %vm3032_vm8, %v42043_v43, %v42042_v55  ;;  %v42050_v5 = vld [vmem:[#allocation45_spill] sm:$0xff]  ;;  %v42051_v52 = vld [vmem:[#allocation46_spill] sm:$0xff] }
 0x7bc   : > { %14296 = vmatprep.subr.mxu1 %v13917_v32  ;;  %15022 = vmatprep.subr.mxu0 %v14574_v37  ;;  %v15217_v34 = vsel %vm3032_vm8, %v42039_v4, %v42038_v19  ;;  %v15229_v42 = vsel %vm3032_vm8, %v42050_v5, %v37562_v16  ;;  %v14571_v8 = vsel %vm2376_vm7, %v37426_v6, %v42049_v44  ;;  %v42054_v4 = vld [vmem:[#allocation24_spill] sm:$0xff] }
 0x7bd   : > { %14218 = vmatprep.mubr.f32.mxu1 %v41945_v0  ;;  %14944 = vmatprep.mubr.f32.mxu0 %v41945_v0  ;;  %v15228_v32 = vsel %vm3032_vm8, %v42051_v52, %v42050_v5  ;;  %v15883_v5 = vsel %vm3688_vm9, %v37632_v57, %v37654_v63 }
 0x7be   : > { %33568 = vmatmul.mubr.msk.f32.vlgmr.msra.gmra.mrb[18].mxu1 %vm474_vm4, %v37608_v33  ;;  %33578 = vmatmul.mubr.msk.f32.vlgmr.msra.gmra.mrb[20].mxu0 %vm474_vm4, %v37702_v47  ;;  %v37763_v48 = vpop.permute.xlu1 %16502  ;;  %v37765_v31 = vpop.permute.xlu0 %16504 }
 0x7bf   : > { %14297 = vmatpush1.msra.mxu1 %v13916_v54  ;;  %15023 = vmatpush1.msra.mxu0 %v14573_v35  ;;  %v42053_v54 = vld [vmem:[#allocation34_spill] sm:$0xff] }
 0x7c0   : > { %15251 = vmatprep.subr.mxu0 %v15217_v34  ;;  %14438 = vmatprep.subr.mxu1 %v13921_v18  ;;  %v42052_v18 = vld [vmem:[#allocation25_spill] sm:$0xff]  ;;  %v15871_v34 = vsel %vm3688_vm9, %v42054_v4, %v42053_v54  ;;  %v42062_v4 = vld [vmem:[#allocation35_spill] sm:$0xff] }
 0x7c1   : > { %14360 = vmatprep.mubr.f32.mxu1 %v41945_v0  ;;  %15086 = vmatprep.mubr.f32.mxu0 %v41945_v0  ;;  %v15872_v25 = vsel %vm3688_vm9, %v42053_v54, %v42052_v18 }
 0x7c2   : > { %33570 = vmatmul.mubr.msk.f32.vlgmr.msra.gmra.mrb[20].mxu1 %vm474_vm4, %v37608_v33  ;;  %33580 = vmatmul.mubr.msk.f32.vlgmr.msra.gmra.mrb[22].mxu0 %vm474_vm4, %v37702_v47  ;;  %v37781_v40 = vpop.permute.xlu1 %16506  ;;  %v37783_v24 = vpop.permute.xlu0 %16508 }
 0x7c3   : > { %14439 = vmatpush1.msra.mxu1 %v13920_v38  ;;  %15252 = vmatpush1.msra.mxu0 %v15216_v50 }
 0x7c4   : > { %14667 = vmatprep.subr.mxu1 %v14564_v46  ;;  %15393 = vmatprep.subr.mxu0 %v15221_v12  ;;  %v42057_v46 = vld [vmem:[#allocation40_spill] sm:$0xff]  ;;  %v42058_v12 = vld [vmem:[#allocation33_spill] sm:$0xff] }
 0x7c5   : > { %14502 = vmatprep.mubr.f32.mxu1 %v41945_v0  ;;  %15315 = vmatprep.mubr.f32.mxu0 %v41945_v0  ;;  %v15219_v43 = vsel %vm3032_vm8, %v42057_v46, %v42044_v21 }
 0x7c6   : > { %33572 = vmatmul.mubr.msk.f32.vlgmr.msra.gmra.mrb[22].mxu1 %vm474_vm4, %v37608_v33  ;;  %33583 = vmatmul.mubr.msk.f32.vlgmr.msra.gmra.mrb[16].mxu0 %vm474_vm4, %v37794_v15  ;;  %v37808_v56 = vpop.permute.xlu1 %16510  ;;  %v37810_v2 = vpop.permute.xlu0 %16512  ;;  %v14568_v33 = vsel %vm2376_vm7, %v42045_v11, %v37380_v7  ;;  %v42048_v7 = vld [vmem:[#allocation28_spill] sm:$0xff] }
 0x7c7   : > { %14668 = vmatpush1.msra.mxu1 %v14563_v62  ;;  %15394 = vmatpush1.msra.mxu0 %v15220_v61  ;;  %v15224_v26 = vsel %vm3032_vm8, %v42048_v7, %v42047_v10  ;;  %v15218_v61 = vsel %vm3032_vm8, %v42038_v19, %v42057_v46 }
 0x7c8   : > { %14809 = vmatprep.subr.mxu1 %v14568_v33  ;;  %15535 = vmatprep.subr.mxu0 %v15225_v20  ;;  %v42059_v33 = vld [vmem:[#allocation30_spill] sm:$0xff]  ;;  %v15879_v20 = vsel %vm3688_vm9, %v37578_v28, %v37610_v17 }
 0x7c9   : > { %14731 = vmatprep.mubr.f32.mxu1 %v41945_v0  ;;  %15457 = vmatprep.mubr.f32.mxu0 %v41945_v0  ;;  %v15223_v10 = vsel %vm3032_vm8, %v42059_v33, %v42048_v7  ;;  %v15222_v19 = vsel %vm3032_vm8, %v42042_v55, %v42059_v33  ;;  %v15884_v55 = vsel %vm3688_vm9, %v37654_v63, %v37652_v60 }
 0x7ca   : > { %33575 = vmatmul.mubr.msk.f32.vlgmr.msra.gmra.mrb[16].mxu1 %vm474_vm4, %v37702_v47  ;;  %33585 = vmatmul.mubr.msk.f32.vlgmr.msra.gmra.mrb[18].mxu0 %vm474_vm4, %v37794_v15  ;;  %v37830_v1 = vpop.permute.xlu1 %16514  ;;  %v37832_v45 = vpop.permute.xlu0 %16516  ;;  %v16526_v63 = vsel %vm4344_vm10, %v37721_v39, %v37694_v9 }
 0x7cb   : > { %14810 = vmatpush1.msra.mxu1 %v14567_v49  ;;  %15536 = vmatpush1.msra.mxu0 %v15224_v26  ;;  %v42060_v26 = vld [vmem:[#allocation43_spill] sm:$0xff] }
 0x7cc   : > { %14951 = vmatprep.subr.mxu1 %v14572_v23  ;;  %15677 = vmatprep.subr.mxu0 %v15229_v42  ;;  %v15227_v44 = vsel %vm3032_vm8, %v42060_v26, %v42051_v52  ;;  %v15226_v23 = vsel %vm3032_vm8, %v42046_v41, %v42060_v26 }
 0x7cd   : > { %14873 = vmatprep.mubr.f32.mxu1 %v41945_v0  ;;  %15599 = vmatprep.mubr.f32.mxu0 %v41945_v0 }
 0x7ce   : > { %33577 = vmatmul.mubr.msk.f32.vlgmr.msra.gmra.mrb[18].mxu1 %vm474_vm4, %v37702_v47  ;;  %33587 = vmatmul.mubr.msk.f32.vlgmr.msra.gmra.mrb[20].mxu0 %vm474_vm4, %v37794_v15  ;;  %v37852_v59 = vpop.permute.xlu1 %16518  ;;  %v14558_v37 = vpop.permute.xlu0 %14557 }
 0x7cf   : > { %14952 = vmatpush1.msra.mxu1 %v14571_v8  ;;  %15678 = vmatpush1.msra.mxu0 %v15228_v32  ;;  %v14576_v35 = vsel %vm2376_vm7, %v14558_v37, %v37546_v58  ;;  %v14575_v6 = vsel %vm2376_vm7, %v37529_v29, %v14558_v37  ;;  %v42056_v29 = vld [vmem:[#allocation49_spill] sm:$0xff]  ;;  %v42061_v37 = vld [vmem:[#allocation48_spill] sm:$0xff] }
 0x7d0   : > { %15906 = vmatprep.subr.mxu0 %v15872_v25  ;;  %15015 = vmatprep.mubr.f32.mxu1 %v41945_v0  ;;  %v15876_v50 = vsel %vm3688_vm9, %v42056_v29, %v42055_v14  ;;  %v15875_v62 = vsel %vm3688_vm9, %v42058_v12, %v42056_v29  ;;  %v15874_v54 = vsel %vm3688_vm9, %v42061_v37, %v42058_v12 }
 0x7d1   : > { %15741 = vmatprep.mubr.f32.mxu0 %v41945_v0  ;;  %15093 = vmatprep.subr.mxu1 %v14576_v35  ;;  %v15873_v39 = vsel %vm3688_vm9, %v42052_v18, %v42061_v37  ;;  %v16530_v25 = vsel %vm4344_vm10, %v37741_v30, %v37763_v48  ;;  %v16535_v18 = vsel %vm4344_vm10, %v37808_v56, %v37810_v2 }
 0x7d2   : > { %33579 = vmatmul.mubr.msk.f32.vlgmr.msra.gmra.mrb[20].mxu1 %vm474_vm4, %v37702_v47  ;;  %33589 = vmatmul.mubr.msk.f32.vlgmr.msra.gmra.mrb[22].mxu0 %vm474_vm4, %v37794_v15  ;;  %v37870_v58 = vpop.permute.xlu1 %17149  ;;  %v37872_v38 = vpop.permute.xlu0 %16520 }
 0x7d3   : > { %15907 = vmatpush1.msra.mxu0 %v15871_v34  ;;  %15094 = vmatpush1.msra.mxu1 %v14575_v6 }
 0x7d4   : > { %16048 = vmatprep.subr.mxu0 %v15876_v50  ;;  %15157 = vmatprep.mubr.f32.mxu1 %v41945_v0  ;;  %v15882_v50 = vsel %vm3688_vm9, %v37634_v36, %v37632_v57  ;;  %v16538_v57 = vsel %vm4344_vm10, %v37832_v45, %v37852_v59 }
 0x7d5   : > { %15970 = vmatprep.mubr.f32.mxu0 %v41945_v0  ;;  %15322 = vmatprep.subr.mxu1 %v15219_v43 }
 0x7d6   : > { %33581 = vmatmul.mubr.msk.f32.vlgmr.msra.gmra.mrb[22].mxu1 %vm474_vm4, %v37702_v47  ;;  %33592 = vmatmul.mubr.msk.f32.vlgmr.msra.gmra.mrb[16].mxu0 %vm474_vm4, %v37880_v53  ;;  %v37897_v11 = vpop.permute.xlu1 %17147  ;;  %v37899_v21 = vpop.permute.xlu0 %16524  ;;  %v15880_v47 = vsel %vm3688_vm9, %v37610_v17, %v37603_v3 }
 0x7d7   : > { %16049 = vmatpush1.msra.mxu0 %v15875_v62  ;;  %15323 = vmatpush1.msra.mxu1 %v15218_v61  ;;  %v16529_v61 = vsel %vm4344_vm10, %v37719_v51, %v37741_v30 }
 0x7d8   : > { %16190 = vmatprep.subr.mxu0 %v15880_v47  ;;  %15464 = vmatprep.subr.mxu1 %v15223_v10  ;;  %v16528_v47 = vsel %vm4344_vm10, %v37692_v13, %v37719_v51  ;;  %v16532_v51 = vsel %vm4344_vm10, %v37765_v31, %v37781_v40 }
 0x7d9   : > { %15386 = vmatprep.mubr.f32.mxu1 %v41945_v0  ;;  %16112 = vmatprep.mubr.f32.mxu0 %v41945_v0 }
 0x7da   : > { %33584 = vmatmul.mubr.msk.f32.vlgmr.msra.gmra.mrb[16].mxu1 %vm474_vm4, %v37794_v15  ;;  %33594 = vmatmul.mubr.msk.f32.vlgmr.msra.gmra.mrb[18].mxu0 %vm474_vm4, %v37880_v53  ;;  %v15213_v49 = vpop.permute.xlu1 %15212  ;;  %v37919_v7 = vpop.permute.xlu0 %17151 }
 0x7db   : > { %15465 = vmatpush1.msra.mxu1 %v15222_v19  ;;  %16191 = vmatpush1.msra.mxu0 %v15879_v20  ;;  %v15231_v17 = vsel %vm3032_vm8, %v15213_v49, %v37580_v22  ;;  %v16527_v22 = vsel %vm4344_vm10, %v37694_v9, %v37692_v13  ;;  %v15230_v41 = vsel %vm3032_vm8, %v37562_v16, %v15213_v49  ;;  %v37972_v16 = vld [vmem:[%s41776_s2 + $0xc0] sm:$0xff] }
 0x7dc   : > { %15606 = vmatprep.subr.mxu1 %v15227_v44  ;;  %16332 = vmatprep.subr.mxu0 %v15884_v55  ;;  %v16531_v9 = vsel %vm4344_vm10, %v37763_v48, %v37765_v31  ;;  %v15877_v48 = vsel %vm3688_vm9, %v42055_v14, %v42062_v4  ;;  %v16539_v14 = vsel %vm4344_vm10, %v37852_v59, %v37872_v38 }
 0x7dd   : > { %15528 = vmatprep.mubr.f32.mxu1 %v41945_v0  ;;  %16254 = vmatprep.mubr.f32.mxu0 %v41945_v0  ;;  %v17182_v12 = vsel %vm5000_vm11, %v37870_v58, %v37919_v7  ;;  %v16537_v49 = vsel %vm4344_vm10, %v37830_v1, %v37832_v45 }
 0x7de   : > { %33586 = vmatmul.mubr.msk.f32.vlgmr.msra.gmra.mrb[18].mxu1 %vm474_vm4, %v37794_v15  ;;  %33596 = vmatmul.mubr.msk.f32.vlgmr.msra.gmra.mrb[20].mxu0 %vm474_vm4, %v37880_v53  ;;  %v37941_v42 = vpop.permute.xlu1 %17155  ;;  %v37943_v8 = vpop.permute.xlu0 %17153 }
 0x7df   : > { %15607 = vmatpush1.msra.mxu1 %v15226_v23  ;;  %16333 = vmatpush1.msra.mxu0 %v15883_v5  ;;  %v38129_v23 = vld [vmem:[%s41776_s2 + $0xd0] sm:$0xff] }
 0x7e0   : > { %16561 = vmatprep.subr.mxu0 %v16527_v22  ;;  %15748 = vmatprep.subr.mxu1 %v15231_v17  ;;  %v17184_v17 = vsel %vm5000_vm11, %v37943_v8, %v37941_v42 }
 0x7e1   : > { %15670 = vmatprep.mubr.f32.mxu1 %v41945_v0  ;;  %16396 = vmatprep.mubr.f32.mxu0 %v41945_v0 }
 0x7e2   : > { %33588 = vmatmul.mubr.msk.f32.vlgmr.msra.gmra.mrb[20].mxu1 %vm474_vm4, %v37794_v15  ;;  %33598 = vmatmul.mubr.msk.f32.vlgmr.msra.gmra.mrb[22].mxu0 %vm474_vm4, %v37880_v53  ;;  %v37959_v52 = vpop.permute.xlu1 %17159  ;;  %v37961_v32 = vpop.permute.xlu0 %17157 }
 0x7e3   : > { %15749 = vmatpush1.msra.mxu1 %v15230_v41  ;;  %16562 = vmatpush1.msra.mxu0 %v16526_v63 }
 0x7e4   : > { %15977 = vmatprep.subr.mxu1 %v15874_v54  ;;  %16703 = vmatprep.subr.mxu0 %v16531_v9 }
 0x7e5   : > { %15812 = vmatprep.mubr.f32.mxu1 %v41945_v0  ;;  %16625 = vmatprep.mubr.f32.mxu0 %v41945_v0 }
 0x7e6   : > { %33590 = vmatmul.mubr.msk.f32.vlgmr.msra.gmra.mrb[22].mxu1 %vm474_vm4, %v37794_v15  ;;  %33601 = vmatmul.mubr.msk.f32.vlgmr.msra.gmra.mrb[16].mxu0 %vm474_vm4, %v37972_v16  ;;  %v37986_v35 = vpop.permute.xlu1 %17163  ;;  %v37988_v6 = vpop.permute.xlu0 %17161  ;;  %v15878_v15 = vsel %vm3688_vm9, %v42062_v4, %v37578_v28  ;;  %v16534_v28 = vsel %vm4344_vm10, %v37783_v24, %v37808_v56  ;;  %v15881_v56 = vsel %vm3688_vm9, %v37603_v3, %v37634_v36 }
 0x7e7   : > { %15978 = vmatpush1.msra.mxu1 %v15873_v39  ;;  %16704 = vmatpush1.msra.mxu0 %v16530_v25  ;;  %v17181_v36 = vsel %vm5000_vm11, %v37897_v11, %v37870_v58  ;;  %v38056_v58 = vld [vmem:[%s41776_s2 + $0xc8] sm:$0xff]  ;;  %v17185_v11 = vsel %vm5000_vm11, %v37941_v42, %v37961_v32  ;;  %v17188_v22 = vsel %vm5000_vm11, %v37988_v6, %v37986_v35 }
 0x7e8   : > { %16119 = vmatprep.subr.mxu1 %v15878_v15  ;;  %16845 = vmatprep.subr.mxu0 %v16535_v18 }
 0x7e9   : > { %16041 = vmatprep.mubr.f32.mxu1 %v41945_v0  ;;  %16767 = vmatprep.mubr.f32.mxu0 %v41945_v0 }
 0x7ea   : > { %33593 = vmatmul.mubr.msk.f32.vlgmr.msra.gmra.mrb[16].mxu1 %vm474_vm4, %v37880_v53  ;;  %33603 = vmatmul.mubr.msk.f32.vlgmr.msra.gmra.mrb[18].mxu0 %vm474_vm4, %v37972_v16  ;;  %v38008_v34 = vpop.permute.xlu1 %17167  ;;  %v17166_v29 = vpop.permute.xlu0 %17165 }
 0x7eb   : > { %16120 = vmatpush1.msra.mxu1 %v15877_v48  ;;  %16846 = vmatpush1.msra.mxu0 %v16534_v28  ;;  %v17190_v10 = vsel %vm5000_vm11, %v17166_v29, %v38008_v34 }
 0x7ec   : > { %16261 = vmatprep.subr.mxu1 %v15882_v50  ;;  %16987 = vmatprep.subr.mxu0 %v16539_v14 }
 0x7ed   : > { %16183 = vmatprep.mubr.f32.mxu1 %v41945_v0  ;;  %16909 = vmatprep.mubr.f32.mxu0 %v41945_v0 }
 0x7ee   : > { %33595 = vmatmul.mubr.msk.f32.vlgmr.msra.gmra.mrb[18].mxu1 %vm474_vm4, %v37880_v53  ;;  %33605 = vmatmul.mubr.msk.f32.vlgmr.msra.gmra.mrb[20].mxu0 %vm474_vm4, %v37972_v16  ;;  %v38028_v46 = vpop.permute.xlu1 %17171  ;;  %v15868_v43 = vpop.permute.xlu0 %15867 }
 0x7ef   : > { %16262 = vmatpush1.msra.mxu1 %v15881_v56  ;;  %16988 = vmatpush1.msra.mxu0 %v16538_v57  ;;  %v15886_v62 = vsel %vm3688_vm9, %v15868_v43, %v37673_v27  ;;  %v15885_v3 = vsel %vm3688_vm9, %v37652_v60, %v15868_v43  ;;  %v17186_v60 = vsel %vm5000_vm11, %v37961_v32, %v37959_v52 }
 0x7f0   : > { %17216 = vmatprep.subr.mxu0 %v17182_v12  ;;  %16325 = vmatprep.mubr.f32.mxu1 %v41945_v0 }
 0x7f1   : > { %17051 = vmatprep.mubr.f32.mxu0 %v41945_v0  ;;  %16403 = vmatprep.subr.mxu1 %v15886_v62 }
 0x7f2   : > { %33597 = vmatmul.mubr.msk.f32.vlgmr.msra.gmra.mrb[20].mxu1 %vm474_vm4, %v37880_v53  ;;  %33607 = vmatmul.mubr.msk.f32.vlgmr.msra.gmra.mrb[22].mxu0 %vm474_vm4, %v37972_v16  ;;  %v38046_v27 = vpop.permute.xlu1 %17175  ;;  %v38048_v59 = vpop.permute.xlu0 %17169 }
 0x7f3   : > { %17217 = vmatpush1.msra.mxu0 %v17181_v36  ;;  %16404 = vmatpush1.msra.mxu1 %v15885_v3  ;;  %v17192_v37 = vsel %vm5000_vm11, %v38048_v59, %v38028_v46 }
 0x7f4   : > { %17358 = vmatprep.subr.mxu0 %v17186_v60  ;;  %16467 = vmatprep.mubr.f32.mxu1 %v41945_v0 }
 0x7f5   : > { %17280 = vmatprep.mubr.f32.mxu0 %v41945_v0  ;;  %16632 = vmatprep.subr.mxu1 %v16529_v61 }
 0x7f6   : > { %33599 = vmatmul.mubr.msk.f32.vlgmr.msra.gmra.mrb[22].mxu1 %vm474_vm4, %v37880_v53  ;;  %33610 = vmatmul.mubr.msk.f32.vlgmr.msra.gmra.mrb[16].mxu0 %vm474_vm4, %v38056_v58  ;;  %v38073_v33 = vpop.permute.xlu1 %17179  ;;  %v17174_v30 = vpop.permute.xlu0 %17173  ;;  %v16533_v53 = vsel %vm4344_vm10, %v37781_v40, %v37783_v24  ;;  %v17189_v24 = vsel %vm5000_vm11, %v37986_v35, %v17166_v29  ;;  %v16536_v40 = vsel %vm4344_vm10, %v37810_v2, %v37830_v1 }
 0x7f7   : > { %17359 = vmatpush1.msra.mxu0 %v17185_v11  ;;  %16633 = vmatpush1.msra.mxu1 %v16528_v47  ;;  %v17194_v13 = vsel %vm5000_vm11, %v17174_v30, %v38046_v27  ;;  %v17193_v45 = vsel %vm5000_vm11, %v38028_v46, %v17174_v30 }
 0x7f8   : > { %17500 = vmatprep.subr.mxu0 %v17190_v10  ;;  %16774 = vmatprep.subr.mxu1 %v16533_v53  ;;  %v42064_v10 = vld [vmem:[#allocation7_spill] sm:$0xff] }
 0x7f9   : > { %16696 = vmatprep.mubr.f32.mxu1 %v41945_v0  ;;  %17422 = vmatprep.mubr.f32.mxu0 %v41945_v0 }
 0x7fa   : > { %33602 = vmatmul.mubr.msk.f32.vlgmr.msra.gmra.mrb[16].mxu1 %vm474_vm4, %v37972_v16  ;;  %33612 = vmatmul.mubr.msk.f32.vlgmr.msra.gmra.mrb[18].mxu0 %vm474_vm4, %v38056_v58  ;;  %v16523_v19 = vpop.permute.xlu1 %16522  ;;  %v17805_v20 = vpop.permute.xlu0 %17804 }
 0x7fb   : > { %16775 = vmatpush1.msra.mxu1 %v16532_v51  ;;  %17501 = vmatpush1.msra.mxu0 %v17189_v24  ;;  %v16541_v31 = vsel %vm4344_vm10, %v16523_v19, %v37899_v21  ;;  %v16540_v1 = vsel %vm4344_vm10, %v37872_v38, %v16523_v19  ;;  %v17183_v38 = vsel %vm5000_vm11, %v37919_v7, %v37943_v8 }
 0x7fc   : > { %16916 = vmatprep.subr.mxu1 %v16537_v49  ;;  %17642 = vmatprep.subr.mxu0 %v17194_v13  ;;  %v17187_v7 = vsel %vm5000_vm11, %v37959_v52, %v37988_v6  ;;  %v17191_v52 = vsel %vm5000_vm11, %v38008_v34, %v38048_v59 }
 0x7fd   : > { %16838 = vmatprep.mubr.f32.mxu1 %v41945_v0  ;;  %17564 = vmatprep.mubr.f32.mxu0 %v41945_v0 }
 0x7fe   : > { %33604 = vmatmul.mubr.msk.f32.vlgmr.msra.gmra.mrb[18].mxu1 %vm474_vm4, %v37972_v16  ;;  %33614 = vmatmul.mubr.msk.f32.vlgmr.msra.gmra.mrb[20].mxu0 %vm474_vm4, %v38056_v58  ;;  %v38109_v26 = vpop.permute.xlu1 %17806  ;;  %v17803_v44 = vpop.permute.xlu0 %17802 }
 0x7ff   : > { %16917 = vmatpush1.msra.mxu1 %v16536_v40  ;;  %17643 = vmatpush1.msra.mxu0 %v17193_v45  ;;  %v17837_v21 = vsel %vm5656_vm12, %v17805_v20, %v38109_v26  ;;  %v17836_v2 = vsel %vm5656_vm12, %v17803_v44, %v17805_v20 }
 0x800   : > { %17058 = vmatprep.subr.mxu1 %v16541_v31  ;;  %16980 = vmatprep.mubr.f32.mxu1 %v41945_v0 }
 0x801   : > { %17706 = vmatprep.mubr.f32.mxu0 %v41945_v0  ;;  %17871 = vmatprep.subr.mxu0 %v17837_v21 }
 0x802   : > { %33606 = vmatmul.mubr.msk.f32.vlgmr.msra.gmra.mrb[20].mxu1 %vm474_vm4, %v37972_v16  ;;  %33616 = vmatmul.mubr.msk.f32.vlgmr.msra.gmra.mrb[22].mxu0 %vm474_vm4, %v38056_v58  ;;  %v17809_v55 = vpop.permute.xlu1 %17808 }
 0x803   : > { %17059 = vmatpush1.msra.mxu1 %v16540_v1  ;;  %17122 = vmatprep.mubr.f32.mxu1 %v41945_v0  ;;  %v17811_v5 = vpop.permute.xlu0 %17810  ;;  %v17838_v15 = vsel %vm5656_vm12, %v38109_v26, %v17809_v55 }
 0x804   : > { %17287 = vmatprep.subr.mxu1 %v17184_v17  ;;  %17872 = vmatpush1.msra.mxu0 %v17836_v2  ;;  %v17839_v35 = vsel %vm5656_vm12, %v17809_v55, %v17811_v5  ;;  %v42065_v55 = vld [vmem:[#allocation8_spill] sm:$0xff] }
 0x805   : > { %17935 = vmatprep.mubr.f32.mxu0 %v41945_v0 }
 0x806   : > { %33608 = vmatmul.mubr.msk.f32.vlgmr.msra.gmra.mrb[22].mxu1 %vm474_vm4, %v37972_v16  ;;  %33619 = vmatmul.mubr.msk.f32.vlgmr.msra.gmra.mrb[16].mxu0 %vm474_vm4, %v38129_v23  ;;  %v17813_v42 = vpop.permute.xlu1 %17812 }
 0x807   : > { %17288 = vmatpush1.msra.mxu1 %v17183_v38  ;;  %17351 = vmatprep.mubr.f32.mxu1 %v41945_v0  ;;  %v17815_v63 = vpop.permute.xlu0 %17814  ;;  %v17840_v41 = vsel %vm5656_vm12, %v17811_v5, %v17813_v42 }
 0x808   : > { %17429 = vmatprep.subr.mxu1 %v17188_v22  ;;  %v17841_v32 = vsel %vm5656_vm12, %v17813_v42, %v17815_v63  ;;  %18077 = vmatprep.mubr.f32.mxu0 %v41945_v0  ;;  %v42066_v42 = vld [vmem:[#allocation9_spill] sm:$0xff] }
 0x809   : > { %18013 = vmatprep.subr.mxu0 %v17841_v32  ;;  %v42067_v32 = vld [vmem:[#allocation10_spill] sm:$0xff] }
 0x80a   : > { %33611 = vmatmul.mubr.msk.f32.vlgmr.msra.gmra.mrb[16].mxu1 %vm474_vm4, %v38056_v58  ;;  %18014 = vmatpush1.msra.mxu0 %v17840_v41  ;;  %v17817_v8 = vpop.permute.xlu1 %17816 }
 0x80b   : > { %17430 = vmatpush1.msra.mxu1 %v17187_v7  ;;  %17493 = vmatprep.mubr.f32.mxu1 %v41945_v0  ;;  %v17819_v54 = vpop.permute.xlu0 %17818  ;;  %v17842_v34 = vsel %vm5656_vm12, %v17815_v63, %v17817_v8 }
 0x80c   : > { %17571 = vmatprep.subr.mxu1 %v17192_v37  ;;  %33621 = vmatmul.mubr.msk.f32.vlgmr.msra.gmra.mrb[18].mxu0 %vm474_vm4, %v38129_v23  ;;  %v17843_v48 = vsel %vm5656_vm12, %v17817_v8, %v17819_v54 }
 0x80d   : > { %18219 = vmatprep.mubr.f32.mxu0 %v41945_v0 }
 0x80e   : > { %33613 = vmatmul.mubr.msk.f32.vlgmr.msra.gmra.mrb[18].mxu1 %vm474_vm4, %v38056_v58  ;;  %v17821_v16 = vpop.permute.xlu1 %17820 }
 0x80f   : > { %17572 = vmatpush1.msra.mxu1 %v17191_v52  ;;  %17635 = vmatprep.mubr.f32.mxu1 %v41945_v0  ;;  %v17178_v9 = vpop.permute.xlu0 %17177  ;;  %v17844_v28 = vsel %vm5656_vm12, %v17819_v54, %v17821_v16 }
 0x810   : > { %v17196_v39 = vsel %vm5000_vm11, %v17178_v9, %v38073_v33  ;;  %v17195_v25 = vsel %vm5000_vm11, %v38046_v27, %v17178_v9  ;;  %v42063_v33 = vld [vmem:[#allocation6_spill] sm:$0xff]  ;;  %v42068_v9 = vld [vmem:[#allocation11_spill] sm:$0xff] }
 0x811   : > { %17713 = vmatprep.subr.mxu1 %v17196_v39 }
 0x812   : > { %33615 = vmatmul.mubr.msk.f32.vlgmr.msra.gmra.mrb[20].mxu1 %vm474_vm4, %v38056_v58 }
 0x813   : > { %17714 = vmatpush1.msra.mxu1 %v17195_v25  ;;  %17777 = vmatprep.mubr.f32.mxu1 %v41945_v0 }
 0x814   : > { %17942 = vmatprep.subr.mxu1 %v17839_v35  ;;  %v17825_v4 = vpop.permute.xlu1 %17824 }
 0x815   : > { %v17823_v6 = vpop.permute.xlu0 %17822 }
 0x816   : > { %33617 = vmatmul.mubr.msk.f32.vlgmr.msra.gmra.mrb[22].mxu1 %vm474_vm4, %v38056_v58  ;;  %v17845_v18 = vsel %vm5656_vm12, %v17821_v16, %v17823_v6  ;;  %v17846_v56 = vsel %vm5656_vm12, %v17823_v6, %v17825_v4 }
 0x817   : > { %17943 = vmatpush1.msra.mxu1 %v17838_v15  ;;  %18155 = vmatprep.subr.mxu0 %v17845_v18 }
 0x818   : > { %18084 = vmatprep.subr.mxu1 %v17843_v48  ;;  %18006 = vmatprep.mubr.f32.mxu1 %v41945_v0 }
 0x819   : > { %18156 = vmatpush1.msra.mxu0 %v17844_v28 }
 0x81a   : > { %33620 = vmatmul.mubr.msk.f32.vlgmr.msra.gmra.mrb[16].mxu1 %vm474_vm4, %v38129_v23  ;;  %33623 = vmatmul.mubr.msk.f32.vlgmr.msra.gmra.mrb[20].mxu0 %vm474_vm4, %v38129_v23  ;;  %v17827_v29 = vpop.permute.xlu0 %17826  ;;  %v17829_v14 = vpop.permute.xlu1 %17828 }
 0x81b   : > { %18085 = vmatpush1.msra.mxu1 %v17842_v34  ;;  %v17847_v50 = vsel %vm5656_vm12, %v17825_v4, %v17827_v29  ;;  %18148 = vmatprep.mubr.f32.mxu1 %v41945_v0  ;;  %v17848_v43 = vsel %vm5656_vm12, %v17827_v29, %v17829_v14  ;;  %v42069_v4 = vld [vmem:[#allocation12_spill] sm:$0xff]  ;;  %v42070_v34 = vld [vmem:[#allocation13_spill] sm:$0xff] }
 0x81c   : > { %18226 = vmatprep.subr.mxu1 %v17847_v50  ;;  %18361 = vmatprep.mubr.f32.mxu0 %v41945_v0 }
 0x81e   : > { %33622 = vmatmul.mubr.msk.f32.vlgmr.msra.gmra.mrb[18].mxu1 %vm474_vm4, %v38129_v23  ;;  %v17833_v12 = vpop.permute.xlu1 %17832 }
 0x81f   : > { %18227 = vmatpush1.msra.mxu1 %v17846_v56  ;;  %v17831_v57 = vpop.permute.xlu0 %17830  ;;  %18290 = vmatprep.mubr.f32.mxu1 %v41945_v0  ;;  %v42071_v56 = vld [vmem:[#allocation14_spill] sm:$0xff] }
 0x820   : > { %v17849_v46 = vsel %vm5656_vm12, %v17829_v14, %v17831_v57  ;;  %v17850_v36 = vsel %vm5656_vm12, %v17831_v57, %v17833_v12 }
 0x821   : > { %18297 = vmatprep.subr.mxu0 %v17849_v46 }
 0x822   : > { %18298 = vmatpush1.msra.mxu0 %v17848_v43  ;;  %33624 = vmatmul.mubr.msk.f32.vlgmr.msra.gmra.mrb[20].mxu1 %vm474_vm4, %v38129_v23 }
 0x823   : > { %33625 = vmatmul.mubr.msk.f32.vlgmr.msra.gmra.mrb[22].mxu0 %vm474_vm4, %v38129_v23  ;;  %v17835_v62 = vpop.permute.xlu0 %17834  ;;  %18432 = vmatprep.mubr.f32.mxu1 %v41945_v0 }
 0x824   : > { %v17851_v3 = vsel %vm5656_vm12, %v17833_v12, %v17835_v62  ;;  %18778 = vmatprep.mubr.f32.mxu0 %v41945_v0  ;;  %v42072_v12 = vld [vmem:[#allocation15_spill] sm:$0xff] }
 0x825   : > { %18368 = vmatprep.subr.mxu1 %v17851_v3 }
 0x826   : > { %18369 = vmatpush1.msra.mxu1 %v17850_v36 }
 0x827   : > { %33626 = vmatmul.mubr.msk.f32.vlgmr.msra.gmra.mrb[22].mxu1 %vm474_vm4, %v38129_v23 }
 0x828   : > { %18849 = vmatprep.mubr.f32.mxu1 %v41945_v0 }
 0x82f   : > { %v38205_v27 = vpop.permute.xlu1 %18459 }
 0x8d9   : > { %v17937_v59 = vpop.f32.mrb[16].mxu0 }
 0x8da   : > { %v18462_v60 = vadd.f32 %v38205_v27, %v17937_v59  ;;  %v17939_v58 = vpop.f32.mrb[17].mxu0  ;;  %v42073_v59 = vld [vmem:[#allocation16_spill] sm:$0xff] }
 0x8db   : > { %v18463_v61 = vadd.f32 %v38205_v27, %v17939_v58 }
 0x8dc   : > { %v18478_v11 = vmax.f32 %v18462_v60, 0.0 }
 0x8dd   : > { %v18479_v47 = vmax.f32 %v18463_v61, 0.0 }
 0x8de   : > { %v18494_v30 = vmul.f32 %v18478_v11, %v42063_v33  ;;  %v42074_v11 = vld [vmem:[#allocation17_spill] sm:$0xff] }
 0x8df   : > { %v18495_v53 = vmul.f32 %v18479_v47, %v42064_v10  ;;  %v18079_v13 = vpop.f32.mrb[18].mxu0 }
 0x8e0   : > { %18526 = vrot.lane.b32.xlu0 %v18494_v30, %s34797_s14  ;;  %v18081_v51 = vpop.f32.mrb[19].mxu0  ;;  %v18466_v20 = vadd.f32 %v38205_v27, %v18079_v13  ;;  %v42075_v13 = vld [vmem:[#allocation18_spill] sm:$0xff] }
 0x8e1   : > { %18528 = vrot.lane.b32.xlu1 %v18495_v53, %s34797_s14  ;;  %v18467_v45 = vadd.f32 %v38205_v27, %v18081_v51 }
 0x8e2   : > { %v18482_v1 = vmax.f32 %v18466_v20, 0.0 }
 0x8e3   : > { %v18483_v38 = vmax.f32 %v18467_v45, 0.0  ;;  %v42078_v45 = vld [vmem:[#allocation21_spill] sm:$0xff] }
 0x8e4   : > { %v18498_v7 = vmul.f32 %v18482_v1, %v42067_v32 }
 0x8e5   : > { %v18499_v16 = vmul.f32 %v18483_v38, %v42068_v9 }
 0x8ed   : > { %v18008_v24 = vpop.f32.mrb[16].mxu1  ;;  %v18221_v19 = vpop.f32.mrb[20].mxu0 }
 0x8ee   : > { %v18464_v49 = vadd.f32 %v38205_v27, %v18008_v24  ;;  %v18010_v31 = vpop.f32.mrb[17].mxu1  ;;  %v18223_v40 = vpop.f32.mrb[21].mxu0  ;;  %v18470_v8 = vadd.f32 %v38205_v27, %v18221_v19  ;;  %v42076_v19 = vld [vmem:[#allocation19_spill] sm:$0xff] }
 0x8ef   : > { %v18465_v26 = vadd.f32 %v38205_v27, %v18010_v31  ;;  %v18471_v39 = vadd.f32 %v38205_v27, %v18223_v40  ;;  %v42077_v31 = vld [vmem:[#allocation20_spill] sm:$0xff] }
 0x8f0   : > { %v18480_v44 = vmax.f32 %v18464_v49, 0.0  ;;  %v18486_v6 = vmax.f32 %v18470_v8, 0.0 }
 0x8f1   : > { %v18481_v21 = vmax.f32 %v18465_v26, 0.0  ;;  %v18150_v2 = vpop.f32.mrb[18].mxu1  ;;  %v18487_v28 = vmax.f32 %v18471_v39, 0.0 }
 0x8f2   : > { %v18496_v17 = vmul.f32 %v18480_v44, %v42065_v55  ;;  %v18468_v23 = vadd.f32 %v38205_v27, %v18150_v2  ;;  %v18152_v5 = vpop.f32.mrb[19].mxu1  ;;  %v18502_v57 = vmul.f32 %v18486_v6, %v42071_v56 }
 0x8f3   : > { %v18497_v22 = vmul.f32 %v18481_v21, %v42066_v42  ;;  %v18469_v63 = vadd.f32 %v38205_v27, %v18152_v5  ;;  %v18503_v62 = vmul.f32 %v18487_v28, %v42072_v12 }
 0x8f4   : > { %18530 = vrot.lane.b32.xlu0 %v18496_v17, %s34797_s14  ;;  %v18484_v37 = vmax.f32 %v18468_v23, 0.0 }
 0x8f5   : > { %18532 = vrot.lane.b32.xlu1 %v18497_v22, %s34797_s14  ;;  %v18292_v41 = vpop.f32.mrb[20].mxu1  ;;  %v18485_v25 = vmax.f32 %v18469_v63, 0.0 }
 0x8f6   : > { %v18363_v54 = vpop.f32.mrb[22].mxu0  ;;  %v18294_v52 = vpop.f32.mrb[21].mxu1  ;;  %v18500_v15 = vmul.f32 %v18484_v37, %v42069_v4  ;;  %v18472_v18 = vadd.f32 %v38205_v27, %v18292_v41 }
 0x8f7   : > { %v18365_v35 = vpop.f32.mrb[23].mxu0  ;;  %v18501_v29 = vmul.f32 %v18485_v25, %v42070_v34  ;;  %v18473_v50 = vadd.f32 %v38205_v27, %v18294_v52  ;;  %v18474_v43 = vadd.f32 %v38205_v27, %v18363_v54 }
 0x8f8   : > { %18534 = vrot.lane.b32.xlu0 %v18498_v7, %s34797_s14  ;;  %v18488_v46 = vmax.f32 %v18472_v18, 0.0  ;;  %v18475_v36 = vadd.f32 %v38205_v27, %v18365_v35 }
 0x8f9   : > { %18536 = vrot.lane.b32.xlu1 %v18499_v16, %s34797_s14  ;;  %v18489_v3 = vmax.f32 %v18473_v50, 0.0  ;;  %v18490_v58 = vmax.f32 %v18474_v43, 0.0 }
 0x8fa   : > { %v18434_v48 = vpop.f32.mrb[22].mxu1  ;;  %v18504_v60 = vmul.f32 %v18488_v46, %v42073_v59  ;;  %v18491_v30 = vmax.f32 %v18475_v36, 0.0 }
 0x8fb   : > { %v18436_v14 = vpop.f32.mrb[23].mxu1  ;;  %v18476_v61 = vadd.f32 %v38205_v27, %v18434_v48  ;;  %v18505_v47 = vmul.f32 %v18489_v3, %v42074_v11  ;;  %v18506_v51 = vmul.f32 %v18490_v58, %v42075_v13 }
 0x8fc   : > { %18538 = vrot.lane.b32.xlu0 %v18500_v15, %s34797_s14  ;;  %v18477_v53 = vadd.f32 %v38205_v27, %v18436_v14  ;;  %v18507_v20 = vmul.f32 %v18491_v30, %v42076_v19 }
 0x8fd   : > { %18540 = vrot.lane.b32.xlu1 %v18501_v29, %s34797_s14  ;;  %v18492_v24 = vmax.f32 %v18476_v61, 0.0  ;;  %v38446_v61 = vld [vmem:[%s41776_s2 + $0xe0] sm:$0xff] }
 0x8fe   : > { %v18493_v49 = vmax.f32 %v18477_v53, 0.0 }
 0x8ff   : > { %v18508_v40 = vmul.f32 %v18492_v24, %v42077_v31 }
 0x900   : > { %18542 = vrot.lane.b32.xlu0 %v18502_v57, %s34797_s14  ;;  %v18509_v26 = vmul.f32 %v18493_v49, %v42078_v45 }
 0x901   : > { %18544 = vrot.lane.b32.xlu1 %v18503_v62, %s34797_s14 }
 0x904   : > { %18546 = vrot.lane.b32.xlu0 %v18504_v60, %s34797_s14 }
 0x905   : > { %18548 = vrot.lane.b32.xlu1 %v18505_v47, %s34797_s14 }
 0x908   : > { %18550 = vrot.lane.b32.xlu0 %v18506_v51, %s34797_s14 }
 0x909   : > { %18552 = vrot.lane.b32.xlu1 %v18507_v20, %s34797_s14 }
 0x90c   : > { %18554 = vrot.lane.b32.xlu0 %v18508_v40, %s34797_s14 }
 0x90d   : > { %18556 = vrot.lane.b32.xlu1 %v18509_v26, %s34797_s14 }
 0x952   : > { %v18527_v27 = vpop.permute.xlu0 %18526 }
 0x953   : > { %18590 = vst.msk [vmem:[#allocation2] sm:$0xff] %vm350_vm2, %v18527_v27  ;;  %v18529_v21 = vpop.permute.xlu1 %18528 }
 0x954   : > { %v38271_v2 = vsel %vm250_vm0, %v18527_v27, %v18529_v21 }
 0x95a   : > { %v38256_v44 = vld [vmem:[#allocation2] sm:$0xff] }
 0x95b   : > { %19282 = vrot.lane.b32.xlu1 %v38256_v44, %s34798_s15  ;;  %18645 = vrot.lane.b32.xlu0 %v38256_v44, %s34799_s16 }
 0x95f   : > { %20576 = vrot.lane.b32.xlu1 %v38256_v44, %s34801_s18  ;;  %19921 = vrot.lane.b32.xlu0 %v38256_v44, %s34800_s17 }
 0x963   : > { %21886 = vrot.lane.b32.xlu1 %v38256_v44, %s34803_s9  ;;  %21231 = vrot.lane.b32.xlu0 %v38256_v44, %s34802_s26 }
 0x966   : > { %v18531_v1 = vpop.permute.xlu0 %18530 }
 0x967   : > { %v38274_v17 = vsel %vm250_vm0, %v18529_v21, %v18531_v1  ;;  %v18533_v23 = vpop.permute.xlu1 %18532  ;;  %18647 = vrot.lane.b32.xlu0 %v38271_v2, %s34799_s16 }
 0x968   : > { %18649 = vrot.lane.b32.xlu1 %v38274_v17, %s34799_s16  ;;  %v38305_v7 = vsel %vm250_vm0, %v18531_v1, %v18533_v23 }
 0x96a   : > { %v18535_v37 = vpop.permute.xlu0 %18534 }
 0x96b   : > { %v18537_v5 = vpop.permute.xlu1 %18536  ;;  %19286 = vrot.lane.b32.xlu0 %v38274_v17, %s34798_s15  ;;  %v38324_v54 = vsel %vm250_vm0, %v18533_v23, %v18535_v37 }
 0x96c   : > { %19284 = vrot.lane.b32.xlu1 %v38271_v2, %s34798_s15  ;;  %v38342_v39 = vsel %vm250_vm0, %v18535_v37, %v18537_v5 }
 0x96e   : > { %v18539_v52 = vpop.permute.xlu0 %18538 }
 0x96f   : > { %v18541_v38 = vpop.permute.xlu1 %18540  ;;  %19923 = vrot.lane.b32.xlu0 %v38271_v2, %s34800_s17  ;;  %v38339_v16 = vsel %vm250_vm0, %v18537_v5, %v18539_v52 }
 0x970   : > { %19925 = vrot.lane.b32.xlu1 %v38274_v17, %s34800_s17  ;;  %v38369_v25 = vsel %vm250_vm0, %v18539_v52, %v18541_v38 }
 0x972   : > { %v18543_v35 = vpop.permute.xlu0 %18542 }
 0x973   : > { %v18545_v22 = vpop.permute.xlu1 %18544  ;;  %20580 = vrot.lane.b32.xlu0 %v38274_v17, %s34801_s18  ;;  %v38384_v6 = vsel %vm250_vm0, %v18541_v38, %v18543_v35 }
 0x974   : > { %20578 = vrot.lane.b32.xlu1 %v38271_v2, %s34801_s18  ;;  %v38395_v18 = vsel %vm250_vm0, %v18543_v35, %v18545_v22 }
 0x976   : > { %v18547_v15 = vpop.permute.xlu0 %18546 }
 0x977   : > { %v38292_v63 = vpop.permute.xlu1 %18548  ;;  %21233 = vrot.lane.b32.xlu0 %v38271_v2, %s34802_s26  ;;  %v38402_v28 = vsel %vm250_vm0, %v18545_v22, %v18547_v15 }
 0x978   : > { %21235 = vrot.lane.b32.xlu1 %v38274_v17, %s34802_s26  ;;  %v38434_v3 = vsel %vm250_vm0, %v18547_v15, %v38292_v63 }
 0x97a   : > { %v18551_v48 = vpop.permute.xlu0 %18550 }
 0x97b   : > { %v38298_v41 = vpop.permute.xlu1 %18552  ;;  %21890 = vrot.lane.b32.xlu0 %v38274_v17, %s34803_s9  ;;  %v38466_v24 = vsel %vm250_vm0, %v38292_v63, %v18551_v48 }
 0x97c   : > { %21888 = vrot.lane.b32.xlu1 %v38271_v2, %s34803_s9  ;;  %v38488_v21 = vsel %vm250_vm0, %v18551_v48, %v38298_v41 }
 0x97e   : > { %v38408_v29 = vpop.permute.xlu0 %18554 }
 0x97f   : > { %v38307_v8 = vpop.permute.xlu1 %18556  ;;  %19288 = vrot.lane.b32.xlu0 %v38305_v7, %s34798_s15  ;;  %v38499_v23 = vsel %vm250_vm0, %v38298_v41, %v38408_v29 }
 0x980   : > { %18606 = vst.msk [vmem:[#allocation2 + $0x80] sm:$0xff] %vm250_vm0, %v38307_v8  ;;  %18651 = vrot.lane.b32.xlu1 %v38305_v7, %s34799_s16 }
 0x983   : > { %20582 = vrot.lane.b32.xlu0 %v38305_v7, %s34801_s18 }
 0x984   : > { %19927 = vrot.lane.b32.xlu1 %v38305_v7, %s34800_s17 }
 0x987   : > { %21892 = vrot.lane.b32.xlu0 %v38305_v7, %s34803_s9  ;;  %v38509_v22 = vld [vmem:[#allocation2 + $0x80] sm:$0xff] }
 0x988   : > { %21237 = vrot.lane.b32.xlu1 %v38305_v7, %s34802_s26 }
 0x98b   : > { %18653 = vrot.lane.b32.xlu0 %v38324_v54, %s34799_s16 }
 0x98c   : > { %19290 = vrot.lane.b32.xlu1 %v38324_v54, %s34798_s15 }
 0x98f   : > { %19929 = vrot.lane.b32.xlu0 %v38324_v54, %s34800_s17 }
 0x990   : > { %20584 = vrot.lane.b32.xlu1 %v38324_v54, %s34801_s18 }
 0x993   : > { %21239 = vrot.lane.b32.xlu0 %v38324_v54, %s34802_s26 }
 0x994   : > { %21894 = vrot.lane.b32.xlu1 %v38324_v54, %s34803_s9 }
 0x997   : > { %18657 = vrot.lane.b32.xlu0 %v38339_v16, %s34799_s16 }
 0x998   : > { %18655 = vrot.lane.b32.xlu1 %v38342_v39, %s34799_s16 }
 0x99b   : > { %19292 = vrot.lane.b32.xlu0 %v38342_v39, %s34798_s15 }
 0x99c   : > { %19294 = vrot.lane.b32.xlu1 %v38339_v16, %s34798_s15 }
 0x99f   : > { %19933 = vrot.lane.b32.xlu0 %v38339_v16, %s34800_s17 }
 0x9a0   : > { %19931 = vrot.lane.b32.xlu1 %v38342_v39, %s34800_s17 }
 0x9a3   : > { %20586 = vrot.lane.b32.xlu0 %v38342_v39, %s34801_s18 }
 0x9a4   : > { %20588 = vrot.lane.b32.xlu1 %v38339_v16, %s34801_s18 }
 0x9a7   : > { %21243 = vrot.lane.b32.xlu0 %v38339_v16, %s34802_s26 }
 0x9a8   : > { %21241 = vrot.lane.b32.xlu1 %v38342_v39, %s34802_s26 }
 0x9ab   : > { %21896 = vrot.lane.b32.xlu0 %v38342_v39, %s34803_s9 }
 0x9ac   : > { %21898 = vrot.lane.b32.xlu1 %v38339_v16, %s34803_s9 }
 0x9af   : > { %19296 = vrot.lane.b32.xlu0 %v38369_v25, %s34798_s15 }
 0x9b0   : > { %18659 = vrot.lane.b32.xlu1 %v38369_v25, %s34799_s16 }
 0x9b3   : > { %20590 = vrot.lane.b32.xlu0 %v38369_v25, %s34801_s18 }
 0x9b4   : > { %19935 = vrot.lane.b32.xlu1 %v38369_v25, %s34800_s17 }
 0x9b7   : > { %21900 = vrot.lane.b32.xlu0 %v38369_v25, %s34803_s9 }
 0x9b8   : > { %21245 = vrot.lane.b32.xlu1 %v38369_v25, %s34802_s26 }
 0x9bb   : > { %18661 = vrot.lane.b32.xlu0 %v38384_v6, %s34799_s16 }
 0x9bc   : > { %19298 = vrot.lane.b32.xlu1 %v38384_v6, %s34798_s15 }
 0x9bf   : > { %19937 = vrot.lane.b32.xlu0 %v38384_v6, %s34800_s17 }
 0x9c0   : > { %20592 = vrot.lane.b32.xlu1 %v38384_v6, %s34801_s18 }
 0x9c3   : > { %21247 = vrot.lane.b32.xlu0 %v38384_v6, %s34802_s26 }
 0x9c4   : > { %18663 = vrot.lane.b32.xlu1 %v38395_v18, %s34799_s16 }
 0x9c7   : > { %18665 = vrot.lane.b32.xlu0 %v38402_v28, %s34799_s16 }
 0x9c8   : > { %19302 = vrot.lane.b32.xlu1 %v38402_v28, %s34798_s15 }
 0x9cb   : > { %19300 = vrot.lane.b32.xlu0 %v38395_v18, %s34798_s15 }
 0x9cc   : > { %19939 = vrot.lane.b32.xlu1 %v38395_v18, %s34800_s17 }
 0x9cd   : > { %v38414_v50 = vpop.permute.xlu1 %19282  ;;  %v18646_v14 = vpop.permute.xlu0 %18645 }
 0x9cf   : > { %19941 = vrot.lane.b32.xlu0 %v38402_v28, %s34800_s17 }
 0x9d0   : > { %20596 = vrot.lane.b32.xlu1 %v38402_v28, %s34801_s18 }
 0x9d1   : > { %v38420_v57 = vpop.permute.xlu1 %20576  ;;  %v38422_v46 = vpop.permute.xlu0 %19921 }
 0x9d3   : > { %20594 = vrot.lane.b32.xlu0 %v38395_v18, %s34801_s18 }
 0x9d4   : > { %21249 = vrot.lane.b32.xlu1 %v38395_v18, %s34802_s26 }
 0x9d5   : > { %v38428_v43 = vpop.permute.xlu1 %21886  ;;  %v38430_v62 = vpop.permute.xlu0 %21231 }
 0x9d6   : > { %42079 = vst [vmem:[#allocation29_spill] sm:$0xff] %v38428_v43  ;;  %42080 = vst [vmem:[#allocation47_spill] sm:$0xff] %v38430_v62 }
 0x9d7   : > { %21251 = vrot.lane.b32.xlu0 %v38402_v28, %s34802_s26 }
 0x9d8   : > { %18667 = vrot.lane.b32.xlu1 %v38434_v3, %s34799_s16 }
 0x9d9   : > { %v18648_v36 = vpop.permute.xlu0 %18647 }
 0x9da   : > { %v18650_v60 = vpop.permute.xlu1 %18649  ;;  %v18679_v47 = vsel %vm441_vm3, %v18646_v14, %v18648_v36 }
 0x9db   : > { %19304 = vrot.lane.b32.xlu0 %v38434_v3, %s34798_s15  ;;  %v18680_v58 = vsel %vm441_vm3, %v18648_v36, %v18650_v60 }
 0x9dc   : > { %19943 = vrot.lane.b32.xlu1 %v38434_v3, %s34800_s17  ;;  %18714 = vmatprep.subr.mxu0 %v18680_v58 }
 0x9dd   : > { %v38451_v30 = vpop.permute.xlu0 %19286  ;;  %18715 = vmatpush1.msra.mxu0 %v18679_v47 }
 0x9de   : > { %v38453_v53 = vpop.permute.xlu1 %19284  ;;  %33630 = vmatmul.mubr.msk.f32.vlgmr.msra.gmra.mrb[24].mxu0 %vm474_vm4, %v38446_v61 }
 0x9df   : > { %20598 = vrot.lane.b32.xlu0 %v38434_v3, %s34801_s18  ;;  %18920 = vmatprep.mubr.f32.mxu0 %v41945_v0 }
 0x9e0   : > { %21253 = vrot.lane.b32.xlu1 %v38434_v3, %s34802_s26 }
 0x9e1   : > { %v38462_v51 = vpop.permute.xlu0 %19923 }
 0x9e2   : > { %v38468_v20 = vpop.permute.xlu1 %19925 }
 0x9e3   : > { %18669 = vrot.lane.b32.xlu0 %v38466_v24, %s34799_s16 }
 0x9e4   : > { %19306 = vrot.lane.b32.xlu1 %v38466_v24, %s34798_s15 }
 0x9e5   : > { %v38474_v49 = vpop.permute.xlu0 %20580 }
 0x9e6   : > { %v38476_v40 = vpop.permute.xlu1 %20578 }
 0x9e7   : > { %19945 = vrot.lane.b32.xlu0 %v38466_v24, %s34800_s17 }
 0x9e8   : > { %20600 = vrot.lane.b32.xlu1 %v38466_v24, %s34801_s18 }
 0x9e9   : > { %v38482_v26 = vpop.permute.xlu0 %21233 }
 0x9ea   : > { %v38484_v27 = vpop.permute.xlu1 %21235 }
 0x9eb   : > { %21255 = vrot.lane.b32.xlu0 %v38466_v24, %s34802_s26 }
 0x9ec   : > { %18671 = vrot.lane.b32.xlu1 %v38488_v21, %s34799_s16 }
 0x9ed   : > { %v38494_v1 = vpop.permute.xlu0 %21890 }
 0x9ee   : > { %42081 = vst [vmem:[#allocation37_spill] sm:$0xff] %v38494_v1  ;;  %v38501_v5 = vpop.permute.xlu1 %21888 }
 0x9ef   : > { %42082 = vst [vmem:[#allocation31_spill] sm:$0xff] %v38501_v5  ;;  %18673 = vrot.lane.b32.xlu0 %v38499_v23, %s34799_s16 }
 0x9f0   : > { %19310 = vrot.lane.b32.xlu1 %v38499_v23, %s34798_s15 }
 0x9f1   : > { %v38507_v38 = vpop.permute.xlu0 %19288 }
 0x9f2   : > { %v18652_v63 = vpop.permute.xlu1 %18651 }
 0x9f3   : > { %18677 = vrot.lane.b32.xlu0 %v38509_v22, %s34799_s16  ;;  %v18681_v36 = vsel %vm441_vm3, %v18650_v60, %v18652_v63 }
 0x9f4   : > { %19314 = vrot.lane.b32.xlu1 %v38509_v22, %s34798_s15 }
 0x9f5   : > { %v38515_v41 = vpop.permute.xlu0 %20582 }
 0x9f6   : > { %42083 = vst [vmem:[#allocation32_spill] sm:$0xff] %v38515_v41  ;;  %v38517_v37 = vpop.permute.xlu1 %19927 }
 0x9f7   : > { %19308 = vrot.lane.b32.xlu0 %v38488_v21, %s34798_s15 }
 0x9f8   : > { %19947 = vrot.lane.b32.xlu1 %v38488_v21, %s34800_s17 }
 0x9f9   : > { %v38523_v52 = vpop.permute.xlu0 %21892 }
 0x9fa   : > { %42084 = vst [vmem:[#allocation23_spill] sm:$0xff] %v38523_v52  ;;  %v38525_v35 = vpop.permute.xlu1 %21237 }
 0x9fb   : > { %42085 = vst [vmem:[#allocation42_spill] sm:$0xff] %v38525_v35  ;;  %19949 = vrot.lane.b32.xlu0 %v38499_v23, %s34800_s17 }
 0x9fc   : > { %20604 = vrot.lane.b32.xlu1 %v38499_v23, %s34801_s18 }
 0x9fd   : > { %v18654_v15 = vpop.permute.xlu0 %18653 }
 0x9fe   : > { %v18682_v48 = vsel %vm441_vm3, %v18652_v63, %v18654_v15  ;;  %v38532_v14 = vpop.permute.xlu1 %19290 }
 0x9ff   : > { %19953 = vrot.lane.b32.xlu0 %v38509_v22, %s34800_s17  ;;  %18785 = vmatprep.subr.mxu1 %v18682_v48  ;;  %v38557_v48 = vsel %vm250_vm0, %v38408_v29, %v38307_v8 }
 0xa00   : > { %18786 = vmatpush1.msra.mxu1 %v18681_v36  ;;  %20608 = vrot.lane.b32.xlu1 %v38509_v22, %s34801_s18 }
 0xa01   : > { %v38539_v58 = vpop.permute.xlu0 %19929  ;;  %33631 = vmatmul.mubr.msk.f32.vlgmr.msra.gmra.mrb[24].mxu1 %vm474_vm4, %v38446_v61 }
 0xa02   : > { %v38543_v47 = vpop.permute.xlu1 %20584  ;;  %18991 = vmatprep.mubr.f32.mxu1 %v41945_v0 }
 0xa03   : > { %20602 = vrot.lane.b32.xlu0 %v38488_v21, %s34801_s18 }
 0xa04   : > { %21257 = vrot.lane.b32.xlu1 %v38488_v21, %s34802_s26 }
 0xa05   : > { %v38550_v60 = vpop.permute.xlu0 %21239 }
 0xa06   : > { %42086 = vst [vmem:[#allocation27_spill] sm:$0xff] %v38550_v60  ;;  %v38552_v63 = vpop.permute.xlu1 %21894 }
 0xa07   : > { %42087 = vst [vmem:[#allocation41_spill] sm:$0xff] %v38552_v63  ;;  %21259 = vrot.lane.b32.xlu0 %v38499_v23, %s34802_s26 }
 0xa08   : > { %18675 = vrot.lane.b32.xlu1 %v38557_v48, %s34799_s16 }
 0xa09   : > { %v18658_v36 = vpop.permute.xlu0 %18657 }
 0xa0a   : > { %v18656_v45 = vpop.permute.xlu1 %18655 }
 0xa0b   : > { %21263 = vrot.lane.b32.xlu0 %v38509_v22, %s34802_s26  ;;  %v18684_v31 = vsel %vm441_vm3, %v18656_v45, %v18658_v36  ;;  %v18683_v19 = vsel %vm441_vm3, %v18654_v15, %v18656_v45 }
 0xa0c   : > { %21902 = vrot.lane.b32.xlu1 %v38384_v6, %s34803_s9  ;;  %18856 = vmatprep.subr.mxu0 %v18684_v31 }
 0xa0d   : > { %v38569_v8 = vpop.permute.xlu0 %19292  ;;  %18857 = vmatpush1.msra.mxu0 %v18683_v19 }
 0xa0e   : > { %v38571_v29 = vpop.permute.xlu1 %19294  ;;  %33632 = vmatmul.mubr.msk.f32.vlgmr.msra.gmra.mrb[26].mxu0 %vm474_vm4, %v38446_v61 }
 0xa0f   : > { %21904 = vrot.lane.b32.xlu0 %v38395_v18, %s34803_s9  ;;  %19062 = vmatprep.mubr.f32.mxu0 %v41945_v0 }
 0xa10   : > { %21906 = vrot.lane.b32.xlu1 %v38402_v28, %s34803_s9 }
 0xa11   : > { %v38580_v45 = vpop.permute.xlu0 %19933 }
 0xa12   : > { %v38582_v15 = vpop.permute.xlu1 %19931 }
 0xa13   : > { %21908 = vrot.lane.b32.xlu0 %v38434_v3, %s34803_s9 }
 0xa14   : > { %21910 = vrot.lane.b32.xlu1 %v38466_v24, %s34803_s9 }
 0xa15   : > { %v38588_v19 = vpop.permute.xlu0 %20586 }
 0xa16   : > { %v38590_v31 = vpop.permute.xlu1 %20588 }
 0xa17   : > { %21912 = vrot.lane.b32.xlu0 %v38488_v21, %s34803_s9 }
 0xa18   : > { %21914 = vrot.lane.b32.xlu1 %v38499_v23, %s34803_s9 }
 0xa19   : > { %v38596_v13 = vpop.permute.xlu0 %21243 }
 0xa1a   : > { %42088 = vst [vmem:[#allocation39_spill] sm:$0xff] %v38596_v13  ;;  %v38598_v11 = vpop.permute.xlu1 %21241 }
 0xa1b   : > { %42089 = vst [vmem:[#allocation22_spill] sm:$0xff] %v38598_v11  ;;  %19312 = vrot.lane.b32.xlu0 %v38557_v48, %s34798_s15 }
 0xa1c   : > { %21918 = vrot.lane.b32.xlu1 %v38509_v22, %s34803_s9 }
 0xa1d   : > { %v38604_v59 = vpop.permute.xlu0 %21896 }
 0xa1e   : > { %42090 = vst [vmem:[#allocation38_spill] sm:$0xff] %v38604_v59  ;;  %v38606_v12 = vpop.permute.xlu1 %21898 }
 0xa1f   : > { %42091 = vst [vmem:[#allocation36_spill] sm:$0xff] %v38606_v12  ;;  %22543 = vrot.lane.b32.xlu0 %v38271_v2, %s34804_s12 }
 0xa20   : > { %22545 = vrot.lane.b32.xlu1 %v38274_v17, %s34804_s12 }
 0xa21   : > { %v38612_v56 = vpop.permute.xlu0 %19296 }
 0xa22   : > { %v18660_v34 = vpop.permute.xlu1 %18659 }
 0xa23   : > { %22541 = vrot.lane.b32.xlu0 %v38256_v44, %s34804_s12  ;;  %v18685_v52 = vsel %vm441_vm3, %v18658_v36, %v18660_v34 }
 0xa24   : > { %22547 = vrot.lane.b32.xlu1 %v38305_v7, %s34804_s12 }
 0xa25   : > { %v38618_v4 = vpop.permute.xlu0 %20590 }
 0xa26   : > { %42092 = vst [vmem:[#allocation28_spill] sm:$0xff] %v38618_v4  ;;  %v38620_v9 = vpop.permute.xlu1 %19935 }
 0xa27   : > { %42093 = vst [vmem:[#allocation44_spill] sm:$0xff] %v38620_v9  ;;  %22549 = vrot.lane.b32.xlu0 %v38324_v54, %s34804_s12  ;;  %v19316_v9 = vsel %vm1080_vm5, %v38414_v50, %v38453_v53 }
 0xa28   : > { %19951 = vrot.lane.b32.xlu1 %v38557_v48, %s34800_s17 }
 0xa29   : > { %v38626_v32 = vpop.permute.xlu0 %21900 }
 0xa2a   : > { %42094 = vst [vmem:[#allocation45_spill] sm:$0xff] %v38626_v32  ;;  %v38628_v42 = vpop.permute.xlu1 %21245 }
 0xa2b   : > { %42095 = vst [vmem:[#allocation46_spill] sm:$0xff] %v38628_v42  ;;  %22553 = vrot.lane.b32.xlu0 %v38339_v16, %s34804_s12 }
 0xa2c   : > { %22551 = vrot.lane.b32.xlu1 %v38342_v39, %s34804_s12 }
 0xa2d   : > { %v18662_v55 = vpop.permute.xlu0 %18661 }
 0xa2e   : > { %v18686_v10 = vsel %vm441_vm3, %v18660_v34, %v18662_v55  ;;  %v38635_v33 = vpop.permute.xlu1 %19298 }
 0xa2f   : > { %22557 = vrot.lane.b32.xlu0 %v38384_v6, %s34804_s12  ;;  %18927 = vmatprep.subr.mxu1 %v18686_v10 }
 0xa30   : > { %18928 = vmatpush1.msra.mxu1 %v18685_v52  ;;  %22555 = vrot.lane.b32.xlu1 %v38369_v25, %s34804_s12 }
 0xa31   : > { %v38642_v32 = vpop.permute.xlu0 %19937  ;;  %33633 = vmatmul.mubr.msk.f32.vlgmr.msra.gmra.mrb[26].mxu1 %vm474_vm4, %v38446_v61 }
 0xa32   : > { %v38646_v42 = vpop.permute.xlu1 %20592  ;;  %19133 = vmatprep.mubr.f32.mxu1 %v41945_v0 }
 0xa33   : > { %22561 = vrot.lane.b32.xlu0 %v38402_v28, %s34804_s12 }
 0xa34   : > { %22559 = vrot.lane.b32.xlu1 %v38395_v18, %s34804_s12 }
 0xa35   : > { %v38653_v10 = vpop.permute.xlu0 %21247 }
 0xa36   : > { %42096 = vst [vmem:[#allocation25_spill] sm:$0xff] %v38653_v10  ;;  %v18664_v34 = vpop.permute.xlu1 %18663 }
 0xa37   : > { %22565 = vrot.lane.b32.xlu0 %v38466_v24, %s34804_s12  ;;  %v18687_v63 = vsel %vm441_vm3, %v18662_v55, %v18664_v34 }
 0xa38   : > { %22563 = vrot.lane.b32.xlu1 %v38434_v3, %s34804_s12 }
 0xa39   : > { %v18666_v52 = vpop.permute.xlu0 %18665 }
 0xa3a   : > { %v18688_v36 = vsel %vm441_vm3, %v18664_v34, %v18666_v52  ;;  %v38660_v35 = vpop.permute.xlu1 %19302 }
 0xa3b   : > { %20606 = vrot.lane.b32.xlu0 %v38557_v48, %s34801_s18  ;;  %18998 = vmatprep.subr.mxu0 %v18688_v36 }
 0xa3c   : > { %18999 = vmatpush1.msra.mxu0 %v18687_v63  ;;  %22567 = vrot.lane.b32.xlu1 %v38488_v21, %s34804_s12 }
 0xa3d   : > { %v38667_v59 = vpop.permute.xlu0 %19300  ;;  %33634 = vmatmul.mubr.msk.f32.vlgmr.msra.gmra.mrb[28].mxu0 %vm474_vm4, %v38446_v61 }
 0xa3e   : > { %v38671_v12 = vpop.permute.xlu1 %19939  ;;  %19204 = vmatprep.mubr.f32.mxu0 %v41945_v0 }
 0xa3f   : > { %22569 = vrot.lane.b32.xlu0 %v38499_v23, %s34804_s12 }
 0xa40   : > { %23198 = vrot.lane.b32.xlu1 %v38271_v2, %s34805_s20 }
 0xa41   : > { %v38678_v55 = vpop.permute.xlu0 %19941 }
 0xa42   : > { %v38680_v63 = vpop.permute.xlu1 %20596 }
 0xa43   : > { %22573 = vrot.lane.b32.xlu0 %v38509_v22, %s34804_s12 }
 0xa44   : > { %23196 = vrot.lane.b32.xlu1 %v38256_v44, %s34805_s20 }
 0xa45   : > { %v38686_v34 = vpop.permute.xlu0 %20594 }
 0xa46   : > { %v38688_v36 = vpop.permute.xlu1 %21249 }
 0xa47   : > { %42097 = vst [vmem:[#allocation34_spill] sm:$0xff] %v38688_v36  ;;  %23200 = vrot.lane.b32.xlu0 %v38274_v17, %s34805_s20 }
 0xa48   : > { %21261 = vrot.lane.b32.xlu1 %v38557_v48, %s34802_s26 }
 0xa49   : > { %v38694_v43 = vpop.permute.xlu0 %21251 }
 0xa4a   : > { %42098 = vst [vmem:[#allocation24_spill] sm:$0xff] %v38694_v43  ;;  %v18668_v4 = vpop.permute.xlu1 %18667 }
 0xa4b   : > { %23202 = vrot.lane.b32.xlu0 %v38305_v7, %s34805_s20  ;;  %v18689_v11 = vsel %vm441_vm3, %v18666_v52, %v18668_v4 }
 0xa4c   : > { %23204 = vrot.lane.b32.xlu1 %v38324_v54, %s34805_s20 }
 0xa4d   : > { %v38700_v5 = vpop.permute.xlu0 %19304 }
 0xa4e   : > { %v38702_v1 = vpop.permute.xlu1 %19943 }
 0xa4f   : > { %42099 = vst [vmem:[#allocation26_spill] sm:$0xff] %v38702_v1  ;;  %23206 = vrot.lane.b32.xlu0 %v38342_v39, %s34805_s20  ;;  %v19317_v1 = vsel %vm1080_vm5, %v38453_v53, %v38451_v30  ;;  %v19325_v53 = vsel %vm1080_vm5, %v38667_v59, %v38660_v35 }
 0xa50   : > { %23208 = vrot.lane.b32.xlu1 %v38339_v16, %s34805_s20 }
 0xa51   : > { %v38708_v41 = vpop.permute.xlu0 %20598 }
 0xa52   : > { %42100 = vst [vmem:[#allocation49_spill] sm:$0xff] %v38708_v41  ;;  %v38710_v10 = vpop.permute.xlu1 %21253 }
 0xa53   : > { %42101 = vst [vmem:[#allocation40_spill] sm:$0xff] %v38710_v10  ;;  %23210 = vrot.lane.b32.xlu0 %v38369_v25, %s34805_s20 }
 0xa54   : > { %23212 = vrot.lane.b32.xlu1 %v38384_v6, %s34805_s20 }
 0xa55   : > { %v18670_v36 = vpop.permute.xlu0 %18669 }
 0xa56   : > { %v18690_v43 = vsel %vm441_vm3, %v18668_v4, %v18670_v36  ;;  %v38717_v60 = vpop.permute.xlu1 %19306 }
 0xa57   : > { %23214 = vrot.lane.b32.xlu0 %v38395_v18, %s34805_s20  ;;  %19069 = vmatprep.subr.mxu1 %v18690_v43 }
 0xa58   : > { %19070 = vmatpush1.msra.mxu1 %v18689_v11  ;;  %23216 = vrot.lane.b32.xlu1 %v38402_v28, %s34805_s20 }
 0xa59   : > { %v38724_v10 = vpop.permute.xlu0 %19945  ;;  %33635 = vmatmul.mubr.msk.f32.vlgmr.msra.gmra.mrb[28].mxu1 %vm474_vm4, %v38446_v61 }
 0xa5a   : > { %v38728_v41 = vpop.permute.xlu1 %20600  ;;  %19275 = vmatprep.mubr.f32.mxu1 %v41945_v0 }
 0xa5b   : > { %21916 = vrot.lane.b32.xlu0 %v38557_v48, %s34803_s9 }
 0xa5c   : > { %23220 = vrot.lane.b32.xlu1 %v38466_v24, %s34805_s20 }
 0xa5d   : > { %v38735_v4 = vpop.permute.xlu0 %21255 }
 0xa5e   : > { %42102 = vst [vmem:[#allocation33_spill] sm:$0xff] %v38735_v4  ;;  %v18672_v11 = vpop.permute.xlu1 %18671 }
 0xa5f   : > { %23218 = vrot.lane.b32.xlu0 %v38434_v3, %s34805_s20  ;;  %v18691_v4 = vsel %vm441_vm3, %v18670_v36, %v18672_v11  ;;  %v19321_v36 = vsel %vm1080_vm5, %v38569_v8, %v38571_v29 }
 0xa60   : > { %23224 = vrot.lane.b32.xlu1 %v38499_v23, %s34805_s20 }
 0xa61   : > { %v38741_v43 = vpop.permute.xlu0 %18673 }
 0xa62   : > { %v18692_v52 = vsel %vm441_vm3, %v18672_v11, %v38741_v43  ;;  %v38745_v13 = vpop.permute.xlu1 %19310  ;;  %v38769_v11 = vld [vmem:[%s41776_s2 + $0xd8] sm:$0xff] }
 0xa63   : > { %23222 = vrot.lane.b32.xlu0 %v38488_v21, %s34805_s20  ;;  %19140 = vmatprep.subr.mxu0 %v18692_v52 }
 0xa64   : > { %19141 = vmatpush1.msra.mxu0 %v18691_v4  ;;  %23228 = vrot.lane.b32.xlu1 %v38509_v22, %s34805_s20 }
 0xa65   : > { %33636 = vmatmul.mubr.msk.f32.vlgmr.msra.gmra.mrb[30].mxu0 %vm474_vm4, %v38446_v61  ;;  %19351 = vmatprep.subr.mxu0 %v19317_v1  ;;  %v18678_v62 = vpop.permute.xlu0 %18677  ;;  %v19324_v1 = vsel %vm1080_vm5, %v38635_v33, %v38667_v59 }
 0xa66   : > { %19352 = vmatpush1.msra.mxu0 %v19316_v9  ;;  %19415 = vmatprep.mubr.f32.mxu0 %v41945_v0  ;;  %v38764_v4 = vpop.permute.xlu1 %19314  ;;  %v19320_v9 = vsel %vm1080_vm5, %v38532_v14, %v38569_v8 }
 0xa67   : > { %23853 = vrot.lane.b32.xlu0 %v38271_v2, %s34806_s10  ;;  %19493 = vmatprep.subr.mxu0 %v19321_v36 }
 0xa68   : > { %22571 = vrot.lane.b32.xlu1 %v38557_v48, %s34804_s12 }
 0xa69   : > { %33638 = vmatmul.mubr.msk.f32.vlgmr.msra.gmra.mrb[24].mxu0 %vm474_vm4, %v38769_v11  ;;  %v19309_v50 = vpop.permute.xlu0 %19308 }
 0xa6a   : > { %19494 = vmatpush1.msra.mxu0 %v19320_v9  ;;  %19557 = vmatprep.mubr.f32.mxu0 %v41945_v0  ;;  %v38784_v2 = vpop.permute.xlu1 %19947  ;;  %v19329_v52 = vsel %vm1080_vm5, %v19309_v50, %v38745_v13  ;;  %v19328_v59 = vsel %vm1080_vm5, %v38717_v60, %v19309_v50  ;;  %v19960_v50 = vsel %vm1720_vm6, %v38582_v15, %v38580_v45 }
 0xa6b   : > { %19635 = vmatprep.subr.mxu0 %v19325_v53  ;;  %23851 = vrot.lane.b32.xlu0 %v38256_v44, %s34806_s10  ;;  %v19964_v53 = vsel %vm1720_vm6, %v38671_v12, %v38678_v55 }
 0xa6c   : > { %23855 = vrot.lane.b32.xlu1 %v38274_v17, %s34806_s10  ;;  %v19956_v17 = vsel %vm1720_vm6, %v38462_v51, %v38468_v20 }
 0xa6d   : > { %33640 = vmatmul.mubr.msk.f32.vlgmr.msra.gmra.mrb[26].mxu0 %vm474_vm4, %v38769_v11  ;;  %v38795_v8 = vpop.permute.xlu0 %19949 }
 0xa6e   : > { %19636 = vmatpush1.msra.mxu0 %v19324_v1  ;;  %19699 = vmatprep.mubr.f32.mxu0 %v41945_v0  ;;  %v38800_v36 = vpop.permute.xlu1 %20604 }
 0xa6f   : > { %19777 = vmatprep.subr.mxu0 %v19329_v52  ;;  %23859 = vrot.lane.b32.xlu0 %v38324_v54, %s34806_s10 }
 0xa70   : > { %23857 = vrot.lane.b32.xlu1 %v38305_v7, %s34806_s10  ;;  %v19955_v7 = vsel %vm1720_vm6, %v38422_v46, %v38462_v51  ;;  %v19959_v46 = vsel %vm1720_vm6, %v38539_v58, %v38582_v15  ;;  %v19963_v15 = vsel %vm1720_vm6, %v38642_v32, %v38671_v12  ;;  %v19319_v12 = vsel %vm1080_vm5, %v38507_v38, %v38532_v14 }
 0xa71   : > { %33642 = vmatmul.mubr.msk.f32.vlgmr.msra.gmra.mrb[28].mxu0 %vm474_vm4, %v38769_v11  ;;  %v38810_v44 = vpop.permute.xlu0 %19953 }
 0xa72   : > { %19778 = vmatpush1.msra.mxu0 %v19328_v59  ;;  %19841 = vmatprep.mubr.f32.mxu0 %v41945_v0  ;;  %v38816_v9 = vpop.permute.xlu1 %20608  ;;  %v19967_v59 = vsel %vm1720_vm6, %v38724_v10, %v38784_v2 }
 0xa73   : > { %19990 = vmatprep.subr.mxu0 %v19956_v17  ;;  %23863 = vrot.lane.b32.xlu0 %v38339_v16, %s34806_s10 }
 0xa74   : > { %23861 = vrot.lane.b32.xlu1 %v38342_v39, %s34806_s10  ;;  %v38838_v39 = vld [vmem:[%s41776_s2 + $0xe8] sm:$0xff] }
 0xa75   : > { %33644 = vmatmul.mubr.msk.f32.vlgmr.msra.gmra.mrb[30].mxu0 %vm474_vm4, %v38769_v11  ;;  %v38827_v54 = vpop.permute.xlu0 %20602 }
 0xa76   : > { %19991 = vmatpush1.msra.mxu0 %v19955_v7  ;;  %20054 = vmatprep.mubr.f32.mxu0 %v41945_v0  ;;  %v38833_v16 = vpop.permute.xlu1 %21257 }
 0xa77   : > { %20132 = vmatprep.subr.mxu0 %v19960_v50  ;;  %23867 = vrot.lane.b32.xlu0 %v38384_v6, %s34806_s10 }
 0xa78   : > { %23865 = vrot.lane.b32.xlu1 %v38369_v25, %s34806_s10 }
 0xa79   : > { %33647 = vmatmul.mubr.msk.f32.vlgmr.msra.gmra.mrb[24].mxu0 %vm474_vm4, %v38838_v39  ;;  %v38849_v51 = vpop.permute.xlu0 %21259 }
 0xa7a   : > { %20133 = vmatpush1.msra.mxu0 %v19959_v46  ;;  %20196 = vmatprep.mubr.f32.mxu0 %v41945_v0  ;;  %v18676_v6 = vpop.permute.xlu1 %18675  ;;  %v19957_v46 = vsel %vm1720_vm6, %v38468_v20, %v38517_v37 }
 0xa7b   : > { %20274 = vmatprep.subr.mxu0 %v19964_v53  ;;  %23226 = vrot.lane.b32.xlu0 %v38557_v48, %s34805_s20  ;;  %v18694_v25 = vsel %vm441_vm3, %v18676_v6, %v18678_v62  ;;  %v18693_v1 = vsel %vm441_vm3, %v38741_v43, %v18676_v6  ;;  %v19968_v62 = vsel %vm1720_vm6, %v38784_v2, %v38795_v8 }
 0xa7c   : > { %23869 = vrot.lane.b32.xlu1 %v38395_v18, %s34806_s10  ;;  %19211 = vmatprep.subr.mxu1 %v18694_v25  ;;  %v19318_v18 = vsel %vm1080_vm5, %v38451_v30, %v38507_v38  ;;  %v19323_v30 = vsel %vm1080_vm5, %v38612_v56, %v38635_v33  ;;  %v20610_v33 = vsel %vm2376_vm7, %v38420_v57, %v38476_v40  ;;  %v38931_v57 = vld [vmem:[%s41776_s2 + $0xf0] sm:$0xff] }
 0xa7d   : > { %33649 = vmatmul.mubr.msk.f32.vlgmr.msra.gmra.mrb[26].mxu0 %vm474_vm4, %v38838_v39  ;;  %v38867_v52 = vpop.permute.xlu0 %21263  ;;  %19212 = vmatpush1.msra.mxu1 %v18693_v1 }
 0xa7e   : > { %20275 = vmatpush1.msra.mxu0 %v19963_v15  ;;  %20338 = vmatprep.mubr.f32.mxu0 %v41945_v0  ;;  %v38873_v43 = vpop.permute.xlu1 %21902  ;;  %v42106_v15 = vld [vmem:[#allocation39_spill] sm:$0xff] }
 0xa7f   : > { %20416 = vmatprep.subr.mxu0 %v19968_v62  ;;  %23871 = vrot.lane.b32.xlu0 %v38402_v28, %s34806_s10  ;;  %v42107_v62 = vld [vmem:[#allocation22_spill] sm:$0xff] }
 0xa80   : > { %33637 = vmatmul.mubr.msk.f32.vlgmr.msra.gmra.mrb[30].mxu1 %vm474_vm4, %v38446_v61  ;;  %19422 = vmatprep.subr.mxu1 %v19319_v12  ;;  %v20611_v61 = vsel %vm2376_vm7, %v38476_v40, %v38474_v49  ;;  %v21270_v12 = vsel %vm3032_vm8, %v42107_v62, %v42106_v15 }
 0xa81   : > { %33651 = vmatmul.mubr.msk.f32.vlgmr.msra.gmra.mrb[28].mxu0 %vm474_vm4, %v38838_v39  ;;  %v38890_v28 = vpop.permute.xlu0 %21904  ;;  %19423 = vmatpush1.msra.mxu1 %v19318_v18 }
 0xa82   : > { %20417 = vmatpush1.msra.mxu0 %v19967_v59  ;;  %23873 = vrot.lane.b32.xlu1 %v38434_v3, %s34806_s10  ;;  %v38897_v14 = vpop.permute.xlu1 %21906  ;;  %v19322_v3 = vsel %vm1080_vm5, %v38571_v29, %v38612_v56  ;;  %v20615_v56 = vsel %vm2376_vm7, %v38588_v19, %v38590_v31  ;;  %v20619_v29 = vsel %vm2376_vm7, %v38686_v34, %v38680_v63  ;;  %v42108_v59 = vld [vmem:[#allocation27_spill] sm:$0xff] }
 0xa83   : > { %20645 = vmatprep.subr.mxu0 %v20611_v61  ;;  %23875 = vrot.lane.b32.xlu0 %v38466_v24, %s34806_s10  ;;  %v19327_v24 = vsel %vm1080_vm5, %v38700_v5, %v38717_v60  ;;  %v21269_v61 = vsel %vm3032_vm8, %v42108_v59, %v42107_v62 }
 0xa84   : > { %19564 = vmatprep.subr.mxu1 %v19323_v30  ;;  %19486 = vmatprep.mubr.f32.mxu1 %v41945_v0 }
 0xa85   : > { %20480 = vmatprep.mubr.f32.mxu0 %v41945_v0  ;;  %33639 = vmatmul.mubr.msk.f32.vlgmr.msra.gmra.mrb[24].mxu1 %vm474_vm4, %v38769_v11  ;;  %v38911_v38 = vpop.permute.xlu0 %21908 }
 0xa86   : > { %19565 = vmatpush1.msra.mxu1 %v19322_v3  ;;  %33653 = vmatmul.mubr.msk.f32.vlgmr.msra.gmra.mrb[30].mxu0 %vm474_vm4, %v38838_v39  ;;  %v38921_v2 = vpop.permute.xlu1 %21910  ;;  %v42109_v3 = vld [vmem:[#allocation24_spill] sm:$0xff] }
 0xa87   : > { %20646 = vmatpush1.msra.mxu0 %v20610_v33  ;;  %19706 = vmatprep.subr.mxu1 %v19327_v24  ;;  %v42110_v33 = vld [vmem:[#allocation34_spill] sm:$0xff] }
 0xa88   : > { %20787 = vmatprep.subr.mxu0 %v20615_v56  ;;  %23877 = vrot.lane.b32.xlu1 %v38488_v21, %s34806_s10  ;;  %v19326_v21 = vsel %vm1080_vm5, %v38660_v35, %v38700_v5  ;;  %v33709_v35 = vld [vmem:[%s41777_s3 + $0x18] sm:$0xff]  ;;  %v21274_v24 = vsel %vm3032_vm8, %v42110_v33, %v42109_v3 }
 0xa89   : > { %23879 = vrot.lane.b32.xlu0 %v38499_v23, %s34806_s10  ;;  %19628 = vmatprep.mubr.f32.mxu1 %v41945_v0  ;;  %v38936_v40 = vpop.permute.xlu0 %21912  ;;  %v20614_v23 = vsel %vm2376_vm7, %v38543_v47, %v38588_v19 }
 0xa8a   : > { %20709 = vmatprep.mubr.f32.mxu0 %v41945_v0  ;;  %33641 = vmatmul.mubr.msk.f32.vlgmr.msra.gmra.mrb[26].mxu1 %vm474_vm4, %v38769_v11  ;;  %v38944_v60 = vpop.permute.xlu1 %21914 }
 0xa8b   : > { %19707 = vmatpush1.msra.mxu1 %v19326_v21  ;;  %33656 = vmatmul.mubr.msk.f32.vlgmr.msra.gmra.mrb[24].mxu0 %vm474_vm4, %v38931_v57 }
 0xa8c   : > { %20788 = vmatpush1.msra.mxu0 %v20614_v23  ;;  %23881 = vrot.lane.b32.xlu1 %v38557_v48, %s34806_s10 }
 0xa8d   : > { %20929 = vmatprep.subr.mxu0 %v20619_v29  ;;  %23883 = vrot.lane.b32.xlu0 %v38509_v22, %s34806_s10  ;;  %v19313_v5 = vpop.permute.xlu0 %19312  ;;  %v20618_v22 = vsel %vm2376_vm7, %v38646_v42, %v38686_v34  ;;  %v20622_v34 = vsel %vm2376_vm7, %v38728_v41, %v38827_v54 }
 0xa8e   : > { %19770 = vmatprep.mubr.f32.mxu1 %v41945_v0  ;;  %20851 = vmatprep.mubr.f32.mxu0 %v41945_v0  ;;  %v19331_v19 = vsel %vm1080_vm5, %v19313_v5, %v38764_v4  ;;  %v38965_v17 = vpop.permute.xlu1 %21918  ;;  %v19330_v48 = vsel %vm1080_vm5, %v38745_v13, %v19313_v5  ;;  %v20623_v4 = vsel %vm2376_vm7, %v38827_v54, %v38800_v36  ;;  %v42105_v54 = vld [vmem:[#allocation26_spill] sm:$0xff]  ;;  %v42112_v5 = vld [vmem:[#allocation32_spill] sm:$0xff] }
 0xa8f   : > { %33643 = vmatmul.mubr.msk.f32.vlgmr.msra.gmra.mrb[28].mxu1 %vm474_vm4, %v38769_v11  ;;  %33658 = vmatmul.mubr.msk.f32.vlgmr.msra.gmra.mrb[26].mxu0 %vm474_vm4, %v38931_v57  ;;  %v19958_v13 = vsel %vm1720_vm6, %v38517_v37, %v38539_v58  ;;  %v42103_v58 = vld [vmem:[#allocation44_spill] sm:$0xff]  ;;  %v19966_v1 = vsel %vm1720_vm6, %v42105_v54, %v38724_v10  ;;  %v19965_v10 = vsel %vm1720_vm6, %v38678_v55, %v42105_v54 }
 0xa90   : > { %20930 = vmatpush1.msra.mxu0 %v20618_v22  ;;  %24508 = vperm.xlu1 %34729, %v33709_v35   ;;  %v19962_v53 = vsel %vm1720_vm6, %v42103_v58, %v38642_v32  ;;  %v19961_v20 = vsel %vm1720_vm6, %v38580_v45, %v42103_v58  ;;  %v42104_v32 = vld [vmem:[#allocation47_spill] sm:$0xff]  ;;  %v20613_v35 = vsel %vm2376_vm7, %v42112_v5, %v38543_v47  ;;  %v42113_v22 = vld [vmem:[#allocation33_spill] sm:$0xff] }
 0xa91   : > { %21071 = vmatprep.subr.mxu0 %v20623_v4  ;;  %19848 = vmatprep.subr.mxu1 %v19331_v19  ;;  %v38979_v7 = vpop.permute.xlu0 %22543  ;;  %v21265_v37 = vsel %vm3032_vm8, %v42104_v32, %v38482_v26  ;;  %v39029_v45 = vld [vmem:[%s41776_s2 + $0xf8] sm:$0xff]  ;;  %v20612_v4 = vsel %vm2376_vm7, %v38474_v49, %v42112_v5  ;;  %v42114_v47 = vld [vmem:[#allocation37_spill] sm:$0xff] }
 0xa92   : > { %19849 = vmatpush1.msra.mxu1 %v19330_v48  ;;  %19912 = vmatprep.mubr.f32.mxu1 %v41945_v0  ;;  %v38982_v50 = vpop.permute.xlu1 %22545  ;;  %v21277_v48 = vsel %vm3032_vm8, %v42113_v22, %v38833_v16  ;;  %v42119_v32 = vld [vmem:[#allocation36_spill] sm:$0xff] }
 0xa93   : > { %20993 = vmatprep.mubr.f32.mxu0 %v41945_v0  ;;  %33645 = vmatmul.mubr.msk.f32.vlgmr.msra.gmra.mrb[30].mxu1 %vm474_vm4, %v38769_v11  ;;  %v21266_v11 = vsel %vm3032_vm8, %v38482_v26, %v38484_v27 }
 0xa94   : > { %20061 = vmatprep.subr.mxu1 %v19958_v13  ;;  %33660 = vmatmul.mubr.msk.f32.vlgmr.msra.gmra.mrb[28].mxu0 %vm474_vm4, %v38931_v57  ;;  %v42115_v13 = vld [vmem:[#allocation31_spill] sm:$0xff] }
 0xa95   : > { %21072 = vmatpush1.msra.mxu0 %v20622_v34  ;;  %20062 = vmatpush1.msra.mxu1 %v19957_v46  ;;  %v39004_v6 = vpop.permute.xlu0 %22541  ;;  %v21921_v34 = vsel %vm3688_vm9, %v42115_v13, %v42114_v47  ;;  %v42116_v46 = vld [vmem:[#allocation28_spill] sm:$0xff] }
 0xa96   : > { %21300 = vmatprep.subr.mxu0 %v21266_v11  ;;  %20203 = vmatprep.subr.mxu1 %v19962_v53  ;;  %v39006_v25 = vpop.permute.xlu1 %22547  ;;  %v20616_v49 = vsel %vm2376_vm7, %v38590_v31, %v42116_v46  ;;  %v42118_v53 = vld [vmem:[#allocation49_spill] sm:$0xff] }
 0xa97   : > { %20125 = vmatprep.mubr.f32.mxu1 %v41945_v0  ;;  %21135 = vmatprep.mubr.f32.mxu0 %v41945_v0  ;;  %v39118_v31 = vld [vmem:[%s41776_s2 + $0x100] sm:$0xff] }
 0xa98   : > { %33648 = vmatmul.mubr.msk.f32.vlgmr.msra.gmra.mrb[24].mxu1 %vm474_vm4, %v38838_v39  ;;  %33662 = vmatmul.mubr.msk.f32.vlgmr.msra.gmra.mrb[30].mxu0 %vm474_vm4, %v38931_v57 }
 0xa99   : > { %20204 = vmatpush1.msra.mxu1 %v19961_v20  ;;  %21301 = vmatpush1.msra.mxu0 %v21265_v37  ;;  %v39031_v18 = vpop.permute.xlu0 %22549  ;;  %v20621_v20 = vsel %vm2376_vm7, %v42118_v53, %v38728_v41  ;;  %v42120_v37 = vld [vmem:[#allocation38_spill] sm:$0xff]  ;;  %v20620_v41 = vsel %vm2376_vm7, %v38680_v63, %v42118_v53  ;;  %v42125_v53 = vld [vmem:[#allocation23_spill] sm:$0xff] }
 0xa9a   : > { %20345 = vmatprep.subr.mxu1 %v19966_v1  ;;  %21442 = vmatprep.subr.mxu0 %v21270_v12  ;;  %v19952_v26 = vpop.permute.xlu1 %19951  ;;  %v21925_v54 = vsel %vm3688_vm9, %v42120_v37, %v42119_v32  ;;  %v42121_v12 = vld [vmem:[#allocation41_spill] sm:$0xff] }
 0xa9b   : > { %20267 = vmatprep.mubr.f32.mxu1 %v41945_v0  ;;  %21364 = vmatprep.mubr.f32.mxu0 %v41945_v0  ;;  %v19970_v30 = vsel %vm1720_vm6, %v19952_v26, %v38810_v44  ;;  %v19969_v55 = vsel %vm1720_vm6, %v38795_v8, %v19952_v26  ;;  %v42111_v44 = vld [vmem:[#allocation25_spill] sm:$0xff]  ;;  %v21278_v8 = vsel %vm3032_vm8, %v38833_v16, %v38849_v51 }
 0xa9c   : > { %33650 = vmatmul.mubr.msk.f32.vlgmr.msra.gmra.mrb[26].mxu1 %vm474_vm4, %v38838_v39  ;;  %33665 = vmatmul.mubr.msk.f32.vlgmr.msra.gmra.mrb[24].mxu0 %vm474_vm4, %v39029_v45  ;;  %v21273_v23 = vsel %vm3032_vm8, %v42111_v44, %v42110_v33  ;;  %v21924_v26 = vsel %vm3688_vm9, %v42121_v12, %v42120_v37 }
 0xa9d   : > { %20346 = vmatpush1.msra.mxu1 %v19965_v10  ;;  %21443 = vmatpush1.msra.mxu0 %v21269_v61  ;;  %v39050_v56 = vpop.permute.xlu0 %22553  ;;  %v21929_v10 = vsel %vm3688_vm9, %v38890_v28, %v38897_v14 }
 0xa9e   : > { %21584 = vmatprep.subr.mxu0 %v21274_v24  ;;  %20409 = vmatprep.mubr.f32.mxu1 %v41945_v0  ;;  %v39055_v21 = vpop.permute.xlu1 %22551  ;;  %v21928_v24 = vsel %vm3688_vm9, %v38873_v43, %v38890_v28  ;;  %v21932_v28 = vsel %vm3688_vm9, %v38921_v2, %v38936_v40 }
 0xa9f   : > { %21506 = vmatprep.mubr.f32.mxu0 %v41945_v0  ;;  %20487 = vmatprep.subr.mxu1 %v19970_v30 }
 0xaa0   : > { %33652 = vmatmul.mubr.msk.f32.vlgmr.msra.gmra.mrb[28].mxu1 %vm474_vm4, %v38838_v39  ;;  %33667 = vmatmul.mubr.msk.f32.vlgmr.msra.gmra.mrb[26].mxu0 %vm474_vm4, %v39029_v45 }
 0xaa1   : > { %21585 = vmatpush1.msra.mxu0 %v21273_v23  ;;  %20488 = vmatpush1.msra.mxu1 %v19969_v55  ;;  %v39068_v29 = vpop.permute.xlu0 %22557  ;;  %v42122_v55 = vld [vmem:[#allocation42_spill] sm:$0xff] }
 0xaa2   : > { %21726 = vmatprep.subr.mxu0 %v21278_v8  ;;  %20551 = vmatprep.mubr.f32.mxu1 %v41945_v0  ;;  %v39074_v19 = vpop.permute.xlu1 %22555  ;;  %v21268_v23 = vsel %vm3032_vm8, %v42122_v55, %v42108_v59  ;;  %v21267_v5 = vsel %vm3032_vm8, %v38484_v27, %v42122_v55  ;;  %v22576_v59 = vsel %vm4344_vm10, %v38979_v7, %v38982_v50 }
 0xaa3   : > { %21648 = vmatprep.mubr.f32.mxu0 %v41945_v0  ;;  %20716 = vmatprep.subr.mxu1 %v20613_v35  ;;  %v42123_v35 = vld [vmem:[#allocation46_spill] sm:$0xff]  ;;  %v22575_v27 = vsel %vm4344_vm10, %v39004_v6, %v38979_v7  ;;  %v22580_v7 = vsel %vm4344_vm10, %v39055_v21, %v39050_v56 }
 0xaa4   : > { %33654 = vmatmul.mubr.msk.f32.vlgmr.msra.gmra.mrb[30].mxu1 %vm474_vm4, %v38838_v39  ;;  %33669 = vmatmul.mubr.msk.f32.vlgmr.msra.gmra.mrb[28].mxu0 %vm474_vm4, %v39029_v45  ;;  %v20617_v39 = vsel %vm2376_vm7, %v42116_v46, %v38646_v42  ;;  %v42117_v42 = vld [vmem:[#allocation29_spill] sm:$0xff]  ;;  %v22579_v46 = vsel %vm4344_vm10, %v39031_v18, %v39055_v21 }
 0xaa5   : > { %21727 = vmatpush1.msra.mxu0 %v21277_v48  ;;  %20717 = vmatpush1.msra.mxu1 %v20612_v4  ;;  %v39093_v11 = vpop.permute.xlu0 %22561  ;;  %v21920_v16 = vsel %vm3688_vm9, %v42117_v42, %v42115_v13  ;;  %v39205_v6 = vld [vmem:[%s41776_s2 + $0x108] sm:$0xff] }
 0xaa6   : > { %21955 = vmatprep.subr.mxu0 %v21921_v34  ;;  %20858 = vmatprep.subr.mxu1 %v20617_v39  ;;  %v39095_v58 = vpop.permute.xlu1 %22559 }
 0xaa7   : > { %20780 = vmatprep.mubr.f32.mxu1 %v41945_v0  ;;  %21790 = vmatprep.mubr.f32.mxu0 %v41945_v0 }
 0xaa8   : > { %33657 = vmatmul.mubr.msk.f32.vlgmr.msra.gmra.mrb[24].mxu1 %vm474_vm4, %v38931_v57  ;;  %33671 = vmatmul.mubr.msk.f32.vlgmr.msra.gmra.mrb[30].mxu0 %vm474_vm4, %v39029_v45 }
 0xaa9   : > { %20859 = vmatpush1.msra.mxu1 %v20616_v49  ;;  %21956 = vmatpush1.msra.mxu0 %v21920_v16  ;;  %v39120_v1 = vpop.permute.xlu0 %22565  ;;  %v22584_v49 = vsel %vm4344_vm10, %v39095_v58, %v39093_v11 }
 0xaaa   : > { %21000 = vmatprep.subr.mxu1 %v20621_v20  ;;  %22097 = vmatprep.subr.mxu0 %v21925_v54  ;;  %v39122_v62 = vpop.permute.xlu1 %22563  ;;  %v21923_v20 = vsel %vm3688_vm9, %v42125_v53, %v42121_v12  ;;  %v21922_v54 = vsel %vm3688_vm9, %v42114_v47, %v42125_v53  ;;  %v42126_v12 = vld [vmem:[#allocation45_spill] sm:$0xff] }
 0xaab   : > { %20922 = vmatprep.mubr.f32.mxu1 %v41945_v0  ;;  %22019 = vmatprep.mubr.f32.mxu0 %v41945_v0 }
 0xaac   : > { %33659 = vmatmul.mubr.msk.f32.vlgmr.msra.gmra.mrb[26].mxu1 %vm474_vm4, %v38931_v57  ;;  %33674 = vmatmul.mubr.msk.f32.vlgmr.msra.gmra.mrb[24].mxu0 %vm474_vm4, %v39118_v31 }
 0xaad   : > { %21001 = vmatpush1.msra.mxu1 %v20620_v41  ;;  %22098 = vmatpush1.msra.mxu0 %v21924_v26  ;;  %v20607_v61 = vpop.permute.xlu0 %20606 }
 0xaae   : > { %22239 = vmatprep.subr.mxu0 %v21929_v10  ;;  %21064 = vmatprep.mubr.f32.mxu1 %v41945_v0  ;;  %v20625_v63 = vsel %vm2376_vm7, %v20607_v61, %v38816_v9  ;;  %v20624_v30 = vsel %vm2376_vm7, %v38800_v36, %v20607_v61  ;;  %v39144_v33 = vpop.permute.xlu1 %22567  ;;  %v21933_v36 = vsel %vm3688_vm9, %v38936_v40, %v38944_v60 }
 0xaaf   : > { %22161 = vmatprep.mubr.f32.mxu0 %v41945_v0  ;;  %21142 = vmatprep.subr.mxu1 %v20625_v63  ;;  %v21271_v40 = vsel %vm3032_vm8, %v42106_v15, %v42123_v35  ;;  %v21931_v61 = vsel %vm3688_vm9, %v38911_v38, %v38921_v2  ;;  %v21930_v2 = vsel %vm3688_vm9, %v38897_v14, %v38911_v38 }
 0xab0   : > { %33661 = vmatmul.mubr.msk.f32.vlgmr.msra.gmra.mrb[28].mxu1 %vm474_vm4, %v38931_v57  ;;  %33676 = vmatmul.mubr.msk.f32.vlgmr.msra.gmra.mrb[26].mxu0 %vm474_vm4, %v39118_v31 }
 0xab1   : > { %22240 = vmatpush1.msra.mxu0 %v21928_v24  ;;  %21143 = vmatpush1.msra.mxu1 %v20624_v30  ;;  %v39157_v9 = vpop.permute.xlu0 %22569  ;;  %v39290_v30 = vld [vmem:[%s41776_s2 + $0x110] sm:$0xff] }
 0xab2   : > { %22381 = vmatprep.subr.mxu0 %v21933_v36  ;;  %21206 = vmatprep.mubr.f32.mxu1 %v41945_v0  ;;  %v39163_v8 = vpop.permute.xlu1 %23198 }
 0xab3   : > { %22303 = vmatprep.mubr.f32.mxu0 %v41945_v0  ;;  %21371 = vmatprep.subr.mxu1 %v21268_v23 }
 0xab4   : > { %33663 = vmatmul.mubr.msk.f32.vlgmr.msra.gmra.mrb[30].mxu1 %vm474_vm4, %v38931_v57  ;;  %33678 = vmatmul.mubr.msk.f32.vlgmr.msra.gmra.mrb[28].mxu0 %vm474_vm4, %v39118_v31  ;;  %v21272_v57 = vsel %vm3032_vm8, %v42123_v35, %v42111_v44  ;;  %v42124_v44 = vld [vmem:[#allocation40_spill] sm:$0xff] }
 0xab5   : > { %22382 = vmatpush1.msra.mxu0 %v21932_v28  ;;  %21372 = vmatpush1.msra.mxu1 %v21267_v5  ;;  %v39182_v48 = vpop.permute.xlu0 %22573  ;;  %v21276_v13 = vsel %vm3032_vm8, %v42124_v44, %v42113_v22  ;;  %v21275_v22 = vsel %vm3032_vm8, %v42109_v3, %v42124_v44  ;;  %v22577_v5 = vsel %vm4344_vm10, %v38982_v50, %v39006_v25  ;;  %v39376_v44 = vld [vmem:[%s41776_s2 + $0x118] sm:$0xff] }
 0xab6   : > { %22610 = vmatprep.subr.mxu0 %v22576_v59  ;;  %21513 = vmatprep.subr.mxu1 %v21272_v57  ;;  %v23197_v4 = vpop.permute.xlu1 %23196  ;;  %v22581_v50 = vsel %vm4344_vm10, %v39050_v56, %v39074_v19  ;;  %v22585_v56 = vsel %vm4344_vm10, %v39093_v11, %v39122_v62 }
 0xab7   : > { %21435 = vmatprep.mubr.f32.mxu1 %v41945_v0  ;;  %22445 = vmatprep.mubr.f32.mxu0 %v41945_v0  ;;  %v23230_v47 = vsel %vm5000_vm11, %v23197_v4, %v39163_v8 }
 0xab8   : > { %33666 = vmatmul.mubr.msk.f32.vlgmr.msra.gmra.mrb[24].mxu1 %vm474_vm4, %v39029_v45  ;;  %33680 = vmatmul.mubr.msk.f32.vlgmr.msra.gmra.mrb[30].mxu0 %vm474_vm4, %v39118_v31 }
 0xab9   : > { %21514 = vmatpush1.msra.mxu1 %v21271_v40  ;;  %22611 = vmatpush1.msra.mxu0 %v22575_v27  ;;  %v39207_v34 = vpop.permute.xlu0 %23200 }
 0xaba   : > { %21655 = vmatprep.subr.mxu1 %v21276_v13  ;;  %22752 = vmatprep.subr.mxu0 %v22580_v7  ;;  %v21262_v15 = vpop.permute.xlu1 %21261  ;;  %v23231_v41 = vsel %vm5000_vm11, %v39163_v8, %v39207_v34 }
 0xabb   : > { %21577 = vmatprep.mubr.f32.mxu1 %v41945_v0  ;;  %22674 = vmatprep.mubr.f32.mxu0 %v41945_v0  ;;  %v21280_v39 = vsel %vm3032_vm8, %v21262_v15, %v38867_v52  ;;  %v21279_v3 = vsel %vm3032_vm8, %v38849_v51, %v21262_v15  ;;  %v22583_v52 = vsel %vm4344_vm10, %v39068_v29, %v39095_v58 }
 0xabc   : > { %33668 = vmatmul.mubr.msk.f32.vlgmr.msra.gmra.mrb[26].mxu1 %vm474_vm4, %v39029_v45  ;;  %33683 = vmatmul.mubr.msk.f32.vlgmr.msra.gmra.mrb[24].mxu0 %vm474_vm4, %v39205_v6  ;;  %v22588_v51 = vsel %vm4344_vm10, %v39144_v33, %v39157_v9  ;;  %v22587_v58 = vsel %vm4344_vm10, %v39120_v1, %v39144_v33 }
 0xabd   : > { %21656 = vmatpush1.msra.mxu1 %v21275_v22  ;;  %22753 = vmatpush1.msra.mxu0 %v22579_v46  ;;  %v39226_v42 = vpop.permute.xlu0 %23202 }
 0xabe   : > { %22894 = vmatprep.subr.mxu0 %v22584_v49  ;;  %21719 = vmatprep.mubr.f32.mxu1 %v41945_v0  ;;  %v39231_v16 = vpop.permute.xlu1 %23204  ;;  %v23232_v7 = vsel %vm5000_vm11, %v39207_v34, %v39226_v42 }
 0xabf   : > { %22816 = vmatprep.mubr.f32.mxu0 %v41945_v0  ;;  %21797 = vmatprep.subr.mxu1 %v21280_v39 }
 0xac0   : > { %33670 = vmatmul.mubr.msk.f32.vlgmr.msra.gmra.mrb[28].mxu1 %vm474_vm4, %v39029_v45  ;;  %33685 = vmatmul.mubr.msk.f32.vlgmr.msra.gmra.mrb[26].mxu0 %vm474_vm4, %v39205_v6 }
 0xac1   : > { %22895 = vmatpush1.msra.mxu0 %v22583_v52  ;;  %21798 = vmatpush1.msra.mxu1 %v21279_v3  ;;  %v23207_v21 = vpop.permute.xlu0 %23206 }
 0xac2   : > { %23036 = vmatprep.subr.mxu0 %v22588_v51  ;;  %21861 = vmatprep.mubr.f32.mxu1 %v41945_v0  ;;  %v39248_v37 = vpop.permute.xlu1 %23208  ;;  %v23234_v24 = vsel %vm5000_vm11, %v39231_v16, %v23207_v21 }
 0xac3   : > { %22958 = vmatprep.mubr.f32.mxu0 %v41945_v0  ;;  %22026 = vmatprep.subr.mxu1 %v21923_v20  ;;  %v23235_v63 = vsel %vm5000_vm11, %v23207_v21, %v39248_v37 }
 0xac4   : > { %33672 = vmatmul.mubr.msk.f32.vlgmr.msra.gmra.mrb[30].mxu1 %vm474_vm4, %v39029_v45  ;;  %33687 = vmatmul.mubr.msk.f32.vlgmr.msra.gmra.mrb[28].mxu0 %vm474_vm4, %v39205_v6  ;;  %v21927_v45 = vsel %vm3688_vm9, %v42126_v12, %v38873_v43  ;;  %v21926_v43 = vsel %vm3688_vm9, %v42119_v32, %v42126_v12 }
 0xac5   : > { %23037 = vmatpush1.msra.mxu0 %v22587_v58  ;;  %22027 = vmatpush1.msra.mxu1 %v21922_v54  ;;  %v39267_v26 = vpop.permute.xlu0 %23210 }
 0xac6   : > { %23265 = vmatprep.subr.mxu0 %v23231_v41  ;;  %22168 = vmatprep.subr.mxu1 %v21927_v45  ;;  %v39269_v10 = vpop.permute.xlu1 %23212  ;;  %v23236_v34 = vsel %vm5000_vm11, %v39248_v37, %v39267_v26 }
 0xac7   : > { %22090 = vmatprep.mubr.f32.mxu1 %v41945_v0  ;;  %23100 = vmatprep.mubr.f32.mxu0 %v41945_v0  ;;  %v23237_v15 = vsel %vm5000_vm11, %v39267_v26, %v39269_v10 }
 0xac8   : > { %33675 = vmatmul.mubr.msk.f32.vlgmr.msra.gmra.mrb[24].mxu1 %vm474_vm4, %v39118_v31  ;;  %33689 = vmatmul.mubr.msk.f32.vlgmr.msra.gmra.mrb[30].mxu0 %vm474_vm4, %v39205_v6 }
 0xac9   : > { %22169 = vmatpush1.msra.mxu1 %v21926_v43  ;;  %23266 = vmatpush1.msra.mxu0 %v23230_v47  ;;  %v23215_v33 = vpop.permute.xlu0 %23214 }
 0xaca   : > { %22310 = vmatprep.subr.mxu1 %v21931_v61  ;;  %23407 = vmatprep.subr.mxu0 %v23235_v63  ;;  %v39292_v32 = vpop.permute.xlu1 %23216 }
 0xacb   : > { %22232 = vmatprep.mubr.f32.mxu1 %v41945_v0  ;;  %23329 = vmatprep.mubr.f32.mxu0 %v41945_v0  ;;  %v23239_v36 = vsel %vm5000_vm11, %v23215_v33, %v39292_v32 }
 0xacc   : > { %33677 = vmatmul.mubr.msk.f32.vlgmr.msra.gmra.mrb[26].mxu1 %vm474_vm4, %v39118_v31  ;;  %33692 = vmatmul.mubr.msk.f32.vlgmr.msra.gmra.mrb[24].mxu0 %vm474_vm4, %v39290_v30 }
 0xacd   : > { %22311 = vmatpush1.msra.mxu1 %v21930_v2  ;;  %23408 = vmatpush1.msra.mxu0 %v23234_v24  ;;  %v21917_v55 = vpop.permute.xlu0 %21916 }
 0xace   : > { %22374 = vmatprep.mubr.f32.mxu1 %v41945_v0  ;;  %v21935_v23 = vsel %vm3688_vm9, %v21917_v55, %v38965_v17  ;;  %23471 = vmatprep.mubr.f32.mxu0 %v41945_v0  ;;  %v21934_v14 = vsel %vm3688_vm9, %v38944_v60, %v21917_v55  ;;  %v39313_v38 = vpop.permute.xlu1 %23220  ;;  %v23238_v17 = vsel %vm5000_vm11, %v39269_v10, %v23215_v33 }
 0xacf   : > { %22452 = vmatprep.subr.mxu1 %v21935_v23  ;;  %23549 = vmatprep.subr.mxu0 %v23239_v36  ;;  %v22578_v60 = vsel %vm4344_vm10, %v39006_v25, %v39031_v18  ;;  %v22582_v18 = vsel %vm4344_vm10, %v39074_v19, %v39068_v29  ;;  %v22586_v25 = vsel %vm4344_vm10, %v39122_v62, %v39120_v1 }
 0xad0   : > { %33679 = vmatmul.mubr.msk.f32.vlgmr.msra.gmra.mrb[28].mxu1 %vm474_vm4, %v39118_v31  ;;  %33694 = vmatmul.mubr.msk.f32.vlgmr.msra.gmra.mrb[26].mxu0 %vm474_vm4, %v39290_v30  ;;  %v23233_v62 = vsel %vm5000_vm11, %v39226_v42, %v39231_v16 }
 0xad1   : > { %22453 = vmatpush1.msra.mxu1 %v21934_v14  ;;  %22516 = vmatprep.mubr.f32.mxu1 %v41945_v0  ;;  %v39325_v8 = vpop.permute.xlu0 %23218 }
 0xad2   : > { %23550 = vmatpush1.msra.mxu0 %v23238_v17  ;;  %22681 = vmatprep.subr.mxu1 %v22578_v60  ;;  %v39327_v28 = vpop.permute.xlu1 %23224  ;;  %v23241_v49 = vsel %vm5000_vm11, %v39325_v8, %v39313_v38  ;;  %v23240_v16 = vsel %vm5000_vm11, %v39292_v32, %v39325_v8 }
 0xad3   : > { %23613 = vmatprep.mubr.f32.mxu0 %v41945_v0 }
 0xad4   : > { %33681 = vmatmul.mubr.msk.f32.vlgmr.msra.gmra.mrb[30].mxu1 %vm474_vm4, %v39118_v31  ;;  %33696 = vmatmul.mubr.msk.f32.vlgmr.msra.gmra.mrb[28].mxu0 %vm474_vm4, %v39290_v30 }
 0xad5   : > { %22682 = vmatpush1.msra.mxu1 %v22577_v5  ;;  %22745 = vmatprep.mubr.f32.mxu1 %v41945_v0  ;;  %v23223_v59 = vpop.permute.xlu0 %23222 }
 0xad6   : > { %22823 = vmatprep.subr.mxu1 %v22582_v18  ;;  %v23243_v35 = vsel %vm5000_vm11, %v23223_v59, %v39327_v28  ;;  %v23242_v31 = vsel %vm5000_vm11, %v39313_v38, %v23223_v59  ;;  %v39345_v57 = vpop.permute.xlu1 %23228  ;;  %23755 = vmatprep.mubr.f32.mxu0 %v41945_v0  ;;  %v42128_v18 = vld [vmem:[#allocation7_spill] sm:$0xff] }
 0xad7   : > { %23691 = vmatprep.subr.mxu0 %v23243_v35 }
 0xad8   : > { %33684 = vmatmul.mubr.msk.f32.vlgmr.msra.gmra.mrb[24].mxu1 %vm474_vm4, %v39205_v6  ;;  %23692 = vmatpush1.msra.mxu0 %v23242_v31 }
 0xad9   : > { %22824 = vmatpush1.msra.mxu1 %v22581_v50  ;;  %22887 = vmatprep.mubr.f32.mxu1 %v41945_v0  ;;  %v23854_v29 = vpop.permute.xlu0 %23853 }
 0xada   : > { %22965 = vmatprep.subr.mxu1 %v22586_v25  ;;  %v22572_v4 = vpop.permute.xlu1 %22571  ;;  %33698 = vmatmul.mubr.msk.f32.vlgmr.msra.gmra.mrb[30].mxu0 %vm474_vm4, %v39290_v30 }
 0xadb   : > { %v22590_v27 = vsel %vm4344_vm10, %v22572_v4, %v39182_v48  ;;  %23984 = vmatprep.mubr.f32.mxu0 %v41945_v0  ;;  %v22589_v1 = vsel %vm4344_vm10, %v39157_v9, %v22572_v4 }
 0xadc   : > { %33686 = vmatmul.mubr.msk.f32.vlgmr.msra.gmra.mrb[26].mxu1 %vm474_vm4, %v39205_v6 }
 0xadd   : > { %22966 = vmatpush1.msra.mxu1 %v22585_v56  ;;  %23029 = vmatprep.mubr.f32.mxu1 %v41945_v0  ;;  %v23852_v19 = vpop.permute.xlu0 %23851 }
 0xade   : > { %23107 = vmatprep.subr.mxu1 %v22590_v27  ;;  %v23856_v40 = vpop.permute.xlu1 %23855  ;;  %v23885_v11 = vsel %vm5656_vm12, %v23852_v19, %v23854_v29 }
 0xadf   : > { %v23886_v48 = vsel %vm5656_vm12, %v23854_v29, %v23856_v40 }
 0xae0   : > { %33688 = vmatmul.mubr.msk.f32.vlgmr.msra.gmra.mrb[28].mxu1 %vm474_vm4, %v39205_v6  ;;  %23920 = vmatprep.subr.mxu0 %v23886_v48 }
 0xae1   : > { %23108 = vmatpush1.msra.mxu1 %v22589_v1  ;;  %23171 = vmatprep.mubr.f32.mxu1 %v41945_v0  ;;  %v23860_v9 = vpop.permute.xlu0 %23859 }
 0xae2   : > { %23336 = vmatprep.subr.mxu1 %v23233_v62  ;;  %23921 = vmatpush1.msra.mxu0 %v23885_v11  ;;  %v23858_v13 = vpop.permute.xlu1 %23857  ;;  %v42129_v11 = vld [vmem:[#allocation8_spill] sm:$0xff] }
 0xae3   : > { %33701 = vmatmul.mubr.msk.f32.vlgmr.msra.gmra.mrb[24].mxu0 %vm474_vm4, %v39376_v44  ;;  %v23888_v20 = vsel %vm5656_vm12, %v23858_v13, %v23860_v9  ;;  %v23887_v41 = vsel %vm5656_vm12, %v23856_v40, %v23858_v13 }
 0xae4   : > { %33690 = vmatmul.mubr.msk.f32.vlgmr.msra.gmra.mrb[30].mxu1 %vm474_vm4, %v39205_v6  ;;  %24126 = vmatprep.mubr.f32.mxu0 %v41945_v0 }
 0xae5   : > { %23337 = vmatpush1.msra.mxu1 %v23232_v7  ;;  %23400 = vmatprep.mubr.f32.mxu1 %v41945_v0  ;;  %v23864_v22 = vpop.permute.xlu0 %23863 }
 0xae6   : > { %23478 = vmatprep.subr.mxu1 %v23237_v15  ;;  %v23862_v46 = vpop.permute.xlu1 %23861  ;;  %v42130_v15 = vld [vmem:[#allocation9_spill] sm:$0xff] }
 0xae7   : > { %v23890_v39 = vsel %vm5656_vm12, %v23862_v46, %v23864_v22  ;;  %v23889_v6 = vsel %vm5656_vm12, %v23860_v9, %v23862_v46 }
 0xae8   : > { %33693 = vmatmul.mubr.msk.f32.vlgmr.msra.gmra.mrb[24].mxu1 %vm474_vm4, %v39290_v30  ;;  %24062 = vmatprep.subr.mxu0 %v23890_v39 }
 0xae9   : > { %23479 = vmatpush1.msra.mxu1 %v23236_v34  ;;  %23542 = vmatprep.mubr.f32.mxu1 %v41945_v0  ;;  %v23868_v42 = vpop.permute.xlu0 %23867 }
 0xaea   : > { %23620 = vmatprep.subr.mxu1 %v23241_v49  ;;  %24063 = vmatpush1.msra.mxu0 %v23889_v6  ;;  %v23866_v3 = vpop.permute.xlu1 %23865  ;;  %v42131_v49 = vld [vmem:[#allocation10_spill] sm:$0xff] }
 0xaeb   : > { %33703 = vmatmul.mubr.msk.f32.vlgmr.msra.gmra.mrb[26].mxu0 %vm474_vm4, %v39376_v44  ;;  %v23892_v45 = vsel %vm5656_vm12, %v23866_v3, %v23868_v42  ;;  %v23891_v47 = vsel %vm5656_vm12, %v23864_v22, %v23866_v3 }
 0xaec   : > { %33695 = vmatmul.mubr.msk.f32.vlgmr.msra.gmra.mrb[26].mxu1 %vm474_vm4, %v39290_v30  ;;  %24268 = vmatprep.mubr.f32.mxu0 %v41945_v0 }
 0xaed   : > { %23621 = vmatpush1.msra.mxu1 %v23240_v16  ;;  %23684 = vmatprep.mubr.f32.mxu1 %v41945_v0  ;;  %v23227_v52 = vpop.permute.xlu0 %23226 }
 0xaee   : > { %v23245_v51 = vsel %vm5000_vm11, %v23227_v52, %v39345_v57  ;;  %v23244_v21 = vsel %vm5000_vm11, %v39327_v28, %v23227_v52  ;;  %v23870_v53 = vpop.permute.xlu1 %23869  ;;  %v42127_v28 = vld [vmem:[#allocation6_spill] sm:$0xff] }
 0xaef   : > { %23762 = vmatprep.subr.mxu1 %v23245_v51  ;;  %v23893_v54 = vsel %vm5656_vm12, %v23868_v42, %v23870_v53  ;;  %v42132_v51 = vld [vmem:[#allocation11_spill] sm:$0xff] }
 0xaf0   : > { %33697 = vmatmul.mubr.msk.f32.vlgmr.msra.gmra.mrb[28].mxu1 %vm474_vm4, %v39290_v30 }
 0xaf1   : > { %23763 = vmatpush1.msra.mxu1 %v23244_v21  ;;  %23826 = vmatprep.mubr.f32.mxu1 %v41945_v0  ;;  %v23872_v37 = vpop.permute.xlu0 %23871 }
 0xaf2   : > { %23991 = vmatprep.subr.mxu1 %v23888_v20  ;;  %v23894_v58 = vsel %vm5656_vm12, %v23870_v53, %v23872_v37 }
 0xaf3   : > { %24204 = vmatprep.subr.mxu0 %v23894_v58 }
 0xaf4   : > { %33699 = vmatmul.mubr.msk.f32.vlgmr.msra.gmra.mrb[30].mxu1 %vm474_vm4, %v39290_v30  ;;  %24205 = vmatpush1.msra.mxu0 %v23893_v54  ;;  %v23874_v12 = vpop.permute.xlu1 %23873  ;;  %v42133_v54 = vld [vmem:[#allocation12_spill] sm:$0xff] }
 0xaf5   : > { %23992 = vmatpush1.msra.mxu1 %v23887_v41  ;;  %24055 = vmatprep.mubr.f32.mxu1 %v41945_v0  ;;  %v23876_v26 = vpop.permute.xlu0 %23875  ;;  %v23895_v63 = vsel %vm5656_vm12, %v23872_v37, %v23874_v12 }
 0xaf6   : > { %24133 = vmatprep.subr.mxu1 %v23892_v45  ;;  %33705 = vmatmul.mubr.msk.f32.vlgmr.msra.gmra.mrb[28].mxu0 %vm474_vm4, %v39376_v44  ;;  %v23896_v10 = vsel %vm5656_vm12, %v23874_v12, %v23876_v26 }
 0xaf7   : > { %24410 = vmatprep.mubr.f32.mxu0 %v41945_v0 }
 0xaf8   : > { %33702 = vmatmul.mubr.msk.f32.vlgmr.msra.gmra.mrb[24].mxu1 %vm474_vm4, %v39376_v44 }
 0xaf9   : > { %24134 = vmatpush1.msra.mxu1 %v23891_v47  ;;  %24197 = vmatprep.mubr.f32.mxu1 %v41945_v0 }
 0xafa   : > { %24275 = vmatprep.subr.mxu1 %v23896_v10  ;;  %v23878_v43 = vpop.permute.xlu1 %23877  ;;  %v42134_v10 = vld [vmem:[#allocation13_spill] sm:$0xff] }
 0xafb   : > { %v23880_v61 = vpop.permute.xlu0 %23879  ;;  %v23897_v33 = vsel %vm5656_vm12, %v23876_v26, %v23878_v43 }
 0xafc   : > { %33704 = vmatmul.mubr.msk.f32.vlgmr.msra.gmra.mrb[26].mxu1 %vm474_vm4, %v39376_v44  ;;  %v23898_v30 = vsel %vm5656_vm12, %v23878_v43, %v23880_v61 }
 0xafd   : > { %24276 = vmatpush1.msra.mxu1 %v23895_v63  ;;  %24346 = vmatprep.subr.mxu0 %v23898_v30 }
 0xafe   : > { %24339 = vmatprep.mubr.f32.mxu1 %v41945_v0  ;;  %24347 = vmatpush1.msra.mxu0 %v23897_v33  ;;  %v23882_v32 = vpop.permute.xlu1 %23881 }
 0xaff   : > { %33707 = vmatmul.mubr.msk.f32.vlgmr.msra.gmra.mrb[30].mxu0 %vm474_vm4, %v39376_v44  ;;  %v23884_v2 = vpop.permute.xlu0 %23883  ;;  %v23899_v36 = vsel %vm5656_vm12, %v23880_v61, %v23882_v32  ;;  %v42135_v61 = vld [vmem:[#allocation14_spill] sm:$0xff] }
 0xb00   : > { %33706 = vmatmul.mubr.msk.f32.vlgmr.msra.gmra.mrb[28].mxu1 %vm474_vm4, %v39376_v44  ;;  %v23900_v24 = vsel %vm5656_vm12, %v23882_v32, %v23884_v2  ;;  %24827 = vmatprep.mubr.f32.mxu0 %v41945_v0  ;;  %v42136_v32 = vld [vmem:[#allocation15_spill] sm:$0xff] }
 0xb01   : > { %24417 = vmatprep.subr.mxu1 %v23900_v24  ;;  %24481 = vmatprep.mubr.f32.mxu1 %v41945_v0 }
 0xb02   : > { %24418 = vmatpush1.msra.mxu1 %v23899_v36 }
 0xb04   : > { %33708 = vmatmul.mubr.msk.f32.vlgmr.msra.gmra.mrb[30].mxu1 %vm474_vm4, %v39376_v44 }
 0xb05   : > { %24898 = vmatprep.mubr.f32.mxu1 %v41945_v0 }
 0xb0f   : > { %v39455_v55 = vpop.permute.xlu1 %24508 }
 0xbb6   : > { %v23986_v23 = vpop.f32.mrb[24].mxu0 }
 0xbb7   : > { %v24511_v14 = vadd.f32 %v39455_v55, %v23986_v23  ;;  %v23988_v38 = vpop.f32.mrb[25].mxu0  ;;  %v42137_v23 = vld [vmem:[#allocation16_spill] sm:$0xff] }
 0xbb8   : > { %v24512_v17 = vadd.f32 %v39455_v55, %v23988_v38 }
 0xbb9   : > { %v24527_v60 = vmax.f32 %v24511_v14, 0.0 }
 0xbba   : > { %v24528_v8 = vmax.f32 %v24512_v17, 0.0 }
 0xbbb   : > { %v24543_v5 = vmul.f32 %v24527_v60, %v42127_v28  ;;  %v42138_v60 = vld [vmem:[#allocation17_spill] sm:$0xff] }
 0xbbc   : > { %v24544_v59 = vmul.f32 %v24528_v8, %v42128_v18 }
 0xbbd   : > { %24575 = vrot.lane.b32.xlu0 %v24543_v5, %s34797_s14 }
 0xbbe   : > { %24577 = vrot.lane.b32.xlu1 %v24544_v59, %s34797_s14  ;;  %v24128_v35 = vpop.f32.mrb[26].mxu0 }
 0xbbf   : > { %v24130_v31 = vpop.f32.mrb[27].mxu0  ;;  %v24515_v29 = vadd.f32 %v39455_v55, %v24128_v35  ;;  %v42139_v35 = vld [vmem:[#allocation18_spill] sm:$0xff] }
 0xbc0   : > { %v24516_v56 = vadd.f32 %v39455_v55, %v24130_v31 }
 0xbc1   : > { %v24531_v44 = vmax.f32 %v24515_v29, 0.0 }
 0xbc2   : > { %v24532_v7 = vmax.f32 %v24516_v56, 0.0  ;;  %v42142_v56 = vld [vmem:[#allocation21_spill] sm:$0xff] }
 0xbc3   : > { %v24547_v42 = vmul.f32 %v24531_v44, %v42131_v49 }
 0xbc4   : > { %v24548_v21 = vmul.f32 %v24532_v7, %v42132_v51 }
 0xbc9   : > { %v24270_v57 = vpop.f32.mrb[28].mxu0 }
 0xbca   : > { %v24272_v50 = vpop.f32.mrb[29].mxu0  ;;  %v24519_v3 = vadd.f32 %v39455_v55, %v24270_v57 }
 0xbcb   : > { %v24057_v25 = vpop.f32.mrb[24].mxu1  ;;  %v24520_v53 = vadd.f32 %v39455_v55, %v24272_v50  ;;  %v42140_v50 = vld [vmem:[#allocation19_spill] sm:$0xff] }
 0xbcc   : > { %v24513_v4 = vadd.f32 %v39455_v55, %v24057_v25  ;;  %v24059_v27 = vpop.f32.mrb[25].mxu1  ;;  %v24535_v58 = vmax.f32 %v24519_v3, 0.0 }
 0xbcd   : > { %v24514_v19 = vadd.f32 %v39455_v55, %v24059_v27  ;;  %v24536_v26 = vmax.f32 %v24520_v53, 0.0 }
 0xbce   : > { %v24529_v1 = vmax.f32 %v24513_v4, 0.0  ;;  %v24551_v63 = vmul.f32 %v24535_v58, %v42135_v61  ;;  %v42141_v4 = vld [vmem:[#allocation20_spill] sm:$0xff] }
 0xbcf   : > { %v24530_v40 = vmax.f32 %v24514_v19, 0.0  ;;  %v24199_v48 = vpop.f32.mrb[26].mxu1  ;;  %v24552_v2 = vmul.f32 %v24536_v26, %v42136_v32 }
 0xbd0   : > { %v24545_v62 = vmul.f32 %v24529_v1, %v42129_v11  ;;  %v24517_v9 = vadd.f32 %v39455_v55, %v24199_v48  ;;  %v24201_v13 = vpop.f32.mrb[27].mxu1 }
 0xbd1   : > { %v24546_v22 = vmul.f32 %v24530_v40, %v42130_v15  ;;  %v24518_v46 = vadd.f32 %v39455_v55, %v24201_v13 }
 0xbd2   : > { %24579 = vrot.lane.b32.xlu0 %v24545_v62, %s34797_s14  ;;  %v24412_v39 = vpop.f32.mrb[30].mxu0  ;;  %v24533_v16 = vmax.f32 %v24517_v9, 0.0 }
 0xbd3   : > { %24581 = vrot.lane.b32.xlu1 %v24546_v22, %s34797_s14  ;;  %v24341_v6 = vpop.f32.mrb[28].mxu1  ;;  %v24414_v34 = vpop.f32.mrb[31].mxu0  ;;  %v24534_v20 = vmax.f32 %v24518_v46, 0.0  ;;  %v24523_v33 = vadd.f32 %v39455_v55, %v24412_v39 }
 0xbd4   : > { %v24343_v52 = vpop.f32.mrb[29].mxu1  ;;  %v24549_v41 = vmul.f32 %v24533_v16, %v42133_v54  ;;  %v24521_v12 = vadd.f32 %v39455_v55, %v24341_v6  ;;  %v24524_v36 = vadd.f32 %v39455_v55, %v24414_v34 }
 0xbd5   : > { %v24550_v47 = vmul.f32 %v24534_v20, %v42134_v10  ;;  %v24522_v43 = vadd.f32 %v39455_v55, %v24343_v52  ;;  %v24539_v38 = vmax.f32 %v24523_v33, 0.0 }
 0xbd6   : > { %24583 = vrot.lane.b32.xlu0 %v24547_v42, %s34797_s14  ;;  %v24537_v30 = vmax.f32 %v24521_v12, 0.0  ;;  %v24540_v5 = vmax.f32 %v24524_v36, 0.0 }
 0xbd7   : > { %24585 = vrot.lane.b32.xlu1 %v24548_v21, %s34797_s14  ;;  %v24483_v37 = vpop.f32.mrb[30].mxu1  ;;  %v24538_v24 = vmax.f32 %v24522_v43, 0.0  ;;  %v24555_v31 = vmul.f32 %v24539_v38, %v42139_v35 }
 0xbd8   : > { %v24485_v45 = vpop.f32.mrb[31].mxu1  ;;  %v24553_v14 = vmul.f32 %v24537_v30, %v42137_v23  ;;  %v24525_v17 = vadd.f32 %v39455_v55, %v24483_v37  ;;  %v24556_v25 = vmul.f32 %v24540_v5, %v42140_v50 }
 0xbd9   : > { %v24554_v8 = vmul.f32 %v24538_v24, %v42138_v60  ;;  %v24526_v59 = vadd.f32 %v39455_v55, %v24485_v45 }
 0xbda   : > { %24587 = vrot.lane.b32.xlu0 %v24549_v41, %s34797_s14  ;;  %v24541_v57 = vmax.f32 %v24525_v17, 0.0 }
 0xbdb   : > { %24589 = vrot.lane.b32.xlu1 %v24550_v47, %s34797_s14  ;;  %v24542_v29 = vmax.f32 %v24526_v59, 0.0 }
 0xbdc   : > { %v24557_v27 = vmul.f32 %v24541_v57, %v42141_v4 }
 0xbdd   : > { %v24558_v19 = vmul.f32 %v24542_v29, %v42142_v56 }
 0xbde   : > { %24591 = vrot.lane.b32.xlu0 %v24551_v63, %s34797_s14 }
 0xbdf   : > { %24593 = vrot.lane.b32.xlu1 %v24552_v2, %s34797_s14 }
 0xbe2   : > { %24595 = vrot.lane.b32.xlu0 %v24553_v14, %s34797_s14 }
 0xbe3   : > { %24597 = vrot.lane.b32.xlu1 %v24554_v8, %s34797_s14 }
 0xbe6   : > { %24599 = vrot.lane.b32.xlu0 %v24555_v31, %s34797_s14 }
 0xbe7   : > { %24601 = vrot.lane.b32.xlu1 %v24556_v25, %s34797_s14 }
 0xbea   : > { %24603 = vrot.lane.b32.xlu0 %v24557_v27, %s34797_s14 }
 0xbeb   : > { %24605 = vrot.lane.b32.xlu1 %v24558_v19, %s34797_s14 }
 0xc2f   : > { %v24576_v55 = vpop.permute.xlu0 %24575 }
 0xc30   : > { %24639 = vst.msk [vmem:[#allocation2] sm:$0xff] %vm350_vm2, %v24576_v55  ;;  %v24578_v1 = vpop.permute.xlu1 %24577 }
 0xc31   : > { %v39507_v40 = vsel %vm250_vm0, %v24576_v55, %v24578_v1  ;;  %v39724_v55 = vld [vmem:[%s41776_s2 + $0x128] sm:$0xff] }
 0xc37   : > { %v39509_v48 = vld [vmem:[#allocation2] sm:$0xff] }
 0xc38   : > { %25331 = vrot.lane.b32.xlu1 %v39509_v48, %s34798_s15  ;;  %24694 = vrot.lane.b32.xlu0 %v39509_v48, %s34799_s16 }
 0xc3c   : > { %26625 = vrot.lane.b32.xlu1 %v39509_v48, %s34801_s18  ;;  %25970 = vrot.lane.b32.xlu0 %v39509_v48, %s34800_s17 }
 0xc40   : > { %27935 = vrot.lane.b32.xlu1 %v39509_v48, %s34803_s9  ;;  %27280 = vrot.lane.b32.xlu0 %v39509_v48, %s34802_s26 }
 0xc44   : > { %v24580_v44 = vpop.permute.xlu0 %24579  ;;  %25333 = vrot.lane.b32.xlu1 %v39507_v40, %s34798_s15  ;;  %24696 = vrot.lane.b32.xlu0 %v39507_v40, %s34799_s16 }
 0xc45   : > { %v39528_v62 = vsel %vm250_vm0, %v24578_v1, %v24580_v44  ;;  %v24582_v9 = vpop.permute.xlu1 %24581 }
 0xc46   : > { %v39531_v13 = vsel %vm250_vm0, %v24580_v44, %v24582_v9 }
 0xc48   : > { %v24584_v7 = vpop.permute.xlu0 %24583  ;;  %26627 = vrot.lane.b32.xlu1 %v39507_v40, %s34801_s18  ;;  %25972 = vrot.lane.b32.xlu0 %v39507_v40, %s34800_s17 }
 0xc49   : > { %v39538_v22 = vsel %vm250_vm0, %v24582_v9, %v24584_v7  ;;  %v24586_v46 = vpop.permute.xlu1 %24585 }
 0xc4a   : > { %v39541_v39 = vsel %vm250_vm0, %v24584_v7, %v24586_v46 }
 0xc4c   : > { %v24588_v6 = vpop.permute.xlu0 %24587  ;;  %27937 = vrot.lane.b32.xlu1 %v39507_v40, %s34803_s9  ;;  %27282 = vrot.lane.b32.xlu0 %v39507_v40, %s34802_s26 }
 0xc4d   : > { %v39548_v34 = vsel %vm250_vm0, %v24586_v46, %v24588_v6  ;;  %v24590_v42 = vpop.permute.xlu1 %24589 }
 0xc4e   : > { %v39551_v3 = vsel %vm250_vm0, %v24588_v6, %v24590_v42 }
 0xc50   : > { %v24592_v16 = vpop.permute.xlu0 %24591  ;;  %25335 = vrot.lane.b32.xlu0 %v39528_v62, %s34798_s15  ;;  %24698 = vrot.lane.b32.xlu1 %v39528_v62, %s34799_s16 }
 0xc51   : > { %v39558_v52 = vsel %vm250_vm0, %v24590_v42, %v24592_v16  ;;  %v24594_v21 = vpop.permute.xlu1 %24593 }
 0xc52   : > { %v39561_v53 = vsel %vm250_vm0, %v24592_v16, %v24594_v21 }
 0xc54   : > { %v24596_v20 = vpop.permute.xlu0 %24595  ;;  %26629 = vrot.lane.b32.xlu0 %v39528_v62, %s34801_s18  ;;  %25974 = vrot.lane.b32.xlu1 %v39528_v62, %s34800_s17 }
 0xc55   : > { %v39568_v37 = vsel %vm250_vm0, %v24594_v21, %v24596_v20  ;;  %v24598_v58 = vpop.permute.xlu1 %24597 }
 0xc56   : > { %v39571_v41 = vsel %vm250_vm0, %v24596_v20, %v24598_v58 }
 0xc58   : > { %v24600_v12 = vpop.permute.xlu0 %24599  ;;  %27939 = vrot.lane.b32.xlu0 %v39528_v62, %s34803_s9  ;;  %27284 = vrot.lane.b32.xlu1 %v39528_v62, %s34802_s26 }
 0xc59   : > { %v39578_v45 = vsel %vm250_vm0, %v24598_v58, %v24600_v12  ;;  %v24602_v26 = vpop.permute.xlu1 %24601 }
 0xc5a   : > { %v39581_v47 = vsel %vm250_vm0, %v24600_v12, %v24602_v26 }
 0xc5c   : > { %v24604_v43 = vpop.permute.xlu0 %24603  ;;  %24700 = vrot.lane.b32.xlu1 %v39531_v13, %s34799_s16  ;;  %24702 = vrot.lane.b32.xlu0 %v39538_v22, %s34799_s16 }
 0xc5d   : > { %v39588_v63 = vsel %vm250_vm0, %v24602_v26, %v24604_v43  ;;  %v24606_v30 = vpop.permute.xlu1 %24605 }
 0xc5e   : > { %v39591_v33 = vsel %vm250_vm0, %v24604_v43, %v24606_v30  ;;  %24655 = vst.msk [vmem:[#allocation2 + $0x80] sm:$0xff] %vm250_vm0, %v24606_v30 }
 0xc60   : > { %25339 = vrot.lane.b32.xlu1 %v39538_v22, %s34798_s15  ;;  %25337 = vrot.lane.b32.xlu0 %v39531_v13, %s34798_s15 }
 0xc64   : > { %25976 = vrot.lane.b32.xlu1 %v39531_v13, %s34800_s17  ;;  %25978 = vrot.lane.b32.xlu0 %v39538_v22, %s34800_s17 }
 0xc65   : > { %v39756_v12 = vld [vmem:[#allocation2 + $0x80] sm:$0xff] }
 0xc68   : > { %26633 = vrot.lane.b32.xlu1 %v39538_v22, %s34801_s18  ;;  %26631 = vrot.lane.b32.xlu0 %v39531_v13, %s34801_s18 }
 0xc6c   : > { %27286 = vrot.lane.b32.xlu1 %v39531_v13, %s34802_s26  ;;  %27288 = vrot.lane.b32.xlu0 %v39538_v22, %s34802_s26 }
 0xc70   : > { %27943 = vrot.lane.b32.xlu1 %v39538_v22, %s34803_s9  ;;  %27941 = vrot.lane.b32.xlu0 %v39531_v13, %s34803_s9 }
 0xc74   : > { %24704 = vrot.lane.b32.xlu1 %v39541_v39, %s34799_s16  ;;  %25341 = vrot.lane.b32.xlu0 %v39541_v39, %s34798_s15 }
 0xc78   : > { %25980 = vrot.lane.b32.xlu1 %v39541_v39, %s34800_s17  ;;  %26635 = vrot.lane.b32.xlu0 %v39541_v39, %s34801_s18 }
 0xc7c   : > { %27290 = vrot.lane.b32.xlu1 %v39541_v39, %s34802_s26  ;;  %27945 = vrot.lane.b32.xlu0 %v39541_v39, %s34803_s9 }
 0xc80   : > { %25343 = vrot.lane.b32.xlu1 %v39548_v34, %s34798_s15  ;;  %24706 = vrot.lane.b32.xlu0 %v39548_v34, %s34799_s16 }
 0xc84   : > { %26637 = vrot.lane.b32.xlu1 %v39548_v34, %s34801_s18  ;;  %25982 = vrot.lane.b32.xlu0 %v39548_v34, %s34800_s17 }
 0xc88   : > { %24708 = vrot.lane.b32.xlu1 %v39551_v3, %s34799_s16  ;;  %27292 = vrot.lane.b32.xlu0 %v39548_v34, %s34802_s26 }
 0xc8c   : > { %25347 = vrot.lane.b32.xlu1 %v39558_v52, %s34798_s15  ;;  %24710 = vrot.lane.b32.xlu0 %v39558_v52, %s34799_s16 }
 0xc90   : > { %25984 = vrot.lane.b32.xlu1 %v39551_v3, %s34800_s17  ;;  %25345 = vrot.lane.b32.xlu0 %v39551_v3, %s34798_s15 }
 0xc94   : > { %26641 = vrot.lane.b32.xlu1 %v39558_v52, %s34801_s18  ;;  %25986 = vrot.lane.b32.xlu0 %v39558_v52, %s34800_s17 }
 0xc98   : > { %27294 = vrot.lane.b32.xlu1 %v39551_v3, %s34802_s26  ;;  %26639 = vrot.lane.b32.xlu0 %v39551_v3, %s34801_s18 }
 0xc9c   : > { %24712 = vrot.lane.b32.xlu1 %v39561_v53, %s34799_s16  ;;  %27296 = vrot.lane.b32.xlu0 %v39558_v52, %s34802_s26 }
 0xca0   : > { %25988 = vrot.lane.b32.xlu1 %v39561_v53, %s34800_s17  ;;  %25349 = vrot.lane.b32.xlu0 %v39561_v53, %s34798_s15 }
 0xca4   : > { %27298 = vrot.lane.b32.xlu1 %v39561_v53, %s34802_s26  ;;  %26643 = vrot.lane.b32.xlu0 %v39561_v53, %s34801_s18 }
 0xca8   : > { %25351 = vrot.lane.b32.xlu1 %v39568_v37, %s34798_s15  ;;  %24714 = vrot.lane.b32.xlu0 %v39568_v37, %s34799_s16 }
 0xcaa   : > { %v39670_v2 = vpop.permute.xlu1 %25331  ;;  %v24695_v24 = vpop.permute.xlu0 %24694 }
 0xcac   : > { %26645 = vrot.lane.b32.xlu1 %v39568_v37, %s34801_s18  ;;  %25990 = vrot.lane.b32.xlu0 %v39568_v37, %s34800_s17 }
 0xcae   : > { %v39676_v36 = vpop.permute.xlu1 %26625  ;;  %v39678_v14 = vpop.permute.xlu0 %25970 }
 0xcb0   : > { %24716 = vrot.lane.b32.xlu1 %v39571_v41, %s34799_s16  ;;  %27300 = vrot.lane.b32.xlu0 %v39568_v37, %s34802_s26 }
 0xcb2   : > { %v39684_v38 = vpop.permute.xlu1 %27935  ;;  %v39686_v17 = vpop.permute.xlu0 %27280 }
 0xcb3   : > { %42143 = vst [vmem:[#allocation30_spill] sm:$0xff] %v39684_v38  ;;  %42144 = vst [vmem:[#allocation43_spill] sm:$0xff] %v39686_v17 }
 0xcb4   : > { %25355 = vrot.lane.b32.xlu1 %v39578_v45, %s34798_s15  ;;  %24718 = vrot.lane.b32.xlu0 %v39578_v45, %s34799_s16 }
 0xcb6   : > { %v39692_v8 = vpop.permute.xlu1 %25333  ;;  %v24697_v5 = vpop.permute.xlu0 %24696 }
 0xcb7   : > { %v24728_v1 = vsel %vm441_vm3, %v24695_v24, %v24697_v5 }
 0xcb8   : > { %25992 = vrot.lane.b32.xlu1 %v39571_v41, %s34800_s17  ;;  %25353 = vrot.lane.b32.xlu0 %v39571_v41, %s34798_s15 }
 0xcba   : > { %v39698_v59 = vpop.permute.xlu1 %26627  ;;  %v39700_v31 = vpop.permute.xlu0 %25972 }
 0xcbc   : > { %26649 = vrot.lane.b32.xlu1 %v39578_v45, %s34801_s18  ;;  %25994 = vrot.lane.b32.xlu0 %v39578_v45, %s34800_s17 }
 0xcbe   : > { %v39706_v57 = vpop.permute.xlu1 %27937  ;;  %v39708_v25 = vpop.permute.xlu0 %27282 }
 0xcbf   : > { %42145 = vst [vmem:[#allocation48_spill] sm:$0xff] %v39706_v57  ;;  %42146 = vst [vmem:[#allocation35_spill] sm:$0xff] %v39708_v25 }
 0xcc0   : > { %27302 = vrot.lane.b32.xlu1 %v39571_v41, %s34802_s26  ;;  %26647 = vrot.lane.b32.xlu0 %v39571_v41, %s34801_s18 }
 0xcc2   : > { %v24699_v29 = vpop.permute.xlu1 %24698  ;;  %v39714_v27 = vpop.permute.xlu0 %25335 }
 0xcc3   : > { %v24729_v19 = vsel %vm441_vm3, %v24697_v5, %v24699_v29 }
 0xcc4   : > { %24720 = vrot.lane.b32.xlu1 %v39581_v47, %s34799_s16  ;;  %27304 = vrot.lane.b32.xlu0 %v39578_v45, %s34802_s26 }
 0xcc5   : > { %24763 = vmatprep.subr.mxu0 %v24729_v19 }
 0xcc6   : > { %24764 = vmatpush1.msra.mxu0 %v24728_v1  ;;  %v39727_v44 = vpop.permute.xlu1 %25974  ;;  %v39729_v9 = vpop.permute.xlu0 %26629 }
 0xcc7   : > { %33712 = vmatmul.mubr.msk.f32.vlgmr.msra.gmra.mrb[32].mxu0 %vm474_vm4, %v39724_v55 }
 0xcc8   : > { %25996 = vrot.lane.b32.xlu1 %v39581_v47, %s34800_s17  ;;  %25357 = vrot.lane.b32.xlu0 %v39581_v47, %s34798_s15 }
 0xcc9   : > { %24969 = vmatprep.mubr.f32.mxu0 %v41945_v0 }
 0xcca   : > { %v39738_v7 = vpop.permute.xlu1 %27284  ;;  %v39740_v46 = vpop.permute.xlu0 %27939 }
 0xccb   : > { %42147 = vst [vmem:[#allocation44_spill] sm:$0xff] %v39738_v7  ;;  %42148 = vst [vmem:[#allocation47_spill] sm:$0xff] %v39740_v46 }
 0xccc   : > { %27306 = vrot.lane.b32.xlu1 %v39581_v47, %s34802_s26  ;;  %26651 = vrot.lane.b32.xlu0 %v39581_v47, %s34801_s18 }
 0xcce   : > { %v24701_v6 = vpop.permute.xlu1 %24700  ;;  %v24703_v42 = vpop.permute.xlu0 %24702 }
 0xccf   : > { %v24731_v16 = vsel %vm441_vm3, %v24701_v6, %v24703_v42  ;;  %v24730_v21 = vsel %vm441_vm3, %v24699_v29, %v24701_v6 }
 0xcd0   : > { %25359 = vrot.lane.b32.xlu1 %v39588_v63, %s34798_s15  ;;  %24722 = vrot.lane.b32.xlu0 %v39588_v63, %s34799_s16 }
 0xcd1   : > { %24834 = vmatprep.subr.mxu1 %v24731_v16 }
 0xcd2   : > { %24835 = vmatpush1.msra.mxu1 %v24730_v21  ;;  %v39752_v20 = vpop.permute.xlu1 %25339  ;;  %v39754_v58 = vpop.permute.xlu0 %25337 }
 0xcd3   : > { %33713 = vmatmul.mubr.msk.f32.vlgmr.msra.gmra.mrb[32].mxu1 %vm474_vm4, %v39724_v55 }
 0xcd4   : > { %25363 = vrot.lane.b32.xlu1 %v39756_v12, %s34798_s15  ;;  %24726 = vrot.lane.b32.xlu0 %v39756_v12, %s34799_s16 }
 0xcd5   : > { %25040 = vmatprep.mubr.f32.mxu1 %v41945_v0 }
 0xcd6   : > { %v39765_v26 = vpop.permute.xlu1 %25976  ;;  %v39767_v43 = vpop.permute.xlu0 %25978 }
 0xcd8   : > { %26653 = vrot.lane.b32.xlu1 %v39588_v63, %s34801_s18  ;;  %25998 = vrot.lane.b32.xlu0 %v39588_v63, %s34800_s17 }
 0xcda   : > { %v39773_v30 = vpop.permute.xlu1 %26633  ;;  %v39775_v24 = vpop.permute.xlu0 %26631 }
 0xcdb   : > { %42149 = vst [vmem:[#allocation26_spill] sm:$0xff] %v39775_v24 }
 0xcdc   : > { %26657 = vrot.lane.b32.xlu1 %v39756_v12, %s34801_s18  ;;  %26002 = vrot.lane.b32.xlu0 %v39756_v12, %s34800_s17 }
 0xcde   : > { %v39781_v5 = vpop.permute.xlu1 %27286  ;;  %v39783_v29 = vpop.permute.xlu0 %27288 }
 0xcdf   : > { %42150 = vst [vmem:[#allocation39_spill] sm:$0xff] %v39781_v5  ;;  %42151 = vst [vmem:[#allocation22_spill] sm:$0xff] %v39783_v29 }
 0xce0   : > { %24724 = vrot.lane.b32.xlu1 %v39591_v33, %s34799_s16  ;;  %27308 = vrot.lane.b32.xlu0 %v39588_v63, %s34802_s26 }
 0xce2   : > { %v39789_v19 = vpop.permute.xlu1 %27943  ;;  %v39791_v1 = vpop.permute.xlu0 %27941 }
 0xce3   : > { %42152 = vst [vmem:[#allocation27_spill] sm:$0xff] %v39789_v19  ;;  %42153 = vst [vmem:[#allocation24_spill] sm:$0xff] %v39791_v1 }
 0xce4   : > { %27947 = vrot.lane.b32.xlu1 %v39548_v34, %s34803_s9  ;;  %27312 = vrot.lane.b32.xlu0 %v39756_v12, %s34802_s26 }
 0xce6   : > { %v24705_v6 = vpop.permute.xlu1 %24704  ;;  %v39797_v16 = vpop.permute.xlu0 %25341 }
 0xce7   : > { %v24732_v10 = vsel %vm441_vm3, %v24703_v42, %v24705_v6 }
 0xce8   : > { %27951 = vrot.lane.b32.xlu1 %v39558_v52, %s34803_s9  ;;  %27949 = vrot.lane.b32.xlu0 %v39551_v3, %s34803_s9 }
 0xcea   : > { %v39803_v21 = vpop.permute.xlu1 %25980  ;;  %v39805_v56 = vpop.permute.xlu0 %26635 }
 0xcec   : > { %27955 = vrot.lane.b32.xlu1 %v39568_v37, %s34803_s9  ;;  %27953 = vrot.lane.b32.xlu0 %v39561_v53, %s34803_s9 }
 0xcee   : > { %v39811_v4 = vpop.permute.xlu1 %27290  ;;  %v39813_v50 = vpop.permute.xlu0 %27945 }
 0xcef   : > { %42154 = vst [vmem:[#allocation34_spill] sm:$0xff] %v39811_v4  ;;  %42155 = vst [vmem:[#allocation25_spill] sm:$0xff] %v39813_v50 }
 0xcf0   : > { %27959 = vrot.lane.b32.xlu1 %v39578_v45, %s34803_s9  ;;  %27957 = vrot.lane.b32.xlu0 %v39571_v41, %s34803_s9 }
 0xcf2   : > { %v39819_v35 = vpop.permute.xlu1 %25343  ;;  %v24707_v60 = vpop.permute.xlu0 %24706 }
 0xcf3   : > { %v24733_v23 = vsel %vm441_vm3, %v24705_v6, %v24707_v60 }
 0xcf4   : > { %27963 = vrot.lane.b32.xlu1 %v39588_v63, %s34803_s9  ;;  %25361 = vrot.lane.b32.xlu0 %v39591_v33, %s34798_s15 }
 0xcf5   : > { %24905 = vmatprep.subr.mxu0 %v24733_v23 }
 0xcf6   : > { %24906 = vmatpush1.msra.mxu0 %v24732_v10  ;;  %v39827_v32 = vpop.permute.xlu1 %26637  ;;  %v39829_v54 = vpop.permute.xlu0 %25982 }
 0xcf7   : > { %33714 = vmatmul.mubr.msk.f32.vlgmr.msra.gmra.mrb[34].mxu0 %vm474_vm4, %v39724_v55 }
 0xcf8   : > { %27967 = vrot.lane.b32.xlu1 %v39756_v12, %s34803_s9  ;;  %27961 = vrot.lane.b32.xlu0 %v39581_v47, %s34803_s9 }
 0xcf9   : > { %25111 = vmatprep.mubr.f32.mxu0 %v41945_v0 }
 0xcfa   : > { %v24709_v61 = vpop.permute.xlu1 %24708  ;;  %v39838_v23 = vpop.permute.xlu0 %27292 }
 0xcfb   : > { %42156 = vst [vmem:[#allocation32_spill] sm:$0xff] %v39838_v23  ;;  %v24734_v15 = vsel %vm441_vm3, %v24707_v60, %v24709_v61 }
 0xcfc   : > { %28594 = vrot.lane.b32.xlu1 %v39528_v62, %s34804_s12  ;;  %28592 = vrot.lane.b32.xlu0 %v39507_v40, %s34804_s12 }
 0xcfe   : > { %v39844_v10 = vpop.permute.xlu1 %25347  ;;  %v24711_v42 = vpop.permute.xlu0 %24710 }
 0xcff   : > { %v24735_v6 = vsel %vm441_vm3, %v24709_v61, %v24711_v42 }
 0xd00   : > { %26000 = vrot.lane.b32.xlu1 %v39591_v33, %s34800_s17  ;;  %28590 = vrot.lane.b32.xlu0 %v39509_v48, %s34804_s12 }
 0xd01   : > { %24976 = vmatprep.subr.mxu1 %v24735_v6 }
 0xd02   : > { %24977 = vmatpush1.msra.mxu1 %v24734_v15  ;;  %v39852_v11 = vpop.permute.xlu1 %25984  ;;  %v39854_v51 = vpop.permute.xlu0 %25345 }
 0xd03   : > { %33715 = vmatmul.mubr.msk.f32.vlgmr.msra.gmra.mrb[34].mxu1 %vm474_vm4, %v39724_v55 }
 0xd04   : > { %28596 = vrot.lane.b32.xlu1 %v39531_v13, %s34804_s12  ;;  %28598 = vrot.lane.b32.xlu0 %v39538_v22, %s34804_s12 }
 0xd05   : > { %25182 = vmatprep.mubr.f32.mxu1 %v41945_v0 }
 0xd06   : > { %v39863_v49 = vpop.permute.xlu1 %26641  ;;  %v39865_v6 = vpop.permute.xlu0 %25986 }
 0xd07   : > { %42157 = vst [vmem:[#allocation33_spill] sm:$0xff] %v39863_v49  ;;  %v25365_v49 = vsel %vm1080_vm5, %v39670_v2, %v39692_v8 }
 0xd08   : > { %28600 = vrot.lane.b32.xlu1 %v39541_v39, %s34804_s12  ;;  %28602 = vrot.lane.b32.xlu0 %v39548_v34, %s34804_s12 }
 0xd0a   : > { %v39871_v15 = vpop.permute.xlu1 %27294  ;;  %v39873_v61 = vpop.permute.xlu0 %26639 }
 0xd0b   : > { %42158 = vst [vmem:[#allocation37_spill] sm:$0xff] %v39871_v15  ;;  %42159 = vst [vmem:[#allocation31_spill] sm:$0xff] %v39873_v61 }
 0xd0c   : > { %28604 = vrot.lane.b32.xlu1 %v39551_v3, %s34804_s12  ;;  %28606 = vrot.lane.b32.xlu0 %v39558_v52, %s34804_s12 }
 0xd0e   : > { %v24713_v60 = vpop.permute.xlu1 %24712  ;;  %v39879_v18 = vpop.permute.xlu0 %27296 }
 0xd0f   : > { %42160 = vst [vmem:[#allocation28_spill] sm:$0xff] %v39879_v18  ;;  %v24736_v57 = vsel %vm441_vm3, %v24711_v42, %v24713_v60 }
 0xd10   : > { %28608 = vrot.lane.b32.xlu1 %v39561_v53, %s34804_s12  ;;  %28610 = vrot.lane.b32.xlu0 %v39568_v37, %s34804_s12 }
 0xd12   : > { %v39885_v28 = vpop.permute.xlu1 %25988  ;;  %v39887_v1 = vpop.permute.xlu0 %25349 }
 0xd14   : > { %28612 = vrot.lane.b32.xlu1 %v39571_v41, %s34804_s12  ;;  %26655 = vrot.lane.b32.xlu0 %v39591_v33, %s34801_s18 }
 0xd16   : > { %v39893_v15 = vpop.permute.xlu1 %27298  ;;  %v39895_v19 = vpop.permute.xlu0 %26643 }
 0xd17   : > { %42161 = vst [vmem:[#allocation29_spill] sm:$0xff] %v39893_v15 }
 0xd18   : > { %28616 = vrot.lane.b32.xlu1 %v39581_v47, %s34804_s12  ;;  %28614 = vrot.lane.b32.xlu0 %v39578_v45, %s34804_s12 }
 0xd1a   : > { %v39901_v5 = vpop.permute.xlu1 %25351  ;;  %v24715_v50 = vpop.permute.xlu0 %24714 }
 0xd1b   : > { %v24737_v38 = vsel %vm441_vm3, %v24713_v60, %v24715_v50 }
 0xd1c   : > { %29247 = vrot.lane.b32.xlu1 %v39507_v40, %s34805_s20  ;;  %28618 = vrot.lane.b32.xlu0 %v39588_v63, %s34804_s12 }
 0xd1d   : > { %25047 = vmatprep.subr.mxu0 %v24737_v38 }
 0xd1e   : > { %25048 = vmatpush1.msra.mxu0 %v24736_v57  ;;  %v39909_v46 = vpop.permute.xlu1 %26645  ;;  %v39911_v18 = vpop.permute.xlu0 %25990 }
 0xd1f   : > { %33716 = vmatmul.mubr.msk.f32.vlgmr.msra.gmra.mrb[36].mxu0 %vm474_vm4, %v39724_v55 }
 0xd20   : > { %27310 = vrot.lane.b32.xlu1 %v39591_v33, %s34802_s26  ;;  %28622 = vrot.lane.b32.xlu0 %v39756_v12, %s34804_s12  ;;  %s242_s26 = sand.u32 1, %s34786_s22  }
 0xd21   : > { %25253 = vmatprep.mubr.f32.mxu0 %v41945_v0  ;;  %s33305_s29 = scalar_lea.sflag [#allocation4], %s242_s26 }
 0xd22   : > { %v24717_v15 = vpop.permute.xlu1 %24716  ;;  %v39920_v38 = vpop.permute.xlu0 %27300 }
 0xd23   : > { %42162 = vst [vmem:[#allocation49_spill] sm:$0xff] %v39920_v38  ;;  %v24738_v61 = vsel %vm441_vm3, %v24715_v50, %v24717_v15 }
 0xd24   : > { %29245 = vrot.lane.b32.xlu1 %v39509_v48, %s34805_s20  ;;  %29249 = vrot.lane.b32.xlu0 %v39528_v62, %s34805_s20 }
 0xd26   : > { %v39926_v57 = vpop.permute.xlu1 %25355  ;;  %v24719_v42 = vpop.permute.xlu0 %24718 }
 0xd27   : > { %v24739_v60 = vsel %vm441_vm3, %v24717_v15, %v24719_v42 }
 0xd28   : > { %29253 = vrot.lane.b32.xlu1 %v39538_v22, %s34805_s20  ;;  %29251 = vrot.lane.b32.xlu0 %v39531_v13, %s34805_s20 }
 0xd29   : > { %25118 = vmatprep.subr.mxu1 %v24739_v60 }
 0xd2a   : > { %25119 = vmatpush1.msra.mxu1 %v24738_v61  ;;  %v25993_v29 = vpop.permute.xlu1 %25992  ;;  %v39934_v4 = vpop.permute.xlu0 %25353 }
 0xd2b   : > { %v39938_v23 = vsel %vm1720_vm6, %v39911_v18, %v25993_v29  ;;  %33717 = vmatmul.mubr.msk.f32.vlgmr.msra.gmra.mrb[36].mxu1 %vm474_vm4, %v39724_v55 }
 0xd2c   : > { %42163 = vst [vmem:[#allocation36_spill] sm:$0xff] %v39938_v23  ;;  %29257 = vrot.lane.b32.xlu1 %v39548_v34, %s34805_s20  ;;  %29255 = vrot.lane.b32.xlu0 %v39541_v39, %s34805_s20 }
 0xd2d   : > { %25324 = vmatprep.mubr.f32.mxu1 %v41945_v0 }
 0xd2e   : > { %v39947_v50 = vpop.permute.xlu1 %26649  ;;  %v39949_v15 = vpop.permute.xlu0 %25994 }
 0xd2f   : > { %42164 = vst [vmem:[#allocation38_spill] sm:$0xff] %v39947_v50  ;;  %v39953_v61 = vsel %vm1720_vm6, %v25993_v29, %v39949_v15 }
 0xd30   : > { %42165 = vst [vmem:[#allocation41_spill] sm:$0xff] %v39953_v61  ;;  %29261 = vrot.lane.b32.xlu1 %v39558_v52, %s34805_s20  ;;  %29259 = vrot.lane.b32.xlu0 %v39551_v3, %s34805_s20 }
 0xd32   : > { %v27303_v60 = vpop.permute.xlu1 %27302  ;;  %v26648_v24 = vpop.permute.xlu0 %26647 }
 0xd33   : > { %v39961_v17 = vsel %vm3032_vm8, %v39920_v38, %v27303_v60  ;;  %v39965_v25 = vsel %vm2376_vm7, %v39909_v46, %v26648_v24  ;;  %v39969_v29 = vsel %vm2376_vm7, %v26648_v24, %v39947_v50 }
 0xd34   : > { %42166 = vst [vmem:[#allocation42_spill] sm:$0xff] %v39961_v17  ;;  %42167 = vst [vmem:[#allocation46_spill] sm:$0xff] %v39965_v25  ;;  %29265 = vrot.lane.b32.xlu1 %v39568_v37, %s34805_s20  ;;  %27965 = vrot.lane.b32.xlu0 %v39591_v33, %s34803_s9  ;;  %s33381_s9 = sshll.u32 %s242_s26, 1 }
 0xd35   : > { %42168 = vst [vmem:[#allocation40_spill] sm:$0xff] %v39969_v29  ;;  %s244_s11 = scalar_lea.vmem [#allocation3], %s33381_s9 }
 0xd36   : > { %v24721_v7 = vpop.permute.xlu1 %24720  ;;  %v27305_v23 = vpop.permute.xlu0 %27304  ;;  %s33318_s13 = sshll.u32 %s244_s11, 4  ;;  %s41734_s13 = int_to_ptr.vmem [resolvable:$true] %s33318_s13 }
 0xd37   : > { %v39976_v61 = vsel %vm3032_vm8, %v27303_v60, %v27305_v23  ;;  %s34732_s15 = scalar_lea.vmem %s41734_s13, 32 }
 0xd38   : > { %42169 = vst [vmem:[#allocation23_spill] sm:$0xff] %v39976_v61  ;;  %29269 = vrot.lane.b32.xlu1 %v39578_v45, %s34805_s20  ;;  %29263 = vrot.lane.b32.xlu0 %v39561_v53, %s34805_s20  ;;  %p34733_p11 = scmp.ne.s32.totalorder %s41734_s13, %s34732_s15 }
 0xd3a   : > { %v39982_v17 = vpop.permute.xlu1 %25996  ;;  %v25358_v24 = vpop.permute.xlu0 %25357  ;;  %p34734_p12 = pnand %p34733_p11, %p34882_p5 }
 0xd3c   : > { %29273 = vrot.lane.b32.xlu1 %v39588_v63, %s34805_s20  ;;  %29267 = vrot.lane.b32.xlu0 %v39571_v41, %s34805_s20  ;;  %p34735_p13 = pneg %p34734_p12 }
 0xd3e   : > { %v39988_v25 = vpop.permute.xlu1 %27306  ;;  %v39990_v29 = vpop.permute.xlu0 %26651 }
 0xd3f   : > { %42170 = vst [vmem:[#allocation45_spill] sm:$0xff] %v39988_v25  ;;  %42171 = vst [vmem:[#allocation50_spill] sm:$0xff] %v39990_v29  ;;  %v39994_v60 = vsel %vm3032_vm8, %v27305_v23, %v39988_v25  ;;  %v24740_v23 = vsel %vm441_vm3, %v24719_v42, %v24721_v7  ;;  %v25366_v25 = vsel %vm1080_vm5, %v39692_v8, %v39714_v27 }
 0xd40   : > { %42172 = vst [vmem:[#allocation51_spill] sm:$0xff] %v39994_v60  ;;  %28620 = vrot.lane.b32.xlu1 %v39591_v33, %s34804_s12  ;;  %29271 = vrot.lane.b32.xlu0 %v39581_v47, %s34805_s20  ;;  %v25374_v8 = vsel %vm1080_vm5, %v39887_v1, %v39901_v5 }
 0xd42   : > { %v40000_v61 = vpop.permute.xlu1 %25359  ;;  %v24723_v38 = vpop.permute.xlu0 %24722 }
 0xd43   : > { %v24741_v50 = vsel %vm441_vm3, %v24721_v7, %v24723_v38  ;;  %v40026_v7 = vld [vmem:[%s41776_s2 + $0x120] sm:$0xff] }
 0xd44   : > { %29277 = vrot.lane.b32.xlu1 %v39756_v12, %s34805_s20  ;;  %29902 = vrot.lane.b32.xlu0 %v39507_v40, %s34806_s10  ;;  %v25370_v40 = vsel %vm1080_vm5, %v39797_v16, %v39819_v35 }
 0xd45   : > { %25189 = vmatprep.subr.mxu0 %v24741_v50  ;;  %v25377_v50 = vsel %vm1080_vm5, %v39926_v57, %v25358_v24 }
 0xd46   : > { %25190 = vmatpush1.msra.mxu0 %v24740_v23  ;;  %v40008_v60 = vpop.permute.xlu1 %25363  ;;  %v24727_v29 = vpop.permute.xlu0 %24726 }
 0xd47   : > { %33718 = vmatmul.mubr.msk.f32.vlgmr.msra.gmra.mrb[38].mxu0 %vm474_vm4, %v39724_v55  ;;  %25400 = vmatprep.subr.mxu0 %v25366_v25 }
 0xd48   : > { %25401 = vmatpush1.msra.mxu0 %v25365_v49  ;;  %29904 = vrot.lane.b32.xlu1 %v39528_v62, %s34806_s10  ;;  %v25369_v62 = vsel %vm1080_vm5, %v39752_v20, %v39797_v16  ;;  %v25373_v16 = vsel %vm1080_vm5, %v39844_v10, %v39887_v1 }
 0xd49   : > { %29900 = vrot.lane.b32.xlu0 %v39509_v48, %s34806_s10  ;;  %25542 = vmatprep.subr.mxu0 %v25370_v40 }
 0xd4a   : > { %25464 = vmatprep.mubr.f32.mxu0 %v41945_v0  ;;  %v40031_v2 = vpop.permute.xlu1 %26653  ;;  %v40033_v49 = vpop.permute.xlu0 %25998 }
 0xd4b   : > { %33720 = vmatmul.mubr.msk.f32.vlgmr.msra.gmra.mrb[32].mxu0 %vm474_vm4, %v40026_v7 }
 0xd4c   : > { %25543 = vmatpush1.msra.mxu0 %v25369_v62  ;;  %29906 = vrot.lane.b32.xlu1 %v39531_v13, %s34806_s10  ;;  %v25378_v13 = vsel %vm1080_vm5, %v25358_v24, %v40000_v61  ;;  %v25367_v24 = vsel %vm1080_vm5, %v39714_v27, %v39754_v58  ;;  %v26013_v62 = vsel %vm1720_vm6, %v39885_v28, %v39911_v18 }
 0xd4d   : > { %25684 = vmatprep.subr.mxu0 %v25374_v8  ;;  %29908 = vrot.lane.b32.xlu0 %v39538_v22, %s34806_s10  ;;  %v25375_v18 = vsel %vm1080_vm5, %v39901_v5, %v39934_v4 }
 0xd4e   : > { %25606 = vmatprep.mubr.f32.mxu0 %v41945_v0  ;;  %v40048_v48 = vpop.permute.xlu1 %26657  ;;  %v40050_v25 = vpop.permute.xlu0 %26002 }
 0xd4f   : > { %33722 = vmatmul.mubr.msk.f32.vlgmr.msra.gmra.mrb[34].mxu0 %vm474_vm4, %v40026_v7 }
 0xd50   : > { %25685 = vmatpush1.msra.mxu0 %v25373_v16  ;;  %29910 = vrot.lane.b32.xlu1 %v39541_v39, %s34806_s10  ;;  %v26005_v39 = vsel %vm1720_vm6, %v39700_v31, %v39727_v44 }
 0xd51   : > { %25826 = vmatprep.subr.mxu0 %v25378_v13  ;;  %29912 = vrot.lane.b32.xlu0 %v39548_v34, %s34806_s10  ;;  %v40218_v13 = vld [vmem:[%s41776_s2 + $0x138] sm:$0xff] }
 0xd52   : > { %25748 = vmatprep.mubr.f32.mxu0 %v41945_v0  ;;  %v24725_v22 = vpop.permute.xlu1 %24724  ;;  %v40064_v42 = vpop.permute.xlu0 %27308 }
 0xd53   : > { %33724 = vmatmul.mubr.msk.f32.vlgmr.msra.gmra.mrb[36].mxu0 %vm474_vm4, %v40026_v7  ;;  %v24743_v1 = vsel %vm441_vm3, %v24725_v22, %v24727_v29  ;;  %v24742_v23 = vsel %vm441_vm3, %v24723_v38, %v24725_v22  ;;  %v25368_v38 = vsel %vm1080_vm5, %v39754_v58, %v39752_v20  ;;  %v26009_v20 = vsel %vm1720_vm6, %v39803_v21, %v39829_v54 }
 0xd54   : > { %25827 = vmatpush1.msra.mxu0 %v25377_v50  ;;  %29914 = vrot.lane.b32.xlu1 %v39551_v3, %s34806_s10  ;;  %v26004_v3 = vsel %vm1720_vm6, %v39678_v14, %v39700_v31  ;;  %v40110_v14 = vld [vmem:[%s41776_s2 + $0x130] sm:$0xff]  ;;  %v26008_v58 = vsel %vm1720_vm6, %v39767_v43, %v39803_v21  ;;  %v26017_v21 = vsel %vm1720_vm6, %v39982_v17, %v40033_v49 }
 0xd55   : > { %26039 = vmatprep.subr.mxu0 %v26005_v39  ;;  %29275 = vrot.lane.b32.xlu0 %v39591_v33, %s34805_s20  ;;  %v26011_v50 = vsel %vm1720_vm6, %v39852_v11, %v39865_v6  ;;  %v42175_v39 = vld [vmem:[#allocation41_spill] sm:$0xff] }
 0xd56   : > { %25260 = vmatprep.subr.mxu1 %v24743_v1  ;;  %25890 = vmatprep.mubr.f32.mxu0 %v41945_v0  ;;  %v40080_v34 = vpop.permute.xlu1 %27947  ;;  %v40082_v29 = vpop.permute.xlu0 %27312 }
 0xd57   : > { %25261 = vmatpush1.msra.mxu1 %v24742_v23  ;;  %33726 = vmatmul.mubr.msk.f32.vlgmr.msra.gmra.mrb[38].mxu0 %vm474_vm4, %v40026_v7 }
 0xd58   : > { %33719 = vmatmul.mubr.msk.f32.vlgmr.msra.gmra.mrb[38].mxu1 %vm474_vm4, %v39724_v55  ;;  %25471 = vmatprep.subr.mxu1 %v25368_v38  ;;  %v25372_v55 = vsel %vm1080_vm5, %v39854_v51, %v39844_v10  ;;  %v25376_v10 = vsel %vm1080_vm5, %v39934_v4, %v39926_v57 }
 0xd59   : > { %26040 = vmatpush1.msra.mxu0 %v26004_v3  ;;  %25472 = vmatpush1.msra.mxu1 %v25367_v24  ;;  %v42177_v24 = vld [vmem:[#allocation36_spill] sm:$0xff] }
 0xd5a   : > { %26181 = vmatprep.subr.mxu0 %v26009_v20  ;;  %29918 = vrot.lane.b32.xlu1 %v39561_v53, %s34806_s10  ;;  %v40105_v40 = vpop.permute.xlu1 %27951  ;;  %v27950_v31 = vpop.permute.xlu0 %27949  ;;  %v42178_v20 = vld [vmem:[#allocation44_spill] sm:$0xff] }
 0xd5b   : > { %29916 = vrot.lane.b32.xlu0 %v39558_v52, %s34806_s10  ;;  %25613 = vmatprep.subr.mxu1 %v25372_v55  ;;  %v40116_v27 = vsel %vm3688_vm9, %v40080_v34, %v27950_v31  ;;  %v40120_v53 = vsel %vm3688_vm9, %v27950_v31, %v40105_v40  ;;  %v25371_v52 = vsel %vm1080_vm5, %v39819_v35, %v39854_v51  ;;  %v42179_v55 = vld [vmem:[#allocation35_spill] sm:$0xff] }
 0xd5c   : > { %25535 = vmatprep.mubr.f32.mxu1 %v41945_v0  ;;  %26103 = vmatprep.mubr.f32.mxu0 %v41945_v0  ;;  %v26012_v35 = vsel %vm1720_vm6, %v39865_v6, %v39885_v28  ;;  %v26016_v28 = vsel %vm1720_vm6, %v39949_v15, %v39982_v17  ;;  %v33791_v15 = vld [vmem:[%s41777_s3 + $0x20] sm:$0xff]  ;;  %v42174_v6 = vld [vmem:[#allocation50_spill] sm:$0xff] }
 0xd5d   : > { %33721 = vmatmul.mubr.msk.f32.vlgmr.msra.gmra.mrb[32].mxu1 %vm474_vm4, %v40026_v7  ;;  %33729 = vmatmul.mubr.msk.f32.vlgmr.msra.gmra.mrb[32].mxu0 %vm474_vm4, %v40110_v14  ;;  %v26672_v23 = vsel %vm2376_vm7, %v42174_v6, %v40031_v2 }
 0xd5e   : > { %25614 = vmatpush1.msra.mxu1 %v25371_v52  ;;  %26182 = vmatpush1.msra.mxu0 %v26008_v58  ;;  %v40140_v8 = vpop.permute.xlu1 %27955  ;;  %v40142_v51 = vpop.permute.xlu0 %27953 }
 0xd5f   : > { %25755 = vmatprep.subr.mxu1 %v25376_v10  ;;  %26323 = vmatprep.subr.mxu0 %v26013_v62  ;;  %v42180_v10 = vld [vmem:[#allocation43_spill] sm:$0xff] }
 0xd60   : > { %29922 = vrot.lane.b32.xlu1 %v39571_v41, %s34806_s10  ;;  %29920 = vrot.lane.b32.xlu0 %v39568_v37, %s34806_s10  ;;  %v27314_v62 = vsel %vm3032_vm8, %v42180_v10, %v42179_v55 }
 0xd61   : > { %25677 = vmatprep.mubr.f32.mxu1 %v41945_v0  ;;  %26245 = vmatprep.mubr.f32.mxu0 %v41945_v0 }
 0xd62   : > { %33723 = vmatmul.mubr.msk.f32.vlgmr.msra.gmra.mrb[34].mxu1 %vm474_vm4, %v40026_v7  ;;  %33731 = vmatmul.mubr.msk.f32.vlgmr.msra.gmra.mrb[34].mxu0 %vm474_vm4, %v40110_v14  ;;  %v40160_v41 = vpop.permute.xlu1 %27959  ;;  %v27958_v37 = vpop.permute.xlu0 %27957 }
 0xd63   : > { %25756 = vmatpush1.msra.mxu1 %v25375_v18  ;;  %26324 = vmatpush1.msra.mxu0 %v26012_v35  ;;  %v40167_v4 = vsel %vm3688_vm9, %v40140_v8, %v27958_v37  ;;  %v40171_v5 = vsel %vm3688_vm9, %v27958_v37, %v40160_v41  ;;  %v42181_v18 = vld [vmem:[#allocation26_spill] sm:$0xff]  ;;  %v42182_v37 = vld [vmem:[#allocation32_spill] sm:$0xff] }
 0xd64   : > { %26465 = vmatprep.subr.mxu0 %v26017_v21  ;;  %29926 = vrot.lane.b32.xlu1 %v39581_v47, %s34806_s10  ;;  %v26660_v47 = vsel %vm2376_vm7, %v39698_v59, %v39729_v9  ;;  %v26662_v35 = vsel %vm2376_vm7, %v42181_v18, %v39773_v30  ;;  %v42183_v21 = vld [vmem:[#allocation34_spill] sm:$0xff] }
 0xd65   : > { %29924 = vrot.lane.b32.xlu0 %v39578_v45, %s34806_s10  ;;  %26387 = vmatprep.mubr.f32.mxu0 %v41945_v0 }
 0xd66   : > { %33733 = vmatmul.mubr.msk.f32.vlgmr.msra.gmra.mrb[36].mxu0 %vm474_vm4, %v40110_v14  ;;  %25819 = vmatprep.mubr.f32.mxu1 %v41945_v0  ;;  %v40184_v57 = vpop.permute.xlu1 %27963  ;;  %v25362_v16 = vpop.permute.xlu0 %25361 }
 0xd67   : > { %26466 = vmatpush1.msra.mxu0 %v26016_v28  ;;  %26529 = vmatprep.mubr.f32.mxu0 %v41945_v0  ;;  %v25380_v45 = vsel %vm1080_vm5, %v25362_v16, %v40008_v60  ;;  %v25379_v17 = vsel %vm1080_vm5, %v40000_v61, %v25362_v16  ;;  %v40308_v28 = vld [vmem:[%s41776_s2 + $0x140] sm:$0xff] }
 0xd68   : > { %26694 = vmatprep.subr.mxu0 %v26660_v47  ;;  %29930 = vrot.lane.b32.xlu1 %v39591_v33, %s34806_s10  ;;  %v26659_v33 = vsel %vm2376_vm7, %v39676_v36, %v39698_v59  ;;  %v26007_v36 = vsel %vm1720_vm6, %v39765_v26, %v39767_v43  ;;  %v26668_v43 = vsel %vm2376_vm7, %v39895_v19, %v39909_v46  ;;  %v42173_v46 = vld [vmem:[#allocation33_spill] sm:$0xff] }
 0xd69   : > { %29928 = vrot.lane.b32.xlu0 %v39588_v63, %s34806_s10  ;;  %33725 = vmatmul.mubr.msk.f32.vlgmr.msra.gmra.mrb[36].mxu1 %vm474_vm4, %v40026_v7  ;;  %v26664_v63 = vsel %vm2376_vm7, %v39805_v56, %v39827_v32 }
 0xd6a   : > { %33735 = vmatmul.mubr.msk.f32.vlgmr.msra.gmra.mrb[38].mxu0 %vm474_vm4, %v40110_v14  ;;  %25897 = vmatprep.subr.mxu1 %v25380_v45  ;;  %v40208_v60 = vpop.permute.xlu1 %27967  ;;  %v40210_v61 = vpop.permute.xlu0 %27961  ;;  %v42184_v45 = vld [vmem:[#allocation22_spill] sm:$0xff] }
 0xd6b   : > { %26695 = vmatpush1.msra.mxu0 %v26659_v33  ;;  %25898 = vmatpush1.msra.mxu1 %v25379_v17  ;;  %v27318_v17 = vsel %vm3032_vm8, %v42184_v45, %v42183_v21 }
 0xd6c   : > { %26836 = vmatprep.subr.mxu0 %v26664_v63  ;;  %30557 = vperm.xlu1 %34729, %v33791_v15   ;;  %v42185_v15 = vld [vmem:[#allocation31_spill] sm:$0xff]  ;;  %v42186_v63 = vld [vmem:[#allocation49_spill] sm:$0xff] }
 0xd6d   : > { %29932 = vrot.lane.b32.xlu0 %v39756_v12, %s34806_s10  ;;  %25961 = vmatprep.mubr.f32.mxu1 %v41945_v0  ;;  %v26663_v12 = vsel %vm2376_vm7, %v39773_v30, %v39805_v56  ;;  %v26661_v30 = vsel %vm2376_vm7, %v39729_v9, %v42181_v18  ;;  %v26666_v33 = vsel %vm2376_vm7, %v42185_v15, %v42173_v46  ;;  %v42197_v18 = vld [vmem:[#allocation39_spill] sm:$0xff]  ;;  %s33906_s10 = sshll.u32 %s34865_s25, 5  ;;  %s34808_s25 = smov [#allocation3]  }
 0xd6e   : > { %26758 = vmatprep.mubr.f32.mxu0 %v41945_v0  ;;  %33727 = vmatmul.mubr.msk.f32.vlgmr.msra.gmra.mrb[38].mxu1 %vm474_vm4, %v40026_v7  ;;  %v40229_v59 = vpop.permute.xlu1 %28594  ;;  %v40231_v22 = vpop.permute.xlu0 %28592  ;;  %v26006_v7 = vsel %vm1720_vm6, %v39727_v44, %v39765_v26  ;;  %v26010_v44 = vsel %vm1720_vm6, %v39829_v54, %v39852_v11  ;;  %v26667_v26 = vsel %vm2376_vm7, %v42173_v46, %v39895_v19  ;;  %v42176_v19 = vld [vmem:[#allocation38_spill] sm:$0xff]  ;;  %v42190_v46 = vld [vmem:[#allocation40_spill] sm:$0xff]  ;;  %s41732_s14 = scalar_lea.hbm %s41780_s6, %s33906_s10  ;;  %s34736_s16 = sshll.u32 %s34808_s25, 4  ;;  %s34737_s16 = int_to_ptr.vmem [resolvable:$false] %s34736_s16 }
 0xd6f   : > { %26110 = vmatprep.subr.mxu1 %v26007_v36  ;;  %33738 = vmatmul.mubr.msk.f32.vlgmr.msra.gmra.mrb[32].mxu0 %vm474_vm4, %v40218_v13  ;;  %v26671_v3 = vsel %vm2376_vm7, %v42176_v19, %v42174_v6  ;;  %v42187_v36 = vld [vmem:[#allocation29_spill] sm:$0xff]  ;;  %v42194_v19 = vld [vmem:[#allocation48_spill] sm:$0xff]  ;;  %s34738_s17 = scalar_lea.vmem %s34737_s16, 64  ;;  %p34739_p0 = scmp.lt.s32.totalorder %s41734_s13, %s34737_s16 }
 0xd70   : > { %26837 = vmatpush1.msra.mxu0 %v26663_v12  ;;  %26111 = vmatpush1.msra.mxu1 %v26006_v7  ;;  %v26665_v7 = vsel %vm2376_vm7, %v39827_v32, %v42185_v15  ;;  %v42199_v15 = vld [vmem:[#allocation37_spill] sm:$0xff]  ;;  %p34740_p1 = scmp.lt.s32.totalorder %s34738_s17, %s34732_s15 }
 0xd71   : > { %26978 = vmatprep.subr.mxu0 %v26668_v43  ;;  %26252 = vmatprep.subr.mxu1 %v26011_v50  ;;  %v42188_v43 = vld [vmem:[#allocation28_spill] sm:$0xff] }
 0xd72   : > { %26174 = vmatprep.mubr.f32.mxu1 %v41945_v0  ;;  %26900 = vmatprep.mubr.f32.mxu0 %v41945_v0  ;;  %v26001_v56 = vpop.permute.xlu1 %26000  ;;  %v40249_v1 = vpop.permute.xlu0 %28590  ;;  %v27322_v50 = vsel %vm3032_vm8, %v42188_v43, %v42187_v36  ;;  %p34741_p2 = por %p34740_p1, %p34739_p0 }
 0xd73   : > { %33730 = vmatmul.mubr.msk.f32.vlgmr.msra.gmra.mrb[32].mxu1 %vm474_vm4, %v40110_v14  ;;  %33740 = vmatmul.mubr.msk.f32.vlgmr.msra.gmra.mrb[34].mxu0 %vm474_vm4, %v40218_v13  ;;  %v26019_v11 = vsel %vm1720_vm6, %v26001_v56, %v40050_v25  ;;  %v27315_v25 = vsel %vm3032_vm8, %v42179_v55, %v42178_v20  ;;  %v26018_v58 = vsel %vm1720_vm6, %v40033_v49, %v26001_v56  ;;  %v42189_v56 = vld [vmem:[#allocation45_spill] sm:$0xff] }
 0xd74   : > { %26253 = vmatpush1.msra.mxu1 %v26010_v44  ;;  %26979 = vmatpush1.msra.mxu0 %v26667_v26  ;;  %v27319_v49 = vsel %vm3032_vm8, %v42183_v21, %v42182_v37  ;;  %v27327_v44 = vsel %vm3032_vm8, %v42189_v56, %v40064_v42  ;;  %p34742_p3 = pnand %p34741_p2, %p34735_p13 }
 0xd75   : > { %26394 = vmatprep.subr.mxu1 %v42175_v39  ;;  %27120 = vmatprep.subr.mxu0 %v26672_v23  ;;  %v42191_v23 = vld [vmem:[#allocation46_spill] sm:$0xff]  ;;  %v42192_v39 = vld [vmem:[#allocation51_spill] sm:$0xff] }
 0xd76   : > { %26316 = vmatprep.mubr.f32.mxu1 %v41945_v0  ;;  %27042 = vmatprep.mubr.f32.mxu0 %v41945_v0  ;;  %v40269_v54 = vpop.permute.xlu1 %28596  ;;  %v40271_v38 = vpop.permute.xlu0 %28598 }
 0xd77   : > { %33732 = vmatmul.mubr.msk.f32.vlgmr.msra.gmra.mrb[34].mxu1 %vm474_vm4, %v40110_v14  ;;  %33742 = vmatmul.mubr.msk.f32.vlgmr.msra.gmra.mrb[36].mxu0 %vm474_vm4, %v40218_v13 }
 0xd78   : > { %26395 = vmatpush1.msra.mxu1 %v42177_v24  ;;  %27121 = vmatpush1.msra.mxu0 %v26671_v3 }
 0xd79   : > { %27349 = vmatprep.subr.mxu0 %v27315_v25  ;;  %26536 = vmatprep.subr.mxu1 %v26019_v11  ;;  %v42193_v11 = vld [vmem:[#allocation47_spill] sm:$0xff]  ;;  %v42195_v25 = vld [vmem:[#allocation30_spill] sm:$0xff] }
 0xd7a   : > { %26458 = vmatprep.mubr.f32.mxu1 %v41945_v0  ;;  %27184 = vmatprep.mubr.f32.mxu0 %v41945_v0  ;;  %v40286_v31 = vpop.permute.xlu1 %28600  ;;  %v40288_v52 = vpop.permute.xlu0 %28602  ;;  %v27970_v3 = vsel %vm3688_vm9, %v42194_v19, %v42193_v11 }
 0xd7b   : > { %33734 = vmatmul.mubr.msk.f32.vlgmr.msra.gmra.mrb[36].mxu1 %vm474_vm4, %v40110_v14  ;;  %33744 = vmatmul.mubr.msk.f32.vlgmr.msra.gmra.mrb[38].mxu0 %vm474_vm4, %v40218_v13 }
 0xd7c   : > { %26537 = vmatpush1.msra.mxu1 %v26018_v58  ;;  %27350 = vmatpush1.msra.mxu0 %v27314_v62  ;;  %v27969_v58 = vsel %vm3688_vm9, %v42195_v25, %v42194_v19  ;;  %v40388_v62 = vld [vmem:[%s41776_s2 + $0x148] sm:$0xff] }
 0xd7d   : > { %26765 = vmatprep.subr.mxu1 %v26662_v35  ;;  %27491 = vmatprep.subr.mxu0 %v27319_v49  ;;  %v27317_v35 = vsel %vm3032_vm8, %v42197_v18, %v42184_v45  ;;  %v27316_v45 = vsel %vm3032_vm8, %v42178_v20, %v42197_v18  ;;  %v27977_v20 = vsel %vm3688_vm9, %v40105_v40, %v40142_v51 }
 0xd7e   : > { %26600 = vmatprep.mubr.f32.mxu1 %v41945_v0  ;;  %27413 = vmatprep.mubr.f32.mxu0 %v41945_v0  ;;  %v40312_v16 = vpop.permute.xlu1 %28604  ;;  %v40314_v47 = vpop.permute.xlu0 %28606 }
 0xd7f   : > { %33736 = vmatmul.mubr.msk.f32.vlgmr.msra.gmra.mrb[38].mxu1 %vm474_vm4, %v40110_v14  ;;  %33747 = vmatmul.mubr.msk.f32.vlgmr.msra.gmra.mrb[32].mxu0 %vm474_vm4, %v40308_v28  ;;  %v27323_v14 = vsel %vm3032_vm8, %v42187_v36, %v42186_v63  ;;  %v27982_v36 = vsel %vm3688_vm9, %v40210_v61, %v40184_v57 }
 0xd80   : > { %26766 = vmatpush1.msra.mxu1 %v26661_v30  ;;  %27492 = vmatpush1.msra.mxu0 %v27318_v17  ;;  %v27978_v17 = vsel %vm3688_vm9, %v40142_v51, %v40140_v8  ;;  %v27320_v8 = vsel %vm3032_vm8, %v42182_v37, %v42199_v15 }
 0xd81   : > { %26907 = vmatprep.subr.mxu1 %v26666_v33  ;;  %27633 = vmatprep.subr.mxu0 %v27323_v14  ;;  %v42200_v14 = vld [vmem:[#allocation23_spill] sm:$0xff] }
 0xd82   : > { %26829 = vmatprep.mubr.f32.mxu1 %v41945_v0  ;;  %27555 = vmatprep.mubr.f32.mxu0 %v41945_v0  ;;  %v40334_v9 = vpop.permute.xlu1 %28608  ;;  %v40336_v12 = vpop.permute.xlu0 %28610 }
 0xd83   : > { %33739 = vmatmul.mubr.msk.f32.vlgmr.msra.gmra.mrb[32].mxu1 %vm474_vm4, %v40218_v13  ;;  %33749 = vmatmul.mubr.msk.f32.vlgmr.msra.gmra.mrb[34].mxu0 %vm474_vm4, %v40308_v28 }
 0xd84   : > { %26908 = vmatpush1.msra.mxu1 %v26665_v7  ;;  %27634 = vmatpush1.msra.mxu0 %v27322_v50  ;;  %v27981_v7 = vsel %vm3688_vm9, %v40160_v41, %v40210_v61  ;;  %v28624_v50 = vsel %vm4344_vm10, %v40249_v1, %v40231_v22 }
 0xd85   : > { %27049 = vmatprep.subr.mxu1 %v42190_v46  ;;  %27775 = vmatprep.subr.mxu0 %v27327_v44  ;;  %v42202_v44 = vld [vmem:[#allocation24_spill] sm:$0xff] }
 0xd86   : > { %26971 = vmatprep.mubr.f32.mxu1 %v41945_v0  ;;  %27697 = vmatprep.mubr.f32.mxu0 %v41945_v0  ;;  %v40354_v32 = vpop.permute.xlu1 %28612  ;;  %v26656_v26 = vpop.permute.xlu0 %26655 }
 0xd87   : > { %33741 = vmatmul.mubr.msk.f32.vlgmr.msra.gmra.mrb[34].mxu1 %vm474_vm4, %v40218_v13  ;;  %33751 = vmatmul.mubr.msk.f32.vlgmr.msra.gmra.mrb[36].mxu0 %vm474_vm4, %v40308_v28  ;;  %v26674_v6 = vsel %vm2376_vm7, %v26656_v26, %v40048_v48  ;;  %v26673_v24 = vsel %vm2376_vm7, %v40031_v2, %v26656_v26  ;;  %v42196_v2 = vld [vmem:[#allocation25_spill] sm:$0xff]  ;;  %v28629_v26 = vsel %vm4344_vm10, %v40286_v31, %v40288_v52 }
 0xd88   : > { %27050 = vmatpush1.msra.mxu1 %v42191_v23  ;;  %27776 = vmatpush1.msra.mxu0 %v42192_v39  ;;  %v27974_v10 = vsel %vm3688_vm9, %v42196_v2, %v40080_v34  ;;  %v42198_v34 = vld [vmem:[#allocation27_spill] sm:$0xff]  ;;  %v27971_v23 = vsel %vm3688_vm9, %v42193_v11, %v42202_v44  ;;  %v28633_v39 = vsel %vm4344_vm10, %v40334_v9, %v40336_v12 }
 0xd89   : > { %28004 = vmatprep.subr.mxu0 %v27970_v3  ;;  %27113 = vmatprep.mubr.f32.mxu1 %v41945_v0  ;;  %v27973_v30 = vsel %vm3688_vm9, %v42198_v34, %v42196_v2  ;;  %v27972_v46 = vsel %vm3688_vm9, %v42202_v44, %v42198_v34  ;;  %v28632_v11 = vsel %vm4344_vm10, %v40314_v47, %v40334_v9 }
 0xd8a   : > { %27839 = vmatprep.mubr.f32.mxu0 %v41945_v0  ;;  %27191 = vmatprep.subr.mxu1 %v26674_v6  ;;  %v40371_v55 = vpop.permute.xlu1 %28616  ;;  %v40373_v48 = vpop.permute.xlu0 %28614  ;;  %v28628_v6 = vsel %vm4344_vm10, %v40271_v38, %v40286_v31 }
 0xd8b   : > { %33743 = vmatmul.mubr.msk.f32.vlgmr.msra.gmra.mrb[36].mxu1 %vm474_vm4, %v40218_v13  ;;  %33753 = vmatmul.mubr.msk.f32.vlgmr.msra.gmra.mrb[38].mxu0 %vm474_vm4, %v40308_v28  ;;  %v28636_v3 = vsel %vm4344_vm10, %v40373_v48, %v40371_v55 }
 0xd8c   : > { %28005 = vmatpush1.msra.mxu0 %v27969_v58  ;;  %27192 = vmatpush1.msra.mxu1 %v26673_v24  ;;  %v28627_v58 = vsel %vm4344_vm10, %v40269_v54, %v40271_v38  ;;  %v28631_v38 = vsel %vm4344_vm10, %v40312_v16, %v40314_v47  ;;  %v28635_v47 = vsel %vm4344_vm10, %v40354_v32, %v40373_v48 }
 0xd8d   : > { %28146 = vmatprep.subr.mxu0 %v27974_v10  ;;  %27255 = vmatprep.mubr.f32.mxu1 %v41945_v0  ;;  %v28634_v48 = vsel %vm4344_vm10, %v40336_v12, %v40354_v32 }
 0xd8e   : > { %28068 = vmatprep.mubr.f32.mxu0 %v41945_v0  ;;  %27420 = vmatprep.subr.mxu1 %v27317_v35  ;;  %v40395_v21 = vpop.permute.xlu1 %29247  ;;  %v40397_v49 = vpop.permute.xlu0 %28618  ;;  %v28626_v35 = vsel %vm4344_vm10, %v40229_v59, %v40269_v54 }
 0xd8f   : > { %33745 = vmatmul.mubr.msk.f32.vlgmr.msra.gmra.mrb[38].mxu1 %vm474_vm4, %v40218_v13  ;;  %33756 = vmatmul.mubr.msk.f32.vlgmr.msra.gmra.mrb[32].mxu0 %vm474_vm4, %v40388_v62  ;;  %v27321_v13 = vsel %vm3032_vm8, %v42199_v15, %v42188_v43  ;;  %v42201_v43 = vld [vmem:[#allocation42_spill] sm:$0xff] }
 0xd90   : > { %28147 = vmatpush1.msra.mxu0 %v27973_v30  ;;  %27421 = vmatpush1.msra.mxu1 %v27316_v45 }
 0xd91   : > { %28288 = vmatprep.subr.mxu0 %v27978_v17  ;;  %27562 = vmatprep.subr.mxu1 %v27321_v13 }
 0xd92   : > { %27484 = vmatprep.mubr.f32.mxu1 %v41945_v0  ;;  %28210 = vmatprep.mubr.f32.mxu0 %v41945_v0  ;;  %v27311_v33 = vpop.permute.xlu1 %27310  ;;  %v40417_v63 = vpop.permute.xlu0 %28622 }
 0xd93   : > { %33748 = vmatmul.mubr.msk.f32.vlgmr.msra.gmra.mrb[32].mxu1 %vm474_vm4, %v40308_v28  ;;  %33758 = vmatmul.mubr.msk.f32.vlgmr.msra.gmra.mrb[34].mxu0 %vm474_vm4, %v40388_v62  ;;  %v27329_v40 = vsel %vm3032_vm8, %v27311_v33, %v40082_v29  ;;  %v28625_v29 = vsel %vm4344_vm10, %v40231_v22, %v40229_v59  ;;  %v27328_v56 = vsel %vm3032_vm8, %v40064_v42, %v27311_v33  ;;  %v40476_v42 = vld [vmem:[%s41776_s2 + $0x150] sm:$0xff] }
 0xd94   : > { %27563 = vmatpush1.msra.mxu1 %v27320_v8  ;;  %28289 = vmatpush1.msra.mxu0 %v27977_v20 }
 0xd95   : > { %27704 = vmatprep.subr.mxu1 %v42200_v14  ;;  %28430 = vmatprep.subr.mxu0 %v27982_v36 }
 0xd96   : > { %27626 = vmatprep.mubr.f32.mxu1 %v41945_v0  ;;  %28352 = vmatprep.mubr.f32.mxu0 %v41945_v0  ;;  %v40437_v51 = vpop.permute.xlu1 %29245  ;;  %v40439_v37 = vpop.permute.xlu0 %29249 }
 0xd97   : > { %33750 = vmatmul.mubr.msk.f32.vlgmr.msra.gmra.mrb[34].mxu1 %vm474_vm4, %v40308_v28  ;;  %33760 = vmatmul.mubr.msk.f32.vlgmr.msra.gmra.mrb[36].mxu0 %vm474_vm4, %v40388_v62 }
 0xd98   : > { %27705 = vmatpush1.msra.mxu1 %v42201_v43  ;;  %28431 = vmatpush1.msra.mxu0 %v27981_v7 }
 0xd99   : > { %28659 = vmatprep.subr.mxu0 %v28625_v29  ;;  %27846 = vmatprep.subr.mxu1 %v27329_v40 }
 0xd9a   : > { %27768 = vmatprep.mubr.f32.mxu1 %v41945_v0  ;;  %28494 = vmatprep.mubr.f32.mxu0 %v41945_v0  ;;  %v40454_v41 = vpop.permute.xlu1 %29253  ;;  %v40456_v61 = vpop.permute.xlu0 %29251 }
 0xd9b   : > { %33752 = vmatmul.mubr.msk.f32.vlgmr.msra.gmra.mrb[36].mxu1 %vm474_vm4, %v40308_v28  ;;  %33762 = vmatmul.mubr.msk.f32.vlgmr.msra.gmra.mrb[38].mxu0 %vm474_vm4, %v40388_v62  ;;  %v29282_v33 = vsel %vm5000_vm11, %v40456_v61, %v40454_v41  ;;  %v29281_v8 = vsel %vm5000_vm11, %v40439_v37, %v40456_v61 }
 0xd9c   : > { %27847 = vmatpush1.msra.mxu1 %v27328_v56  ;;  %28660 = vmatpush1.msra.mxu0 %v28624_v50 }
 0xd9d   : > { %28075 = vmatprep.subr.mxu1 %v27972_v46  ;;  %28801 = vmatprep.subr.mxu0 %v28629_v26 }
 0xd9e   : > { %27910 = vmatprep.mubr.f32.mxu1 %v41945_v0  ;;  %28723 = vmatprep.mubr.f32.mxu0 %v41945_v0  ;;  %v40480_v22 = vpop.permute.xlu1 %29257  ;;  %v29256_v1 = vpop.permute.xlu0 %29255 }
 0xd9f   : > { %33754 = vmatmul.mubr.msk.f32.vlgmr.msra.gmra.mrb[38].mxu1 %vm474_vm4, %v40308_v28  ;;  %33765 = vmatmul.mubr.msk.f32.vlgmr.msra.gmra.mrb[32].mxu0 %vm474_vm4, %v40476_v42 }
 0xda0   : > { %28076 = vmatpush1.msra.mxu1 %v27971_v23  ;;  %28802 = vmatpush1.msra.mxu0 %v28628_v6 }
 0xda1   : > { %28217 = vmatprep.subr.mxu1 %v40120_v53  ;;  %28943 = vmatprep.subr.mxu0 %v28633_v39  ;;  %v28637_v53 = vsel %vm4344_vm10, %v40371_v55, %v40397_v49 }
 0xda2   : > { %28139 = vmatprep.mubr.f32.mxu1 %v41945_v0  ;;  %28865 = vmatprep.mubr.f32.mxu0 %v41945_v0  ;;  %v40498_v31 = vpop.permute.xlu1 %29261  ;;  %v40500_v28 = vpop.permute.xlu0 %29259 }
 0xda3   : > { %33757 = vmatmul.mubr.msk.f32.vlgmr.msra.gmra.mrb[32].mxu1 %vm474_vm4, %v40388_v62  ;;  %33767 = vmatmul.mubr.msk.f32.vlgmr.msra.gmra.mrb[34].mxu0 %vm474_vm4, %v40476_v42  ;;  %v29286_v14 = vsel %vm5000_vm11, %v40500_v28, %v40498_v31 }
 0xda4   : > { %28218 = vmatpush1.msra.mxu1 %v40116_v27  ;;  %28944 = vmatpush1.msra.mxu0 %v28632_v11 }
 0xda5   : > { %28359 = vmatprep.subr.mxu1 %v40171_v5  ;;  %29085 = vmatprep.subr.mxu0 %v28637_v53  ;;  %v29280_v5 = vsel %vm5000_vm11, %v40395_v21, %v40439_v37 }
 0xda6   : > { %28281 = vmatprep.mubr.f32.mxu1 %v41945_v0  ;;  %29007 = vmatprep.mubr.f32.mxu0 %v41945_v0  ;;  %v40516_v9 = vpop.permute.xlu1 %29265  ;;  %v27966_v19 = vpop.permute.xlu0 %27965 }
 0xda7   : > { %33759 = vmatmul.mubr.msk.f32.vlgmr.msra.gmra.mrb[34].mxu1 %vm474_vm4, %v40388_v62  ;;  %33769 = vmatmul.mubr.msk.f32.vlgmr.msra.gmra.mrb[36].mxu0 %vm474_vm4, %v40476_v42  ;;  %v27984_v27 = vsel %vm3688_vm9, %v27966_v19, %v40208_v60  ;;  %v27983_v24 = vsel %vm3688_vm9, %v40184_v57, %v27966_v19  ;;  %v29284_v57 = vsel %vm5000_vm11, %v29256_v1, %v40480_v22  ;;  %v40549_v60 = vld [vmem:[%s41776_s2 + $0x158] sm:$0xff] }
 0xda8   : > { %28360 = vmatpush1.msra.mxu1 %v40167_v4  ;;  %29086 = vmatpush1.msra.mxu0 %v28636_v3  ;;  %v29279_v4 = vsel %vm5000_vm11, %v40437_v51, %v40395_v21  ;;  %v29283_v21 = vsel %vm5000_vm11, %v40454_v41, %v29256_v1  ;;  %v29285_v51 = vsel %vm5000_vm11, %v40480_v22, %v40500_v28 }
 0xda9   : > { %29314 = vmatprep.subr.mxu0 %v29280_v5  ;;  %28423 = vmatprep.mubr.f32.mxu1 %v41945_v0 }
 0xdaa   : > { %29149 = vmatprep.mubr.f32.mxu0 %v41945_v0  ;;  %28501 = vmatprep.subr.mxu1 %v27984_v27  ;;  %v40535_v55 = vpop.permute.xlu1 %29269  ;;  %v29264_v25 = vpop.permute.xlu0 %29263 }
 0xdab   : > { %33761 = vmatmul.mubr.msk.f32.vlgmr.msra.gmra.mrb[36].mxu1 %vm474_vm4, %v40388_v62  ;;  %33771 = vmatmul.mubr.msk.f32.vlgmr.msra.gmra.mrb[38].mxu0 %vm474_vm4, %v40476_v42  ;;  %v29288_v2 = vsel %vm5000_vm11, %v29264_v25, %v40516_v9  ;;  %v29287_v34 = vsel %vm5000_vm11, %v40498_v31, %v29264_v25 }
 0xdac   : > { %29315 = vmatpush1.msra.mxu0 %v29279_v4  ;;  %28502 = vmatpush1.msra.mxu1 %v27983_v24 }
 0xdad   : > { %29456 = vmatprep.subr.mxu0 %v29284_v57  ;;  %28565 = vmatprep.mubr.f32.mxu1 %v41945_v0  ;;  %v33801_v57 = vld [vmem:[%s41778_s4 + $0xc8] sm:$0x3] }
 0xdae   : > { %29378 = vmatprep.mubr.f32.mxu0 %v41945_v0  ;;  %28730 = vmatprep.subr.mxu1 %v28627_v58  ;;  %v40558_v10 = vpop.permute.xlu1 %29273  ;;  %v40560_v18 = vpop.permute.xlu0 %29267  ;;  %v33792_v58 = vld [vmem:[%s41778_s4 + $0x80] sm:$0xff] }
 0xdaf   : > { %33763 = vmatmul.mubr.msk.f32.vlgmr.msra.gmra.mrb[38].mxu1 %vm474_vm4, %v40388_v62  ;;  %33774 = vmatmul.mubr.msk.f32.vlgmr.msra.gmra.mrb[32].mxu0 %vm474_vm4, %v40549_v60  ;;  %v28630_v62 = vsel %vm4344_vm10, %v40288_v52, %v40312_v16  ;;  %v29290_v43 = vsel %vm5000_vm11, %v40560_v18, %v40535_v55  ;;  %v29289_v61 = vsel %vm5000_vm11, %v40516_v9, %v40560_v18  ;;  %v33795_v18 = vld [vmem:[%s41778_s4 + $0x98] sm:$0xff] }
 0xdb0   : > { %29457 = vmatpush1.msra.mxu0 %v29283_v21  ;;  %28731 = vmatpush1.msra.mxu1 %v28626_v35  ;;  %v33803_v35 = vld [vmem:[%s41778_s4 + $0xd8] sm:$0x3] }
 0xdb1   : > { %28872 = vmatprep.subr.mxu1 %v28631_v38  ;;  %29598 = vmatprep.subr.mxu0 %v29288_v2  ;;  %v33800_v2 = vld [vmem:[%s41778_s4 + $0xc0] sm:$0x3]  ;;  %v33914_v21 = vpack.c.bf16 %v33803_v35, %v33795_v18  ;;  %v33794_v38 = vld [vmem:[%s41778_s4 + $0x90] sm:$0xff] }
 0xdb2   : > { %28794 = vmatprep.mubr.f32.mxu1 %v41945_v0  ;;  %29520 = vmatprep.mubr.f32.mxu0 %v41945_v0  ;;  %v28621_v59 = vpop.permute.xlu1 %28620  ;;  %v29272_v54 = vpop.permute.xlu0 %29271  ;;  %v40923_v35 = vld [vmem:[%s41778_s4 + $0x130] sm:$0xff] }
 0xdb3   : > { %33766 = vmatmul.mubr.msk.f32.vlgmr.msra.gmra.mrb[32].mxu1 %vm474_vm4, %v40476_v42  ;;  %33776 = vmatmul.mubr.msk.f32.vlgmr.msra.gmra.mrb[34].mxu0 %vm474_vm4, %v40549_v60  ;;  %v29292_v30 = vsel %vm5000_vm11, %v29272_v54, %v40558_v10  ;;  %v29291_v52 = vsel %vm5000_vm11, %v40535_v55, %v29272_v54  ;;  %v28639_v16 = vsel %vm4344_vm10, %v28621_v59, %v40417_v63 }
 0xdb4   : > { %28873 = vmatpush1.msra.mxu1 %v28630_v62  ;;  %29599 = vmatpush1.msra.mxu0 %v29287_v34  ;;  %v28638_v13 = vsel %vm4344_vm10, %v40397_v49, %v28621_v59  ;;  %v40620_v49 = vld [vmem:[%s41776_s2 + $0x160] sm:$0xff]  ;;  %v33802_v59 = vld [vmem:[%s41778_s4 + $0xd0] sm:$0x3]  ;;  %v33797_v62 = vld [vmem:[%s41778_s4 + $0xa8] sm:$0xff]  ;;  %42208 = vst [vmem:[#allocation44_spill] sm:$0xff] %v40923_v35 }
 0xdb5   : > { %29014 = vmatprep.subr.mxu1 %v28635_v47  ;;  %28936 = vmatprep.mubr.f32.mxu1 %v41945_v0  ;;  %v33916_v54 = vpack.c.bf16 %v33802_v59, %v33794_v38  ;;  %v33805_v34 = vld [vmem:[%s41778_s4 + $0xe8] sm:$0x3]  ;;  %v42211_v59 = vld [vmem:[#allocation6_spill] sm:$0xff] }
 0xdb6   : > { %29662 = vmatprep.mubr.f32.mxu0 %v41945_v0  ;;  %29740 = vmatprep.subr.mxu0 %v29292_v30  ;;  %v29278_v45 = vpop.permute.xlu1 %29277  ;;  %v29903_v17 = vpop.permute.xlu0 %29902  ;;  %v33918_v47 = vpack.c.bf16 %v33805_v34, %v33797_v62  ;;  %v33799_v30 = vld [vmem:[%s41778_s4 + $0xb8] sm:$0xff]  ;;  %v40933_v38 = vld [vmem:[%s41778_s4 + $0x188] sm:$0xff] }
 0xdb7   : > { %33768 = vmatmul.mubr.msk.f32.vlgmr.msra.gmra.mrb[34].mxu1 %vm474_vm4, %v40476_v42  ;;  %33778 = vmatmul.mubr.msk.f32.vlgmr.msra.gmra.mrb[36].mxu0 %vm474_vm4, %v40549_v60  ;;  %42210 = vst [vmem:[#allocation43_spill] sm:$0xff] %v40933_v38 }
 0xdb8   : > { %29015 = vmatpush1.msra.mxu1 %v28634_v48  ;;  %29078 = vmatprep.mubr.f32.mxu1 %v41945_v0 }
 0xdb9   : > { %29156 = vmatprep.subr.mxu1 %v28639_v16  ;;  %29741 = vmatpush1.msra.mxu0 %v29291_v52  ;;  %v33807_v52 = vld [vmem:[%s41778_s4 + $0xf8] sm:$0x3] }
 0xdba   : > { %29804 = vmatprep.mubr.f32.mxu0 %v41945_v0  ;;  %v29905_v15 = vpop.permute.xlu1 %29904  ;;  %v33922_v16 = vpack.c.bf16 %v33807_v52, %v33799_v30  ;;  %v40945_v30 = vld [vmem:[%s41778_s4 + $0x1c8] sm:$0x3]  ;;  %v40950_v52 = vld [vmem:[%s41778_s4 + $0x198] sm:$0xff] }
 0xdbb   : > { %33770 = vmatmul.mubr.msk.f32.vlgmr.msra.gmra.mrb[36].mxu1 %vm474_vm4, %v40476_v42  ;;  %33780 = vmatmul.mubr.msk.f32.vlgmr.msra.gmra.mrb[38].mxu0 %vm474_vm4, %v40549_v60  ;;  %v29901_v12 = vpop.permute.xlu0 %29900  ;;  %v29935_v32 = vsel %vm5656_vm12, %v29903_v17, %v29905_v15  ;;  %42212 = vst [vmem:[#allocation26_spill] sm:$0xff] %v40945_v30  ;;  %42213 = vst [vmem:[#allocation32_spill] sm:$0xff] %v40950_v52  ;;  %v42225_v30 = vld [vmem:[#allocation16_spill] sm:$0xff] }
 0xdbc   : > { %29157 = vmatpush1.msra.mxu1 %v28638_v13  ;;  %29220 = vmatprep.mubr.f32.mxu1 %v41945_v0  ;;  %v29934_v63 = vsel %vm5656_vm12, %v29901_v12, %v29903_v17  ;;  %v40735_v12 = vld [vmem:[%s41778_s4 + $0xa0] sm:$0xff] }
 0xdbd   : > { %29385 = vmatprep.subr.mxu1 %v29282_v33  ;;  %29969 = vmatprep.subr.mxu0 %v29935_v32  ;;  %v40740_v32 = vld [vmem:[%s41778_s4 + $0xe0] sm:$0x3]  ;;  %v40745_v33 = vld [vmem:[%s41778_s4 + $0xb0] sm:$0xff] }
 0xdbe   : > { %29970 = vmatpush1.msra.mxu0 %v29934_v63  ;;  %30033 = vmatprep.mubr.f32.mxu0 %v41945_v0  ;;  %v29907_v20 = vpop.permute.xlu1 %29906  ;;  %v40750_v63 = vld [vmem:[%s41778_s4 + $0xf0] sm:$0x3] }
 0xdbf   : > { %33772 = vmatmul.mubr.msk.f32.vlgmr.msra.gmra.mrb[38].mxu1 %vm474_vm4, %v40476_v42  ;;  %33783 = vmatmul.mubr.msk.f32.vlgmr.msra.gmra.mrb[32].mxu0 %vm474_vm4, %v40620_v49  ;;  %v29909_v36 = vpop.permute.xlu0 %29908  ;;  %v29936_v1 = vsel %vm5656_vm12, %v29905_v15, %v29907_v20 }
 0xdc0   : > { %29386 = vmatpush1.msra.mxu1 %v29281_v8  ;;  %29449 = vmatprep.mubr.f32.mxu1 %v41945_v0  ;;  %v29937_v26 = vsel %vm5656_vm12, %v29907_v20, %v29909_v36  ;;  %v40760_v20 = vld [vmem:[%s41778_s4 + $0x48] sm:$0x3]  ;;  %v40765_v8 = vld [vmem:[%s41778_s4] sm:$0xff] }
 0xdc1   : > { %29527 = vmatprep.subr.mxu1 %v29286_v14  ;;  %30175 = vmatprep.mubr.f32.mxu0 %v41945_v0  ;;  %v40775_v14 = vld [vmem:[%s41778_s4 + $0x18] sm:$0xff] }
 0xdc2   : > { %v29911_v40 = vpop.permute.xlu1 %29910 }
 0xdc3   : > { %33775 = vmatmul.mubr.msk.f32.vlgmr.msra.gmra.mrb[32].mxu1 %vm474_vm4, %v40549_v60  ;;  %v29938_v37 = vsel %vm5656_vm12, %v29909_v36, %v29911_v40  ;;  %v29913_v7 = vpop.permute.xlu0 %29912  ;;  %v40770_v36 = vld [vmem:[%s41778_s4 + $0x40] sm:$0x3] }
 0xdc4   : > { %29528 = vmatpush1.msra.mxu1 %v29285_v51  ;;  %29591 = vmatprep.mubr.f32.mxu1 %v41945_v0  ;;  %v29939_v29 = vsel %vm5656_vm12, %v29911_v40, %v29913_v7  ;;  %v40780_v40 = vld [vmem:[%s41778_s4 + $0x58] sm:$0x3]  ;;  %v40785_v51 = vld [vmem:[%s41778_s4 + $0x10] sm:$0xff] }
 0xdc5   : > { %29669 = vmatprep.subr.mxu1 %v29290_v43  ;;  %30111 = vmatprep.subr.mxu0 %v29939_v29  ;;  %v40800_v43 = vld [vmem:[%s41778_s4 + $0x68] sm:$0x3]  ;;  %v40805_v29 = vld [vmem:[%s41778_s4 + $0x20] sm:$0xff] }
 0xdc6   : > { %30112 = vmatpush1.msra.mxu0 %v29938_v37  ;;  %v29915_v41 = vpop.permute.xlu1 %29914  ;;  %v40790_v37 = vld [vmem:[%s41778_s4 + $0x50] sm:$0x3] }
 0xdc7   : > { %33777 = vmatmul.mubr.msk.f32.vlgmr.msra.gmra.mrb[34].mxu1 %vm474_vm4, %v40549_v60  ;;  %33785 = vmatmul.mubr.msk.f32.vlgmr.msra.gmra.mrb[34].mxu0 %vm474_vm4, %v40620_v49  ;;  %v29276_v50 = vpop.permute.xlu0 %29275  ;;  %v29940_v39 = vsel %vm5656_vm12, %v29913_v7, %v29915_v41  ;;  %v40795_v7 = vld [vmem:[%s41778_s4 + $0x28] sm:$0xff] }
 0xdc8   : > { %29670 = vmatpush1.msra.mxu1 %v29289_v61  ;;  %29733 = vmatprep.mubr.f32.mxu1 %v41945_v0  ;;  %v29294_v56 = vsel %vm5000_vm11, %v29276_v50, %v29278_v45  ;;  %v29293_v44 = vsel %vm5000_vm11, %v40558_v10, %v29276_v50  ;;  %v33912_v10 = vpack.c.bf16 %v33800_v2, %v33792_v58  ;;  %v40815_v50 = vld [vmem:[%s41778_s4 + $0x38] sm:$0xff] }
 0xdc9   : > { %29811 = vmatprep.subr.mxu1 %v29294_v56  ;;  %30317 = vmatprep.mubr.f32.mxu0 %v41945_v0  ;;  %v40820_v56 = vld [vmem:[%s41778_s4 + $0x78] sm:$0x3] }
 0xdcb   : > { %33779 = vmatmul.mubr.msk.f32.vlgmr.msra.gmra.mrb[36].mxu1 %vm474_vm4, %v40549_v60 }
 0xdcc   : > { %29812 = vmatpush1.msra.mxu1 %v29293_v44  ;;  %29875 = vmatprep.mubr.f32.mxu1 %v41945_v0  ;;  %v29919_v46 = vpop.permute.xlu1 %29918  ;;  %v40825_v44 = vld [vmem:[%s41778_s4 + $0x30] sm:$0xff] }
 0xdcd   : > { %30040 = vmatprep.subr.mxu1 %v29937_v26  ;;  %v29917_v42 = vpop.permute.xlu0 %29916 }
 0xdce   : > { %v29941_v22 = vsel %vm5656_vm12, %v29915_v41, %v29917_v42  ;;  %v29942_v28 = vsel %vm5656_vm12, %v29917_v42, %v29919_v46  ;;  %v40810_v41 = vld [vmem:[%s41778_s4 + $0x60] sm:$0x3] }
 0xdcf   : > { %33781 = vmatmul.mubr.msk.f32.vlgmr.msra.gmra.mrb[38].mxu1 %vm474_vm4, %v40549_v60 }
 0xdd0   : > { %30041 = vmatpush1.msra.mxu1 %v29936_v1  ;;  %30104 = vmatprep.mubr.f32.mxu1 %v41945_v0  ;;  %v40836_v1 = vld [vmem:[%s41778_s4 + $0x108] sm:$0xff] }
 0xdd1   : > { %30182 = vmatprep.subr.mxu1 %v29941_v22 }
 0xdd2   : > { %v29923_v6 = vpop.permute.xlu1 %29922  ;;  %v29921_v23 = vpop.permute.xlu0 %29920 }
 0xdd3   : > { %33784 = vmatmul.mubr.msk.f32.vlgmr.msra.gmra.mrb[32].mxu1 %vm474_vm4, %v40620_v49  ;;  %v29943_v31 = vsel %vm5656_vm12, %v29919_v46, %v29921_v23  ;;  %v29944_v19 = vsel %vm5656_vm12, %v29921_v23, %v29923_v6  ;;  %v40830_v46 = vld [vmem:[%s41778_s4 + $0x70] sm:$0x3]  ;;  %v40846_v23 = vld [vmem:[%s41778_s4 + $0x100] sm:$0xff] }
 0xdd4   : > { %30183 = vmatpush1.msra.mxu1 %v29940_v39  ;;  %30253 = vmatprep.subr.mxu0 %v29943_v31  ;;  %v40851_v39 = vld [vmem:[%s41778_s4 + $0x140] sm:$0x3] }
 0xdd5   : > { %30246 = vmatprep.mubr.f32.mxu1 %v41945_v0  ;;  %30254 = vmatpush1.msra.mxu0 %v29942_v28 }
 0xdd6   : > { %33787 = vmatmul.mubr.msk.f32.vlgmr.msra.gmra.mrb[36].mxu0 %vm474_vm4, %v40620_v49  ;;  %v29927_v53 = vpop.permute.xlu1 %29926 }
 0xdd7   : > { %33786 = vmatmul.mubr.msk.f32.vlgmr.msra.gmra.mrb[34].mxu1 %vm474_vm4, %v40620_v49  ;;  %v29925_v11 = vpop.permute.xlu0 %29924  ;;  %30459 = vmatprep.mubr.f32.mxu0 %v41945_v0 }
 0xdd8   : > { %v29945_v9 = vsel %vm5656_vm12, %v29923_v6, %v29925_v11  ;;  %30388 = vmatprep.mubr.f32.mxu1 %v41945_v0  ;;  %v29946_v5 = vsel %vm5656_vm12, %v29925_v11, %v29927_v53  ;;  %v40841_v6 = vld [vmem:[%s41778_s4 + $0x148] sm:$0x3]  ;;  %v40857_v11 = vld [vmem:[%s41778_s4 + $0x118] sm:$0xff] }
 0xdd9   : > { %30324 = vmatprep.subr.mxu1 %v29945_v9  ;;  %v40867_v9 = vld [vmem:[%s41778_s4 + $0x110] sm:$0xff] }
 0xdda   : > { %30325 = vmatpush1.msra.mxu1 %v29944_v19  ;;  %v29931_v24 = vpop.permute.xlu1 %29930  ;;  %42203 = vst [vmem:[#allocation33_spill] sm:$0xff] %v40867_v9  ;;  %v40872_v19 = vld [vmem:[%s41778_s4 + $0x150] sm:$0x3] }
 0xddb   : > { %33788 = vmatmul.mubr.msk.f32.vlgmr.msra.gmra.mrb[36].mxu1 %vm474_vm4, %v40620_v49  ;;  %v29929_v3 = vpop.permute.xlu0 %29928 }
 0xddc   : > { %v29947_v27 = vsel %vm5656_vm12, %v29927_v53, %v29929_v3  ;;  %30530 = vmatprep.mubr.f32.mxu1 %v41945_v0  ;;  %v29948_v4 = vsel %vm5656_vm12, %v29929_v3, %v29931_v24  ;;  %v33793_v0 = vld [vmem:[%s41778_s4 + $0x88] sm:$0xff]  ;;  %v40862_v53 = vld [vmem:[%s41778_s4 + $0x158] sm:$0x3] }
 0xddd   : > { %30395 = vmatprep.subr.mxu0 %v29947_v27  ;;  %v33910_v60 = vpack.c.bf16 %v33801_v57, %v33793_v0  ;;  %v40877_v3 = vld [vmem:[%s41778_s4 + $0x128] sm:$0xff]  ;;  %v40900_v0 = vld [vmem:[%s41778_s4 + $0x160] sm:$0x3]  ;;  %v40905_v57 = vld [vmem:[%s41778_s4 + $0x138] sm:$0xff] }
 0xdde   : > { %30396 = vmatpush1.msra.mxu0 %v29946_v5  ;;  %v40882_v27 = vld [vmem:[%s41778_s4 + $0x168] sm:$0x3]  ;;  %v40887_v5 = vld [vmem:[%s41778_s4 + $0x120] sm:$0xff]  ;;  %42205 = vst [vmem:[#allocation41_spill] sm:$0xff] %v40900_v0  ;;  %42206 = vst [vmem:[#allocation38_spill] sm:$0xff] %v40905_v57 }
 0xddf   : > { %33789 = vmatmul.mubr.msk.f32.vlgmr.msra.gmra.mrb[38].mxu0 %vm474_vm4, %v40620_v49  ;;  %v29933_v55 = vpop.permute.xlu0 %29932  ;;  %33911 = vmatprep.subr.bf16.mxu0 %v33910_v60  ;;  %42204 = vst [vmem:[#allocation50_spill] sm:$0xff] %v40887_v5  ;;  %v40910_v60 = vld [vmem:[%s41778_s4 + $0x178] sm:$0x3]  ;;  %v42226_v0 = vld [vmem:[#allocation17_spill] sm:$0xff] }
 0xde0   : > { %v29949_v25 = vsel %vm5656_vm12, %v29931_v24, %v29933_v55  ;;  %42207 = vst [vmem:[#allocation36_spill] sm:$0xff] %v40910_v60  ;;  %v42227_v60 = vpack.c.bf16 %v40740_v32, %v40735_v12 }
 0xde1   : > { %30466 = vmatprep.subr.mxu1 %v29949_v25 }
 0xde2   : > { %30467 = vmatpush1.msra.mxu1 %v29948_v4 }
 0xde3   : > { %33790 = vmatmul.mubr.msk.f32.vlgmr.msra.gmra.mrb[38].mxu1 %vm474_vm4, %v40620_v49  ;;  %33915 = vmatprep.subr.bf16.mxu1 %v33914_v21  ;;  %v40755_v49 = vld [vmem:[%s41778_s4 + $0x8] sm:$0xff]  ;;  %v40928_v21 = vld [vmem:[%s41778_s4 + $0x170] sm:$0x3] }
 0xde4   : > { %42209 = vst [vmem:[#allocation35_spill] sm:$0xff] %v40928_v21  ;;  %v42223_v21 = vld [vmem:[#allocation13_spill] sm:$0xff] }
 0xde5   : > { %33913 = vmatpush1.bf16.xpose.msra.mxu0 %v33912_v10 }
 0xde6   : > { %33919 = vmatprep.subr.bf16.mxu0 %v33918_v47 }
 0xde9   : > { %33917 = vmatpush1.bf16.xpose.msra.mxu1 %v33916_v54 }
 0xdea   : > { %33923 = vmatprep.subr.bf16.mxu1 %v33922_v16  ;;  %v40955_v16 = vld [vmem:[%s41778_s4 + $0x1d8] sm:$0x3] }
 0xdeb   : > { %v40728_v48 = vpop.permute.xlu1 %30557  ;;  %42214 = vst [vmem:[#allocation34_spill] sm:$0xff] %v40955_v16 }
 0xe92   : > { %v30035_v45 = vpop.f32.mrb[32].mxu0 }
 0xe93   : > { %v30037_v17 = vpop.f32.mrb[33].mxu0  ;;  %v30560_v15 = vadd.f32 %v40728_v48, %v30035_v45  ;;  %v42215_v45 = vld [vmem:[#allocation7_spill] sm:$0xff] }
 0xe94   : > { %v30561_v13 = vadd.f32 %v40728_v48, %v30037_v17 }
 0xe95   : > { %v30576_v26 = vmax.f32 %v30560_v15, 0.0 }
 0xe96   : > { %v30577_v31 = vmax.f32 %v30561_v13, 0.0  ;;  %v42217_v13 = vld [vmem:[#allocation11_spill] sm:$0xff] }
 0xe97   : > { %v40936_v54 = vmul.f32 %v30576_v26, %v42211_v59  ;;  %v42216_v26 = vld [vmem:[#allocation10_spill] sm:$0xff] }
 0xe98   : > { %v40958_v17 = vmul.f32 %v30577_v31, %v42215_v45  ;;  %v42218_v31 = vld [vmem:[#allocation8_spill] sm:$0xff] }
 0xe99   : > { %v42230_v12 = vrot.slane %v40936_v54, 2 }
 0xe9a   : > { %v30177_v61 = vpop.f32.mrb[34].mxu0  ;;  %v30666_v59 = vrot.slane %v40958_v17, 1 }
 0xe9b   : > { %v30564_v42 = vadd.f32 %v40728_v48, %v30177_v61  ;;  %v30179_v22 = vpop.f32.mrb[35].mxu0  ;;  %v42219_v61 = vld [vmem:[#allocation9_spill] sm:$0xff] }
 0xe9c   : > { %v30565_v28 = vadd.f32 %v40728_v48, %v30179_v22 }
 0xe9d   : > { %v30580_v62 = vmax.f32 %v30564_v42, 0.0 }
 0xe9e   : > { %v30581_v15 = vmax.f32 %v30565_v28, 0.0 }
 0xe9f   : > { %v40981_v42 = vmul.f32 %v30580_v62, %v42216_v26 }
 0xea0   : > { %v40987_v28 = vmul.f32 %v30581_v15, %v42217_v13 }
 0xea6   : > { %v30106_v2 = vpop.f32.mrb[32].mxu1 }
 0xea7   : > { %v30562_v45 = vadd.f32 %v40728_v48, %v30106_v2  ;;  %v30108_v4 = vpop.f32.mrb[33].mxu1 }
 0xea8   : > { %v30563_v34 = vadd.f32 %v40728_v48, %v30108_v4 }
 0xea9   : > { %v30578_v13 = vmax.f32 %v30562_v45, 0.0  ;;  %v30319_v55 = vpop.f32.mrb[36].mxu0 }
 0xeaa   : > { %v30579_v47 = vmax.f32 %v30563_v34, 0.0  ;;  %v30248_v62 = vpop.f32.mrb[34].mxu1  ;;  %v30568_v26 = vadd.f32 %v40728_v48, %v30319_v55  ;;  %v30321_v25 = vpop.f32.mrb[37].mxu0 }
 0xeab   : > { %v41015_v18 = vmul.f32 %v30578_v13, %v42218_v31  ;;  %v30566_v45 = vadd.f32 %v40728_v48, %v30248_v62  ;;  %v30250_v15 = vpop.f32.mrb[35].mxu1  ;;  %v30569_v10 = vadd.f32 %v40728_v48, %v30321_v25  ;;  %v42220_v62 = vld [vmem:[#allocation14_spill] sm:$0xff] }
 0xeac   : > { %v41021_v34 = vmul.f32 %v30579_v47, %v42219_v61  ;;  %v30584_v24 = vmax.f32 %v30568_v26, 0.0  ;;  %v30567_v55 = vadd.f32 %v40728_v48, %v30250_v15  ;;  %v42221_v61 = vld [vmem:[#allocation12_spill] sm:$0xff]  ;;  %v42222_v15 = vld [vmem:[#allocation15_spill] sm:$0xff] }
 0xead   : > { %v30582_v22 = vmax.f32 %v30566_v45, 0.0  ;;  %v30585_v58 = vmax.f32 %v30569_v10, 0.0  ;;  %v30667_v31 = vrot.slane %v41015_v18, 1  ;;  %v31268_v13 = vrot.slane %v41015_v18, 2 }
 0xeae   : > { %v41028_v52 = vmul.f32 %v30584_v24, %v42220_v62  ;;  %v30583_v25 = vmax.f32 %v30567_v55, 0.0  ;;  %v30390_v16 = vpop.f32.mrb[36].mxu1  ;;  %v30668_v2 = vrot.slane %v41021_v34, 1  ;;  %v31269_v47 = vrot.slane %v41021_v34, 2 }
 0xeaf   : > { %v41033_v26 = vmul.f32 %v30582_v22, %v42221_v61  ;;  %v41036_v4 = vmul.f32 %v30585_v58, %v42222_v15  ;;  %v30570_v10 = vadd.f32 %v40728_v48, %v30390_v16  ;;  %v30392_v45 = vpop.f32.mrb[37].mxu1  ;;  %v42224_v62 = vrot.slane %v40936_v54, 1 }
 0xeb0   : > { %v41041_v24 = vmul.f32 %v30583_v25, %v42223_v21  ;;  %v30571_v55 = vadd.f32 %v40728_v48, %v30392_v45  ;;  %v30616_v22 = vrot.slane %v41028_v52, 7 }
 0xeb1   : > { %v30681_v38 = vsel %vm30632_vm13, %v42224_v62, %v41028_v52  ;;  %v30586_v61 = vmax.f32 %v30570_v10, 0.0  ;;  %v30682_v58 = vsel %vm30632_vm13, %v30666_v59, %v41036_v4  ;;  %v30617_v16 = vrot.slane %v41036_v4, 7 }
 0xeb2   : > { %v30671_v15 = vrot.slane %v41033_v26, 1  ;;  %v30587_v35 = vmax.f32 %v30571_v55, 0.0  ;;  %v30461_v21 = vpop.f32.mrb[38].mxu0  ;;  %30770 = vmatprep.mubr.f32.mxu0 %v30682_v58  ;;  %v30672_v25 = vrot.slane %v41041_v24, 1  ;;  %v41056_v45 = vsel %vm30632_vm13, %v40936_v54, %v30616_v22 }
 0xeb3   : > { %v31283_v62 = vrot.slane %v41036_v4, 1  ;;  %v41060_v10 = vmul.f32 %v30586_v61, %v42225_v30  ;;  %v30572_v59 = vadd.f32 %v40728_v48, %v30461_v21  ;;  %v30463_v5 = vpop.f32.mrb[39].mxu0  ;;  %30771 = vmatmul.mubr.f32.vlgmr.msra.gmra.mrb[40].mxu0 %v30681_v38  ;;  %v30634_v55 = vsel %vm30632_vm13, %v40958_v17, %v30617_v16 }
 0xeb4   : > { %v31282_v58 = vrot.slane %v41028_v52, 1  ;;  %v41067_v57 = vmul.f32 %v30587_v35, %v42226_v0  ;;  %v30573_v22 = vadd.f32 %v40728_v48, %v30463_v5  ;;  %33921 = vmatpush1.bf16.xpose.msra.mxu0 %v42227_v60  ;;  %v42228_v30 = vrot.slane %v40958_v17, 2 }
 0xeb5   : > { %v31273_v38 = vrot.slane %v41041_v24, 2  ;;  %v30588_v21 = vmax.f32 %v30572_v59, 0.0  ;;  %v30683_v16 = vsel %vm30632_vm13, %v30667_v31, %v41060_v10  ;;  %v42229_v0 = vpack.c.bf16 %v40760_v20, %v40755_v49 }
 0xeb6   : > { %v41076_v61 = vsel %vm30632_vm13, %v42228_v30, %v31283_v62  ;;  %v30618_v5 = vrot.slane %v41060_v10, 7  ;;  %v41088_v32 = vsel %vm30632_vm13, %v42230_v12, %v31282_v58  ;;  %v30589_v60 = vmax.f32 %v30573_v22, 0.0  ;;  %v30532_v35 = vpop.f32.mrb[38].mxu1  ;;  %v42231_v30 = vld [vmem:[#allocation18_spill] sm:$0xff] }
 0xeb7   : > { %33927 = vmatprep.subr.bf16.mxu0 %v42229_v0  ;;  %v30684_v62 = vsel %vm30632_vm13, %v30668_v2, %v41067_v57  ;;  %v30619_v59 = vrot.slane %v41067_v57, 7  ;;  %v31285_v31 = vrot.slane %v41067_v57, 1  ;;  %v41095_v9 = vmul.f32 %v30588_v21, %v42231_v30  ;;  %v30534_v20 = vpop.f32.mrb[39].mxu1  ;;  %v42232_v0 = vld [vmem:[#allocation19_spill] sm:$0xff] }
 0xeb8   : > { %v30574_v49 = vadd.f32 %v40728_v48, %v30532_v35  ;;  %30840 = vmatprep.mubr.f32.mxu1 %v30684_v62  ;;  %v41100_v58 = vsel %vm30632_vm13, %v41015_v18, %v30618_v5  ;;  %v31284_v22 = vrot.slane %v41060_v10, 1  ;;  %v41104_v12 = vmul.f32 %v30589_v60, %v42232_v0 }
 0xeb9   : > { %v30575_v2 = vadd.f32 %v40728_v48, %v30534_v20  ;;  %30841 = vmatmul.mubr.f32.vlgmr.msra.gmra.mrb[40].mxu1 %v30683_v16  ;;  %v30636_v21 = vsel %vm30632_vm13, %v41021_v34, %v30619_v59  ;;  %v41110_v30 = vsel %vm30632_vm13, %v31269_v47, %v31285_v31  ;;  %v42233_v62 = vpack.c.bf16 %v40750_v63, %v40745_v33 }
 0xeba   : > { %v30590_v35 = vmax.f32 %v30574_v49, 0.0  ;;  %v42234_v5 = vrot.slane %v40981_v42, 1  ;;  %v30620_v0 = vrot.slane %v41095_v9, 7  ;;  %v41121_v48 = vsel %vm30632_vm13, %v31268_v13, %v31284_v22  ;;  %v42237_v49 = vld [vmem:[#allocation20_spill] sm:$0xff] }
 0xebb   : > { %33925 = vmatpush1.bf16.xpose.msra.mxu1 %v42233_v62  ;;  %v30591_v16 = vmax.f32 %v30575_v2, 0.0  ;;  %v42235_v47 = vrot.slane %v40987_v28, 1  ;;  %v42236_v33 = vpack.c.bf16 %v40780_v40, %v40775_v14  ;;  %v30621_v63 = vrot.slane %v41104_v12, 7  ;;  %v42238_v62 = vld [vmem:[#allocation21_spill] sm:$0xff] }
 0xebc   : > { %v30685_v60 = vsel %vm30632_vm13, %v42234_v5, %v41095_v9  ;;  %v31287_v31 = vrot.slane %v41104_v12, 1  ;;  %v41133_v20 = vmul.f32 %v30590_v35, %v42237_v49  ;;  %v41137_v13 = vsel %vm30632_vm13, %v40981_v42, %v30620_v0 }
 0xebd   : > { %v30686_v59 = vsel %vm30632_vm13, %v42235_v47, %v41104_v12  ;;  %33931 = vmatprep.subr.bf16.mxu1 %v42236_v33  ;;  %v31286_v22 = vrot.slane %v41095_v9, 1  ;;  %v31621_v2 = vrot.slane %v41036_v4, 2  ;;  %v41142_v5 = vmul.f32 %v30591_v16, %v42238_v62 }
 0xebe   : > { %30910 = vmatprep.mubr.f32.mxu0 %v30686_v59  ;;  %v30638_v14 = vsel %vm30632_vm13, %v40987_v28, %v30621_v63  ;;  %v42239_v40 = vrot.slane %v40987_v28, 2  ;;  %v31272_v47 = vrot.slane %v41033_v26, 2  ;;  %v42240_v0 = vpack.c.bf16 %v40770_v36, %v40765_v8 }
 0xebf   : > { %30911 = vmatmul.mubr.f32.vlgmr.msra.gmra.mrb[42].mxu0 %v30685_v60  ;;  %v30687_v16 = vsel %vm30632_vm13, %v30671_v15, %v41133_v20  ;;  %v30622_v60 = vrot.slane %v41133_v20, 7  ;;  %v42241_v59 = vrot.slane %v40981_v42, 2  ;;  %v42242_v63 = vrot.slane %v40958_v17, 3 }
 0xec0   : > { %v41149_v35 = vsel %vm30632_vm13, %v42239_v40, %v31287_v31  ;;  %33929 = vmatpush1.bf16.xpose.msra.mxu0 %v42240_v0  ;;  %31050 = vmatprep.mubr.f32.mxu0 %v30634_v55  ;;  %v30688_v8 = vsel %vm30632_vm13, %v30672_v25, %v41142_v5  ;;  %v42243_v36 = vpack.c.bf16 %v40800_v43, %v40795_v7  ;;  %v30623_v15 = vrot.slane %v41142_v5, 7 }
 0xec1   : > { %v41161_v33 = vsel %vm30632_vm13, %v42241_v59, %v31286_v22  ;;  %v41166_v31 = vsel %vm30632_vm13, %v42242_v63, %v31621_v2  ;;  %v31289_v55 = vrot.slane %v41142_v5, 1  ;;  %v31288_v49 = vrot.slane %v41133_v20, 1  ;;  %30980 = vmatprep.mubr.f32.mxu1 %v30688_v8 }
 0xec2   : > { %33935 = vmatprep.subr.bf16.mxu0 %v42243_v36  ;;  %v41178_v22 = vsel %vm30632_vm13, %v41033_v26, %v30622_v60  ;;  %v31623_v2 = vrot.slane %v41067_v57, 2  ;;  %v31620_v62 = vrot.slane %v41028_v52, 2  ;;  %v31625_v25 = vrot.slane %v41104_v12, 2  ;;  %30981 = vmatmul.mubr.f32.vlgmr.msra.gmra.mrb[42].mxu1 %v30687_v16 }
 0xec3   : > { %v30640_v7 = vsel %vm30632_vm13, %v41041_v24, %v30623_v15  ;;  %v41186_v43 = vsel %vm30632_vm13, %v31273_v38, %v31289_v55  ;;  %v41189_v40 = vsel %vm30632_vm13, %v31272_v47, %v31288_v49  ;;  %v31606_v0 = vrot.slane %v41015_v18, 3  ;;  %31120 = vmatprep.mubr.f32.mxu1 %v30636_v21 }
 0xec4   : > { %v42244_v60 = vpack.c.bf16 %v40790_v37, %v40785_v51  ;;  %v42245_v59 = vrot.slane %v41021_v34, 3  ;;  %v42246_v63 = vrot.slane %v40936_v54, 3  ;;  %v42247_v47 = vrot.slane %v40987_v28, 3 }
 0xec5   : > { %v31622_v36 = vrot.slane %v41060_v10, 2  ;;  %v42248_v51 = vpack.c.bf16 %v40820_v56, %v40815_v50  ;;  %v31611_v37 = vrot.slane %v41041_v24, 3  ;;  %v31627_v21 = vrot.slane %v41142_v5, 2 }
 0xec6   : > { %33933 = vmatpush1.bf16.xpose.msra.mxu1 %v42244_v60  ;;  %v41198_v16 = vsel %vm30632_vm13, %v42245_v59, %v31623_v2  ;;  %v41203_v38 = vsel %vm30632_vm13, %v42246_v63, %v31620_v62  ;;  %v41208_v8 = vsel %vm30632_vm13, %v42247_v47, %v31625_v25  ;;  %v31624_v15 = vrot.slane %v41095_v9, 2 }
 0xec7   : > { %33939 = vmatprep.subr.bf16.mxu1 %v42248_v51  ;;  %v31959_v55 = vrot.slane %v41036_v4, 3  ;;  %v41219_v49 = vsel %vm30632_vm13, %v31606_v0, %v31622_v36  ;;  %v31610_v2 = vrot.slane %v41033_v26, 3  ;;  %v31626_v62 = vrot.slane %v41133_v20, 2  ;;  %31051 = vmatmul.mubr.f32.vlgmr.msra.gmra.mrb[44].mxu0 %v41056_v45 }
 0xec8   : > { %v31945_v25 = vrot.slane %v41021_v34, 4  ;;  %v41226_v50 = vsel %vm30632_vm13, %v31611_v37, %v31627_v21  ;;  %v42249_v56 = vrot.slane %v40981_v42, 3  ;;  %v42250_v59 = vrot.slane %v40958_v17, 4  ;;  %31190 = vmatprep.mubr.f32.mxu0 %v30638_v14 }
 0xec9   : > { %v31961_v63 = vrot.slane %v41067_v57, 3  ;;  %v42251_v47 = vpack.c.bf16 %v40810_v41, %v40805_v29  ;;  %v41243_v45 = vsel %vm30632_vm13, %v31610_v2, %v31626_v62  ;;  %v31958_v36 = vrot.slane %v41028_v52, 3 }
 0xeca   : > { %v41231_v60 = vsel %vm30632_vm13, %v42249_v56, %v31624_v15  ;;  %v41236_v0 = vsel %vm30632_vm13, %v42250_v59, %v31959_v55  ;;  %v31963_v51 = vrot.slane %v41104_v12, 3  ;;  %v31944_v37 = vrot.slane %v41015_v18, 4 }
 0xecb   : > { %33937 = vmatpush1.bf16.xpose.msra.mxu0 %v42251_v47  ;;  %v42252_v21 = vpack.c.bf16 %v40841_v6, %v40836_v1  ;;  %v41252_v15 = vsel %vm30632_vm13, %v31945_v25, %v31961_v63  ;;  %v31960_v29 = vrot.slane %v41060_v10, 3  ;;  %v31949_v41 = vrot.slane %v41041_v24, 4 }
 0xecc   : > { %v31965_v14 = vrot.slane %v41142_v5, 3  ;;  %v42253_v55 = vrot.slane %v40936_v54, 4  ;;  %v42254_v62 = vrot.slane %v40987_v28, 4  ;;  %v31962_v1 = vrot.slane %v41095_v9, 3 }
 0xecd   : > { %33943 = vmatprep.subr.bf16.mxu0 %v42252_v21  ;;  %v32297_v6 = vrot.slane %v41036_v4, 4  ;;  %31121 = vmatmul.mubr.f32.vlgmr.msra.gmra.mrb[44].mxu1 %v41100_v58  ;;  %v41271_v25 = vsel %vm30632_vm13, %v31944_v37, %v31960_v29  ;;  %v31948_v63 = vrot.slane %v41033_v26, 4  ;;  %v31964_v47 = vrot.slane %v41133_v20, 3 }
 0xece   : > { %v41260_v2 = vsel %vm30632_vm13, %v42253_v55, %v31958_v36  ;;  %v41265_v56 = vsel %vm30632_vm13, %v42254_v62, %v31963_v51  ;;  %v41274_v59 = vsel %vm30632_vm13, %v31949_v41, %v31965_v14  ;;  %v42255_v36 = vpack.c.bf16 %v40830_v46, %v40825_v44  ;;  %31260 = vmatprep.mubr.f32.mxu1 %v30640_v7 }
 0xecf   : > { %v42256_v51 = vrot.slane %v40981_v42, 4  ;;  %v42257_v58 = vrot.slane %v40958_v17, 5  ;;  %v32283_v29 = vrot.slane %v41021_v34, 5  ;;  %v32299_v41 = vrot.slane %v41067_v57, 4 }
 0xed0   : > { %33941 = vmatpush1.bf16.xpose.msra.mxu1 %v42255_v36  ;;  %v42258_v14 = vpack.c.bf16 %v40862_v53, %v40857_v11  ;;  %v41297_v44 = vsel %vm30632_vm13, %v31948_v63, %v31964_v47  ;;  %v32296_v46 = vrot.slane %v41028_v52, 4  ;;  %v32301_v7 = vrot.slane %v41104_v12, 4 }
 0xed1   : > { %v41284_v21 = vsel %vm30632_vm13, %v42256_v51, %v31962_v1  ;;  %v41289_v37 = vsel %vm30632_vm13, %v42257_v58, %v32297_v6  ;;  %v32282_v55 = vrot.slane %v41015_v18, 5  ;;  %v41303_v62 = vsel %vm30632_vm13, %v32283_v29, %v32299_v41 }
 0xed2   : > { %33947 = vmatprep.subr.bf16.mxu1 %v42258_v14  ;;  %v32298_v1 = vrot.slane %v41060_v10, 4  ;;  %v32287_v6 = vrot.slane %v41041_v24, 5  ;;  %v32303_v36 = vrot.slane %v41142_v5, 4  ;;  %31191 = vmatmul.mubr.f32.vlgmr.msra.gmra.mrb[46].mxu0 %v41137_v13  ;;  %v42259_v11 = vrot.slane %v40936_v54, 5 }
 0xed3   : > { %v42260_v63 = vrot.slane %v40987_v28, 5  ;;  %v32300_v51 = vrot.slane %v41095_v9, 4  ;;  %v32635_v58 = vrot.slane %v41036_v4, 5  ;;  %v42261_v29 = vpack.c.bf16 %v40851_v39, %v40846_v23  ;;  %31387 = vmatprep.mubr.f32.mxu0 %v41076_v61 }
 0xed4   : > { %v41312_v53 = vsel %vm30632_vm13, %v42259_v11, %v32296_v46  ;;  %v41326_v13 = vsel %vm30632_vm13, %v32282_v55, %v32298_v1  ;;  %v41329_v41 = vsel %vm30632_vm13, %v32287_v6, %v32303_v36  ;;  %v32286_v14 = vrot.slane %v41033_v26, 5 }
 0xed5   : > { %v41317_v47 = vsel %vm30632_vm13, %v42260_v63, %v32301_v7  ;;  %33945 = vmatpush1.bf16.xpose.msra.mxu0 %v42261_v29  ;;  %v32302_v46 = vrot.slane %v41133_v20, 4  ;;  %v42262_v7 = vpack.c.bf16 %v40882_v27, %v40877_v3  ;;  %v42263_v11 = vrot.slane %v40981_v42, 5 }
 0xed6   : > { %v42264_v39 = vrot.slane %v40958_v17, 6  ;;  %v32621_v55 = vrot.slane %v41021_v34, 6  ;;  %v32637_v1 = vrot.slane %v41067_v57, 5  ;;  %v32634_v3 = vrot.slane %v41028_v52, 5 }
 0xed7   : > { %33951 = vmatprep.subr.bf16.mxu0 %v42262_v7  ;;  %v41339_v23 = vsel %vm30632_vm13, %v42263_v11, %v32300_v51  ;;  %v41349_v6 = vsel %vm30632_vm13, %v32286_v14, %v32302_v46  ;;  %v32639_v27 = vrot.slane %v41104_v12, 5  ;;  %v32620_v36 = vrot.slane %v41015_v18, 6  ;;  %31261 = vmatmul.mubr.f32.vlgmr.msra.gmra.mrb[46].mxu1 %v41178_v22  ;;  %v42267_v14 = vld [vmem:[#allocation33_spill] sm:$0xff] }
 0xed8   : > { %v41344_v61 = vsel %vm30632_vm13, %v42264_v39, %v32635_v58  ;;  %42265 = vst [vmem:[#allocation22_spill] sm:$0xff] %v41349_v6  ;;  %v41356_v63 = vsel %vm30632_vm13, %v32621_v55, %v32637_v1  ;;  %v32636_v51 = vrot.slane %v41060_v10, 5  ;;  %v32625_v58 = vrot.slane %v41041_v24, 6  ;;  %31457 = vmatprep.mubr.f32.mxu1 %v41110_v30  ;;  %v42272_v6 = vld [vmem:[#allocation38_spill] sm:$0xff] }
 0xed9   : > { %42266 = vst [vmem:[#allocation31_spill] sm:$0xff] %v41356_v63  ;;  %v32641_v29 = vrot.slane %v41142_v5, 5  ;;  %v42268_v46 = vpack.c.bf16 %v40872_v19, %v42267_v14  ;;  %v42269_v7 = vrot.slane %v40936_v54, 6  ;;  %v42270_v22 = vrot.slane %v40987_v28, 6  ;;  %v42271_v63 = vld [vmem:[#allocation36_spill] sm:$0xff] }
 0xeda   : > { %v32638_v55 = vrot.slane %v41095_v9, 5  ;;  %v32973_v1 = vrot.slane %v41036_v4, 6  ;;  %v42273_v19 = vpack.c.bf16 %v42271_v63, %v42272_v6  ;;  %v41381_v30 = vsel %vm30632_vm13, %v32620_v36, %v32636_v51 }
 0xedb   : > { %33949 = vmatpush1.bf16.xpose.msra.mxu1 %v42268_v46  ;;  %v41368_v11 = vsel %vm30632_vm13, %v42269_v7, %v32634_v3  ;;  %v41373_v39 = vsel %vm30632_vm13, %v42270_v22, %v32639_v27  ;;  %v41384_v14 = vsel %vm30632_vm13, %v32625_v58, %v32641_v29  ;;  %v32624_v3 = vrot.slane %v41033_v26, 6 }
 0xedc   : > { %33955 = vmatprep.subr.bf16.mxu1 %v42273_v19  ;;  %v32640_v46 = vrot.slane %v41133_v20, 5  ;;  %v42274_v27 = vrot.slane %v40981_v42, 6  ;;  %v42275_v4 = vrot.slane %v40958_v17, 7  ;;  %v32959_v36 = vrot.slane %v41021_v34, 7  ;;  %31388 = vmatmul.mubr.f32.vlgmr.msra.gmra.mrb[48].mxu0 %v41088_v32  ;;  %v42277_v17 = vld [vmem:[#allocation50_spill] sm:$0xff] }
 0xedd   : > { %v32975_v63 = vrot.slane %v41067_v57, 6  ;;  %v32972_v58 = vrot.slane %v41028_v52, 6  ;;  %v32977_v29 = vrot.slane %v41104_v12, 6  ;;  %v32958_v22 = vrot.slane %v41015_v18, 7  ;;  %31527 = vmatprep.mubr.f32.mxu0 %v41149_v35  ;;  %v42279_v52 = vld [vmem:[#allocation26_spill] sm:$0xff]  ;;  %v33824_v18 = vld [vmem:[%s41778_s4 + $0x180] sm:$0xff] }
 0xede   : > { %v41391_v7 = vsel %vm30632_vm13, %v42274_v27, %v32638_v55  ;;  %v41396_v6 = vsel %vm30632_vm13, %v42275_v4, %v32973_v1  ;;  %v41402_v51 = vsel %vm30632_vm13, %v32624_v3, %v32640_v46  ;;  %v42276_v55 = vld [vmem:[#allocation41_spill] sm:$0xff]  ;;  %v32974_v57 = vrot.slane %v41060_v10, 6  ;;  %v42280_v3 = vld [vmem:[#allocation43_spill] sm:$0xff]  ;;  %v33832_v35 = vld [vmem:[%s41778_s4 + $0x1c0] sm:$0x3] }
 0xedf   : > { %v42278_v19 = vpack.c.bf16 %v42276_v55, %v42277_v17  ;;  %v41412_v34 = vsel %vm30632_vm13, %v32959_v36, %v32975_v63  ;;  %v32963_v32 = vrot.slane %v41041_v24, 7  ;;  %v32979_v1 = vrot.slane %v41142_v5, 6  ;;  %v33829_v36 = vld [vmem:[%s41778_s4 + $0x1a8] sm:$0xff]  ;;  %v42285_v55 = vld [vmem:[#allocation44_spill] sm:$0xff] }
 0xee0   : > { %v42281_v12 = vpack.c.bf16 %v42279_v52, %v42280_v3  ;;  %v42282_v46 = vrot.slane %v40936_v54, 7  ;;  %v42283_v24 = vrot.slane %v40987_v28, 7  ;;  %v32960_v27 = vrot.slane %v40981_v42, 7  ;;  %v33837_v54 = vld [vmem:[%s41778_s4 + $0x1e8] sm:$0x3] }
 0xee1   : > { %33953 = vmatpush1.bf16.xpose.msra.mxu0 %v42278_v19  ;;  %v32976_v4 = vrot.slane %v41095_v9, 6  ;;  %v41445_v63 = vsel %vm30632_vm13, %v32958_v22, %v32974_v57  ;;  %v41448_v28 = vsel %vm30632_vm13, %v32963_v32, %v32979_v1  ;;  %v32978_v42 = vrot.slane %v41133_v20, 6  ;;  %v42287_v57 = vld [vmem:[#allocation34_spill] sm:$0xff]  ;;  %v42288_v32 = vld [vmem:[#allocation32_spill] sm:$0xff]  ;;  %v33839_v52 = vld [vmem:[%s41778_s4 + $0x1f8] sm:$0x3] }
 0xee2   : > { %33959 = vmatprep.subr.bf16.mxu0 %v42281_v12  ;;  %v41429_v10 = vsel %vm30632_vm13, %v42282_v46, %v32972_v58  ;;  %v41434_v5 = vsel %vm30632_vm13, %v42283_v24, %v32977_v29  ;;  %v32962_v58 = vrot.slane %v41033_v26, 7  ;;  %31458 = vmatmul.mubr.f32.vlgmr.msra.gmra.mrb[48].mxu1 %v41121_v48  ;;  %v42284_v29 = vld [vmem:[#allocation35_spill] sm:$0xff]  ;;  %v33960_v22 = vpack.c.bf16 %v33832_v35, %v33824_v18  ;;  %v33834_v20 = vld [vmem:[%s41778_s4 + $0x1d0] sm:$0x3]  ;;  %v33828_v12 = vld [vmem:[%s41778_s4 + $0x1a0] sm:$0xff] }
 0xee3   : > { %v41454_v9 = vsel %vm30632_vm13, %v32960_v27, %v32976_v4  ;;  %v42286_v17 = vpack.c.bf16 %v42284_v29, %v42285_v55  ;;  %31597 = vmatprep.mubr.f32.mxu1 %v41186_v43  ;;  %v42289_v26 = vpack.c.bf16 %v42287_v57, %v42288_v32  ;;  %v33826_v48 = vld [vmem:[%s41778_s4 + $0x190] sm:$0xff]  ;;  %v33966_v1 = vpack.c.bf16 %v33837_v54, %v33829_v36  ;;  %v33831_v43 = vld [vmem:[%s41778_s4 + $0x1b8] sm:$0xff]  ;;  %v33836_v18 = vld [vmem:[%s41778_s4 + $0x1e0] sm:$0x3] }
 0xee4   : > { %v41461_v19 = vsel %vm30632_vm13, %v32962_v58, %v32978_v42  ;;  %v33964_v3 = vpack.c.bf16 %v33834_v20, %v33826_v48  ;;  %v33970_v35 = vpack.c.bf16 %v33839_v52, %v33831_v43  ;;  %v33841_v46 = vld [vmem:[%s41778_s4 + $0x208] sm:$0xff]  ;;  %v33830_v24 = vld [vmem:[%s41778_s4 + $0x1b0] sm:$0xff]  ;;  %v33843_v36 = vld [vmem:[%s41778_s4 + $0x218] sm:$0xff] }
 0xee5   : > { %33957 = vmatpush1.bf16.xpose.msra.mxu1 %v42286_v17  ;;  %v33838_v27 = vld [vmem:[%s41778_s4 + $0x1f0] sm:$0x3]  ;;  %v33840_v54 = vld [vmem:[%s41778_s4 + $0x200] sm:$0xff]  ;;  %v33845_v29 = vld [vmem:[%s41778_s4 + $0x228] sm:$0xff] }
 0xee6   : > { %33963 = vmatprep.subr.bf16.mxu1 %v42289_v26  ;;  %v33848_v58 = vld [vmem:[%s41778_s4 + $0x240] sm:$0x3]  ;;  %v33842_v55 = vld [vmem:[%s41778_s4 + $0x210] sm:$0xff]  ;;  %v33847_v57 = vld [vmem:[%s41778_s4 + $0x238] sm:$0xff] }
 0xee7   : > { %v33850_v17 = vld [vmem:[%s41778_s4 + $0x250] sm:$0x3]  ;;  %v33844_v32 = vld [vmem:[%s41778_s4 + $0x220] sm:$0xff]  ;;  %v33857_v20 = vld [vmem:[%s41778_s4 + $0x288] sm:$0xff] }
 0xee8   : > { %31528 = vmatmul.mubr.f32.vlgmr.msra.gmra.mrb[50].mxu0 %v41161_v33  ;;  %v33849_v33 = vld [vmem:[%s41778_s4 + $0x248] sm:$0x3]  ;;  %v33852_v26 = vld [vmem:[%s41778_s4 + $0x260] sm:$0x3]  ;;  %v33854_v43 = vld [vmem:[%s41778_s4 + $0x270] sm:$0x3] }
 0xee9   : > { %33961 = vmatpush1.bf16.xpose.msra.mxu0 %v33960_v22  ;;  %31725 = vmatprep.mubr.f32.mxu0 %v41166_v31  ;;  %v33968_v31 = vpack.c.bf16 %v33836_v18, %v33828_v12  ;;  %v33974_v4 = vpack.c.bf16 %v33849_v33, %v33841_v46  ;;  %v33856_v12 = vld [vmem:[%s41778_s4 + $0x280] sm:$0xff]  ;;  %v33861_v46 = vld [vmem:[%s41778_s4 + $0x2a8] sm:$0xff]  ;;  %v33858_v33 = vld [vmem:[%s41778_s4 + $0x290] sm:$0xff] }
 0xeea   : > { %33967 = vmatprep.subr.bf16.mxu0 %v33966_v1  ;;  %v33846_v1 = vld [vmem:[%s41778_s4 + $0x230] sm:$0xff]  ;;  %v33864_v18 = vld [vmem:[%s41778_s4 + $0x2c0] sm:$0x3] }
 0xeec   : > { %31598 = vmatmul.mubr.f32.vlgmr.msra.gmra.mrb[50].mxu1 %v41189_v40  ;;  %v33851_v40 = vld [vmem:[%s41778_s4 + $0x258] sm:$0x3] }
 0xeed   : > { %33965 = vmatpush1.bf16.xpose.msra.mxu1 %v33964_v3  ;;  %31795 = vmatprep.mubr.f32.mxu1 %v41198_v16  ;;  %v33972_v16 = vpack.c.bf16 %v33838_v27, %v33830_v24  ;;  %v33978_v42 = vpack.c.bf16 %v33851_v40, %v33843_v36  ;;  %v33859_v3 = vld [vmem:[%s41778_s4 + $0x298] sm:$0xff]  ;;  %v33868_v36 = vld [vmem:[%s41778_s4 + $0x2e0] sm:$0x3] }
 0xeee   : > { %33971 = vmatprep.subr.bf16.mxu1 %v33970_v35  ;;  %v33863_v27 = vld [vmem:[%s41778_s4 + $0x2b8] sm:$0xff] }
 0xef0   : > { %31726 = vmatmul.mubr.f32.vlgmr.msra.gmra.mrb[52].mxu0 %v41203_v38  ;;  %v33853_v38 = vld [vmem:[%s41778_s4 + $0x268] sm:$0x3] }
 0xef1   : > { %33969 = vmatpush1.bf16.xpose.msra.mxu0 %v33968_v31  ;;  %31865 = vmatprep.mubr.f32.mxu0 %v41208_v8  ;;  %v33976_v8 = vpack.c.bf16 %v33848_v58, %v33840_v54  ;;  %v33982_v22 = vpack.c.bf16 %v33853_v38, %v33845_v29  ;;  %v33866_v31 = vld [vmem:[%s41778_s4 + $0x2d0] sm:$0x3]  ;;  %v33875_v29 = vld [vmem:[%s41778_s4 + $0x318] sm:$0xff]  ;;  %v33872_v38 = vld [vmem:[%s41778_s4 + $0x300] sm:$0xff] }
 0xef2   : > { %33975 = vmatprep.subr.bf16.mxu0 %v33974_v4  ;;  %v33860_v4 = vld [vmem:[%s41778_s4 + $0x2a0] sm:$0xff]  ;;  %v33862_v54 = vld [vmem:[%s41778_s4 + $0x2b0] sm:$0xff] }
 0xef3   : > { %v33870_v58 = vld [vmem:[%s41778_s4 + $0x2f0] sm:$0x3] }
 0xef4   : > { %31796 = vmatmul.mubr.f32.vlgmr.msra.gmra.mrb[52].mxu1 %v41219_v49  ;;  %v33855_v49 = vld [vmem:[%s41778_s4 + $0x278] sm:$0x3] }
 0xef5   : > { %33973 = vmatpush1.bf16.xpose.msra.mxu1 %v33972_v16  ;;  %31935 = vmatprep.mubr.f32.mxu1 %v41226_v50  ;;  %v33980_v50 = vpack.c.bf16 %v33850_v17, %v33842_v55  ;;  %v33986_v48 = vpack.c.bf16 %v33855_v49, %v33847_v57  ;;  %v33873_v16 = vld [vmem:[%s41778_s4 + $0x308] sm:$0xff]  ;;  %v33882_v57 = vld [vmem:[%s41778_s4 + $0x350] sm:$0x3] }
 0xef6   : > { %33979 = vmatprep.subr.bf16.mxu1 %v33978_v42  ;;  %v33877_v17 = vld [vmem:[%s41778_s4 + $0x328] sm:$0xff] }
 0xef8   : > { %31866 = vmatmul.mubr.f32.vlgmr.msra.gmra.mrb[54].mxu0 %v41231_v60  ;;  %v33865_v60 = vld [vmem:[%s41778_s4 + $0x2c8] sm:$0x3] }
 0xef9   : > { %33977 = vmatpush1.bf16.xpose.msra.mxu0 %v33976_v8  ;;  %32063 = vmatprep.mubr.f32.mxu0 %v41236_v0  ;;  %v33984_v0 = vpack.c.bf16 %v33852_v26, %v33844_v32  ;;  %v33990_v52 = vpack.c.bf16 %v33865_v60, %v33857_v20  ;;  %v33880_v8 = vld [vmem:[%s41778_s4 + $0x340] sm:$0x3]  ;;  %v33889_v20 = vld [vmem:[%s41778_s4 + $0x388] sm:$0xff]  ;;  %v42291_v60 = vld [vmem:[#allocation31_spill] sm:$0xff] }
 0xefa   : > { %33983 = vmatprep.subr.bf16.mxu0 %v33982_v22  ;;  %v33874_v22 = vld [vmem:[%s41778_s4 + $0x310] sm:$0xff]  ;;  %v33876_v32 = vld [vmem:[%s41778_s4 + $0x320] sm:$0xff] }
 0xefb   : > { %v33884_v26 = vld [vmem:[%s41778_s4 + $0x360] sm:$0x3] }
 0xefc   : > { %31936 = vmatmul.mubr.f32.vlgmr.msra.gmra.mrb[54].mxu1 %v41243_v45  ;;  %v33867_v45 = vld [vmem:[%s41778_s4 + $0x2d8] sm:$0x3] }
 0xefd   : > { %33981 = vmatpush1.bf16.xpose.msra.mxu1 %v33980_v50  ;;  %32133 = vmatprep.mubr.f32.mxu1 %v41252_v15  ;;  %v33988_v15 = vpack.c.bf16 %v33854_v43, %v33846_v1  ;;  %v33994_v35 = vpack.c.bf16 %v33867_v45, %v33859_v3  ;;  %v33879_v50 = vld [vmem:[%s41778_s4 + $0x338] sm:$0xff]  ;;  %v33878_v1 = vld [vmem:[%s41778_s4 + $0x330] sm:$0xff] }
 0xefe   : > { %33987 = vmatprep.subr.bf16.mxu1 %v33986_v48  ;;  %v33886_v43 = vld [vmem:[%s41778_s4 + $0x370] sm:$0x3]  ;;  %v33891_v3 = vld [vmem:[%s41778_s4 + $0x398] sm:$0xff] }
 0xeff   : > { %v33899_v45 = vld [vmem:[%s41778_s4 + $0x3d8] sm:$0x3] }
 0xf00   : > { %32064 = vmatmul.mubr.f32.vlgmr.msra.gmra.mrb[56].mxu0 %v41260_v2  ;;  %v33869_v2 = vld [vmem:[%s41778_s4 + $0x2e8] sm:$0x3] }
 0xf01   : > { %33985 = vmatpush1.bf16.xpose.msra.mxu0 %v33984_v0  ;;  %32203 = vmatprep.mubr.f32.mxu0 %v41265_v56  ;;  %v33992_v56 = vpack.c.bf16 %v33864_v18, %v33856_v12  ;;  %v33998_v24 = vpack.c.bf16 %v33869_v2, %v33861_v46  ;;  %v34016_v0 = vpack.c.bf16 %v33884_v26, %v33876_v32  ;;  %v33888_v12 = vld [vmem:[%s41778_s4 + $0x380] sm:$0xff]  ;;  %v33893_v46 = vld [vmem:[%s41778_s4 + $0x3a8] sm:$0xff]  ;;  %v33890_v2 = vld [vmem:[%s41778_s4 + $0x390] sm:$0xff] }
 0xf02   : > { %33991 = vmatprep.subr.bf16.mxu0 %v33990_v52  ;;  %v33896_v18 = vld [vmem:[%s41778_s4 + $0x3c0] sm:$0x3] }
 0xf04   : > { %32134 = vmatmul.mubr.f32.vlgmr.msra.gmra.mrb[56].mxu1 %v41271_v25  ;;  %v33871_v25 = vld [vmem:[%s41778_s4 + $0x2f8] sm:$0x3] }
 0xf05   : > { %33989 = vmatpush1.bf16.xpose.msra.mxu1 %v33988_v15  ;;  %32273 = vmatprep.mubr.f32.mxu1 %v41274_v59  ;;  %v33996_v59 = vpack.c.bf16 %v33866_v31, %v33858_v33  ;;  %v34002_v40 = vpack.c.bf16 %v33871_v25, %v33863_v27  ;;  %v34020_v15 = vpack.c.bf16 %v33886_v43, %v33878_v1  ;;  %v33895_v31 = vld [vmem:[%s41778_s4 + $0x3b8] sm:$0xff]  ;;  %v33900_v27 = vld [vmem:[%s41778_s4 + $0x3e0] sm:$0x3] }
 0xf06   : > { %33995 = vmatprep.subr.bf16.mxu1 %v33994_v35  ;;  %v34026_v35 = vpack.c.bf16 %v33899_v45, %v33891_v3 }
 0xf08   : > { %32204 = vmatmul.mubr.f32.vlgmr.msra.gmra.mrb[58].mxu0 %v41284_v21  ;;  %v33881_v21 = vld [vmem:[%s41778_s4 + $0x348] sm:$0x3] }
 0xf09   : > { %33993 = vmatpush1.bf16.xpose.msra.mxu0 %v33992_v56  ;;  %32401 = vmatprep.mubr.f32.mxu0 %v41289_v37  ;;  %v34000_v37 = vpack.c.bf16 %v33868_v36, %v33860_v4  ;;  %v34006_v42 = vpack.c.bf16 %v33881_v21, %v33873_v16  ;;  %v33898_v56 = vld [vmem:[%s41778_s4 + $0x3d0] sm:$0x3] }
 0xf0a   : > { %33999 = vmatprep.subr.bf16.mxu0 %v33998_v24  ;;  %v33892_v24 = vld [vmem:[%s41778_s4 + $0x3a0] sm:$0xff] }
 0xf0c   : > { %32274 = vmatmul.mubr.f32.vlgmr.msra.gmra.mrb[58].mxu1 %v41297_v44  ;;  %v33883_v44 = vld [vmem:[%s41778_s4 + $0x358] sm:$0x3] }
 0xf0d   : > { %33997 = vmatpush1.bf16.xpose.msra.mxu1 %v33996_v59  ;;  %32471 = vmatprep.mubr.f32.mxu1 %v41303_v62  ;;  %v34004_v62 = vpack.c.bf16 %v33870_v58, %v33862_v54  ;;  %v34010_v55 = vpack.c.bf16 %v33883_v44, %v33875_v29  ;;  %v33902_v59 = vld [vmem:[%s41778_s4 + $0x3f0] sm:$0x3] }
 0xf0e   : > { %34003 = vmatprep.subr.bf16.mxu1 %v34002_v40 }
 0xf10   : > { %32402 = vmatmul.mubr.f32.vlgmr.msra.gmra.mrb[60].mxu0 %v41312_v53  ;;  %v33885_v53 = vld [vmem:[%s41778_s4 + $0x368] sm:$0x3] }
 0xf11   : > { %34001 = vmatpush1.bf16.xpose.msra.mxu0 %v34000_v37  ;;  %32541 = vmatprep.mubr.f32.mxu0 %v41317_v47  ;;  %v34008_v47 = vpack.c.bf16 %v33880_v8, %v33872_v38  ;;  %v34014_v49 = vpack.c.bf16 %v33885_v53, %v33877_v17 }
 0xf12   : > { %34007 = vmatprep.subr.bf16.mxu0 %v34006_v42 }
 0xf14   : > { %32472 = vmatmul.mubr.f32.vlgmr.msra.gmra.mrb[60].mxu1 %v41326_v13  ;;  %v33887_v13 = vld [vmem:[%s41778_s4 + $0x378] sm:$0x3] }
 0xf15   : > { %34005 = vmatpush1.bf16.xpose.msra.mxu1 %v34004_v62  ;;  %32611 = vmatprep.mubr.f32.mxu1 %v41329_v41  ;;  %v34012_v41 = vpack.c.bf16 %v33882_v57, %v33874_v22  ;;  %v34018_v48 = vpack.c.bf16 %v33887_v13, %v33879_v50 }
 0xf16   : > { %34011 = vmatprep.subr.bf16.mxu1 %v34010_v55 }
 0xf18   : > { %32542 = vmatmul.mubr.f32.vlgmr.msra.gmra.mrb[62].mxu0 %v41339_v23  ;;  %v33897_v23 = vld [vmem:[%s41778_s4 + $0x3c8] sm:$0x3] }
 0xf19   : > { %34009 = vmatpush1.bf16.xpose.msra.mxu0 %v34008_v47  ;;  %32739 = vmatprep.mubr.f32.mxu0 %v41344_v61  ;;  %v42290_v61 = vld [vmem:[#allocation22_spill] sm:$0xff]  ;;  %v34022_v52 = vpack.c.bf16 %v33897_v23, %v33889_v20 }
 0xf1a   : > { %34015 = vmatprep.subr.bf16.mxu0 %v34014_v49 }
 0xf1c   : > { %32612 = vmatmul.mubr.f32.vlgmr.msra.gmra.mrb[62].mxu1 %v42290_v61 }
 0xf1d   : > { %34013 = vmatpush1.bf16.xpose.msra.mxu1 %v34012_v41  ;;  %32809 = vmatprep.mubr.f32.mxu1 %v42291_v60 }
 0xf1e   : > { %34019 = vmatprep.subr.bf16.mxu1 %v34018_v48 }
 0xf20   : > { %32740 = vmatmul.mubr.f32.vlgmr.msra.gmra.mrb[64].mxu0 %v41368_v11  ;;  %v33901_v11 = vld [vmem:[%s41778_s4 + $0x3e8] sm:$0x3] }
 0xf21   : > { %34017 = vmatpush1.bf16.xpose.msra.mxu0 %v34016_v0  ;;  %32879 = vmatprep.mubr.f32.mxu0 %v41373_v39  ;;  %v34024_v39 = vpack.c.bf16 %v33896_v18, %v33888_v12  ;;  %v34030_v33 = vpack.c.bf16 %v33901_v11, %v33893_v46 }
 0xf22   : > { %34023 = vmatprep.subr.bf16.mxu0 %v34022_v52 }
 0xf24   : > { %32810 = vmatmul.mubr.f32.vlgmr.msra.gmra.mrb[64].mxu1 %v41381_v30  ;;  %v33903_v30 = vld [vmem:[%s41778_s4 + $0x3f8] sm:$0x3] }
 0xf25   : > { %34021 = vmatpush1.bf16.xpose.msra.mxu1 %v34020_v15  ;;  %32949 = vmatprep.mubr.f32.mxu1 %v41384_v14  ;;  %v34028_v14 = vpack.c.bf16 %v33898_v56, %v33890_v2  ;;  %v34034_v25 = vpack.c.bf16 %v33903_v30, %v33895_v31 }
 0xf26   : > { %34027 = vmatprep.subr.bf16.mxu1 %v34026_v35 }
 0xf28   : > { %32880 = vmatmul.mubr.f32.vlgmr.msra.gmra.mrb[66].mxu0 %v41391_v7  ;;  %v34032_v7 = vpack.c.bf16 %v33900_v27, %v33892_v24 }
 0xf29   : > { %34025 = vmatpush1.bf16.xpose.msra.mxu0 %v34024_v39  ;;  %33077 = vmatprep.mubr.f32.mxu0 %v41396_v6  ;;  %v33894_v6 = vld [vmem:[%s41778_s4 + $0x3b0] sm:$0xff] }
 0xf2a   : > { %34031 = vmatprep.subr.bf16.mxu0 %v34030_v33  ;;  %v34036_v4 = vpack.c.bf16 %v33902_v59, %v33894_v6 }
 0xf2c   : > { %32950 = vmatmul.mubr.f32.vlgmr.msra.gmra.mrb[66].mxu1 %v41402_v51 }
 0xf2d   : > { %34029 = vmatpush1.bf16.xpose.msra.mxu1 %v34028_v14  ;;  %33147 = vmatprep.mubr.f32.mxu1 %v41412_v34 }
 0xf2e   : > { %34035 = vmatprep.subr.bf16.mxu1 %v34034_v25 }
 0xf30   : > { %33078 = vmatmul.mubr.f32.vlgmr.msra.gmra.mrb[68].mxu0 %v41429_v10 }
 0xf31   : > { %34033 = vmatpush1.bf16.xpose.msra.mxu0 %v34032_v7  ;;  %33217 = vmatprep.mubr.f32.mxu0 %v41434_v5 }
 0xf34   : > { %33148 = vmatmul.mubr.f32.vlgmr.msra.gmra.mrb[68].mxu1 %v41445_v63 }
 0xf35   : > { %34037 = vmatpush1.bf16.xpose.msra.mxu1 %v34036_v4  ;;  %33287 = vmatprep.mubr.f32.mxu1 %v41448_v28 }
 0xf38   : > { %33218 = vmatmul.mubr.f32.vlgmr.msra.gmra.mrb[70].mxu0 %v41454_v9 }
 0xf3c   : > { %33288 = vmatmul.mubr.f32.vlgmr.msra.gmra.mrb[70].mxu1 %v41461_v19 }
 0xf86   : > { %v30772_v51 = vpop.f32.mrb[40].mxu0 }
 0xf87   : > { %v30774_v34 = vpop.f32.mrb[41].mxu0 }
 0xf8c   : > { %v30842_v36 = vpop.f32.mrb[40].mxu1 }
 0xf8d   : > { %v30843_v40 = vadd.f32 %v30842_v36, %v30772_v51  ;;  %v30844_v16 = vpop.f32.mrb[41].mxu1 }
 0xf92   : > { %v30912_v21 = vpop.f32.mrb[42].mxu0 }
 0xf93   : > { %v30913_v10 = vadd.f32 %v30912_v21, %v30843_v40  ;;  %v30914_v37 = vpop.f32.mrb[43].mxu0 }
 0xf95   : > { %v30982_v54 = vpop.f32.mrb[42].mxu1 }
 0xf96   : > { %v30983_v5 = vadd.f32 %v30982_v54, %v30913_v10  ;;  %v30984_v58 = vpop.f32.mrb[43].mxu1 }
 0xf9a   : > { %v31052_v42 = vpop.f32.mrb[44].mxu0 }
 0xf9b   : > { %v31053_v63 = vadd.f32 %v31052_v42, %v30983_v5  ;;  %v31054_v29 = vpop.f32.mrb[45].mxu0 }
 0xfa0   : > { %v31122_v44 = vpop.f32.mrb[44].mxu1 }
 0xfa1   : > { %v31123_v28 = vadd.f32 %v31122_v44, %v31053_v63  ;;  %v31124_v62 = vpop.f32.mrb[45].mxu1 }
 0xfa5   : > { %v31192_v9 = vpop.f32.mrb[46].mxu0 }
 0xfa6   : > { %v31193_v38 = vadd.f32 %v31192_v9, %v31123_v28  ;;  %v31194_v19 = vpop.f32.mrb[47].mxu0 }
 0xfaa   : > { %v31262_v8 = vpop.f32.mrb[46].mxu1 }
 0xfab   : > { %v31263_v55 = vadd.f32 %v31262_v8, %v31193_v38  ;;  %v31264_v17 = vpop.f32.mrb[47].mxu1 }
 0xfaf   : > { %v31389_v53 = vpop.f32.mrb[48].mxu0 }
 0xfb0   : > { %v31391_v47 = vpop.f32.mrb[49].mxu0 }
 0xfb5   : > { %v31459_v22 = vpop.f32.mrb[48].mxu1 }
 0xfb6   : > { %v31460_v57 = vadd.f32 %v31459_v22, %v31389_v53  ;;  %v31461_v49 = vpop.f32.mrb[49].mxu1 }
 0xfbb   : > { %v31529_v50 = vpop.f32.mrb[50].mxu0 }
 0xfbc   : > { %v31530_v13 = vadd.f32 %v31529_v50, %v31460_v57  ;;  %v31531_v41 = vpop.f32.mrb[51].mxu0 }
 0xfbd   : > { %v33904_v41 = vld [vmem:[%s41779_s5] ss:$0 sm:$0xff] }
 0xfbf   : > { %v31599_v32 = vpop.f32.mrb[50].mxu1 }
 0xfc0   : > { %v31600_v26 = vadd.f32 %v31599_v32, %v31530_v13  ;;  %v31601_v48 = vpop.f32.mrb[51].mxu1 }
 0xfc2   : > { %v31603_v20 = vadd.f32 %v31600_v26, %v31263_v55 }
 0xfc3   : > { %v31727_v23 = vpop.f32.mrb[52].mxu0 }
 0xfc4   : > { %v31729_v61 = vpop.f32.mrb[53].mxu0 }
 0xfc7   : > { %v31797_v60 = vpop.f32.mrb[52].mxu1 }
 0xfc8   : > { %v31798_v0 = vadd.f32 %v31797_v60, %v31727_v23  ;;  %v31799_v1 = vpop.f32.mrb[53].mxu1 }
 0xfcb   : > { %v31867_v43 = vpop.f32.mrb[54].mxu0 }
 0xfcc   : > { %v31868_v52 = vadd.f32 %v31867_v43, %v31798_v0  ;;  %v31869_v3 = vpop.f32.mrb[55].mxu0 }
 0xfcf   : > { %v31937_v45 = vpop.f32.mrb[54].mxu1 }
 0xfd0   : > { %v31938_v15 = vadd.f32 %v31937_v45, %v31868_v52  ;;  %v31939_v12 = vpop.f32.mrb[55].mxu1 }
 0xfd2   : > { %v31941_v18 = vadd.f32 %v31938_v15, %v31603_v20 }
 0xfd3   : > { %v32065_v35 = vpop.f32.mrb[56].mxu0 }
 0xfd4   : > { %v32067_v46 = vpop.f32.mrb[57].mxu0 }
 0xfd7   : > { %v32135_v11 = vpop.f32.mrb[56].mxu1 }
 0xfd8   : > { %v32136_v39 = vadd.f32 %v32135_v11, %v32065_v35  ;;  %v32137_v2 = vpop.f32.mrb[57].mxu1 }
 0xfdb   : > { %v32205_v56 = vpop.f32.mrb[58].mxu0 }
 0xfdc   : > { %v32206_v33 = vadd.f32 %v32205_v56, %v32136_v39  ;;  %v32207_v31 = vpop.f32.mrb[59].mxu0 }
 0xfdf   : > { %v32275_v30 = vpop.f32.mrb[58].mxu1 }
 0xfe0   : > { %v32276_v14 = vadd.f32 %v32275_v30, %v32206_v33  ;;  %v32277_v24 = vpop.f32.mrb[59].mxu1 }
 0xfe2   : > { %v32279_v27 = vadd.f32 %v32276_v14, %v31941_v18 }
 0xfe3   : > { %v32403_v25 = vpop.f32.mrb[60].mxu0 }
 0xfe4   : > { %v32405_v7 = vpop.f32.mrb[61].mxu0 }
 0xfe7   : > { %v32473_v6 = vpop.f32.mrb[60].mxu1 }
 0xfe8   : > { %v32474_v59 = vadd.f32 %v32473_v6, %v32403_v25  ;;  %v32475_v4 = vpop.f32.mrb[61].mxu1 }
 0xfeb   : > { %v32543_v51 = vpop.f32.mrb[62].mxu0 }
 0xfec   : > { %v32544_v34 = vadd.f32 %v32543_v51, %v32474_v59  ;;  %v32545_v36 = vpop.f32.mrb[63].mxu0 }
 0xfef   : > { %v32613_v40 = vpop.f32.mrb[62].mxu1 }
 0xff0   : > { %v32614_v16 = vadd.f32 %v32613_v40, %v32544_v34  ;;  %v32615_v21 = vpop.f32.mrb[63].mxu1 }
 0xff2   : > { %v32617_v10 = vadd.f32 %v32614_v16, %v32279_v27 }
 0xff3   : > { %v32741_v37 = vpop.f32.mrb[64].mxu0 }
 0xff4   : > { %v32743_v54 = vpop.f32.mrb[65].mxu0 }
 0xff7   : > { %v32811_v5 = vpop.f32.mrb[64].mxu1 }
 0xff8   : > { %v32812_v58 = vadd.f32 %v32811_v5, %v32741_v37  ;;  %v32813_v42 = vpop.f32.mrb[65].mxu1 }
 0xffb   : > { %v32881_v63 = vpop.f32.mrb[66].mxu0 }
 0xffc   : > { %v32882_v29 = vadd.f32 %v32881_v63, %v32812_v58  ;;  %v32883_v44 = vpop.f32.mrb[67].mxu0 }
 0xfff   : > { %v32951_v28 = vpop.f32.mrb[66].mxu1 }
0x1000   : > { %v32952_v62 = vadd.f32 %v32951_v28, %v32882_v29  ;;  %v32953_v9 = vpop.f32.mrb[67].mxu1 }
0x1002   : > { %v32955_v38 = vadd.f32 %v32952_v62, %v32617_v10 }
0x1003   : > { %v33079_v19 = vpop.f32.mrb[68].mxu0 }
0x1004   : > { %v33081_v8 = vpop.f32.mrb[69].mxu0 }
0x1007   : > { %v33149_v55 = vpop.f32.mrb[68].mxu1 }
0x1008   : > { %v33150_v17 = vadd.f32 %v33149_v55, %v33079_v19  ;;  %v33151_v53 = vpop.f32.mrb[69].mxu1 }
0x100b   : > { %v33219_v47 = vpop.f32.mrb[70].mxu0 }
0x100c   : > { %v33220_v22 = vadd.f32 %v33219_v47, %v33150_v17  ;;  %v33221_v57 = vpop.f32.mrb[71].mxu0 }
0x100f   : > { %v33289_v49 = vpop.f32.mrb[70].mxu1 }
0x1010   : > { %v33290_v50 = vadd.f32 %v33289_v49, %v33220_v22  ;;  %v33291_v13 = vpop.f32.mrb[71].mxu1 }
0x1012   : > { %v33293_v32 = vadd.f32 %v33290_v50, %v32955_v38 }
0x1014   : > { %v33301_v26 = vadd.f32 %v33904_v41, %v33293_v32 }
0x1016   : > { %33303 = vst.msk [vmem:[%s244_s11] sm:$0x3] %vm33302_vm14, %v33301_v26 }
0x1017   : > { %34745 = shalt.err (!%p34742_p3)
}
0x1018   : > { %s34746_s18 = scalar_lea.hbm %s41732_s14, 32  ;;  %s34750_s12 = scalar_lea.hbm %s41780_s6, 64 }
0x1019   : > { %p34747_p4 = scmp.ne.s32.totalorder %s41732_s14, %s34746_s18  ;;  %p34751_p9 = scmp.lt.u32.totalorder %s41732_s14, %s41780_s6 }
0x101a   : > { %p34752_p10 = scmp.lt.u32.totalorder %s34750_s12, %s34746_s18  ;;  %p34754_p12 = scmp.lt.u32.totalorder %s34746_s18, %s41732_s14 }
0x101b   : > { %p34748_p7 = pnand %p34747_p4, %p34882_p5 }
0x101c   : > { %p34753_p11 = por %p34752_p10, %p34751_p9 }
0x101d   : > { %p34749_p8 = pneg %p34748_p7 }
0x101e   : > { %p34755_p13 = por %p34754_p12, %p34753_p11 }
0x1020   : > { %p34756_p0 = pnand %p34755_p13, %p34749_p8 }
0x1022   : > { %34759 = shalt.err (!%p34756_p0)
}
0x1023   : > { %34678 = dma.vmem_to_hbm [thread:$0]  (%p34882_p5), %s41734_s13, 32, %s41732_s14, %s33305_s29  }
0x1024 PF: > { %p34684_p1 = scmp.ge.s32.totalorder %s34794_s24, 2  ;;  %s33330_s11 = sand.u32 1, %s34782_s21  }
0x1025   : > { %s33331_s19 = scalar_lea.sflag [#allocation4], %s33330_s11 }
0x1026   : > { %p34681_p2 = pnand %p34684_p1, %p34886_p6 }
0x1028   : > { %34777 = dma.done.wait (!%p34681_p2), %s33331_s19, 32  }
0x1029   : > { %34779 = vsyncadd (!%p34681_p2), %s33331_s19, 4294967264  ;;  %p16_p3 = scmp.ge.s32.totalorder %s34869_s27, 4   ;;  %s42292_s21 = smov %s34786_s22 }
0x102a   : > { %s42293_s22 = smov %s34790_s23  ;;  %s42294_s23 = smov %s34880_s30 }
0x102b   : > { %s42295_s24 = smov %s34869_s27  ;;  %18 = sbr.rel (!%p16_p3) target bundleno = 3 (0x3), region = 134 }
0x1032   :  { %33336 = vsyncpa [#allocation4], 1 }
0x1033   :  { %33338 = vsyncpa [#allocation4 + $0x1], 1 }

</bundles_post_ra>
